<compile_context>
chip_gen: v7x
topology: tpu7x:2x2x1
jax: 0.10.0
libtpu: 0.0.40
codegen_flags: <defaults>
</compile_context>

<pallas_src>
import jax
import jax.numpy as jnp
from jax.experimental import pallas as pl
from jax.experimental.pallas import tpu as pltpu


def _structural_kernel(v_ref, w1_ref, b1_ref, w2_ref, b2_ref, w3_ref, b3_ref,
                       out_ref, padA_ref, pad_ref, x_ref):
    N = v_ref.shape[1]           # sequence length (spatial side of A)
    D = v_ref.shape[2]           # feature dim
    C = b1_ref.shape[1]          # hidden conv channels (64)
    P = N * N

    v = v_ref[0]                 # (N, D) f32

    # ---- Gram matrix, channel-last: A3[n, m, 0] = <v_n, v_m> --------------
    # D is tiny, so a VPU broadcast + lane-reduce beats a poorly-filled MXU
    # matmul and lands directly in the (N, N, 1) layout conv1 wants.
    A3 = jnp.sum(v[:, None, :] * v[None, :, :], axis=2, keepdims=True)  # (N,N,1)

    # ---- conv1: 1 -> C, 3x3, padding=1 (pure VPU lane-splat broadcasts) ---
    padA_ref[...] = jnp.zeros(padA_ref.shape, padA_ref.dtype)  # tiny buffer
    padA_ref[1:N + 1, 1:N + 1, :] = A3

    acc1 = jnp.zeros((N, N, C), jnp.float32)
    for oh in range(3):                            # 9 static taps, pure
        for ow in range(3):                        # accumulation chain
            w1t = w1_ref[oh * 3 + ow].reshape(1, 1, C)
            acc1 = acc1 + padA_ref[oh:oh + N, ow:ow + N, :] * w1t
    h1 = jnp.maximum(acc1 + b1_ref[...].reshape(1, 1, C), 0.0)      # (N,N,C)

    # ---- zero ONLY the halo of the padded feature map ---------------------
    # (interior is fully overwritten below; halo stays zero for conv2+conv3)
    zrow = jnp.zeros((1, N + 2, C), jnp.float32)
    zcol = jnp.zeros((N + 2, 1, C), jnp.float32)
    pad_ref[0:1, :, :] = zrow
    pad_ref[N + 1:N + 2, :, :] = zrow
    pad_ref[:, 0:1, :] = zcol
    pad_ref[:, N + 1:N + 2, :] = zcol
    pad_ref[1:N + 1, 1:N + 1, :] = h1

    # ---- conv2: C -> C as ONE fused im2col matmul (K = 9*C, bf16 MXU) -----
    for oh in range(3):
        for ow in range(3):
            t = oh * 3 + ow
            x_ref[:, t * C:(t + 1) * C] = (
                pad_ref[oh:oh + N, ow:ow + N, :].reshape(P, C).astype(x_ref.dtype))
    acc2 = jnp.dot(x_ref[...], w2_ref[...], preferred_element_type=jnp.float32)
    h2 = jnp.maximum(acc2 + b2_ref[...], 0.0)                       # (P, C)
    pad_ref[1:N + 1, 1:N + 1, :] = h2.reshape(N, N, C)

    # ---- conv3: C -> 1 as ONE fused im2col matmul -------------------------
    for oh in range(3):
        for ow in range(3):
            t = oh * 3 + ow
            x_ref[:, t * C:(t + 1) * C] = (
                pad_ref[oh:oh + N, ow:ow + N, :].reshape(P, C).astype(x_ref.dtype))
    attn = jnp.dot(x_ref[...], w3_ref[...],
                   preferred_element_type=jnp.float32) + b3_ref[...]  # (P, 1)

    # ---- out[n, :] = sum_m attn[n, m] * v[m, :] ----------------------------
    # attn reshaped (N, N, 1) keeps m on sublanes -> per-sublane lane-splat
    # multiply with v broadcast over n, then an XLU sublane reduce over m.
    prod = attn.reshape(N, N, 1) * v[None, :, :]                    # (N, N, D)
    out_ref[0] = jnp.sum(prod, axis=1).astype(out_ref.dtype)        # (N, D)


def structural_module_pallas(vectors, kernel_params):
    """vectors: (B, N, D) float32; kernel_params: reorganized conv weights."""
    w1r, b1r, w2f, b2r, w3f, b3r = kernel_params
    B, N, D = vectors.shape
    C = b1r.shape[1]
    P = N * N
    K9 = 9 * C

    flops = B * (2 * P * D            # Gram matrix
                 + 2 * P * 9 * C      # conv1
                 + 2 * P * 9 * C * C  # conv2 (im2col matmul)
                 + 2 * P * 9 * C      # conv3 (im2col matmul)
                 + 2 * P * D)         # attn @ v
    bytes_accessed = (2 * vectors.size * 4 + w1r.size * 4 + w2f.size * 2
                      + w3f.size * 2 + (b1r.size + b2r.size + b3r.size) * 4)

    grid_spec = pltpu.PrefetchScalarGridSpec(
        num_scalar_prefetch=0,
        grid=(B,),
        in_specs=[
            pl.BlockSpec((1, N, D), lambda b: (b, 0, 0)),   # vectors (per batch)
            pl.BlockSpec((9, 1, C), lambda b: (0, 0, 0)),   # conv1 taps (f32)
            pl.BlockSpec((1, C), lambda b: (0, 0)),         # b1
            pl.BlockSpec((K9, C), lambda b: (0, 0)),        # conv2 im2col W (bf16)
            pl.BlockSpec((1, C), lambda b: (0, 0)),         # b2
            pl.BlockSpec((K9, 1), lambda b: (0, 0)),        # conv3 im2col W (bf16)
            pl.BlockSpec((1, 1), lambda b: (0, 0)),         # b3
        ],
        out_specs=pl.BlockSpec((1, N, D), lambda b: (b, 0, 0)),
        scratch_shapes=[
            pltpu.VMEM((N + 2, N + 2, 1), jnp.float32),     # zero-padded Gram
            pltpu.VMEM((N + 2, N + 2, C), jnp.float32),     # zero-padded hidden map
            pltpu.VMEM((P, K9), jnp.bfloat16),              # im2col slab (P, 9C)
        ],
    )
    return pl.pallas_call(
        _structural_kernel,
        out_shape=jax.ShapeDtypeStruct((B, N, D), vectors.dtype),
        grid_spec=grid_spec,
        compiler_params=pltpu.CompilerParams(
            dimension_semantics=("parallel",),   # v7x: one batch item per TC
            vmem_limit_bytes=32 * 1024 * 1024),
        cost_estimate=pl.CostEstimate(flops=flops, transcendentals=0,
                                      bytes_accessed=bytes_accessed),
    )(vectors, w1r, b1r, w2f, b2r, w3f, b3r)


# ---------------------------------------------------------------------------
# Parameter setup (PyTorch Conv2d shapes, deterministic init) + JAX reference
# ---------------------------------------------------------------------------
def init_params(key, C=64):
    def conv_init(k, o, i):
        kw, kb = jax.random.split(k)
        fan_in = i * 9
        bound = 1.0 / jnp.sqrt(fan_in)
        w = jax.random.uniform(kw, (o, i, 3, 3), jnp.float32, -bound, bound)
        b = jax.random.uniform(kb, (o,), jnp.float32, -bound, bound)
        return w, b

    k1, k2, k3 = jax.random.split(key, 3)
    w1, b1 = conv_init(k1, C, 1)      # Conv2d(1, 64, 3, padding=1)
    w2, b2 = conv_init(k2, C, C)      # Conv2d(64, 64, 3, padding=1)
    w3, b3 = conv_init(k3, 1, C)      # Conv2d(64, 1, 3, padding=1)
    return (w1, b1, w2, b2, w3, b3)


def reorganize_params(torch_params):
    w1, b1, w2, b2, w3, b3 = torch_params
    C = w1.shape[0]
    # conv1: (C,1,3,3) -> (9, 1, C); tap t = kh*3+kw gives a (1, C) row (VPU)
    w1r = jnp.transpose(w1, (2, 3, 1, 0)).reshape(9, 1, C).astype(jnp.float32)
    # conv2: (C,C,3,3) -> (9*C, C) im2col weight, row index = t*C + cin (MXU, bf16)
    w2f = jnp.transpose(w2, (2, 3, 1, 0)).reshape(9 * C, C).astype(jnp.bfloat16)
    # conv3: (1,C,3,3) -> (9*C, 1) im2col weight (MXU, bf16)
    w3f = jnp.transpose(w3, (2, 3, 1, 0)).reshape(9 * C, 1).astype(jnp.bfloat16)
    return (w1r, b1.reshape(1, C), w2f, b2.reshape(1, C), w3f, b3.reshape(1, 1))


def reference(vectors, torch_params):
    w1, b1, w2, b2, w3, b3 = torch_params
    A = jnp.einsum('bnd,bmd->bnm', vectors, vectors)
    x = A[:, None, :, :]
    dn = ('NCHW', 'OIHW', 'NCHW')

    def conv(x, w, b):
        numbers = jax.lax.conv_dimension_numbers(x.shape, w.shape, dn)
        y = jax.lax.conv_general_dilated(x, w, (1, 1), 'SAME',
                                         dimension_numbers=numbers)
        return y + b[None, :, None, None]

    y = jax.nn.relu(conv(x, w1, b1))
    y = jax.nn.relu(conv(y, w2, b2))
    y = conv(y, w3, b3)
    attn = y[:, 0]
    return jnp.einsum('bnm,bmd->bnd', attn, vectors)


if __name__ == "__main__":
    B, N, D, C = 2, 16, 8, 64
    key = jax.random.PRNGKey(0)
    k_v, k_p = jax.random.split(key)
    vectors = jax.random.normal(k_v, (B, N, D), jnp.float32)

    torch_params = init_params(k_p, C)
    kernel_params = reorganize_params(torch_params)

    out = jax.block_until_ready(structural_module_pallas(vectors, kernel_params))
    ref = jax.block_until_ready(reference(vectors, torch_params))

    rel_err = jnp.linalg.norm(out - ref) / (jnp.linalg.norm(ref) + 1e-8)
    assert out.shape == (B, N, D)
    # bf16 MXU operands with f32 accumulation; 5e-2 relative tolerance has
    # ample headroom (observed error is O(1e-3)).
    assert bool(rel_err < 5e-2), f"relative error too large: {rel_err}"
    print("KERNEL_OK")
</pallas_src>

<mosaic_0001>
module attributes {stable_mosaic.version = 11 : i64} {
  func.func @_structural_kernel(%arg0: i32, %arg1: memref<1x16x8xf32, #tpu.memory_space<vmem>>, %arg2: memref<9x1x64xf32, #tpu.memory_space<vmem>>, %arg3: memref<1x64xf32, #tpu.memory_space<vmem>>, %arg4: memref<576x64xbf16, #tpu.memory_space<vmem>>, %arg5: memref<1x64xf32, #tpu.memory_space<vmem>>, %arg6: memref<576x1xbf16, #tpu.memory_space<vmem>>, %arg7: memref<1x1xf32, #tpu.memory_space<vmem>>, %arg8: memref<1x16x8xf32, #tpu.memory_space<vmem>>, %arg9: memref<18x18x1xf32, #tpu.memory_space<vmem>>, %arg10: memref<18x18x64xf32, #tpu.memory_space<vmem>>, %arg11: memref<256x576xbf16, #tpu.memory_space<vmem>>) attributes {dimension_semantics = [#tpu.dimension_semantics<parallel>], iteration_bounds = array<i64: 2>, scalar_prefetch = 0 : i64, scratch_operands = 3 : i64, tpu.core_type = #tpu.core_type<tc>, window_params = [{transform_indices = @transform_0, window_bounds = array<i64: 1, 16, 8>}, {pipeline_mode = #tpu.pipeline_mode<synchronous>, transform_indices = @transform_1, window_bounds = array<i64: 9, 1, 64>}, {pipeline_mode = #tpu.pipeline_mode<synchronous>, transform_indices = @transform_2, window_bounds = array<i64: 1, 64>}, {pipeline_mode = #tpu.pipeline_mode<synchronous>, transform_indices = @transform_3, window_bounds = array<i64: 576, 64>}, {pipeline_mode = #tpu.pipeline_mode<synchronous>, transform_indices = @transform_4, window_bounds = array<i64: 1, 64>}, {pipeline_mode = #tpu.pipeline_mode<synchronous>, transform_indices = @transform_5, window_bounds = array<i64: 576, 1>}, {pipeline_mode = #tpu.pipeline_mode<synchronous>, transform_indices = @transform_6, window_bounds = array<i64: 1, 1>}, {transform_indices = @transform_7, window_bounds = array<i64: 1, 16, 8>}]} {
    %c0 = arith.constant 0 : index
    %c0_0 = arith.constant 0 : index
    %c0_1 = arith.constant 0 : index
    %0 = vector.load %arg1[%c0, %c0_0, %c0_1] : memref<1x16x8xf32, #tpu.memory_space<vmem>>, vector<1x16x8xf32>
    %1 = vector.shape_cast %0 : vector<1x16x8xf32> to vector<16x8xf32>
    %2 = vector.shape_cast %1 : vector<16x8xf32> to vector<16x1x8xf32>
    %3 = vector.shape_cast %1 : vector<16x8xf32> to vector<1x16x8xf32>
    %4 = vector.broadcast %2 : vector<16x1x8xf32> to vector<16x16x8xf32>
    %5 = vector.broadcast %3 : vector<1x16x8xf32> to vector<16x16x8xf32>
    %6 = arith.mulf %4, %5 : vector<16x16x8xf32>
    %cst = arith.constant dense<0.000000e+00> : vector<16x16xf32>
    %7 = vector.multi_reduction <add>, %6, %cst [2] : vector<16x16x8xf32> to vector<16x16xf32>
    %8 = vector.shape_cast %7 : vector<16x16xf32> to vector<16x16x1xf32>
    %cst_2 = arith.constant 0.000000e+00 : f32
    %9 = vector.broadcast %cst_2 : f32 to vector<18x18x1xf32>
    %c0_3 = arith.constant 0 : index
    %c0_4 = arith.constant 0 : index
    %c0_5 = arith.constant 0 : index
    %10 = vector.load %arg9[%c0_3, %c0_4, %c0_5] : memref<18x18x1xf32, #tpu.memory_space<vmem>>, vector<18x18x1xf32>
    tpu.vector_store %arg9[%c0_3, %c0_4, %c0_5], %9 {strides = array<i32>} : memref<18x18x1xf32, #tpu.memory_space<vmem>>, vector<18x18x1xf32>,
    %c1 = arith.constant 1 : index
    %c1_6 = arith.constant 1 : index
    %c0_7 = arith.constant 0 : index
    %11 = vector.load %arg9[%c1, %c1_6, %c0_7] : memref<18x18x1xf32, #tpu.memory_space<vmem>>, vector<16x16x1xf32>
    tpu.vector_store %arg9[%c1, %c1_6, %c0_7], %8 {strides = array<i32>} : memref<18x18x1xf32, #tpu.memory_space<vmem>>, vector<16x16x1xf32>,
    %cst_8 = arith.constant 0.000000e+00 : f32
    %12 = vector.broadcast %cst_8 : f32 to vector<16x16x64xf32>
    %c0_9 = arith.constant 0 : index
    %c0_10 = arith.constant 0 : index
    %c0_11 = arith.constant 0 : index
    %13 = vector.load %arg2[%c0_9, %c0_10, %c0_11] : memref<9x1x64xf32, #tpu.memory_space<vmem>>, vector<1x1x64xf32>
    %14 = vector.shape_cast %13 : vector<1x1x64xf32> to vector<1x64xf32>
    %15 = vector.shape_cast %14 : vector<1x64xf32> to vector<1x1x64xf32>
    %c0_12 = arith.constant 0 : index
    %c0_13 = arith.constant 0 : index
    %c0_14 = arith.constant 0 : index
    %16 = vector.load %arg9[%c0_12, %c0_13, %c0_14] : memref<18x18x1xf32, #tpu.memory_space<vmem>>, vector<16x16x1xf32>
    %17 = vector.broadcast %16 : vector<16x16x1xf32> to vector<16x16x64xf32>
    %18 = vector.broadcast %15 : vector<1x1x64xf32> to vector<16x16x64xf32>
    %19 = arith.mulf %17, %18 : vector<16x16x64xf32>
    %20 = arith.addf %12, %19 : vector<16x16x64xf32>
    %c1_15 = arith.constant 1 : index
    %c0_16 = arith.constant 0 : index
    %c0_17 = arith.constant 0 : index
    %21 = vector.load %arg2[%c1_15, %c0_16, %c0_17] : memref<9x1x64xf32, #tpu.memory_space<vmem>>, vector<1x1x64xf32>
    %22 = vector.shape_cast %21 : vector<1x1x64xf32> to vector<1x64xf32>
    %23 = vector.shape_cast %22 : vector<1x64xf32> to vector<1x1x64xf32>
    %c0_18 = arith.constant 0 : index
    %c1_19 = arith.constant 1 : index
    %c0_20 = arith.constant 0 : index
    %24 = vector.load %arg9[%c0_18, %c1_19, %c0_20] : memref<18x18x1xf32, #tpu.memory_space<vmem>>, vector<16x16x1xf32>
    %25 = vector.broadcast %24 : vector<16x16x1xf32> to vector<16x16x64xf32>
    %26 = vector.broadcast %23 : vector<1x1x64xf32> to vector<16x16x64xf32>
    %27 = arith.mulf %25, %26 : vector<16x16x64xf32>
    %28 = arith.addf %20, %27 : vector<16x16x64xf32>
    %c2 = arith.constant 2 : index
    %c0_21 = arith.constant 0 : index
    %c0_22 = arith.constant 0 : index
    %29 = vector.load %arg2[%c2, %c0_21, %c0_22] : memref<9x1x64xf32, #tpu.memory_space<vmem>>, vector<1x1x64xf32>
    %30 = vector.shape_cast %29 : vector<1x1x64xf32> to vector<1x64xf32>
    %31 = vector.shape_cast %30 : vector<1x64xf32> to vector<1x1x64xf32>
    %c0_23 = arith.constant 0 : index
    %c2_24 = arith.constant 2 : index
    %c0_25 = arith.constant 0 : index
    %32 = vector.load %arg9[%c0_23, %c2_24, %c0_25] : memref<18x18x1xf32, #tpu.memory_space<vmem>>, vector<16x16x1xf32>
    %33 = vector.broadcast %32 : vector<16x16x1xf32> to vector<16x16x64xf32>
    %34 = vector.broadcast %31 : vector<1x1x64xf32> to vector<16x16x64xf32>
    %35 = arith.mulf %33, %34 : vector<16x16x64xf32>
    %36 = arith.addf %28, %35 : vector<16x16x64xf32>
    %c3 = arith.constant 3 : index
    %c0_26 = arith.constant 0 : index
    %c0_27 = arith.constant 0 : index
    %37 = vector.load %arg2[%c3, %c0_26, %c0_27] : memref<9x1x64xf32, #tpu.memory_space<vmem>>, vector<1x1x64xf32>
    %38 = vector.shape_cast %37 : vector<1x1x64xf32> to vector<1x64xf32>
    %39 = vector.shape_cast %38 : vector<1x64xf32> to vector<1x1x64xf32>
    %c1_28 = arith.constant 1 : index
    %c0_29 = arith.constant 0 : index
    %c0_30 = arith.constant 0 : index
    %40 = vector.load %arg9[%c1_28, %c0_29, %c0_30] : memref<18x18x1xf32, #tpu.memory_space<vmem>>, vector<16x16x1xf32>
    %41 = vector.broadcast %40 : vector<16x16x1xf32> to vector<16x16x64xf32>
    %42 = vector.broadcast %39 : vector<1x1x64xf32> to vector<16x16x64xf32>
    %43 = arith.mulf %41, %42 : vector<16x16x64xf32>
    %44 = arith.addf %36, %43 : vector<16x16x64xf32>
    %c4 = arith.constant 4 : index
    %c0_31 = arith.constant 0 : index
    %c0_32 = arith.constant 0 : index
    %45 = vector.load %arg2[%c4, %c0_31, %c0_32] : memref<9x1x64xf32, #tpu.memory_space<vmem>>, vector<1x1x64xf32>
    %46 = vector.shape_cast %45 : vector<1x1x64xf32> to vector<1x64xf32>
    %47 = vector.shape_cast %46 : vector<1x64xf32> to vector<1x1x64xf32>
    %c1_33 = arith.constant 1 : index
    %c1_34 = arith.constant 1 : index
    %c0_35 = arith.constant 0 : index
    %48 = vector.load %arg9[%c1_33, %c1_34, %c0_35] : memref<18x18x1xf32, #tpu.memory_space<vmem>>, vector<16x16x1xf32>
    %49 = vector.broadcast %48 : vector<16x16x1xf32> to vector<16x16x64xf32>
    %50 = vector.broadcast %47 : vector<1x1x64xf32> to vector<16x16x64xf32>
    %51 = arith.mulf %49, %50 : vector<16x16x64xf32>
    %52 = arith.addf %44, %51 : vector<16x16x64xf32>
    %c5 = arith.constant 5 : index
    %c0_36 = arith.constant 0 : index
    %c0_37 = arith.constant 0 : index
    %53 = vector.load %arg2[%c5, %c0_36, %c0_37] : memref<9x1x64xf32, #tpu.memory_space<vmem>>, vector<1x1x64xf32>
    %54 = vector.shape_cast %53 : vector<1x1x64xf32> to vector<1x64xf32>
    %55 = vector.shape_cast %54 : vector<1x64xf32> to vector<1x1x64xf32>
    %c1_38 = arith.constant 1 : index
    %c2_39 = arith.constant 2 : index
    %c0_40 = arith.constant 0 : index
    %56 = vector.load %arg9[%c1_38, %c2_39, %c0_40] : memref<18x18x1xf32, #tpu.memory_space<vmem>>, vector<16x16x1xf32>
    %57 = vector.broadcast %56 : vector<16x16x1xf32> to vector<16x16x64xf32>
    %58 = vector.broadcast %55 : vector<1x1x64xf32> to vector<16x16x64xf32>
    %59 = arith.mulf %57, %58 : vector<16x16x64xf32>
    %60 = arith.addf %52, %59 : vector<16x16x64xf32>
    %c6 = arith.constant 6 : index
    %c0_41 = arith.constant 0 : index
    %c0_42 = arith.constant 0 : index
    %61 = vector.load %arg2[%c6, %c0_41, %c0_42] : memref<9x1x64xf32, #tpu.memory_space<vmem>>, vector<1x1x64xf32>
    %62 = vector.shape_cast %61 : vector<1x1x64xf32> to vector<1x64xf32>
    %63 = vector.shape_cast %62 : vector<1x64xf32> to vector<1x1x64xf32>
    %c2_43 = arith.constant 2 : index
    %c0_44 = arith.constant 0 : index
    %c0_45 = arith.constant 0 : index
    %64 = vector.load %arg9[%c2_43, %c0_44, %c0_45] : memref<18x18x1xf32, #tpu.memory_space<vmem>>, vector<16x16x1xf32>
    %65 = vector.broadcast %64 : vector<16x16x1xf32> to vector<16x16x64xf32>
    %66 = vector.broadcast %63 : vector<1x1x64xf32> to vector<16x16x64xf32>
    %67 = arith.mulf %65, %66 : vector<16x16x64xf32>
    %68 = arith.addf %60, %67 : vector<16x16x64xf32>
    %c7 = arith.constant 7 : index
    %c0_46 = arith.constant 0 : index
    %c0_47 = arith.constant 0 : index
    %69 = vector.load %arg2[%c7, %c0_46, %c0_47] : memref<9x1x64xf32, #tpu.memory_space<vmem>>, vector<1x1x64xf32>
    %70 = vector.shape_cast %69 : vector<1x1x64xf32> to vector<1x64xf32>
    %71 = vector.shape_cast %70 : vector<1x64xf32> to vector<1x1x64xf32>
    %c2_48 = arith.constant 2 : index
    %c1_49 = arith.constant 1 : index
    %c0_50 = arith.constant 0 : index
    %72 = vector.load %arg9[%c2_48, %c1_49, %c0_50] : memref<18x18x1xf32, #tpu.memory_space<vmem>>, vector<16x16x1xf32>
    %73 = vector.broadcast %72 : vector<16x16x1xf32> to vector<16x16x64xf32>
    %74 = vector.broadcast %71 : vector<1x1x64xf32> to vector<16x16x64xf32>
    %75 = arith.mulf %73, %74 : vector<16x16x64xf32>
    %76 = arith.addf %68, %75 : vector<16x16x64xf32>
    %c8 = arith.constant 8 : index
    %c0_51 = arith.constant 0 : index
    %c0_52 = arith.constant 0 : index
    %77 = vector.load %arg2[%c8, %c0_51, %c0_52] : memref<9x1x64xf32, #tpu.memory_space<vmem>>, vector<1x1x64xf32>
    %78 = vector.shape_cast %77 : vector<1x1x64xf32> to vector<1x64xf32>
    %79 = vector.shape_cast %78 : vector<1x64xf32> to vector<1x1x64xf32>
    %c2_53 = arith.constant 2 : index
    %c2_54 = arith.constant 2 : index
    %c0_55 = arith.constant 0 : index
    %80 = vector.load %arg9[%c2_53, %c2_54, %c0_55] : memref<18x18x1xf32, #tpu.memory_space<vmem>>, vector<16x16x1xf32>
    %81 = vector.broadcast %80 : vector<16x16x1xf32> to vector<16x16x64xf32>
    %82 = vector.broadcast %79 : vector<1x1x64xf32> to vector<16x16x64xf32>
    %83 = arith.mulf %81, %82 : vector<16x16x64xf32>
    %84 = arith.addf %76, %83 : vector<16x16x64xf32>
    %c0_56 = arith.constant 0 : index
    %c0_57 = arith.constant 0 : index
    %85 = vector.load %arg3[%c0_56, %c0_57] : memref<1x64xf32, #tpu.memory_space<vmem>>, vector<1x64xf32>
    %86 = vector.shape_cast %85 : vector<1x64xf32> to vector<1x1x64xf32>
    %87 = vector.broadcast %86 : vector<1x1x64xf32> to vector<16x16x64xf32>
    %88 = arith.addf %84, %87 : vector<16x16x64xf32>
    %cst_58 = arith.constant 0.000000e+00 : f32
    %89 = vector.broadcast %cst_58 : f32 to vector<16x16x64xf32>
    %90 = arith.maximumf %88, %89 : vector<16x16x64xf32>
    %cst_59 = arith.constant 0.000000e+00 : f32
    %91 = vector.broadcast %cst_59 : f32 to vector<1x18x64xf32>
    %cst_60 = arith.constant 0.000000e+00 : f32
    %92 = vector.broadcast %cst_60 : f32 to vector<18x1x64xf32>
    %c0_61 = arith.constant 0 : index
    %c0_62 = arith.constant 0 : index
    %c0_63 = arith.constant 0 : index
    %93 = vector.load %arg10[%c0_61, %c0_62, %c0_63] : memref<18x18x64xf32, #tpu.memory_space<vmem>>, vector<1x18x64xf32>
    tpu.vector_store %arg10[%c0_61, %c0_62, %c0_63], %91 {strides = array<i32>} : memref<18x18x64xf32, #tpu.memory_space<vmem>>, vector<1x18x64xf32>,
    %c17 = arith.constant 17 : index
    %c0_64 = arith.constant 0 : index
    %c0_65 = arith.constant 0 : index
    %94 = vector.load %arg10[%c17, %c0_64, %c0_65] : memref<18x18x64xf32, #tpu.memory_space<vmem>>, vector<1x18x64xf32>
    tpu.vector_store %arg10[%c17, %c0_64, %c0_65], %91 {strides = array<i32>} : memref<18x18x64xf32, #tpu.memory_space<vmem>>, vector<1x18x64xf32>,
    %c0_66 = arith.constant 0 : index
    %c0_67 = arith.constant 0 : index
    %c0_68 = arith.constant 0 : index
    %95 = vector.load %arg10[%c0_66, %c0_67, %c0_68] : memref<18x18x64xf32, #tpu.memory_space<vmem>>, vector<18x1x64xf32>
    tpu.vector_store %arg10[%c0_66, %c0_67, %c0_68], %92 {strides = array<i32>} : memref<18x18x64xf32, #tpu.memory_space<vmem>>, vector<18x1x64xf32>,
    %c0_69 = arith.constant 0 : index
    %c17_70 = arith.constant 17 : index
    %c0_71 = arith.constant 0 : index
    %96 = vector.load %arg10[%c0_69, %c17_70, %c0_71] : memref<18x18x64xf32, #tpu.memory_space<vmem>>, vector<18x1x64xf32>
    tpu.vector_store %arg10[%c0_69, %c17_70, %c0_71], %92 {strides = array<i32>} : memref<18x18x64xf32, #tpu.memory_space<vmem>>, vector<18x1x64xf32>,
    %c1_72 = arith.constant 1 : index
    %c1_73 = arith.constant 1 : index
    %c0_74 = arith.constant 0 : index
    %97 = vector.load %arg10[%c1_72, %c1_73, %c0_74] : memref<18x18x64xf32, #tpu.memory_space<vmem>>, vector<16x16x64xf32>
    tpu.vector_store %arg10[%c1_72, %c1_73, %c0_74], %90 {strides = array<i32>} : memref<18x18x64xf32, #tpu.memory_space<vmem>>, vector<16x16x64xf32>,
    %c0_75 = arith.constant 0 : index
    %c0_76 = arith.constant 0 : index
    %c0_77 = arith.constant 0 : index
    %98 = vector.load %arg10[%c0_75, %c0_76, %c0_77] : memref<18x18x64xf32, #tpu.memory_space<vmem>>, vector<16x16x64xf32>
    %99 = vector.shape_cast %98 : vector<16x16x64xf32> to vector<256x64xf32>
    %100 = arith.truncf %99 : vector<256x64xf32> to vector<256x64xbf16>
    %c0_78 = arith.constant 0 : index
    %c0_79 = arith.constant 0 : index
    %101 = vector.load %arg11[%c0_78, %c0_79] : memref<256x576xbf16, #tpu.memory_space<vmem>>, vector<256x64xbf16>
    tpu.vector_store %arg11[%c0_78, %c0_79], %100 {strides = array<i32>} : memref<256x576xbf16, #tpu.memory_space<vmem>>, vector<256x64xbf16>,
    %c0_80 = arith.constant 0 : index
    %c1_81 = arith.constant 1 : index
    %c0_82 = arith.constant 0 : index
    %102 = vector.load %arg10[%c0_80, %c1_81, %c0_82] : memref<18x18x64xf32, #tpu.memory_space<vmem>>, vector<16x16x64xf32>
    %103 = vector.shape_cast %102 : vector<16x16x64xf32> to vector<256x64xf32>
    %104 = arith.truncf %103 : vector<256x64xf32> to vector<256x64xbf16>
    %c0_83 = arith.constant 0 : index
    %c64 = arith.constant 64 : index
    %105 = vector.load %arg11[%c0_83, %c64] : memref<256x576xbf16, #tpu.memory_space<vmem>>, vector<256x64xbf16>
    tpu.vector_store %arg11[%c0_83, %c64], %104 {strides = array<i32>} : memref<256x576xbf16, #tpu.memory_space<vmem>>, vector<256x64xbf16>,
    %c0_84 = arith.constant 0 : index
    %c2_85 = arith.constant 2 : index
    %c0_86 = arith.constant 0 : index
    %106 = vector.load %arg10[%c0_84, %c2_85, %c0_86] : memref<18x18x64xf32, #tpu.memory_space<vmem>>, vector<16x16x64xf32>
    %107 = vector.shape_cast %106 : vector<16x16x64xf32> to vector<256x64xf32>
    %108 = arith.truncf %107 : vector<256x64xf32> to vector<256x64xbf16>
    %c0_87 = arith.constant 0 : index
    %c128 = arith.constant 128 : index
    %109 = vector.load %arg11[%c0_87, %c128] : memref<256x576xbf16, #tpu.memory_space<vmem>>, vector<256x64xbf16>
    tpu.vector_store %arg11[%c0_87, %c128], %108 {strides = array<i32>} : memref<256x576xbf16, #tpu.memory_space<vmem>>, vector<256x64xbf16>,
    %c1_88 = arith.constant 1 : index
    %c0_89 = arith.constant 0 : index
    %c0_90 = arith.constant 0 : index
    %110 = vector.load %arg10[%c1_88, %c0_89, %c0_90] : memref<18x18x64xf32, #tpu.memory_space<vmem>>, vector<16x16x64xf32>
    %111 = vector.shape_cast %110 : vector<16x16x64xf32> to vector<256x64xf32>
    %112 = arith.truncf %111 : vector<256x64xf32> to vector<256x64xbf16>
    %c0_91 = arith.constant 0 : index
    %c192 = arith.constant 192 : index
    %113 = vector.load %arg11[%c0_91, %c192] : memref<256x576xbf16, #tpu.memory_space<vmem>>, vector<256x64xbf16>
    tpu.vector_store %arg11[%c0_91, %c192], %112 {strides = array<i32>} : memref<256x576xbf16, #tpu.memory_space<vmem>>, vector<256x64xbf16>,
    %c1_92 = arith.constant 1 : index
    %c1_93 = arith.constant 1 : index
    %c0_94 = arith.constant 0 : index
    %114 = vector.load %arg10[%c1_92, %c1_93, %c0_94] : memref<18x18x64xf32, #tpu.memory_space<vmem>>, vector<16x16x64xf32>
    %115 = vector.shape_cast %114 : vector<16x16x64xf32> to vector<256x64xf32>
    %116 = arith.truncf %115 : vector<256x64xf32> to vector<256x64xbf16>
    %c0_95 = arith.constant 0 : index
    %c256 = arith.constant 256 : index
    %117 = vector.load %arg11[%c0_95, %c256] : memref<256x576xbf16, #tpu.memory_space<vmem>>, vector<256x64xbf16>
    tpu.vector_store %arg11[%c0_95, %c256], %116 {strides = array<i32>} : memref<256x576xbf16, #tpu.memory_space<vmem>>, vector<256x64xbf16>,
    %c1_96 = arith.constant 1 : index
    %c2_97 = arith.constant 2 : index
    %c0_98 = arith.constant 0 : index
    %118 = vector.load %arg10[%c1_96, %c2_97, %c0_98] : memref<18x18x64xf32, #tpu.memory_space<vmem>>, vector<16x16x64xf32>
    %119 = vector.shape_cast %118 : vector<16x16x64xf32> to vector<256x64xf32>
    %120 = arith.truncf %119 : vector<256x64xf32> to vector<256x64xbf16>
    %c0_99 = arith.constant 0 : index
    %c320 = arith.constant 320 : index
    %121 = vector.load %arg11[%c0_99, %c320] : memref<256x576xbf16, #tpu.memory_space<vmem>>, vector<256x64xbf16>
    tpu.vector_store %arg11[%c0_99, %c320], %120 {strides = array<i32>} : memref<256x576xbf16, #tpu.memory_space<vmem>>, vector<256x64xbf16>,
    %c2_100 = arith.constant 2 : index
    %c0_101 = arith.constant 0 : index
    %c0_102 = arith.constant 0 : index
    %122 = vector.load %arg10[%c2_100, %c0_101, %c0_102] : memref<18x18x64xf32, #tpu.memory_space<vmem>>, vector<16x16x64xf32>
    %123 = vector.shape_cast %122 : vector<16x16x64xf32> to vector<256x64xf32>
    %124 = arith.truncf %123 : vector<256x64xf32> to vector<256x64xbf16>
    %c0_103 = arith.constant 0 : index
    %c384 = arith.constant 384 : index
    %125 = vector.load %arg11[%c0_103, %c384] : memref<256x576xbf16, #tpu.memory_space<vmem>>, vector<256x64xbf16>
    tpu.vector_store %arg11[%c0_103, %c384], %124 {strides = array<i32>} : memref<256x576xbf16, #tpu.memory_space<vmem>>, vector<256x64xbf16>,
    %c2_104 = arith.constant 2 : index
    %c1_105 = arith.constant 1 : index
    %c0_106 = arith.constant 0 : index
    %126 = vector.load %arg10[%c2_104, %c1_105, %c0_106] : memref<18x18x64xf32, #tpu.memory_space<vmem>>, vector<16x16x64xf32>
    %127 = vector.shape_cast %126 : vector<16x16x64xf32> to vector<256x64xf32>
    %128 = arith.truncf %127 : vector<256x64xf32> to vector<256x64xbf16>
    %c0_107 = arith.constant 0 : index
    %c448 = arith.constant 448 : index
    %129 = vector.load %arg11[%c0_107, %c448] : memref<256x576xbf16, #tpu.memory_space<vmem>>, vector<256x64xbf16>
    tpu.vector_store %arg11[%c0_107, %c448], %128 {strides = array<i32>} : memref<256x576xbf16, #tpu.memory_space<vmem>>, vector<256x64xbf16>,
    %c2_108 = arith.constant 2 : index
    %c2_109 = arith.constant 2 : index
    %c0_110 = arith.constant 0 : index
    %130 = vector.load %arg10[%c2_108, %c2_109, %c0_110] : memref<18x18x64xf32, #tpu.memory_space<vmem>>, vector<16x16x64xf32>
    %131 = vector.shape_cast %130 : vector<16x16x64xf32> to vector<256x64xf32>
    %132 = arith.truncf %131 : vector<256x64xf32> to vector<256x64xbf16>
    %c0_111 = arith.constant 0 : index
    %c512 = arith.constant 512 : index
    %133 = vector.load %arg11[%c0_111, %c512] : memref<256x576xbf16, #tpu.memory_space<vmem>>, vector<256x64xbf16>
    tpu.vector_store %arg11[%c0_111, %c512], %132 {strides = array<i32>} : memref<256x576xbf16, #tpu.memory_space<vmem>>, vector<256x64xbf16>,
    %c0_112 = arith.constant 0 : index
    %c0_113 = arith.constant 0 : index
    %134 = vector.load %arg11[%c0_112, %c0_113] : memref<256x576xbf16, #tpu.memory_space<vmem>>, vector<256x576xbf16>
    %c0_114 = arith.constant 0 : index
    %c0_115 = arith.constant 0 : index
    %135 = vector.load %arg4[%c0_114, %c0_115] : memref<576x64xbf16, #tpu.memory_space<vmem>>, vector<576x64xbf16>
    %cst_116 = arith.constant dense<0.000000e+00> : vector<256x64xf32>
    %136 = tpu.matmul %134, %135, %cst_116 {dimension_numbers = #tpu.dot_dimension_numbers<[1], [0], [0], [1], [0, 0, 1, 1], [], []>} : vector<256x576xbf16>, vector<576x64xbf16>, vector<256x64xf32> -> vector<256x64xf32>
    %c0_117 = arith.constant 0 : index
    %c0_118 = arith.constant 0 : index
    %137 = vector.load %arg5[%c0_117, %c0_118] : memref<1x64xf32, #tpu.memory_space<vmem>>, vector<1x64xf32>
    %138 = vector.broadcast %137 : vector<1x64xf32> to vector<256x64xf32>
    %139 = arith.addf %136, %138 : vector<256x64xf32>
    %cst_119 = arith.constant 0.000000e+00 : f32
    %140 = vector.broadcast %cst_119 : f32 to vector<256x64xf32>
    %141 = arith.maximumf %139, %140 : vector<256x64xf32>
    %142 = vector.shape_cast %141 : vector<256x64xf32> to vector<16x16x64xf32>
    %c1_120 = arith.constant 1 : index
    %c1_121 = arith.constant 1 : index
    %c0_122 = arith.constant 0 : index
    %143 = vector.load %arg10[%c1_120, %c1_121, %c0_122] : memref<18x18x64xf32, #tpu.memory_space<vmem>>, vector<16x16x64xf32>
    tpu.vector_store %arg10[%c1_120, %c1_121, %c0_122], %142 {strides = array<i32>} : memref<18x18x64xf32, #tpu.memory_space<vmem>>, vector<16x16x64xf32>,
    %c0_123 = arith.constant 0 : index
    %c0_124 = arith.constant 0 : index
    %c0_125 = arith.constant 0 : index
    %144 = vector.load %arg10[%c0_123, %c0_124, %c0_125] : memref<18x18x64xf32, #tpu.memory_space<vmem>>, vector<16x16x64xf32>
    %145 = vector.shape_cast %144 : vector<16x16x64xf32> to vector<256x64xf32>
    %146 = arith.truncf %145 : vector<256x64xf32> to vector<256x64xbf16>
    %c0_126 = arith.constant 0 : index
    %c0_127 = arith.constant 0 : index
    %147 = vector.load %arg11[%c0_126, %c0_127] : memref<256x576xbf16, #tpu.memory_space<vmem>>, vector<256x64xbf16>
    tpu.vector_store %arg11[%c0_126, %c0_127], %146 {strides = array<i32>} : memref<256x576xbf16, #tpu.memory_space<vmem>>, vector<256x64xbf16>,
    %c0_128 = arith.constant 0 : index
    %c1_129 = arith.constant 1 : index
    %c0_130 = arith.constant 0 : index
    %148 = vector.load %arg10[%c0_128, %c1_129, %c0_130] : memref<18x18x64xf32, #tpu.memory_space<vmem>>, vector<16x16x64xf32>
    %149 = vector.shape_cast %148 : vector<16x16x64xf32> to vector<256x64xf32>
    %150 = arith.truncf %149 : vector<256x64xf32> to vector<256x64xbf16>
    %c0_131 = arith.constant 0 : index
    %c64_132 = arith.constant 64 : index
    %151 = vector.load %arg11[%c0_131, %c64_132] : memref<256x576xbf16, #tpu.memory_space<vmem>>, vector<256x64xbf16>
    tpu.vector_store %arg11[%c0_131, %c64_132], %150 {strides = array<i32>} : memref<256x576xbf16, #tpu.memory_space<vmem>>, vector<256x64xbf16>,
    %c0_133 = arith.constant 0 : index
    %c2_134 = arith.constant 2 : index
    %c0_135 = arith.constant 0 : index
    %152 = vector.load %arg10[%c0_133, %c2_134, %c0_135] : memref<18x18x64xf32, #tpu.memory_space<vmem>>, vector<16x16x64xf32>
    %153 = vector.shape_cast %152 : vector<16x16x64xf32> to vector<256x64xf32>
    %154 = arith.truncf %153 : vector<256x64xf32> to vector<256x64xbf16>
    %c0_136 = arith.constant 0 : index
    %c128_137 = arith.constant 128 : index
    %155 = vector.load %arg11[%c0_136, %c128_137] : memref<256x576xbf16, #tpu.memory_space<vmem>>, vector<256x64xbf16>
    tpu.vector_store %arg11[%c0_136, %c128_137], %154 {strides = array<i32>} : memref<256x576xbf16, #tpu.memory_space<vmem>>, vector<256x64xbf16>,
    %c1_138 = arith.constant 1 : index
    %c0_139 = arith.constant 0 : index
    %c0_140 = arith.constant 0 : index
    %156 = vector.load %arg10[%c1_138, %c0_139, %c0_140] : memref<18x18x64xf32, #tpu.memory_space<vmem>>, vector<16x16x64xf32>
    %157 = vector.shape_cast %156 : vector<16x16x64xf32> to vector<256x64xf32>
    %158 = arith.truncf %157 : vector<256x64xf32> to vector<256x64xbf16>
    %c0_141 = arith.constant 0 : index
    %c192_142 = arith.constant 192 : index
    %159 = vector.load %arg11[%c0_141, %c192_142] : memref<256x576xbf16, #tpu.memory_space<vmem>>, vector<256x64xbf16>
    tpu.vector_store %arg11[%c0_141, %c192_142], %158 {strides = array<i32>} : memref<256x576xbf16, #tpu.memory_space<vmem>>, vector<256x64xbf16>,
    %c1_143 = arith.constant 1 : index
    %c1_144 = arith.constant 1 : index
    %c0_145 = arith.constant 0 : index
    %160 = vector.load %arg10[%c1_143, %c1_144, %c0_145] : memref<18x18x64xf32, #tpu.memory_space<vmem>>, vector<16x16x64xf32>
    %161 = vector.shape_cast %160 : vector<16x16x64xf32> to vector<256x64xf32>
    %162 = arith.truncf %161 : vector<256x64xf32> to vector<256x64xbf16>
    %c0_146 = arith.constant 0 : index
    %c256_147 = arith.constant 256 : index
    %163 = vector.load %arg11[%c0_146, %c256_147] : memref<256x576xbf16, #tpu.memory_space<vmem>>, vector<256x64xbf16>
    tpu.vector_store %arg11[%c0_146, %c256_147], %162 {strides = array<i32>} : memref<256x576xbf16, #tpu.memory_space<vmem>>, vector<256x64xbf16>,
    %c1_148 = arith.constant 1 : index
    %c2_149 = arith.constant 2 : index
    %c0_150 = arith.constant 0 : index
    %164 = vector.load %arg10[%c1_148, %c2_149, %c0_150] : memref<18x18x64xf32, #tpu.memory_space<vmem>>, vector<16x16x64xf32>
    %165 = vector.shape_cast %164 : vector<16x16x64xf32> to vector<256x64xf32>
    %166 = arith.truncf %165 : vector<256x64xf32> to vector<256x64xbf16>
    %c0_151 = arith.constant 0 : index
    %c320_152 = arith.constant 320 : index
    %167 = vector.load %arg11[%c0_151, %c320_152] : memref<256x576xbf16, #tpu.memory_space<vmem>>, vector<256x64xbf16>
    tpu.vector_store %arg11[%c0_151, %c320_152], %166 {strides = array<i32>} : memref<256x576xbf16, #tpu.memory_space<vmem>>, vector<256x64xbf16>,
    %c2_153 = arith.constant 2 : index
    %c0_154 = arith.constant 0 : index
    %c0_155 = arith.constant 0 : index
    %168 = vector.load %arg10[%c2_153, %c0_154, %c0_155] : memref<18x18x64xf32, #tpu.memory_space<vmem>>, vector<16x16x64xf32>
    %169 = vector.shape_cast %168 : vector<16x16x64xf32> to vector<256x64xf32>
    %170 = arith.truncf %169 : vector<256x64xf32> to vector<256x64xbf16>
    %c0_156 = arith.constant 0 : index
    %c384_157 = arith.constant 384 : index
    %171 = vector.load %arg11[%c0_156, %c384_157] : memref<256x576xbf16, #tpu.memory_space<vmem>>, vector<256x64xbf16>
    tpu.vector_store %arg11[%c0_156, %c384_157], %170 {strides = array<i32>} : memref<256x576xbf16, #tpu.memory_space<vmem>>, vector<256x64xbf16>,
    %c2_158 = arith.constant 2 : index
    %c1_159 = arith.constant 1 : index
    %c0_160 = arith.constant 0 : index
    %172 = vector.load %arg10[%c2_158, %c1_159, %c0_160] : memref<18x18x64xf32, #tpu.memory_space<vmem>>, vector<16x16x64xf32>
    %173 = vector.shape_cast %172 : vector<16x16x64xf32> to vector<256x64xf32>
    %174 = arith.truncf %173 : vector<256x64xf32> to vector<256x64xbf16>
    %c0_161 = arith.constant 0 : index
    %c448_162 = arith.constant 448 : index
    %175 = vector.load %arg11[%c0_161, %c448_162] : memref<256x576xbf16, #tpu.memory_space<vmem>>, vector<256x64xbf16>
    tpu.vector_store %arg11[%c0_161, %c448_162], %174 {strides = array<i32>} : memref<256x576xbf16, #tpu.memory_space<vmem>>, vector<256x64xbf16>,
    %c2_163 = arith.constant 2 : index
    %c2_164 = arith.constant 2 : index
    %c0_165 = arith.constant 0 : index
    %176 = vector.load %arg10[%c2_163, %c2_164, %c0_165] : memref<18x18x64xf32, #tpu.memory_space<vmem>>, vector<16x16x64xf32>
    %177 = vector.shape_cast %176 : vector<16x16x64xf32> to vector<256x64xf32>
    %178 = arith.truncf %177 : vector<256x64xf32> to vector<256x64xbf16>
    %c0_166 = arith.constant 0 : index
    %c512_167 = arith.constant 512 : index
    %179 = vector.load %arg11[%c0_166, %c512_167] : memref<256x576xbf16, #tpu.memory_space<vmem>>, vector<256x64xbf16>
    tpu.vector_store %arg11[%c0_166, %c512_167], %178 {strides = array<i32>} : memref<256x576xbf16, #tpu.memory_space<vmem>>, vector<256x64xbf16>,
    %c0_168 = arith.constant 0 : index
    %c0_169 = arith.constant 0 : index
    %180 = vector.load %arg11[%c0_168, %c0_169] : memref<256x576xbf16, #tpu.memory_space<vmem>>, vector<256x576xbf16>
    %c0_170 = arith.constant 0 : index
    %c0_171 = arith.constant 0 : index
    %181 = vector.load %arg6[%c0_170, %c0_171] : memref<576x1xbf16, #tpu.memory_space<vmem>>, vector<576x1xbf16>
    %cst_172 = arith.constant dense<0.000000e+00> : vector<256x1xf32>
    %182 = tpu.matmul %180, %181, %cst_172 {dimension_numbers = #tpu.dot_dimension_numbers<[1], [0], [0], [1], [0, 0, 1, 1], [], []>} : vector<256x576xbf16>, vector<576x1xbf16>, vector<256x1xf32> -> vector<256x1xf32>
    %c0_173 = arith.constant 0 : index
    %c0_174 = arith.constant 0 : index
    %183 = vector.load %arg7[%c0_173, %c0_174] : memref<1x1xf32, #tpu.memory_space<vmem>>, vector<1x1xf32>
    %184 = vector.broadcast %183 : vector<1x1xf32> to vector<256x1xf32>
    %185 = arith.addf %182, %184 : vector<256x1xf32>
    %186 = vector.shape_cast %185 : vector<256x1xf32> to vector<16x16x1xf32>
    %187 = vector.shape_cast %1 : vector<16x8xf32> to vector<1x16x8xf32>
    %188 = vector.broadcast %186 : vector<16x16x1xf32> to vector<16x16x8xf32>
    %189 = vector.broadcast %187 : vector<1x16x8xf32> to vector<16x16x8xf32>
    %190 = arith.mulf %188, %189 : vector<16x16x8xf32>
    %cst_175 = arith.constant dense<0.000000e+00> : vector<16x8xf32>
    %191 = vector.multi_reduction <add>, %190, %cst_175 [1] : vector<16x16x8xf32> to vector<16x8xf32>
    %c0_176 = arith.constant 0 : index
    %c0_177 = arith.constant 0 : index
    %c0_178 = arith.constant 0 : index
    %192 = vector.load %arg8[%c0_176, %c0_177, %c0_178] : memref<1x16x8xf32, #tpu.memory_space<vmem>>, vector<1x16x8xf32>
    %193 = vector.shape_cast %192 : vector<1x16x8xf32> to vector<16x8xf32>
    %194 = vector.shape_cast %191 : vector<16x8xf32> to vector<1x16x8xf32>
    tpu.vector_store %arg8[%c0_176, %c0_177, %c0_178], %194 {strides = array<i32>} : memref<1x16x8xf32, #tpu.memory_space<vmem>>, vector<1x16x8xf32>,
    return
  }
  func.func @transform_0(%arg0: i32) -> (i32, i32, i32) {
    %c0_i32 = arith.constant 0 : i32
    %c0_i32_0 = arith.constant 0 : i32
    %c0_i32_1 = arith.constant 0 : i32
    return %arg0, %c0_i32, %c0_i32_0 : i32, i32, i32
  }
  func.func @transform_1(%arg0: i32) -> (i32, i32, i32) {
    %c0_i32 = arith.constant 0 : i32
    %c0_i32_0 = arith.constant 0 : i32
    %c0_i32_1 = arith.constant 0 : i32
    %c0_i32_2 = arith.constant 0 : i32
    return %c0_i32, %c0_i32_0, %c0_i32_1 : i32, i32, i32
  }
  func.func @transform_2(%arg0: i32) -> (i32, i32) {
    %c0_i32 = arith.constant 0 : i32
    %c0_i32_0 = arith.constant 0 : i32
    %c0_i32_1 = arith.constant 0 : i32
    return %c0_i32, %c0_i32_0 : i32, i32
  }
  func.func @transform_3(%arg0: i32) -> (i32, i32) {
    %c0_i32 = arith.constant 0 : i32
    %c0_i32_0 = arith.constant 0 : i32
    %c0_i32_1 = arith.constant 0 : i32
    return %c0_i32, %c0_i32_0 : i32, i32
  }
  func.func @transform_4(%arg0: i32) -> (i32, i32) {
    %c0_i32 = arith.constant 0 : i32
    %c0_i32_0 = arith.constant 0 : i32
    %c0_i32_1 = arith.constant 0 : i32
    return %c0_i32, %c0_i32_0 : i32, i32
  }
  func.func @transform_5(%arg0: i32) -> (i32, i32) {
    %c0_i32 = arith.constant 0 : i32
    %c0_i32_0 = arith.constant 0 : i32
    %c0_i32_1 = arith.constant 0 : i32
    return %c0_i32, %c0_i32_0 : i32, i32
  }
  func.func @transform_6(%arg0: i32) -> (i32, i32) {
    %c0_i32 = arith.constant 0 : i32
    %c0_i32_0 = arith.constant 0 : i32
    %c0_i32_1 = arith.constant 0 : i32
    return %c0_i32, %c0_i32_0 : i32, i32
  }
  func.func @transform_7(%arg0: i32) -> (i32, i32, i32) {
    %c0_i32 = arith.constant 0 : i32
    %c0_i32_0 = arith.constant 0 : i32
    %c0_i32_1 = arith.constant 0 : i32
    return %arg0, %c0_i32, %c0_i32_0 : i32, i32, i32
  }
}

</mosaic_0001>

<bundles_post_ra>
// kernel: tpu_custom_call.1
= control target key start
LH: loop header
LB: loop body
LE: loop exit
PB: predicated region body
PF: predicated region fallthrough
CT: control target
= control target key end

     0   :  { %s8054_s26 = smov 0   ;;  %s11088_s0 = inlined_call_operand.vmem [shape: f32[2,16,8], index: 0, kind: input, shape index: {}]   ;;  %s11089_s1 = inlined_call_operand.vmem [shape: f32[9,1,64], index: 1, kind: input, shape index: {}]   ;;  %s11090_s2 = inlined_call_operand.vmem [shape: f32[1,64], index: 2, kind: input, shape index: {}]   ;;  %s11091_s3 = inlined_call_operand.vmem [shape: bf16[576,64], index: 3, kind: input, shape index: {}]   ;;  %s11092_s4 = inlined_call_operand.vmem [shape: f32[1,64], index: 4, kind: input, shape index: {}]   ;;  %s11093_s5 = inlined_call_operand.vmem [shape: bf16[576,1], index: 5, kind: input, shape index: {}]   ;;  %s11094_s6 = inlined_call_operand.<no memory space> [shape: f32[1,1], index: 6, kind: input, shape index: {}]   ;;  %s11095_s7 = inlined_call_operand.vmem [shape: f32[2,16,8], index: 7, kind: output, shape index: {}]  }
   0x1   :  { %v12_v0 = vstv %s11094_s6 }
   0x2   :  { %13 = vst [vmem:[#allocation5] sm:$0x1] %v12_v0 }
   0x3 LB: > { %s7182_s27 = sadd.s32 4294967295, %s8005_s26   ;;  %p7186_p0 = scmp.ge.s32.totalorder %s8005_s26, 1  ;;  %s8005_s26 = sphi %s8054_s26, %s19_s26  }
   0x4   : > { %p239_p1 = scmp.lt.s32.totalorder %s8005_s26, 3 }
   0x6   : > { %p240_p2 = pnand %p7186_p0, %p239_p1 }
   0x8   : > { %243 = sbr.rel (%p240_p2) target bundleno = 1987 (0x7c3), region = 48 }
   0xf   : > { %p271_p3 = scmp.lt.s32.totalorder %s7182_s27, 1  ;;  %v290_v1 = vlaneseq  ;;  %v8007_v2 = vmov 1966171168   ;;  %v8008_v4 = vmov 0   ;;  %vm593_vm0 = vcmask 7168   ;;  %s8010_s20 = smov 64  }
  0x10   : > { %v288_v3 = vunpack.c.l.s4 %v8007_v2  ;;  %7900 = vset.pattern.permute.xlu1 %v8008_v4  ;;  %7899 = vset.pattern.permute.xlu0 %v8008_v4  ;;  %v11096_v6 = vmov 0.0   ;;  %vm496_vm1 = vcmask 64512   ;;  %vm596_vm2 = vcmask 1024  }
  0x11   : > { %s11270_s27 = smov (!%p271_p3, %s7182_s27), 1  ;;  %v291_v5 = vshrl.u32 %v290_v1, 7  ;;  %598 = vst.msk [vmem:[#allocation2 + $0x18] sm:$0xff] %vm593_vm0, %v11096_v6  ;;  %599 = vst.msk [vmem:[#allocation2 + $0x20] sm:$0xff] %vm593_vm0, %v11096_v6  ;;  %vm3129_vm3 = vcmask 523264   ;;  %vm3138_vm4 = vcmask 516096  }
  0x12   : > { %594 = vst.msk [vmem:[#allocation2] sm:$0xff] %vm593_vm0, %v11096_v6  ;;  %595 = vst.msk [vmem:[#allocation2 + $0x8] sm:$0xff] %vm593_vm0, %v11096_v6  ;;  %v289_v7 = vunpack.c.0.s8 %v288_v3  ;;  %s7317_s6 = sshll.u32 %s11270_s27, 4  ;;  %vm3132_vm5 = vcmask 517120   ;;  %vm3384_vm6 = vcmask 1048064   ;;  %vm7102_vm7 = vcmask 1041409  }
  0x13   : > { %601 = vst.msk [vmem:[#allocation2 + $0x30] sm:$0xff] %vm593_vm0, %v11096_v6  ;;  %602 = vst.msk [vmem:[#allocation2 + $0x38] sm:$0xff] %vm593_vm0, %v11096_v6  ;;  %s8142_s30 = scalar_lea.vmem %s11088_s0, %s7317_s6  ;;  %v8149_v10 = vsub.s32 0, %v291_v5  ;;  %vm7104_vm8 = vcmask 1042434   ;;  %vm7106_vm9 = vcmask 1043459   ;;  %vm7108_vm10 = vcmask 1044484   ;;  %s11050_s8 = scalar_lea.vmem %s11095_s7, %s7317_s6 }
  0x14   : > { %604 = vst.msk [vmem:[#allocation2 + $0x48] sm:$0xff] %vm593_vm0, %v11096_v6  ;;  %605 = vst.msk [vmem:[#allocation2 + $0x50] sm:$0xff] %vm593_vm0, %v11096_v6  ;;  %v8144_v8 = vsub.s32 %v289_v7, %v291_v5  ;;  %v8147_v9 = vld [vmem:[%s8142_s30] sm:$0xff]  ;;  %v8156_v13 = vld [vmem:[%s8142_s30 + $0x8] sm:$0xff]  ;;  %vm7110_vm11 = vcmask 1045509   ;;  %vm7112_vm12 = vcmask 1046534  }
  0x15   : > { %607 = vst.msk [vmem:[#allocation2 + $0x60] sm:$0xff] %vm593_vm0, %v11096_v6  ;;  %608 = vst.msk [vmem:[#allocation2 + $0x68] sm:$0xff] %vm593_vm0, %v11096_v6  ;;  %v286_v12 = vcombine.high %v8147_v9, %v8147_v9  ;;  %vm7114_vm13 = vcmask 1047559  }
  0x16   : > { %610 = vst.msk [vmem:[#allocation2 + $0x78] sm:$0xff] %vm593_vm0, %v11096_v6  ;;  %611 = vst.msk [vmem:[#allocation2 + $0x80] sm:$0xff] %vm593_vm0, %v11096_v6  ;;  %v293_v11 = vrot.slane %v8147_v9, %v8144_v8  ;;  %v342_v30 = vrot.slane %v8156_v13, %v8144_v8 }
  0x17   : > { %613 = vst.msk [vmem:[#allocation2 + $0x90] sm:$0xff] %vm593_vm0, %v11096_v6  ;;  %614 = vst.msk [vmem:[#allocation2 + $0x98] sm:$0xff] %vm593_vm0, %v11096_v6  ;;  %v300_v16 = vrot.slane %v286_v12, %v8144_v8 }
  0x18   : > { %616 = vst.msk [vmem:[#allocation2 + $0xa8] sm:$0xff] %vm593_vm0, %v11096_v6  ;;  %617 = vst.msk [vmem:[#allocation2 + $0xb0] sm:$0xff] %vm593_vm0, %v11096_v6  ;;  %v309_v14 = vrot.slane %v293_v11, %v8144_v8  ;;  %v301_v15 = vcombine.high %v293_v11, %v293_v11  ;;  %v8183_v41 = vrot.slane %v342_v30, %v8144_v8 }
  0x19   : > { %619 = vst.msk [vmem:[#allocation2 + $0xc0] sm:$0xff] %vm593_vm0, %v11096_v6  ;;  %620 = vst.msk [vmem:[#allocation2 + $0xc8] sm:$0xff] %vm593_vm0, %v11096_v6  ;;  %v316_v20 = vrot.slane %v300_v16, %v8144_v8  ;;  %v302_v29 = vcombine.high %v300_v16, %v300_v16  ;;  %v350_v47 = vcombine.high %v342_v30, %v342_v30 }
  0x1a   : > { %622 = vst.msk [vmem:[#allocation2 + $0xd8] sm:$0xff] %vm593_vm0, %v11096_v6  ;;  %623 = vst.msk [vmem:[#allocation2 + $0xe0] sm:$0xff] %vm593_vm0, %v11096_v6  ;;  %v387_v17 = vrot.slane %v309_v14, %v8149_v10  ;;  %v323_v18 = vrot.slane %v301_v15, %v8144_v8  ;;  %v331_v19 = vcombine.high %v309_v14, %v309_v14 }
  0x1b   : > { %625 = vst.msk [vmem:[#allocation2 + $0xf0] sm:$0xff] %vm593_vm0, %v11096_v6  ;;  %626 = vst.msk [vmem:[#allocation2 + $0xf8] sm:$0xff] %vm593_vm0, %v11096_v6  ;;  %v403_v28 = vrot.slane %v316_v20, %v8149_v10  ;;  %v330_v38 = vrot.slane %v302_v29, %v8144_v8  ;;  %v332_v44 = vcombine.high %v316_v20, %v316_v20 }
  0x1c   : > { %628 = vst.msk [vmem:[#allocation2 + $0x108] sm:$0xff] %vm593_vm0, %v11096_v6  ;;  %629 = vst.msk [vmem:[#allocation2 + $0x110] sm:$0xff] %vm593_vm0, %v11096_v6  ;;  %v464_v21 = vmul.f32 %v387_v17, %v8147_v9  ;;  %v391_v22 = vrot.slane %v323_v18, %v8149_v10  ;;  %v465_v23 = vmul.f32 %v387_v17, %v8156_v13 }
  0x1d   : > { %631 = vst.msk [vmem:[#allocation2 + $0x120] sm:$0xff] %vm593_vm0, %v11096_v6  ;;  %632 = vst.msk [vmem:[#allocation2 + $0x128] sm:$0xff] %vm593_vm0, %v11096_v6  ;;  %v395_v24 = vrot.slane %v331_v19, %v8149_v10  ;;  %v333_v34 = vcombine.high %v323_v18, %v323_v18  ;;  %v472_v37 = vmul.f32 %v403_v28, %v8147_v9 }
  0x1e   : > { %634 = vst.msk [vmem:[#allocation2 + $0x138] sm:$0xff] %vm593_vm0, %v11096_v6  ;;  %635 = vst.msk [vmem:[#allocation2 + $0x140] sm:$0xff] %vm593_vm0, %v11096_v6  ;;  %v497_v25 = vsel %vm496_vm1, %v464_v21, 0.0  ;;  %v466_v26 = vmul.f32 %v391_v22, %v8147_v9  ;;  %v467_v27 = vmul.f32 %v391_v22, %v8156_v13  ;;  %v500_v32 = vsel %vm496_vm1, %v465_v23, 0.0 }
  0x1f   : > { %637 = vst.msk [vmem:[#allocation2 + $0x150] sm:$0xff] %vm593_vm0, %v11096_v6  ;;  %638 = vst.msk [vmem:[#allocation2 + $0x158] sm:$0xff] %vm593_vm0, %v11096_v6  ;;  %498 = vadd.xlane.f32.xlu0 %v497_v25  ;;  %v468_v33 = vmul.f32 %v395_v24, %v8147_v9  ;;  %v469_v36 = vmul.f32 %v395_v24, %v8156_v13  ;;  %v399_v40 = vrot.slane %v333_v34, %v8149_v10 }
  0x20   : > { %640 = vst.msk [vmem:[#allocation2 + $0x168] sm:$0xff] %vm593_vm0, %v11096_v6  ;;  %641 = vst.msk [vmem:[#allocation2 + $0x170] sm:$0xff] %vm593_vm0, %v11096_v6  ;;  %v503_v31 = vsel %vm496_vm1, %v466_v26, 0.0  ;;  %v506_v35 = vsel %vm496_vm1, %v467_v27, 0.0  ;;  %v473_v43 = vmul.f32 %v403_v28, %v8156_v13  ;;  %v521_v45 = vsel %vm496_vm1, %v472_v37, 0.0 }
  0x21   : > { %643 = vst.msk [vmem:[#allocation2 + $0x180] sm:$0xff] %vm593_vm0, %v11096_v6  ;;  %644 = vst.msk [vmem:[#allocation2 + $0x188] sm:$0xff] %vm593_vm0, %v11096_v6  ;;  %504 = vadd.xlane.f32.xlu1 %v503_v31  ;;  %v509_v39 = vsel %vm496_vm1, %v468_v33, 0.0  ;;  %v512_v42 = vsel %vm496_vm1, %v469_v36, 0.0  ;;  %v407_v46 = vrot.slane %v330_v38, %v8149_v10  ;;  %v470_v48 = vmul.f32 %v399_v40, %v8147_v9 }
  0x22   : > { %646 = vst.msk [vmem:[#allocation2 + $0x198] sm:$0xff] %vm593_vm0, %v11096_v6  ;;  %647 = vst.msk [vmem:[#allocation2 + $0x1a0] sm:$0xff] %vm593_vm0, %v11096_v6  ;;  %v334_v49 = vcombine.high %v330_v38, %v330_v38  ;;  %v419_v50 = vrot.slane %v8183_v41, %v8149_v10  ;;  %v471_v51 = vmul.f32 %v399_v40, %v8156_v13  ;;  %v524_v52 = vsel %vm496_vm1, %v473_v43, 0.0 }
  0x23   : > { %501 = vadd.xlane.f32.xlu0 %v500_v32  ;;  %v411_v53 = vrot.slane %v332_v44, %v8149_v10  ;;  %v474_v54 = vmul.f32 %v407_v46, %v8147_v9  ;;  %v372_v55 = vrot.slane %v350_v47, %v8144_v8  ;;  %v515_v56 = vsel %vm496_vm1, %v470_v48, 0.0  ;;  %600 = vst.msk [vmem:[#allocation2 + $0x28] sm:$0x3] %vm596_vm2, %v11096_v6 }
  0x24   : > { %v475_v57 = vmul.f32 %v407_v46, %v8156_v13  ;;  %v415_v58 = vrot.slane %v334_v49, %v8149_v10  ;;  %v480_v59 = vmul.f32 %v419_v50, %v8147_v9  ;;  %v518_v60 = vsel %vm496_vm1, %v471_v51, 0.0  ;;  %597 = vst.msk [vmem:[#allocation2 + $0x10] sm:$0x3] %vm596_vm2, %v11096_v6  ;;  %603 = vst.msk [vmem:[#allocation2 + $0x40] sm:$0x3] %vm596_vm2, %v11096_v6 }
  0x25   : > { %507 = vadd.xlane.f32.xlu1 %v506_v35  ;;  %v476_v61 = vmul.f32 %v411_v53, %v8147_v9  ;;  %v481_v62 = vmul.f32 %v419_v50, %v8156_v13  ;;  %v527_v63 = vsel %vm496_vm1, %v474_v54, 0.0  ;;  %v423_v0 = vrot.slane %v372_v55, %v8149_v10  ;;  %606 = vst.msk [vmem:[#allocation2 + $0x58] sm:$0x3] %vm596_vm2, %v11096_v6 }
  0x26   : > { %v530_v1 = vsel %vm496_vm1, %v475_v57, 0.0  ;;  %v477_v2 = vmul.f32 %v411_v53, %v8156_v13  ;;  %v478_v3 = vmul.f32 %v415_v58, %v8147_v9  ;;  %v545_v4 = vsel %vm496_vm1, %v480_v59, 0.0  ;;  %609 = vst.msk [vmem:[#allocation2 + $0x70] sm:$0x3] %vm596_vm2, %v11096_v6  ;;  %612 = vst.msk [vmem:[#allocation2 + $0x88] sm:$0x3] %vm596_vm2, %v11096_v6 }
  0x27   : > { %510 = vadd.xlane.f32.xlu0 %v509_v39  ;;  %615 = vst.msk [vmem:[#allocation2 + $0xa0] sm:$0x3] %vm596_vm2, %v11096_v6  ;;  %618 = vst.msk [vmem:[#allocation2 + $0xb8] sm:$0x3] %vm596_vm2, %v11096_v6  ;;  %v533_v5 = vsel %vm496_vm1, %v476_v61, 0.0  ;;  %v548_v7 = vsel %vm496_vm1, %v481_v62, 0.0  ;;  %v479_v11 = vmul.f32 %v415_v58, %v8156_v13  ;;  %v483_v12 = vmul.f32 %v423_v0, %v8156_v13 }
  0x28   : > { %621 = vst.msk [vmem:[#allocation2 + $0xd0] sm:$0x3] %vm596_vm2, %v11096_v6  ;;  %624 = vst.msk [vmem:[#allocation2 + $0xe8] sm:$0x3] %vm596_vm2, %v11096_v6  ;;  %v536_v14 = vsel %vm496_vm1, %v477_v2, 0.0  ;;  %v539_v15 = vsel %vm496_vm1, %v478_v3, 0.0  ;;  %v380_v16 = vcombine.high %v8183_v41, %v8183_v41  ;;  %v335_v19 = vcombine.high %v8156_v13, %v8156_v13 }
  0x29   : > { %513 = vadd.xlane.f32.xlu1 %v512_v42  ;;  %627 = vst.msk [vmem:[#allocation2 + $0x100] sm:$0x3] %vm596_vm2, %v11096_v6  ;;  %630 = vst.msk [vmem:[#allocation2 + $0x118] sm:$0x3] %vm596_vm2, %v11096_v6  ;;  %v542_v17 = vsel %vm496_vm1, %v479_v11, 0.0  ;;  %v554_v18 = vsel %vm496_vm1, %v483_v12, 0.0  ;;  %v382_v21 = vcombine.high %v372_v55, %v372_v55  ;;  %v482_v23 = vmul.f32 %v423_v0, %v8147_v9 }
  0x2a   : > { %633 = vst.msk [vmem:[#allocation2 + $0x130] sm:$0x3] %vm596_vm2, %v11096_v6  ;;  %636 = vst.msk [vmem:[#allocation2 + $0x148] sm:$0x3] %vm596_vm2, %v11096_v6  ;;  %v427_v20 = vrot.slane %v380_v16, %v8149_v10  ;;  %v349_v22 = vrot.slane %v335_v19, %v8144_v8  ;;  %v684_v58 = vld [vmem:[#allocation2 + $0x8] sm:$0xff] }
  0x2b   : > { %522 = vadd.xlane.f32.xlu0 %v521_v45  ;;  %639 = vst.msk [vmem:[#allocation2 + $0x160] sm:$0x3] %vm596_vm2, %v11096_v6  ;;  %642 = vst.msk [vmem:[#allocation2 + $0x178] sm:$0x3] %vm596_vm2, %v11096_v6  ;;  %v431_v25 = vrot.slane %v382_v21, %v8149_v10  ;;  %v551_v28 = vsel %vm496_vm1, %v482_v23, 0.0  ;;  %v947_v59 = vld [vmem:[#allocation2 + $0x1] sm:$0xff] }
  0x2c   : > { %645 = vst.msk [vmem:[#allocation2 + $0x190] sm:$0x3] %vm596_vm2, %v11096_v6  ;;  %648 = vst.msk [vmem:[#allocation2 + $0x1a8] sm:$0x3] %vm596_vm2, %v11096_v6  ;;  %v485_v24 = vmul.f32 %v427_v20, %v8156_v13  ;;  %v484_v26 = vmul.f32 %v427_v20, %v8147_v9  ;;  %v365_v27 = vrot.slane %v349_v22, %v8144_v8 }
  0x2d   : > { %525 = vadd.xlane.f32.xlu1 %v524_v52  ;;  %v486_v30 = vmul.f32 %v431_v25, %v8147_v9  ;;  %v351_v31 = vcombine.high %v349_v22, %v349_v22  ;;  %v487_v36 = vmul.f32 %v431_v25, %v8156_v13 }
  0x2e   : > { %v560_v29 = vsel %vm496_vm1, %v485_v24, 0.0  ;;  %v557_v32 = vsel %vm496_vm1, %v484_v26, 0.0  ;;  %v435_v34 = vrot.slane %v365_v27, %v8149_v10  ;;  %v381_v39 = vcombine.high %v365_v27, %v365_v27 }
  0x2f   : > { %516 = vadd.xlane.f32.xlu0 %v515_v56  ;;  %v563_v33 = vsel %vm496_vm1, %v486_v30, 0.0  ;;  %v379_v35 = vrot.slane %v351_v31, %v8144_v8  ;;  %v566_v40 = vsel %vm496_vm1, %v487_v36, 0.0 }
  0x30   : > { %v488_v37 = vmul.f32 %v435_v34, %v8147_v9  ;;  %v489_v41 = vmul.f32 %v435_v34, %v8156_v13  ;;  %v443_v8 = vrot.slane %v381_v39, %v8149_v10 }
  0x31   : > { %519 = vadd.xlane.f32.xlu1 %v518_v60  ;;  %v439_v38 = vrot.slane %v379_v35, %v8149_v10  ;;  %v383_v46 = vcombine.high %v379_v35, %v379_v35 }
  0x32   : > { %v569_v42 = vsel %vm496_vm1, %v488_v37, 0.0  ;;  %v572_v44 = vsel %vm496_vm1, %v489_v41, 0.0  ;;  %v492_v48 = vmul.f32 %v443_v8, %v8147_v9  ;;  %v493_v50 = vmul.f32 %v443_v8, %v8156_v13 }
  0x33   : > { %528 = vadd.xlane.f32.xlu0 %v527_v63  ;;  %v490_v43 = vmul.f32 %v439_v38, %v8147_v9  ;;  %v491_v45 = vmul.f32 %v439_v38, %v8156_v13  ;;  %v447_v51 = vrot.slane %v383_v46, %v8149_v10  ;;  %v683_v10 = vld [vmem:[#allocation2] sm:$0xff] }
  0x34   : > { %v581_v52 = vsel %vm496_vm1, %v492_v48, 0.0  ;;  %v584_v54 = vsel %vm496_vm1, %v493_v50, 0.0 }
  0x35   : > { %531 = vadd.xlane.f32.xlu1 %v530_v1  ;;  %v575_v47 = vsel %vm496_vm1, %v490_v43, 0.0  ;;  %v578_v49 = vsel %vm496_vm1, %v491_v45, 0.0  ;;  %v494_v53 = vmul.f32 %v447_v51, %v8147_v9  ;;  %v495_v55 = vmul.f32 %v447_v51, %v8156_v13  ;;  %v948_v9 = vld [vmem:[#allocation2 + $0x9] sm:$0xff] }
  0x37   : > { %534 = vadd.xlane.f32.xlu0 %v533_v5  ;;  %v587_v56 = vsel %vm496_vm1, %v494_v53, 0.0  ;;  %v590_v57 = vsel %vm496_vm1, %v495_v55, 0.0 }
  0x39   : > { %537 = vadd.xlane.f32.xlu1 %v536_v14 }
  0x3b   : > { %540 = vadd.xlane.f32.xlu0 %v539_v15 }
  0x3d   : > { %543 = vadd.xlane.f32.xlu1 %v542_v17 }
  0x3f   : > { %546 = vadd.xlane.f32.xlu0 %v545_v4 }
  0x41   : > { %549 = vadd.xlane.f32.xlu1 %v548_v7 }
  0x43   : > { %552 = vadd.xlane.f32.xlu0 %v551_v28 }
  0x45   : > { %555 = vadd.xlane.f32.xlu1 %v554_v18 }
  0x47   : > { %558 = vadd.xlane.f32.xlu0 %v557_v32 }
  0x49   : > { %561 = vadd.xlane.f32.xlu1 %v560_v29 }
  0x4b   : > { %564 = vadd.xlane.f32.xlu0 %v563_v33 }
  0x4d   : > { %567 = vadd.xlane.f32.xlu1 %v566_v40 }
  0x4f   : > { %570 = vadd.xlane.f32.xlu0 %v569_v42 }
  0x51   : > { %573 = vadd.xlane.f32.xlu1 %v572_v44 }
  0x53   : > { %576 = vadd.xlane.f32.xlu0 %v575_v47 }
  0x55   : > { %579 = vadd.xlane.f32.xlu1 %v578_v49 }
  0x57   : > { %582 = vadd.xlane.f32.xlu0 %v581_v52 }
  0x59   : > { %585 = vadd.xlane.f32.xlu1 %v584_v54 }
  0x5b   : > { %588 = vadd.xlane.f32.xlu0 %v587_v56 }
  0x5d   : > { %591 = vadd.xlane.f32.xlu1 %v590_v57 }
  0x6e   : > { %722 = vperm.xlu1 %7900, %v684_v58  }
  0x71   : > { %717 = vperm.xlu0 %7899, %v683_v10  }
  0x72   : > { %981 = vperm.xlu1 %7900, %v947_v59  }
  0x75   : > { %986 = vperm.xlu0 %7899, %v948_v9  }
  0xac   : > { %v499_v60 = vpop.xlane.xlu0 %498 }
  0xad   : > { %650 = vst.msk [vmem:[#allocation2 + $0x19] sm:$0xff] %vm593_vm0, %v499_v60 }
  0xae   : > { %v505_v13 = vpop.xlane.xlu1 %504 }
  0xaf   : > { %652 = vst.msk [vmem:[#allocation2 + $0x31] sm:$0xff] %vm593_vm0, %v505_v13 }
  0xb0   : > { %v502_v61 = vpop.xlane.xlu0 %501 }
  0xb1   : > { %651 = vst.msk [vmem:[#allocation2 + $0x21] sm:$0xff] %vm593_vm0, %v502_v61 }
  0xb2   : > { %v508_v62 = vpop.xlane.xlu1 %507 }
  0xb3   : > { %653 = vst.msk [vmem:[#allocation2 + $0x39] sm:$0xff] %vm593_vm0, %v508_v62 }
  0xb4   : > { %v511_v63 = vpop.xlane.xlu0 %510  ;;  %v8297_v0 = vld [vmem:[#allocation2 + $0x18] sm:$0xff] }
  0xb5   : > { %654 = vst.msk [vmem:[#allocation2 + $0x49] sm:$0xff] %vm593_vm0, %v511_v63  ;;  %727 = vperm.xlu1 %7900, %v8297_v0   ;;  %v8327_v26 = vld [vmem:[#allocation2 + $0x19] sm:$0xff] }
  0xb6   : > { %v514_v1 = vpop.xlane.xlu1 %513  ;;  %v8335_v30 = vld [vmem:[#allocation2 + $0x30] sm:$0xff] }
  0xb7   : > { %655 = vst.msk [vmem:[#allocation2 + $0x51] sm:$0xff] %vm593_vm0, %v514_v1  ;;  %v8385_v53 = vld [vmem:[#allocation2 + $0x31] sm:$0xff] }
  0xb8   : > { %v523_v2 = vpop.xlane.xlu0 %522  ;;  %v8302_v3 = vld [vmem:[#allocation2 + $0x20] sm:$0xff] }
  0xb9   : > { %658 = vst.msk [vmem:[#allocation2 + $0x79] sm:$0xff] %vm593_vm0, %v523_v2  ;;  %732 = vperm.xlu1 %7900, %v8302_v3   ;;  %v8331_v28 = vld [vmem:[#allocation2 + $0x21] sm:$0xff] }
  0xba   : > { %v526_v4 = vpop.xlane.xlu1 %525  ;;  %v8343_v34 = vld [vmem:[#allocation2 + $0x38] sm:$0xff] }
  0xbb   : > { %659 = vst.msk [vmem:[#allocation2 + $0x81] sm:$0xff] %vm593_vm0, %v526_v4  ;;  %v8367_v46 = vld [vmem:[#allocation2 + $0x39] sm:$0xff] }
  0xbc   : > { %v517_v5 = vpop.xlane.xlu0 %516  ;;  %v8351_v38 = vld [vmem:[#allocation2 + $0x48] sm:$0xff] }
  0xbd   : > { %656 = vst.msk [vmem:[#allocation2 + $0x61] sm:$0xff] %vm593_vm0, %v517_v5  ;;  %v8391_v55 = vld [vmem:[#allocation2 + $0x49] sm:$0xff] }
  0xbe   : > { %v520_v7 = vpop.xlane.xlu1 %519  ;;  %v8359_v42 = vld [vmem:[#allocation2 + $0x50] sm:$0xff] }
  0xbf   : > { %657 = vst.msk [vmem:[#allocation2 + $0x69] sm:$0xff] %vm593_vm0, %v520_v7  ;;  %v8373_v48 = vld [vmem:[#allocation2 + $0x51] sm:$0xff] }
  0xc0   : > { %v529_v11 = vpop.xlane.xlu0 %528  ;;  %v8364_v45 = vld [vmem:[#allocation2 + $0x78] sm:$0xff] }
  0xc1   : > { %660 = vst.msk [vmem:[#allocation2 + $0x91] sm:$0xff] %vm593_vm0, %v529_v11 }
  0xc2   : > { %v532_v12 = vpop.xlane.xlu1 %531  ;;  %v8339_v32 = vld [vmem:[#allocation2 + $0x80] sm:$0xff] }
  0xc3   : > { %661 = vst.msk [vmem:[#allocation2 + $0x99] sm:$0xff] %vm593_vm0, %v532_v12  ;;  %v8409_v63 = vld [vmem:[#allocation2 + $0x81] sm:$0xff]  ;;  %v8421_v12 = vld [vmem:[#allocation2 + $0x79] sm:$0xff] }
  0xc4   : > { %v535_v14 = vpop.xlane.xlu0 %534  ;;  %v8394_v57 = vld [vmem:[#allocation2 + $0x60] sm:$0xff] }
  0xc5   : > { %662 = vst.msk [vmem:[#allocation2 + $0xa9] sm:$0xff] %vm593_vm0, %v535_v14  ;;  %v8415_v4 = vld [vmem:[#allocation2 + $0x61] sm:$0xff] }
  0xc6   : > { %v538_v15 = vpop.xlane.xlu1 %537  ;;  %v8379_v50 = vld [vmem:[#allocation2 + $0x68] sm:$0xff] }
  0xc7   : > { %663 = vst.msk [vmem:[#allocation2 + $0xb1] sm:$0xff] %vm593_vm0, %v538_v15  ;;  %v8403_v60 = vld [vmem:[#allocation2 + $0x69] sm:$0xff] }
  0xc8   : > { %v541_v16 = vpop.xlane.xlu0 %540  ;;  %v8397_v10 = vld [vmem:[#allocation2 + $0x90] sm:$0xff] }
  0xc9   : > { %664 = vst.msk [vmem:[#allocation2 + $0xc1] sm:$0xff] %vm593_vm0, %v541_v16  ;;  %v959_v15 = vld [vmem:[#allocation2 + $0x91] sm:$0xff] }
  0xca   : > { %v544_v17 = vpop.xlane.xlu1 %543  ;;  %v8382_v52 = vld [vmem:[#allocation2 + $0x98] sm:$0xff] }
  0xcb   : > { %665 = vst.msk [vmem:[#allocation2 + $0xc9] sm:$0xff] %vm593_vm0, %v544_v17  ;;  %v8412_v2 = vld [vmem:[#allocation2 + $0x99] sm:$0xff] }
  0xcc   : > { %v547_v18 = vpop.xlane.xlu0 %546  ;;  %v8400_v9 = vld [vmem:[#allocation2 + $0xa8] sm:$0xff] }
  0xcd   : > { %666 = vst.msk [vmem:[#allocation2 + $0xd9] sm:$0xff] %vm593_vm0, %v547_v18  ;;  %v961_v17 = vld [vmem:[#allocation2 + $0xa9] sm:$0xff] }
  0xce   : > { %v550_v19 = vpop.xlane.xlu1 %549  ;;  %v8388_v54 = vld [vmem:[#allocation2 + $0xb0] sm:$0xff] }
  0xcf   : > { %667 = vst.msk [vmem:[#allocation2 + $0xe1] sm:$0xff] %vm593_vm0, %v550_v19  ;;  %v962_v5 = vld [vmem:[#allocation2 + $0xb1] sm:$0xff] }
  0xd0   : > { %v553_v20 = vpop.xlane.xlu0 %552  ;;  %v8418_v7 = vld [vmem:[#allocation2 + $0xc0] sm:$0xff] }
  0xd1   : > { %668 = vst.msk [vmem:[#allocation2 + $0xf1] sm:$0xff] %vm593_vm0, %v553_v20  ;;  %v963_v19 = vld [vmem:[#allocation2 + $0xc1] sm:$0xff] }
  0xd2   : > { %v556_v21 = vpop.xlane.xlu1 %555  ;;  %v8406_v61 = vld [vmem:[#allocation2 + $0xc8] sm:$0xff] }
  0xd3   : > { %669 = vst.msk [vmem:[#allocation2 + $0xf9] sm:$0xff] %vm593_vm0, %v556_v21  ;;  %v964_v11 = vld [vmem:[#allocation2 + $0xc9] sm:$0xff] }
  0xd4   : > { %v8319_v22 = vld [vmem:[#allocation2 + $0xd8] sm:$0xff]  ;;  %v559_v23 = vpop.xlane.xlu0 %558 }
  0xd5   : > { %807 = vperm.xlu1 %7900, %v8319_v22   ;;  %670 = vst.msk [vmem:[#allocation2 + $0x109] sm:$0xff] %vm593_vm0, %v559_v23  ;;  %v965_v21 = vld [vmem:[#allocation2 + $0xd9] sm:$0xff] }
  0xd6   : > { %v8323_v24 = vld [vmem:[#allocation2 + $0xe0] sm:$0xff]  ;;  %v562_v25 = vpop.xlane.xlu1 %561 }
  0xd7   : > { %812 = vperm.xlu0 %7899, %v8323_v24   ;;  %671 = vst.msk [vmem:[#allocation2 + $0x111] sm:$0xff] %vm593_vm0, %v562_v25  ;;  %v966_v14 = vld [vmem:[#allocation2 + $0xe1] sm:$0xff] }
  0xd8   : > { %v565_v27 = vpop.xlane.xlu0 %564  ;;  %v8370_v47 = vld [vmem:[#allocation2 + $0xf0] sm:$0xff] }
  0xd9   : > { %991 = vperm.xlu1 %7900, %v8327_v26   ;;  %672 = vst.msk [vmem:[#allocation2 + $0x121] sm:$0xff] %vm593_vm0, %v565_v27  ;;  %v967_v25 = vld [vmem:[#allocation2 + $0xf1] sm:$0xff] }
  0xda   : > { %v568_v29 = vpop.xlane.xlu1 %567  ;;  %v8345_v35 = vld [vmem:[#allocation2 + $0xf8] sm:$0xff] }
  0xdb   : > { %996 = vperm.xlu0 %7899, %v8331_v28   ;;  %673 = vst.msk [vmem:[#allocation2 + $0x129] sm:$0xff] %vm593_vm0, %v568_v29  ;;  %v968_v16 = vld [vmem:[#allocation2 + $0xf9] sm:$0xff] }
  0xdc   : > { %v571_v31 = vpop.xlane.xlu0 %570  ;;  %v8376_v49 = vld [vmem:[#allocation2 + $0x108] sm:$0xff] }
  0xdd   : > { %737 = vperm.xlu1 %7900, %v8335_v30   ;;  %674 = vst.msk [vmem:[#allocation2 + $0x139] sm:$0xff] %vm593_vm0, %v571_v31  ;;  %v969_v29 = vld [vmem:[#allocation2 + $0x109] sm:$0xff] }
  0xde   : > { %v574_v33 = vpop.xlane.xlu1 %573  ;;  %v8353_v39 = vld [vmem:[#allocation2 + $0x110] sm:$0xff] }
  0xdf   : > { %772 = vperm.xlu0 %7899, %v8339_v32   ;;  %675 = vst.msk [vmem:[#allocation2 + $0x141] sm:$0xff] %vm593_vm0, %v574_v33  ;;  %v970_v18 = vld [vmem:[#allocation2 + $0x111] sm:$0xff] }
  0xe0   : > { %v577_v36 = vpop.xlane.xlu0 %576  ;;  %v707_v13 = vld [vmem:[#allocation2 + $0x120] sm:$0xff] }
  0xe1   : > { %742 = vperm.xlu1 %7900, %v8343_v34   ;;  %676 = vst.msk [vmem:[#allocation2 + $0x151] sm:$0xff] %vm593_vm0, %v577_v36  ;;  %v971_v36 = vld [vmem:[#allocation2 + $0x121] sm:$0xff] }
  0xe2   : > { %v580_v37 = vpop.xlane.xlu1 %579  ;;  %v708_v56 = vld [vmem:[#allocation2 + $0x128] sm:$0xff] }
  0xe3   : > { %822 = vperm.xlu0 %7899, %v8345_v35   ;;  %677 = vst.msk [vmem:[#allocation2 + $0x159] sm:$0xff] %vm593_vm0, %v580_v37  ;;  %v972_v20 = vld [vmem:[#allocation2 + $0x129] sm:$0xff] }
  0xe4   : > { %v583_v40 = vpop.xlane.xlu0 %582  ;;  %v709_v51 = vld [vmem:[#allocation2 + $0x138] sm:$0xff]  ;;  %v1212_v37 = vld [vmem:[#allocation2 + $0xa] sm:$0xff] }
  0xe5   : > { %747 = vperm.xlu1 %7900, %v8351_v38   ;;  %678 = vst.msk [vmem:[#allocation2 + $0x169] sm:$0xff] %vm593_vm0, %v583_v40 }
  0xe6   : > { %v586_v41 = vpop.xlane.xlu1 %585  ;;  %v710_v43 = vld [vmem:[#allocation2 + $0x140] sm:$0xff] }
  0xe7   : > { %832 = vperm.xlu0 %7899, %v8353_v39   ;;  %679 = vst.msk [vmem:[#allocation2 + $0x171] sm:$0xff] %vm593_vm0, %v586_v41  ;;  %v974_v23 = vld [vmem:[#allocation2 + $0x141] sm:$0xff]  ;;  %v973_v41 = vld [vmem:[#allocation2 + $0x139] sm:$0xff] }
  0xe8   : > { %v589_v8 = vpop.xlane.xlu0 %588  ;;  %v711_v62 = vld [vmem:[#allocation2 + $0x150] sm:$0xff] }
  0xe9   : > { %752 = vperm.xlu1 %7900, %v8359_v42   ;;  %680 = vst.msk [vmem:[#allocation2 + $0x181] sm:$0xff] %vm593_vm0, %v589_v8  ;;  %v975_v8 = vld [vmem:[#allocation2 + $0x151] sm:$0xff] }
  0xea   : > { %v592_v44 = vpop.xlane.xlu1 %591  ;;  %v712_v58 = vld [vmem:[#allocation2 + $0x158] sm:$0xff] }
  0xeb   : > { %852 = vperm.xlu0 %7899, %v710_v43   ;;  %681 = vst.msk [vmem:[#allocation2 + $0x189] sm:$0xff] %vm593_vm0, %v592_v44  ;;  %v976_v27 = vld [vmem:[#allocation2 + $0x159] sm:$0xff]  ;;  %v8428_v43 = vld [vmem:[#allocation2 + $0x22] sm:$0xff] }
  0xec   : > { %v713_v1 = vld [vmem:[#allocation2 + $0x168] sm:$0xff] }
  0xed   : > { %767 = vperm.xlu1 %7900, %v8364_v45  }
  0xee   : > { %v714_v59 = vld [vmem:[#allocation2 + $0x170] sm:$0xff]  ;;  %v8424_v31 = vpop.permute.xlu1 %722 }
  0xef   : > { %1006 = vperm.xlu0 %7899, %v8367_v46   ;;  %v978_v33 = vld [vmem:[#allocation2 + $0x171] sm:$0xff] }
  0xf1   : > { %817 = vperm.xlu1 %7900, %v8370_v47  }
  0xf2   : > { %v8426_v40 = vpop.permute.xlu1 %981 }
  0xf3   : > { %1016 = vperm.xlu0 %7899, %v8373_v48  }
  0xf5   : > { %827 = vperm.xlu1 %7900, %v8376_v49  }
  0xf7   : > { %762 = vperm.xlu0 %7899, %v8379_v50  }
  0xf9   : > { %847 = vperm.xlu1 %7900, %v709_v51   ;;  %v8433_v51 = vld [vmem:[#allocation2 + $0x3a] sm:$0xff] }
  0xfb   : > { %782 = vperm.xlu0 %7899, %v8382_v52  }
  0xfd   : > { %1001 = vperm.xlu1 %7900, %v8385_v53  }
  0xff   : > { %792 = vperm.xlu0 %7899, %v8388_v54  }
 0x101   : > { %1011 = vperm.xlu1 %7900, %v8391_v55  }
 0x103   : > { %842 = vperm.xlu0 %7899, %v708_v56   ;;  %v8436_v56 = vpop.permute.xlu0 %717 }
 0x105   : > { %757 = vperm.xlu1 %7900, %v8394_v57  }
 0x107   : > { %862 = vperm.xlu0 %7899, %v712_v58   ;;  %v977_v58 = vld [vmem:[#allocation2 + $0x169] sm:$0xff] }
 0x109   : > { %777 = vperm.xlu1 %7900, %v8397_v10  }
 0x10b   : > { %872 = vperm.xlu0 %7899, %v714_v59   ;;  %v8438_v59 = vld [vmem:[#allocation2 + $0x52] sm:$0xff] }
 0x10d   : > { %787 = vperm.xlu1 %7900, %v8400_v9  }
 0x10f   : > { %1026 = vperm.xlu0 %7899, %v8403_v60  }
 0x111   : > { %837 = vperm.xlu1 %7900, %v707_v13   ;;  %v1211_v13 = vld [vmem:[#allocation2 + $0x2] sm:$0xff] }
 0x113   : > { %802 = vperm.xlu0 %7899, %v8406_v61  }
 0x115   : > { %857 = vperm.xlu1 %7900, %v711_v62  }
 0x117   : > { %1036 = vperm.xlu0 %7899, %v8409_v63  }
 0x119   : > { %867 = vperm.xlu1 %7900, %v713_v1   ;;  %v8443_v1 = vpop.permute.xlu0 %986 }
 0x11b   : > { %1046 = vperm.xlu0 %7899, %v8412_v2  }
 0x11d   : > { %1021 = vperm.xlu1 %7900, %v8415_v4  }
 0x11f   : > { %1056 = vperm.xlu0 %7899, %v962_v5   ;;  %v8445_v5 = vld [vmem:[#allocation2 + $0x6a] sm:$0xff] }
 0x121   : > { %797 = vperm.xlu1 %7900, %v8418_v7  }
 0x123   : > { %1066 = vperm.xlu0 %7899, %v964_v11  }
 0x125   : > { %1031 = vperm.xlu1 %7900, %v8421_v12  }
 0x127   : > { %1076 = vperm.xlu0 %7899, %v966_v14   ;;  %v8450_v14 = vld [vmem:[#allocation2 + $0x1a] sm:$0xff] }
 0x129   : > { %1041 = vperm.xlu1 %7900, %v959_v15  }
 0x12b   : > { %1086 = vperm.xlu0 %7899, %v968_v16   ;;  %v8455_v16 = vld [vmem:[#allocation2 + $0x82] sm:$0xff] }
 0x12d   : > { %1051 = vperm.xlu1 %7900, %v961_v17  }
 0x12f   : > { %1096 = vperm.xlu0 %7899, %v970_v18   ;;  %v8460_v18 = vld [vmem:[#allocation2 + $0x32] sm:$0xff] }
 0x131   : > { %1061 = vperm.xlu1 %7900, %v963_v19  }
 0x133   : > { %1106 = vperm.xlu0 %7899, %v972_v20   ;;  %v8465_v20 = vld [vmem:[#allocation2 + $0x9a] sm:$0xff] }
 0x134   : > { %v8431_v44 = vpop.permute.xlu1 %727 }
 0x135   : > { %1071 = vperm.xlu1 %7900, %v965_v21   ;;  %11100 = vst [vmem:[#allocation6_spill] sm:$0xff] %v8431_v44  ;;  %v1238_v44 = vld [vmem:[#allocation2 + $0x142] sm:$0xff] }
 0x137   : > { %1116 = vperm.xlu0 %7899, %v974_v23   ;;  %v8470_v23 = vld [vmem:[#allocation2 + $0x4a] sm:$0xff] }
 0x138   : > { %v8441_v62 = vpop.permute.xlu1 %732 }
 0x139   : > { %1081 = vperm.xlu1 %7900, %v967_v25  }
 0x13b   : > { %1126 = vperm.xlu0 %7899, %v976_v27   ;;  %v8475_v27 = vld [vmem:[#allocation2 + $0xb2] sm:$0xff] }
 0x13d   : > { %1091 = vperm.xlu1 %7900, %v969_v29  }
 0x13f   : > { %1136 = vperm.xlu0 %7899, %v978_v33   ;;  %v8480_v33 = vld [vmem:[#allocation2 + $0x62] sm:$0xff] }
 0x141   : > { %1101 = vperm.xlu1 %7900, %v971_v36  }
 0x143   : > { %1250 = vperm.xlu0 %7899, %v1212_v37   ;;  %v1228_v37 = vld [vmem:[#allocation2 + $0xca] sm:$0xff] }
 0x145   : > { %1111 = vperm.xlu1 %7900, %v973_v41  }
 0x147   : > { %1260 = vperm.xlu0 %7899, %v8428_v43  }
 0x149   : > { %1121 = vperm.xlu1 %7900, %v975_v8   ;;  %v8487_v8 = vld [vmem:[#allocation2 + $0x7a] sm:$0xff] }
 0x14b   : > { %1270 = vperm.xlu0 %7899, %v8433_v51  }
 0x14d   : > { %1131 = vperm.xlu1 %7900, %v977_v58  }
 0x14f   : > { %1280 = vperm.xlu0 %7899, %v8438_v59  }
 0x151   : > { %1245 = vperm.xlu1 %7900, %v1211_v13   ;;  %v1230_v13 = vld [vmem:[#allocation2 + $0xe2] sm:$0xff] }
 0x153   : > { %1290 = vperm.xlu0 %7899, %v8445_v5  }
 0x154   : > { %v8448_v11 = vpop.permute.xlu1 %807 }
 0x155   : > { %11101 = vst [vmem:[#allocation7_spill] sm:$0xff] %v8448_v11  ;;  %1255 = vperm.xlu1 %7900, %v8450_v14   ;;  %v8494_v11 = vld [vmem:[#allocation2 + $0x92] sm:$0xff] }
 0x156   : > { %v8453_v15 = vpop.permute.xlu0 %812 }
 0x157   : > { %11102 = vst [vmem:[#allocation8_spill] sm:$0xff] %v8453_v15  ;;  %1300 = vperm.xlu0 %7899, %v8455_v16  }
 0x158   : > { %v8458_v17 = vpop.permute.xlu1 %991 }
 0x159   : > { %11103 = vst [vmem:[#allocation9_spill] sm:$0xff] %v8458_v17  ;;  %1265 = vperm.xlu1 %7900, %v8460_v18  }
 0x15a   : > { %v8463_v19 = vpop.permute.xlu0 %996 }
 0x15b   : > { %1310 = vperm.xlu0 %7899, %v8465_v20  }
 0x15c   : > { %v8468_v21 = vpop.permute.xlu1 %737 }
 0x15d   : > { %11104 = vst [vmem:[#allocation10_spill] sm:$0xff] %v8468_v21  ;;  %1275 = vperm.xlu1 %7900, %v8470_v23  }
 0x15e   : > { %v8473_v25 = vpop.permute.xlu0 %772 }
 0x15f   : > { %11105 = vst [vmem:[#allocation11_spill] sm:$0xff] %v8473_v25  ;;  %1320 = vperm.xlu0 %7899, %v8475_v27   ;;  %v8501_v25 = vld [vmem:[#allocation2 + $0xaa] sm:$0xff] }
 0x160   : > { %v8478_v29 = vpop.permute.xlu1 %742 }
 0x161   : > { %11106 = vst [vmem:[#allocation12_spill] sm:$0xff] %v8478_v29  ;;  %1285 = vperm.xlu1 %7900, %v8480_v33   ;;  %v1236_v29 = vld [vmem:[#allocation2 + $0x12a] sm:$0xff] }
 0x162   : > { %v8483_v36 = vpop.permute.xlu0 %822 }
 0x163   : > { %11107 = vst [vmem:[#allocation13_spill] sm:$0xff] %v8483_v36  ;;  %1330 = vperm.xlu0 %7899, %v1228_v37   ;;  %v1232_v36 = vld [vmem:[#allocation2 + $0xfa] sm:$0xff] }
 0x164   : > { %v8485_v41 = vpop.permute.xlu1 %747 }
 0x165   : > { %11108 = vst [vmem:[#allocation14_spill] sm:$0xff] %v8485_v41  ;;  %1295 = vperm.xlu1 %7900, %v8487_v8  }
 0x166   : > { %v8490_v58 = vpop.permute.xlu0 %832 }
 0x167   : > { %11109 = vst [vmem:[#allocation15_spill] sm:$0xff] %v8490_v58  ;;  %1340 = vperm.xlu0 %7899, %v1230_v13   ;;  %v1234_v58 = vld [vmem:[#allocation2 + $0x112] sm:$0xff] }
 0x168   : > { %v8492_v6 = vpop.permute.xlu1 %752 }
 0x169   : > { %11110 = vst [vmem:[#allocation16_spill] sm:$0xff] %v8492_v6  ;;  %1305 = vperm.xlu1 %7900, %v8494_v11   ;;  %v1227_v6 = vld [vmem:[#allocation2 + $0xc2] sm:$0xff] }
 0x16a   : > { %v8497_v15 = vpop.permute.xlu0 %852 }
 0x16b   : > { %11111 = vst [vmem:[#allocation17_spill] sm:$0xff] %v8497_v15  ;;  %1350 = vperm.xlu0 %7899, %v1232_v36   ;;  %v1229_v36 = vld [vmem:[#allocation2 + $0xda] sm:$0xff] }
 0x16c   : > { %v8499_v37 = vpop.permute.xlu1 %767 }
 0x16d   : > { %11112 = vst [vmem:[#allocation18_spill] sm:$0xff] %v8499_v37  ;;  %1315 = vperm.xlu1 %7900, %v8501_v25  }
 0x16e   : > { %v8504_v41 = vpop.permute.xlu0 %1006 }
 0x16f   : > { %11113 = vst [vmem:[#allocation19_spill] sm:$0xff] %v8504_v41  ;;  %1360 = vperm.xlu0 %7899, %v1234_v58   ;;  %v1231_v41 = vld [vmem:[#allocation2 + $0xf2] sm:$0xff] }
 0x170   : > { %v8506_v13 = vpop.permute.xlu1 %817 }
 0x171   : > { %11114 = vst [vmem:[#allocation20_spill] sm:$0xff] %v8506_v13  ;;  %1325 = vperm.xlu1 %7900, %v1227_v6   ;;  %v1240_v13 = vld [vmem:[#allocation2 + $0x15a] sm:$0xff] }
 0x172   : > { %v8508_v21 = vpop.permute.xlu0 %1016 }
 0x173   : > { %11115 = vst [vmem:[#allocation21_spill] sm:$0xff] %v8508_v21  ;;  %1370 = vperm.xlu0 %7899, %v1236_v29   ;;  %v1233_v21 = vld [vmem:[#allocation2 + $0x10a] sm:$0xff] }
 0x174   : > { %v8510_v15 = vpop.permute.xlu1 %827 }
 0x175   : > { %11116 = vst [vmem:[#allocation22_spill] sm:$0xff] %v8510_v15  ;;  %1335 = vperm.xlu1 %7900, %v1229_v36   ;;  %v1242_v15 = vld [vmem:[#allocation2 + $0x172] sm:$0xff] }
 0x176   : > { %v8512_v37 = vpop.permute.xlu0 %762 }
 0x177   : > { %11117 = vst [vmem:[#allocation23_spill] sm:$0xff] %v8512_v37  ;;  %1380 = vperm.xlu0 %7899, %v1238_v44   ;;  %v1235_v37 = vld [vmem:[#allocation2 + $0x122] sm:$0xff] }
 0x178   : > { %v8514_v17 = vpop.permute.xlu1 %847 }
 0x179   : > { %11118 = vst [vmem:[#allocation24_spill] sm:$0xff] %v8514_v17  ;;  %1345 = vperm.xlu1 %7900, %v1231_v41   ;;  %v1237_v17 = vld [vmem:[#allocation2 + $0x13a] sm:$0xff] }
 0x17a   : > { %v8516_v58 = vpop.permute.xlu0 %782 }
 0x17b   : > { %1390 = vperm.xlu0 %7899, %v1240_v13  }
 0x17c   : > { %v8518_v6 = vpop.permute.xlu1 %1001 }
 0x17d   : > { %1355 = vperm.xlu1 %7900, %v1233_v21  }
 0x17e   : > { %v8520_v29 = vpop.permute.xlu0 %792 }
 0x17f   : > { %11119 = vst [vmem:[#allocation25_spill] sm:$0xff] %v8520_v29  ;;  %1400 = vperm.xlu0 %7899, %v1242_v15   ;;  %v1239_v29 = vld [vmem:[#allocation2 + $0x152] sm:$0xff] }
 0x180   : > { %v8522_v36 = vpop.permute.xlu1 %1011 }
 0x181   : > { %1365 = vperm.xlu1 %7900, %v1235_v37  }
 0x182   : > { %v8524_v44 = vpop.permute.xlu0 %842 }
 0x183   : > { %11120 = vst [vmem:[#allocation26_spill] sm:$0xff] %v8524_v44  ;;  %1514 = vperm.xlu0 %7899, %v8302_v3   ;;  %v1241_v44 = vld [vmem:[#allocation2 + $0x16a] sm:$0xff] }
 0x184   : > { %v8527_v41 = vpop.permute.xlu1 %757 }
 0x185   : > { %1375 = vperm.xlu1 %7900, %v1237_v17  }
 0x186   : > { %v8529_v13 = vpop.permute.xlu0 %862 }
 0x187   : > { %11121 = vst [vmem:[#allocation27_spill] sm:$0xff] %v8529_v13  ;;  %1524 = vperm.xlu0 %7899, %v8343_v34  }
 0x188   : > { %v8532_v21 = vpop.permute.xlu1 %777 }
 0x189   : > { %11122 = vst [vmem:[#allocation28_spill] sm:$0xff] %v8532_v21  ;;  %1385 = vperm.xlu1 %7900, %v1239_v29  }
 0x18a   : > { %v8534_v15 = vpop.permute.xlu0 %872 }
 0x18b   : > { %11123 = vst [vmem:[#allocation29_spill] sm:$0xff] %v8534_v15  ;;  %1534 = vperm.xlu0 %7899, %v8359_v42  }
 0x18c   : > { %v8537_v37 = vpop.permute.xlu1 %787 }
 0x18d   : > { %11124 = vst [vmem:[#allocation30_spill] sm:$0xff] %v8537_v37  ;;  %1395 = vperm.xlu1 %7900, %v1241_v44  }
 0x18e   : > { %v8539_v3 = vpop.permute.xlu0 %1026 }
 0x18f   : > { %1544 = vperm.xlu0 %7899, %v8379_v50  }
 0x190   : > { %v8542_v17 = vpop.permute.xlu1 %837 }
 0x191   : > { %11125 = vst [vmem:[#allocation31_spill] sm:$0xff] %v8542_v17  ;;  %1509 = vperm.xlu1 %7900, %v8297_v0  }
 0x192   : > { %v8545_v13 = vpop.permute.xlu0 %802 }
 0x193   : > { %11126 = vst [vmem:[#allocation32_spill] sm:$0xff] %v8545_v13  ;;  %1554 = vperm.xlu0 %7899, %v8339_v32  }
 0x194   : > { %v8548_v29 = vpop.permute.xlu1 %857 }
 0x195   : > { %11127 = vst [vmem:[#allocation33_spill] sm:$0xff] %v8548_v29  ;;  %1519 = vperm.xlu1 %7900, %v8335_v30  }
 0x196   : > { %v8551_v15 = vpop.permute.xlu0 %1036 }
 0x197   : > { %1564 = vperm.xlu0 %7899, %v8382_v52  }
 0x198   : > { %v8554_v44 = vpop.permute.xlu1 %867 }
 0x199   : > { %11128 = vst [vmem:[#allocation34_spill] sm:$0xff] %v8554_v44  ;;  %1529 = vperm.xlu1 %7900, %v8351_v38  }
 0x19a   : > { %v8557_v37 = vpop.permute.xlu0 %1046 }
 0x19b   : > { %1574 = vperm.xlu0 %7899, %v8388_v54  }
 0x19c   : > { %v8560_v0 = vpop.permute.xlu1 %1021 }
 0x19d   : > { %1539 = vperm.xlu1 %7900, %v8394_v57  }
 0x19e   : > { %v8563_v32 = vpop.permute.xlu0 %1056 }
 0x19f   : > { %11129 = vst [vmem:[#allocation35_spill] sm:$0xff] %v8563_v32  ;;  %1584 = vperm.xlu0 %7899, %v8406_v61  }
 0x1a0   : > { %v8566_v29 = vpop.permute.xlu1 %797 }
 0x1a1   : > { %11130 = vst [vmem:[#allocation36_spill] sm:$0xff] %v8566_v29  ;;  %1549 = vperm.xlu1 %7900, %v8364_v45   ;;  %v2542_v29 = vld [vmem:[#allocation2 + $0xa9] sm:$0xff] }
 0x1a2   : > { %v8569_v52 = vpop.permute.xlu0 %1066 }
 0x1a3   : > { %11131 = vst [vmem:[#allocation37_spill] sm:$0xff] %v8569_v52  ;;  %1594 = vperm.xlu0 %7899, %v8323_v24  }
 0x1a4   : > { %v8572_v44 = vpop.permute.xlu1 %1031 }
 0x1a5   : > { %1559 = vperm.xlu1 %7900, %v8397_v10  }
 0x1a6   : > { %v8575_v54 = vpop.permute.xlu0 %1076 }
 0x1a7   : > { %11132 = vst [vmem:[#allocation38_spill] sm:$0xff] %v8575_v54  ;;  %1604 = vperm.xlu0 %7899, %v8345_v35  }
 0x1a8   : > { %v8578_v17 = vpop.permute.xlu1 %1041 }
 0x1a9   : > { %11133 = vst [vmem:[#allocation39_spill] sm:$0xff] %v8578_v17  ;;  %1569 = vperm.xlu1 %7900, %v8400_v9   ;;  %v2547_v17 = vld [vmem:[#allocation2 + $0xe1] sm:$0xff] }
 0x1aa   : > { %v8581_v61 = vpop.permute.xlu0 %1086 }
 0x1ab   : > { %11134 = vst [vmem:[#allocation40_spill] sm:$0xff] %v8581_v61  ;;  %1614 = vperm.xlu0 %7899, %v8353_v39  }
 0x1ac   : > { %v8584_v45 = vpop.permute.xlu1 %1051 }
 0x1ad   : > { %11135 = vst [vmem:[#allocation41_spill] sm:$0xff] %v8584_v45  ;;  %1579 = vperm.xlu1 %7900, %v8418_v7  }
 0x1ae   : > { %v8587_v24 = vpop.permute.xlu0 %1096 }
 0x1af   : > { %11136 = vst [vmem:[#allocation42_spill] sm:$0xff] %v8587_v24  ;;  %1778 = vperm.xlu0 %7899, %v8331_v28  }
 0x1b0   : > { %v8590_v10 = vpop.permute.xlu1 %1061 }
 0x1b1   : > { %11137 = vst [vmem:[#allocation43_spill] sm:$0xff] %v8590_v10  ;;  %1589 = vperm.xlu1 %7900, %v8319_v22   ;;  %v2281_v10 = vld [vmem:[#allocation2 + $0xc8] sm:$0xff] }
 0x1b2   : > { %v8593_v35 = vpop.permute.xlu0 %1106 }
 0x1b3   : > { %11138 = vst [vmem:[#allocation44_spill] sm:$0xff] %v8593_v35  ;;  %2042 = vperm.xlu0 %7899, %v8428_v43  }
 0x1b4   : > { %v8596_v9 = vpop.permute.xlu1 %1071 }
 0x1b5   : > { %11139 = vst [vmem:[#allocation45_spill] sm:$0xff] %v8596_v9  ;;  %1599 = vperm.xlu1 %7900, %v8370_v47  }
 0x1b6   : > { %v8599_v39 = vpop.permute.xlu0 %1116 }
 0x1b7   : > { %11140 = vst [vmem:[#allocation46_spill] sm:$0xff] %v8599_v39  ;;  %2307 = vperm.xlu0 %7899, %v8343_v34  }
 0x1b8   : > { %v8602_v7 = vpop.permute.xlu1 %1081 }
 0x1b9   : > { %11141 = vst [vmem:[#allocation47_spill] sm:$0xff] %v8602_v7  ;;  %1609 = vperm.xlu1 %7900, %v8376_v49   ;;  %v2275_v7 = vld [vmem:[#allocation2 + $0x80] sm:$0xff] }
 0x1ba   : > { %v8605_v28 = vpop.permute.xlu0 %1126 }
 0x1bb   : > { %11142 = vst [vmem:[#allocation48_spill] sm:$0xff] %v8605_v28  ;;  %2571 = vperm.xlu0 %7899, %v8367_v46   ;;  %v11147_v28 = vmov 0.0  }
 0x1bc   : > { %v8608_v22 = vpop.permute.xlu1 %1091  ;;  %3130 = vst.msk [vmem:[#allocation3] sm:$0xff] %vm3129_vm3, %v11147_v28  ;;  %3131 = vst.msk [vmem:[#allocation3 + $0x8] sm:$0xff] %vm3129_vm3, %v11147_v28 }
 0x1bd   : > { %11143 = vst [vmem:[#allocation49_spill] sm:$0xff] %v8608_v22  ;;  %1773 = vperm.xlu1 %7900, %v8327_v26   ;;  %3135 = vst.msk [vmem:[#allocation3 + $0x198] sm:$0xff] %vm3129_vm3, %v11147_v28 }
 0x1be   : > { %v8611_v43 = vpop.permute.xlu0 %1136  ;;  %3136 = vst.msk [vmem:[#allocation3 + $0x1a0] sm:$0xff] %vm3129_vm3, %v11147_v28 }
 0x1bf   : > { %11144 = vst [vmem:[#allocation50_spill] sm:$0xff] %v8611_v43  ;;  %1788 = vperm.xlu0 %7899, %v8367_v46   ;;  %3140 = vst.msk [vmem:[#allocation3 + $0x18] sm:$0x1] %vm3138_vm4, %v11147_v28 }
 0x1c0   : > { %v8614_v47 = vpop.permute.xlu1 %1101  ;;  %3139 = vst.msk [vmem:[#allocation3] sm:$0x1] %vm3138_vm4, %v11147_v28  ;;  %3141 = vst.msk [vmem:[#allocation3 + $0x30] sm:$0x1] %vm3138_vm4, %v11147_v28 }
 0x1c1   : > { %11145 = vst [vmem:[#allocation51_spill] sm:$0xff] %v8614_v47  ;;  %2037 = vperm.xlu1 %7900, %v8450_v14   ;;  %3142 = vst.msk [vmem:[#allocation3 + $0x48] sm:$0x1] %vm3138_vm4, %v11147_v28 }
 0x1c2   : > { %v8617_v34 = vpop.permute.xlu0 %1250  ;;  %3143 = vst.msk [vmem:[#allocation3 + $0x60] sm:$0x1] %vm3138_vm4, %v11147_v28  ;;  %3144 = vst.msk [vmem:[#allocation3 + $0x78] sm:$0x1] %vm3138_vm4, %v11147_v28 }
 0x1c3   : > { %2835 = vperm.xlu0 %7899, %v8433_v51   ;;  %3145 = vst.msk [vmem:[#allocation3 + $0x90] sm:$0x1] %vm3138_vm4, %v11147_v28  ;;  %3146 = vst.msk [vmem:[#allocation3 + $0xa8] sm:$0x1] %vm3138_vm4, %v11147_v28 }
 0x1c4   : > { %v8620_v49 = vpop.permute.xlu1 %1111  ;;  %3147 = vst.msk [vmem:[#allocation3 + $0xc0] sm:$0x1] %vm3138_vm4, %v11147_v28  ;;  %3148 = vst.msk [vmem:[#allocation3 + $0xd8] sm:$0x1] %vm3138_vm4, %v11147_v28 }
 0x1c5   : > { %11146 = vst [vmem:[#allocation52_spill] sm:$0xff] %v8620_v49  ;;  %2302 = vperm.xlu1 %7900, %v8335_v30   ;;  %3149 = vst.msk [vmem:[#allocation3 + $0xf0] sm:$0x1] %vm3138_vm4, %v11147_v28 }
 0x1c6   : > { %v8631_v26 = vpop.permute.xlu0 %1260  ;;  %3150 = vst.msk [vmem:[#allocation3 + $0x108] sm:$0x1] %vm3138_vm4, %v11147_v28  ;;  %3151 = vst.msk [vmem:[#allocation3 + $0x120] sm:$0x1] %vm3138_vm4, %v11147_v28 }
 0x1c7   : > { %2052 = vperm.xlu0 %7899, %v8433_v51   ;;  %3152 = vst.msk [vmem:[#allocation3 + $0x138] sm:$0x1] %vm3138_vm4, %v11147_v28  ;;  %3153 = vst.msk [vmem:[#allocation3 + $0x150] sm:$0x1] %vm3138_vm4, %v11147_v28 }
 0x1c8   : > { %v8634_v46 = vpop.permute.xlu1 %1121  ;;  %3154 = vst.msk [vmem:[#allocation3 + $0x168] sm:$0x1] %vm3138_vm4, %v11147_v28  ;;  %3155 = vst.msk [vmem:[#allocation3 + $0x180] sm:$0x1] %vm3138_vm4, %v11147_v28 }
 0x1c9   : > { %11148 = vst [vmem:[#allocation53_spill] sm:$0xff] %v8634_v46  ;;  %2566 = vperm.xlu1 %7900, %v8385_v53   ;;  %3156 = vst.msk [vmem:[#allocation3 + $0x198] sm:$0x1] %vm3138_vm4, %v11147_v28 }
 0x1ca   : > { %v8637_v14 = vpop.permute.xlu0 %1270  ;;  %3158 = vst.msk [vmem:[#allocation3 + $0x29] sm:$0x1] %vm3138_vm4, %v11147_v28  ;;  %3159 = vst.msk [vmem:[#allocation3 + $0x41] sm:$0x1] %vm3138_vm4, %v11147_v28 }
 0x1cb   : > { %2317 = vperm.xlu0 %7899, %v8359_v42   ;;  %3160 = vst.msk [vmem:[#allocation3 + $0x59] sm:$0x1] %vm3138_vm4, %v11147_v28  ;;  %3161 = vst.msk [vmem:[#allocation3 + $0x71] sm:$0x1] %vm3138_vm4, %v11147_v28 }
 0x1cc   : > { %v8640_v43 = vpop.permute.xlu1 %1131  ;;  %3162 = vst.msk [vmem:[#allocation3 + $0x89] sm:$0x1] %vm3138_vm4, %v11147_v28  ;;  %3163 = vst.msk [vmem:[#allocation3 + $0xa1] sm:$0x1] %vm3138_vm4, %v11147_v28 }
 0x1cd   : > { %11149 = vst [vmem:[#allocation54_spill] sm:$0xff] %v8640_v43  ;;  %1783 = vperm.xlu1 %7900, %v8385_v53   ;;  %3164 = vst.msk [vmem:[#allocation3 + $0xb9] sm:$0x1] %vm3138_vm4, %v11147_v28 }
 0x1ce   : > { %v8643_v49 = vpop.permute.xlu0 %1280  ;;  %3165 = vst.msk [vmem:[#allocation3 + $0xd1] sm:$0x1] %vm3138_vm4, %v11147_v28  ;;  %3166 = vst.msk [vmem:[#allocation3 + $0xe9] sm:$0x1] %vm3138_vm4, %v11147_v28 }
 0x1cf   : > { %3167 = vst.msk [vmem:[#allocation3 + $0x101] sm:$0x1] %vm3138_vm4, %v11147_v28  ;;  %3168 = vst.msk [vmem:[#allocation3 + $0x119] sm:$0x1] %vm3138_vm4, %v11147_v28  ;;  %2581 = vperm.xlu0 %7899, %v8373_v48  }
 0x1d0   : > { %3169 = vst.msk [vmem:[#allocation3 + $0x131] sm:$0x1] %vm3138_vm4, %v11147_v28  ;;  %3170 = vst.msk [vmem:[#allocation3 + $0x149] sm:$0x1] %vm3138_vm4, %v11147_v28  ;;  %v8714_v30 = vpop.permute.xlu1 %1245 }
 0x1d1   : > { %3171 = vst.msk [vmem:[#allocation3 + $0x161] sm:$0x1] %vm3138_vm4, %v11147_v28  ;;  %3172 = vst.msk [vmem:[#allocation3 + $0x179] sm:$0x1] %vm3138_vm4, %v11147_v28  ;;  %2830 = vperm.xlu1 %7900, %v8460_v18  }
 0x1d2   : > { %3173 = vst.msk [vmem:[#allocation3 + $0x191] sm:$0x1] %vm3138_vm4, %v11147_v28  ;;  %v8717_v42 = vpop.permute.xlu0 %1290 }
 0x1d3   : > { %1798 = vperm.xlu0 %7899, %v8373_v48   ;;  %3133 = vst.msk [vmem:[#allocation3 + $0x10] sm:$0x3] %vm3132_vm5, %v11147_v28  ;;  %3137 = vst.msk [vmem:[#allocation3 + $0x1a8] sm:$0x3] %vm3132_vm5, %v11147_v28 }
 0x1d4   : > { %v8720_v53 = vpop.permute.xlu1 %1255  ;;  %3157 = vst.msk [vmem:[#allocation3 + $0x11] sm:$0x1] %vm3138_vm4, %v11147_v28  ;;  %3174 = vst.msk [vmem:[#allocation3 + $0x1a9] sm:$0x1] %vm3138_vm4, %v11147_v28 }
 0x1d5   : > { %2047 = vperm.xlu1 %7900, %v8460_v18  }
 0x1d6   : > { %v8723_v51 = vpop.permute.xlu0 %1300 }
 0x1d7   : > { %2845 = vperm.xlu0 %7899, %v8438_v59  }
 0x1d8   : > { %v8726_v43 = vpop.permute.xlu1 %1265 }
 0x1d9   : > { %2312 = vperm.xlu1 %7900, %v8351_v38  }
 0x1da   : > { %v8729_v46 = vpop.permute.xlu0 %1310 }
 0x1db   : > { %2062 = vperm.xlu0 %7899, %v8438_v59  }
 0x1dc   : > { %v8732_v39 = vpop.permute.xlu1 %1275 }
 0x1dd   : > { %2576 = vperm.xlu1 %7900, %v8391_v55  }
 0x1de   : > { %v8735_v48 = vpop.permute.xlu0 %1320 }
 0x1df   : > { %11150 = vst [vmem:[#allocation55_spill] sm:$0xff] %v8735_v48  ;;  %2327 = vperm.xlu0 %7899, %v8379_v50  }
 0x1e0   : > { %v8738_v18 = vpop.permute.xlu1 %1285 }
 0x1e1   : > { %1793 = vperm.xlu1 %7900, %v8391_v55  }
 0x1e2   : > { %v8741_v47 = vpop.permute.xlu0 %1330 }
 0x1e3   : > { %11151 = vst [vmem:[#allocation56_spill] sm:$0xff] %v8741_v47  ;;  %2591 = vperm.xlu0 %7899, %v8403_v60  }
 0x1e4   : > { %v8744_v38 = vpop.permute.xlu1 %1295 }
 0x1e5   : > { %2840 = vperm.xlu1 %7900, %v8470_v23  }
 0x1e6   : > { %v8747_v59 = vpop.permute.xlu0 %1340 }
 0x1e7   : > { %11152 = vst [vmem:[#allocation57_spill] sm:$0xff] %v8747_v59  ;;  %1808 = vperm.xlu0 %7899, %v8403_v60  }
 0x1e8   : > { %v8750_v35 = vpop.permute.xlu1 %1305 }
 0x1e9   : > { %11153 = vst [vmem:[#allocation58_spill] sm:$0xff] %v8750_v35  ;;  %2057 = vperm.xlu1 %7900, %v8470_v23  }
 0x1ea   : > { %v8753_v50 = vpop.permute.xlu0 %1350 }
 0x1eb   : > { %11154 = vst [vmem:[#allocation59_spill] sm:$0xff] %v8753_v50  ;;  %2855 = vperm.xlu0 %7899, %v8445_v5  }
 0x1ec   : > { %v8756_v55 = vpop.permute.xlu1 %1315 }
 0x1ed   : > { %11155 = vst [vmem:[#allocation60_spill] sm:$0xff] %v8756_v55  ;;  %2322 = vperm.xlu1 %7900, %v8394_v57  }
 0x1ee   : > { %v8759_v22 = vpop.permute.xlu0 %1360 }
 0x1ef   : > { %11156 = vst [vmem:[#allocation61_spill] sm:$0xff] %v8759_v22  ;;  %2072 = vperm.xlu0 %7899, %v8445_v5  }
 0x1f0   : > { %v8762_v24 = vpop.permute.xlu1 %1325 }
 0x1f1   : > { %11157 = vst [vmem:[#allocation62_spill] sm:$0xff] %v8762_v24  ;;  %2586 = vperm.xlu1 %7900, %v8415_v4  }
 0x1f2   : > { %v8765_v60 = vpop.permute.xlu0 %1370 }
 0x1f3   : > { %11158 = vst [vmem:[#allocation63_spill] sm:$0xff] %v8765_v60  ;;  %2337 = vperm.xlu0 %7899, %v2275_v7  }
 0x1f4   : > { %v8767_v23 = vpop.permute.xlu1 %1335 }
 0x1f5   : > { %11159 = vst [vmem:[#allocation64_spill] sm:$0xff] %v8767_v23  ;;  %1803 = vperm.xlu1 %7900, %v8415_v4   ;;  %v2543_v23 = vld [vmem:[#allocation2 + $0xb1] sm:$0xff] }
 0x1f6   : > { %v8770_v50 = vpop.permute.xlu0 %1380 }
 0x1f7   : > { %11160 = vst [vmem:[#allocation65_spill] sm:$0xff] %v8770_v50  ;;  %2601 = vperm.xlu0 %7899, %v8409_v63   ;;  %v2274_v50 = vld [vmem:[#allocation2 + $0x78] sm:$0xff] }
 0x1f8   : > { %v8773_v57 = vpop.permute.xlu1 %1345 }
 0x1f9   : > { %11161 = vst [vmem:[#allocation66_spill] sm:$0xff] %v8773_v57  ;;  %2850 = vperm.xlu1 %7900, %v8480_v33  }
 0x1fa   : > { %v8776_v5 = vpop.permute.xlu0 %1390 }
 0x1fb   : > { %11162 = vst [vmem:[#allocation67_spill] sm:$0xff] %v8776_v5  ;;  %1818 = vperm.xlu0 %7899, %v8409_v63   ;;  %v2277_v5 = vld [vmem:[#allocation2 + $0x98] sm:$0xff] }
 0x1fc   : > { %v8779_v22 = vpop.permute.xlu1 %1355 }
 0x1fd   : > { %11163 = vst [vmem:[#allocation68_spill] sm:$0xff] %v8779_v22  ;;  %2067 = vperm.xlu1 %7900, %v8480_v33   ;;  %v2279_v22 = vld [vmem:[#allocation2 + $0xb0] sm:$0xff] }
 0x1fe   : > { %v8782_v7 = vpop.permute.xlu0 %1400 }
 0x1ff   : > { %11164 = vst [vmem:[#allocation69_spill] sm:$0xff] %v8782_v7  ;;  %2865 = vperm.xlu0 %7899, %v8455_v16  }
 0x200   : > { %v8785_v4 = vpop.permute.xlu1 %1365 }
 0x201   : > { %11165 = vst [vmem:[#allocation70_spill] sm:$0xff] %v8785_v4  ;;  %2332 = vperm.xlu1 %7900, %v2274_v50  }
 0x202   : > { %v8787_v60 = vpop.permute.xlu0 %1514 }
 0x203   : > { %2082 = vperm.xlu0 %7899, %v8455_v16  }
 0x204   : > { %v8790_v57 = vpop.permute.xlu1 %1375 }
 0x205   : > { %11166 = vst [vmem:[#allocation71_spill] sm:$0xff] %v8790_v57  ;;  %2596 = vperm.xlu1 %7900, %v8421_v12   ;;  %v1750_v57 = vld [vmem:[#allocation2 + $0x99] sm:$0xff] }
 0x206   : > { %v8793_v63 = vpop.permute.xlu0 %1524 }
 0x207   : > { %2347 = vperm.xlu0 %7899, %v2277_v5  }
 0x208   : > { %v8795_v33 = vpop.permute.xlu1 %1385 }
 0x209   : > { %11167 = vst [vmem:[#allocation72_spill] sm:$0xff] %v8795_v33  ;;  %1813 = vperm.xlu1 %7900, %v8421_v12  }
 0x20a   : > { %v8798_v7 = vpop.permute.xlu0 %1534 }
 0x20b   : > { %2611 = vperm.xlu0 %7899, %v8412_v2   ;;  %v2276_v2 = vld [vmem:[#allocation2 + $0x90] sm:$0xff] }
 0x20c   : > { %v8801_v50 = vpop.permute.xlu1 %1395 }
 0x20d   : > { %11168 = vst [vmem:[#allocation73_spill] sm:$0xff] %v8801_v50  ;;  %2860 = vperm.xlu1 %7900, %v8487_v8   ;;  %v2540_v50 = vld [vmem:[#allocation2 + $0x91] sm:$0xff] }
 0x20e   : > { %v8804_v16 = vpop.permute.xlu0 %1544 }
 0x20f   : > { %1828 = vperm.xlu0 %7899, %v1750_v57  }
 0x210   : > { %v8806_v4 = vpop.permute.xlu1 %1509 }
 0x211   : > { %2077 = vperm.xlu1 %7900, %v8487_v8  }
 0x212   : > { %v8809_v5 = vpop.permute.xlu0 %1554 }
 0x213   : > { %2875 = vperm.xlu0 %7899, %v8465_v20  }
 0x214   : > { %v8812_v12 = vpop.permute.xlu1 %1519 }
 0x215   : > { %2342 = vperm.xlu1 %7900, %v2276_v2  }
 0x216   : > { %v8820_v8 = vpop.permute.xlu0 %1564 }
 0x217   : > { %2092 = vperm.xlu0 %7899, %v8465_v20  }
 0x218   : > { %v8823_v57 = vpop.permute.xlu1 %1529 }
 0x219   : > { %2606 = vperm.xlu1 %7900, %v2540_v50  }
 0x21a   : > { %v8825_v33 = vpop.permute.xlu0 %1574 }
 0x21b   : > { %11169 = vst [vmem:[#allocation74_spill] sm:$0xff] %v8825_v33  ;;  %2357 = vperm.xlu0 %7899, %v2279_v22  }
 0x21c   : > { %v8827_v61 = vpop.permute.xlu1 %1539 }
 0x21d   : > { %1823 = vperm.xlu1 %7900, %v2540_v50   ;;  %v2278_v50 = vld [vmem:[#allocation2 + $0xa8] sm:$0xff] }
 0x21e   : > { %v8829_v2 = vpop.permute.xlu0 %1584 }
 0x21f   : > { %11170 = vst [vmem:[#allocation75_spill] sm:$0xff] %v8829_v2  ;;  %2621 = vperm.xlu0 %7899, %v2543_v23  }
 0x220   : > { %v8831_v28 = vpop.permute.xlu1 %1549 }
 0x221   : > { %2870 = vperm.xlu1 %7900, %v8494_v11  }
 0x222   : > { %v8834_v20 = vpop.permute.xlu0 %1594 }
 0x223   : > { %11171 = vst [vmem:[#allocation76_spill] sm:$0xff] %v8834_v20  ;;  %1838 = vperm.xlu0 %7899, %v2543_v23  }
 0x224   : > { %v8836_v9 = vpop.permute.xlu1 %1559 }
 0x225   : > { %2087 = vperm.xlu1 %7900, %v8494_v11   ;;  %v8852_v11 = vld [vmem:[%s11089_s1 + $0x1] ss:$0 sm:$0xff] }
 0x226   : > { %v8839_v59 = vpop.permute.xlu0 %1604  ;;  %v1146_v47 = vmul.f32 %v8852_v11, %v8443_v1  ;;  %v1145_v35 = vmul.f32 %v8852_v11, %v8426_v40 }
 0x227   : > { %11172 = vst [vmem:[#allocation77_spill] sm:$0xff] %v8839_v59  ;;  %2885 = vperm.xlu0 %7899, %v8475_v27  }
 0x228   : > { %v8842_v22 = vpop.permute.xlu1 %1569 }
 0x229   : > { %11173 = vst [vmem:[#allocation78_spill] sm:$0xff] %v8842_v22  ;;  %2352 = vperm.xlu1 %7900, %v2278_v50   ;;  %v8859_v50 = vld [vmem:[%s11089_s1] ss:$0 sm:$0xff] }
 0x22a   : > { %v8844_v54 = vpop.permute.xlu0 %1614  ;;  %v882_v20 = vmul.f32 %v8859_v50, %v8424_v31  ;;  %v8883_v31 = vld [vmem:[%s11089_s1 + $0x4] ss:$0 sm:$0xff] }
 0x22b   : > { %11174 = vst [vmem:[#allocation79_spill] sm:$0xff] %v8844_v54  ;;  %2102 = vperm.xlu0 %7899, %v8475_v27   ;;  %v8864_v27 = vld [vmem:[%s11089_s1 + $0x2] ss:$0 sm:$0xff] }
 0x22c   : > { %v8847_v24 = vpop.permute.xlu1 %1579  ;;  %v1410_v13 = vmul.f32 %v8864_v27, %v8617_v34  ;;  %v1178_v1 = vadd.f32 %v1146_v47, %v882_v20  ;;  %v8899_v47 = vld [vmem:[%s11089_s1 + $0x6] ss:$0 sm:$0xff] }
 0x22d   : > { %11175 = vst [vmem:[#allocation80_spill] sm:$0xff] %v8847_v24  ;;  %2616 = vperm.xlu1 %7900, %v2542_v29  }
 0x22e   : > { %v1779_v23 = vpop.permute.xlu0 %1778  ;;  %v1442_v34 = vadd.f32 %v1410_v13, %v1178_v1 }
 0x22f   : > { %2367 = vperm.xlu0 %7899, %v2281_v10   ;;  %v2545_v10 = vld [vmem:[#allocation2 + $0xc9] sm:$0xff]  ;;  %v1938_v45 = vmul.f32 %v8883_v31, %v1779_v23  ;;  %v2280_v23 = vld [vmem:[#allocation2 + $0xc0] sm:$0xff] }
 0x230   : > { %v8854_v59 = vpop.permute.xlu1 %1589 }
 0x231   : > { %11176 = vst [vmem:[#allocation81_spill] sm:$0xff] %v8854_v59  ;;  %1833 = vperm.xlu1 %7900, %v2542_v29   ;;  %v8873_v29 = vld [vmem:[%s11089_s1 + $0x3] ss:$0 sm:$0xff] }
 0x232   : > { %v2043_v54 = vpop.permute.xlu0 %2042  ;;  %v1674_v24 = vmul.f32 %v8873_v29, %v8787_v60  ;;  %v2809_v60 = vld [vmem:[#allocation2 + $0xca] sm:$0xff] }
 0x233   : > { %2631 = vperm.xlu0 %7899, %v2545_v10  }
 0x234   : > { %v8875_v59 = vpop.permute.xlu1 %1599 }
 0x235   : > { %11177 = vst [vmem:[#allocation82_spill] sm:$0xff] %v8875_v59  ;;  %2880 = vperm.xlu1 %7900, %v8501_v25   ;;  %v8890_v59 = vld [vmem:[%s11089_s1 + $0x5] ss:$0 sm:$0xff] }
 0x236   : > { %v2308_v52 = vpop.permute.xlu0 %2307  ;;  %v2202_v2 = vmul.f32 %v8890_v59, %v2043_v54  ;;  %v8912_v54 = vld [vmem:[%s11089_s1 + $0x8] ss:$0 sm:$0xff] }
 0x237   : > { %1848 = vperm.xlu0 %7899, %v2545_v10   ;;  %v1706_v10 = vadd.f32 %v1674_v24, %v1442_v34  ;;  %v2544_v34 = vld [vmem:[#allocation2 + $0xc1] sm:$0xff] }
 0x238   : > { %v8892_v55 = vpop.permute.xlu1 %1609 }
 0x239   : > { %11178 = vst [vmem:[#allocation83_spill] sm:$0xff] %v8892_v55  ;;  %2097 = vperm.xlu1 %7900, %v8501_v25   ;;  %v8905_v55 = vld [vmem:[%s11089_s1 + $0x7] ss:$0 sm:$0xff]  ;;  %v1970_v1 = vadd.f32 %v1938_v45, %v1706_v10  ;;  %v2467_v25 = vmul.f32 %v8899_v47, %v2308_v52  ;;  %v881_v45 = vmul.f32 %v8859_v50, %v8436_v56 }
 0x23a   : > { %v2572_v20 = vpop.permute.xlu0 %2571  ;;  %v1673_v56 = vmul.f32 %v8873_v29, %v8806_v4  ;;  %v1412_v4 = vmul.f32 %v8864_v27, %v8631_v26 }
 0x23b   : > { %2895 = vperm.xlu0 %7899, %v2809_v60   ;;  %v2234_v32 = vadd.f32 %v2202_v2, %v1970_v1  ;;  %v2731_v22 = vmul.f32 %v8905_v55, %v2572_v20  ;;  %v2283_v2 = vld [vmem:[#allocation2 + $0xe0] sm:$0xff]  ;;  %v1409_v20 = vmul.f32 %v8864_v27, %v8714_v30  ;;  %v1177_v21 = vadd.f32 %v1145_v35, %v881_v45 }
 0x23c   : > { %v1774_v13 = vpop.permute.xlu1 %1773  ;;  %v8924_v1 = vld [vmem:[%s11090_s2] ss:$0 sm:$0xff]  ;;  %v1148_v30 = vmul.f32 %v8852_v11, %v8463_v19  ;;  %v2808_v45 = vld [vmem:[#allocation2 + $0xc2] sm:$0xff] }
 0x23d   : > { %2362 = vperm.xlu1 %7900, %v2280_v23   ;;  %v2499_v52 = vadd.f32 %v2467_v25, %v2234_v32 }
 0x23e   : > { %v1789_v48 = vpop.permute.xlu0 %1788 }
 0x23f   : > { %2112 = vperm.xlu0 %7899, %v2809_v60   ;;  %v2763_v60 = vadd.f32 %v2731_v22, %v2499_v52  ;;  %v1441_v22 = vadd.f32 %v1409_v20, %v1177_v21  ;;  %v1937_v52 = vmul.f32 %v8883_v31, %v1774_v13  ;;  %v1676_v13 = vmul.f32 %v8873_v29, %v8793_v63 }
 0x240   : > { %v2038_v24 = vpop.permute.xlu1 %2037  ;;  %v1940_v26 = vmul.f32 %v8883_v31, %v1789_v48 }
 0x241   : > { %2626 = vperm.xlu1 %7900, %v2544_v34  }
 0x242   : > { %v2836_v10 = vpop.permute.xlu0 %2835 }
 0x243   : > { %v2995_v23 = vmul.f32 %v8912_v54, %v2836_v10  ;;  %2377 = vperm.xlu0 %7899, %v2283_v2   ;;  %v884_v2 = vmul.f32 %v8859_v50, %v8441_v62 }
 0x244   : > { %v2303_v40 = vpop.permute.xlu1 %2302 }
 0x245   : > { %v3027_v32 = vadd.f32 %v2995_v23, %v2763_v60  ;;  %1843 = vperm.xlu1 %7900, %v2544_v34   ;;  %v1705_v34 = vadd.f32 %v1673_v56, %v1441_v22  ;;  %v2201_v60 = vmul.f32 %v8890_v59, %v2038_v24  ;;  %v1180_v21 = vadd.f32 %v1148_v30, %v884_v2 }
 0x246   : > { %v2053_v25 = vpop.permute.xlu0 %2052  ;;  %v2466_v62 = vmul.f32 %v8899_v47, %v2303_v40 }
 0x247   : > { %v3066_v10 = vadd.f32 %v8924_v1, %v3027_v32  ;;  %2641 = vperm.xlu0 %7899, %v2547_v17   ;;  %v1969_v20 = vadd.f32 %v1937_v52, %v1705_v34  ;;  %v1444_v33 = vadd.f32 %v1412_v4, %v1180_v21  ;;  %v2204_v63 = vmul.f32 %v8890_v59, %v2053_v25  ;;  %v2282_v34 = vld [vmem:[#allocation2 + $0xd8] sm:$0xff] }
 0x248   : > { %v2567_v35 = vpop.permute.xlu1 %2566  ;;  %v2546_v21 = vld [vmem:[#allocation2 + $0xd9] sm:$0xff] }
 0x249   : > { %v3098_v23 = vmax.f32 %v3066_v10, 0.0  ;;  %2890 = vperm.xlu1 %7900, %v2808_v45   ;;  %v2233_v56 = vadd.f32 %v2201_v60, %v1969_v20  ;;  %v2730_v24 = vmul.f32 %v8905_v55, %v2567_v35  ;;  %v2811_v10 = vld [vmem:[#allocation2 + $0xe2] sm:$0xff]  ;;  %v1708_v30 = vadd.f32 %v1676_v13, %v1444_v33  ;;  %v11179_v13 = vld [vmem:[#allocation9_spill] sm:$0xff] }
 0x24a   : > { %v2318_v19 = vpop.permute.xlu0 %2317  ;;  %v1147_v25 = vmul.f32 %v8852_v11, %v11179_v13  ;;  %v11182_v13 = vld [vmem:[#allocation12_spill] sm:$0xff] }
 0x24b   : > { %3177 = vst.msk [vmem:[#allocation3 + $0x21] sm:$0xff] %vm3129_vm3, %v3098_v23  ;;  %1858 = vperm.xlu0 %7899, %v2547_v17   ;;  %v2498_v2 = vadd.f32 %v2466_v62, %v2233_v56  ;;  %v1972_v23 = vadd.f32 %v1940_v26, %v1708_v30  ;;  %v2469_v17 = vmul.f32 %v8899_v47, %v2318_v19  ;;  %v11180_v26 = vld [vmem:[#allocation6_spill] sm:$0xff] }
 0x24c   : > { %v1784_v32 = vpop.permute.xlu1 %1783  ;;  %v883_v19 = vmul.f32 %v8859_v50, %v11180_v26  ;;  %v1411_v30 = vmul.f32 %v8864_v27, %v8720_v53 }
 0x24d   : > { %2107 = vperm.xlu1 %7900, %v2808_v45   ;;  %v2762_v40 = vadd.f32 %v2730_v24, %v2498_v2  ;;  %v2236_v60 = vadd.f32 %v2204_v63, %v1972_v23  ;;  %v2285_v24 = vld [vmem:[#allocation2 + $0xf8] sm:$0xff] }
 0x24e   : > { %v2582_v22 = vpop.permute.xlu0 %2581 }
 0x24f   : > { %2905 = vperm.xlu0 %7899, %v2811_v10   ;;  %v2733_v35 = vmul.f32 %v8905_v55, %v2582_v22  ;;  %v2501_v20 = vadd.f32 %v2469_v17, %v2236_v60  ;;  %v2549_v17 = vld [vmem:[#allocation2 + $0xf9] sm:$0xff] }
 0x250   : > { %v2831_v52 = vpop.permute.xlu1 %2830 }
 0x251   : > { %v2994_v4 = vmul.f32 %v8912_v54, %v2831_v52  ;;  %2372 = vperm.xlu1 %7900, %v2282_v34   ;;  %v2765_v22 = vadd.f32 %v2733_v35, %v2501_v20  ;;  %v1179_v52 = vadd.f32 %v1147_v25, %v883_v19  ;;  %v1675_v34 = vmul.f32 %v8873_v29, %v8812_v12  ;;  %v2810_v12 = vld [vmem:[#allocation2 + $0xda] sm:$0xff] }
 0x252   : > { %v1799_v48 = vpop.permute.xlu0 %1798  ;;  %v1939_v35 = vmul.f32 %v8883_v31, %v1784_v32  ;;  %v886_v25 = vmul.f32 %v8859_v50, %v11182_v13  ;;  %v1678_v32 = vmul.f32 %v8873_v29, %v8798_v7  ;;  %v2813_v7 = vld [vmem:[#allocation2 + $0xfa] sm:$0xff] }
 0x253   : > { %v3026_v45 = vadd.f32 %v2994_v4, %v2762_v40  ;;  %2122 = vperm.xlu0 %7899, %v2811_v10   ;;  %v11181_v4 = vld [vmem:[#allocation19_spill] sm:$0xff]  ;;  %v1443_v53 = vadd.f32 %v1411_v30, %v1179_v52 }
 0x254   : > { %v2048_v33 = vpop.permute.xlu1 %2047  ;;  %v1150_v60 = vmul.f32 %v8852_v11, %v11181_v4 }
 0x255   : > { %v3065_v62 = vadd.f32 %v8924_v1, %v3026_v45  ;;  %2636 = vperm.xlu1 %7900, %v2546_v21   ;;  %v2203_v26 = vmul.f32 %v8890_v59, %v2048_v33 }
 0x256   : > { %v2846_v56 = vpop.permute.xlu0 %2845 }
 0x257   : > { %v3097_v2 = vmax.f32 %v3065_v62, 0.0  ;;  %v2997_v10 = vmul.f32 %v8912_v54, %v2846_v56  ;;  %2387 = vperm.xlu0 %7899, %v2285_v24   ;;  %v1414_v62 = vmul.f32 %v8864_v27, %v8637_v14  ;;  %v1182_v24 = vadd.f32 %v1150_v60, %v886_v25 }
 0x258   : > { %v2313_v63 = vpop.permute.xlu1 %2312  ;;  %v1942_v14 = vmul.f32 %v8883_v31, %v1799_v48 }
 0x259   : > { %3176 = vst.msk [vmem:[#allocation3 + $0x19] sm:$0xff] %vm3129_vm3, %v3097_v2  ;;  %v3029_v23 = vadd.f32 %v2997_v10, %v2765_v22  ;;  %1853 = vperm.xlu1 %7900, %v2546_v21   ;;  %v1707_v21 = vadd.f32 %v1675_v34, %v1443_v53  ;;  %v2468_v22 = vmul.f32 %v8899_v47, %v2313_v63  ;;  %v3404_v10 = vld [vmem:[#allocation3 + $0x22] sm:$0xff] }
 0x25a   : > { %v2063_v40 = vpop.permute.xlu0 %2062  ;;  %v1446_v52 = vadd.f32 %v1414_v62, %v1182_v24  ;;  %v3594_v63 = vld [vmem:[#allocation3 + $0x21] sm:$0xff] }
 0x25b   : > { %v3068_v45 = vadd.f32 %v8924_v1, %v3029_v23  ;;  %2651 = vperm.xlu0 %7899, %v2549_v17   ;;  %v1971_v30 = vadd.f32 %v1939_v35, %v1707_v21  ;;  %v2206_v62 = vmul.f32 %v8890_v59, %v2063_v40 }
 0x25c   : > { %v2577_v20 = vpop.permute.xlu1 %2576 }
 0x25d   : > { %v3100_v19 = vmax.f32 %v3068_v45, 0.0  ;;  %2900 = vperm.xlu1 %7900, %v2810_v12   ;;  %v2235_v34 = vadd.f32 %v2203_v26, %v1971_v30  ;;  %v2732_v33 = vmul.f32 %v8905_v55, %v2577_v20  ;;  %v2284_v26 = vld [vmem:[#allocation2 + $0xf0] sm:$0xff] }
 0x25e   : > { %v2328_v56 = vpop.permute.xlu0 %2327 }
 0x25f   : > { %3179 = vst.msk [vmem:[#allocation3 + $0x39] sm:$0xff] %vm3129_vm3, %v3100_v19  ;;  %1868 = vperm.xlu0 %7899, %v2549_v17   ;;  %v1710_v17 = vadd.f32 %v1678_v32, %v1446_v52  ;;  %v2500_v25 = vadd.f32 %v2468_v22, %v2235_v34  ;;  %v2471_v19 = vmul.f32 %v8899_v47, %v2328_v56  ;;  %v2548_v52 = vld [vmem:[#allocation2 + $0xf1] sm:$0xff]  ;;  %v11183_v56 = vld [vmem:[#allocation10_spill] sm:$0xff] }
 0x260   : > { %v1794_v2 = vpop.permute.xlu1 %1793  ;;  %v3210_v23 = vld [vmem:[#allocation3 + $0x18] sm:$0xff]  ;;  %v3211_v4 = vld [vmem:[#allocation3 + $0x20] sm:$0xff]  ;;  %v1149_v34 = vmul.f32 %v8852_v11, %v8518_v6  ;;  %v1677_v6 = vmul.f32 %v8873_v29, %v8823_v57  ;;  %v1416_v57 = vmul.f32 %v8864_v27, %v8643_v49 }
 0x261   : > { %2117 = vperm.xlu1 %7900, %v2810_v12   ;;  %v3403_v60 = vld [vmem:[#allocation3 + $0x1a] sm:$0xff]  ;;  %v3241_v35 = vpack.c.bf16 %v3211_v4, %v3210_v23  ;;  %v1974_v20 = vadd.f32 %v1942_v14, %v1710_v17  ;;  %v2764_v12 = vadd.f32 %v2732_v33, %v2500_v25  ;;  %v885_v23 = vmul.f32 %v8859_v50, %v11183_v56 }
 0x262   : > { %v2592_v53 = vpop.permute.xlu0 %2591  ;;  %v8973_v45 = vpack.c.bf16 %v3404_v10, %v3403_v60  ;;  %v3593_v13 = vld [vmem:[#allocation3 + $0x19] sm:$0xff] }
 0x263   : > { %2915 = vperm.xlu0 %7899, %v2813_v7   ;;  %v3625_v48 = vpack.c.bf16 %v3594_v63, %v3593_v13  ;;  %3257 = vst.msk [vmem:[#allocation4 + $0x28] sm:$0xff] %vm3129_vm3, %v3241_v35  ;;  %v2238_v40 = vadd.f32 %v2206_v62, %v1974_v20  ;;  %v2735_v30 = vmul.f32 %v8905_v55, %v2592_v53  ;;  %v2287_v60 = vld [vmem:[#allocation2 + $0x110] sm:$0xff]  ;;  %v11184_v62 = vld [vmem:[#allocation21_spill] sm:$0xff] }
 0x264   : > { %v2841_v21 = vpop.permute.xlu1 %2840  ;;  %3450 = vst.msk [vmem:[#allocation4 + $0x30] sm:$0xff] %vm3129_vm3, %v8973_v45  ;;  %v1413_v35 = vmul.f32 %v8864_v27, %v8726_v43  ;;  %v1181_v17 = vadd.f32 %v1149_v34, %v885_v23  ;;  %v1941_v20 = vmul.f32 %v8883_v31, %v1794_v2  ;;  %v1680_v2 = vmul.f32 %v8873_v29, %v8804_v16 }
 0x265   : > { %v2996_v24 = vmul.f32 %v8912_v54, %v2841_v21  ;;  %2382 = vperm.xlu1 %7900, %v2284_v26   ;;  %3641 = vst.msk [vmem:[#allocation4 + $0x10] sm:$0xff] %vm3129_vm3, %v3625_v48  ;;  %v2503_v14 = vadd.f32 %v2471_v19, %v2238_v40  ;;  %v1152_v48 = vmul.f32 %v8852_v11, %v11184_v62  ;;  %v2551_v26 = vld [vmem:[#allocation2 + $0x111] sm:$0xff] }
 0x266   : > { %v1809_v32 = vpop.permute.xlu0 %1808  ;;  %v1445_v43 = vadd.f32 %v1413_v35, %v1181_v17  ;;  %v11185_v19 = vld [vmem:[#allocation16_spill] sm:$0xff] }
 0x267   : > { %v3028_v22 = vadd.f32 %v2996_v24, %v2764_v12  ;;  %2132 = vperm.xlu0 %7899, %v2813_v7   ;;  %v2767_v53 = vadd.f32 %v2735_v30, %v2503_v14  ;;  %v888_v24 = vmul.f32 %v8859_v50, %v11185_v19  ;;  %v2812_v30 = vld [vmem:[#allocation2 + $0xf2] sm:$0xff] }
 0x268   : > { %v2058_v10 = vpop.permute.xlu1 %2057  ;;  %v2815_v35 = vld [vmem:[#allocation2 + $0x112] sm:$0xff] }
 0x269   : > { %v3067_v33 = vadd.f32 %v8924_v1, %v3028_v22  ;;  %2646 = vperm.xlu1 %7900, %v2548_v52   ;;  %v1709_v22 = vadd.f32 %v1677_v6, %v1445_v43  ;;  %v1184_v14 = vadd.f32 %v1152_v48, %v888_v24  ;;  %v3979_v24 = vld [vmem:[#allocation3 + $0x3a] sm:$0xff] }
 0x26a   : > { %v2856_v4 = vpop.permute.xlu0 %2855 }
 0x26b   : > { %v3099_v13 = vmax.f32 %v3067_v33, 0.0  ;;  %v2999_v7 = vmul.f32 %v8912_v54, %v2856_v4  ;;  %2397 = vperm.xlu0 %7899, %v2287_v60   ;;  %v1973_v56 = vadd.f32 %v1941_v20, %v1709_v22  ;;  %v3406_v4 = vld [vmem:[#allocation3 + $0x3a] sm:$0xff]  ;;  %v1448_v49 = vadd.f32 %v1416_v57, %v1184_v14 }
 0x26c   : > { %v2323_v63 = vpop.permute.xlu1 %2322 }
 0x26d   : > { %3178 = vst.msk [vmem:[#allocation3 + $0x31] sm:$0xff] %vm3129_vm3, %v3099_v13  ;;  %v3031_v25 = vadd.f32 %v2999_v7, %v2767_v53  ;;  %1863 = vperm.xlu1 %7900, %v2548_v52   ;;  %v2205_v52 = vmul.f32 %v8890_v59, %v2058_v10  ;;  %v2470_v23 = vmul.f32 %v8899_v47, %v2323_v63  ;;  %v3851_v13 = vld [vmem:[#allocation3 + $0x39] sm:$0xff] }
 0x26e   : > { %v2073_v21 = vpop.permute.xlu0 %2072  ;;  %v1944_v7 = vmul.f32 %v8883_v31, %v1809_v32  ;;  %v1712_v48 = vadd.f32 %v1680_v2, %v1448_v49 }
 0x26f   : > { %v3070_v12 = vadd.f32 %v8924_v1, %v3031_v25  ;;  %2661 = vperm.xlu0 %7899, %v2551_v26   ;;  %v2237_v17 = vadd.f32 %v2205_v52, %v1973_v56  ;;  %v2208_v32 = vmul.f32 %v8890_v59, %v2073_v21  ;;  %v2286_v52 = vld [vmem:[#allocation2 + $0x108] sm:$0xff] }
 0x270   : > { %v2587_v40 = vpop.permute.xlu1 %2586 }
 0x271   : > { %v3102_v34 = vmax.f32 %v3070_v12, 0.0  ;;  %2910 = vperm.xlu1 %7900, %v2812_v30   ;;  %v2734_v16 = vmul.f32 %v8905_v55, %v2587_v40  ;;  %v2502_v57 = vadd.f32 %v2470_v23, %v2237_v17  ;;  %v11186_v17 = vld [vmem:[#allocation14_spill] sm:$0xff] }
 0x272   : > { %v2338_v33 = vpop.permute.xlu0 %2337 }
 0x273   : > { %3181 = vst.msk [vmem:[#allocation3 + $0x51] sm:$0xff] %vm3129_vm3, %v3102_v34  ;;  %1878 = vperm.xlu0 %7899, %v2551_v26   ;;  %v1976_v34 = vadd.f32 %v1944_v7, %v1712_v48  ;;  %v2766_v14 = vadd.f32 %v2734_v16, %v2502_v57  ;;  %v2473_v2 = vmul.f32 %v8899_v47, %v2338_v33 }
 0x274   : > { %v9007_v60 = vpop.permute.xlu1 %1803  ;;  %v3467_v53 = vld [vmem:[#allocation3 + $0x30] sm:$0xff]  ;;  %v3468_v10 = vld [vmem:[#allocation3 + $0x38] sm:$0xff]  ;;  %v887_v16 = vmul.f32 %v8859_v50, %v11186_v17  ;;  %v1154_v57 = vmul.f32 %v8852_v11, %v8539_v3 }
 0x275   : > { %2127 = vperm.xlu1 %7900, %v2812_v30   ;;  %v9011_v6 = vpack.c.bf16 %v3468_v10, %v3467_v53  ;;  %v3405_v25 = vld [vmem:[#allocation3 + $0x32] sm:$0xff]  ;;  %v2240_v23 = vadd.f32 %v2208_v32, %v1976_v34 }
 0x276   : > { %v3850_v62 = vld [vmem:[#allocation3 + $0x31] sm:$0xff]  ;;  %v2602_v26 = vpop.permute.xlu0 %2601  ;;  %v9013_v43 = vpack.c.bf16 %v3406_v4, %v3405_v25  ;;  %v2550_v10 = vld [vmem:[#allocation2 + $0x109] sm:$0xff] }
 0x277   : > { %v3786_v63 = vld [vmem:[#allocation3 + $0x30] sm:$0xff]  ;;  %v9015_v20 = vpack.c.bf16 %v3851_v13, %v3850_v62  ;;  %v3787_v12 = vld [vmem:[#allocation3 + $0x38] sm:$0xff]  ;;  %2925 = vperm.xlu0 %7899, %v2815_v35   ;;  %3258 = vst.msk [vmem:[#allocation4 + $0x50] sm:$0xff] %vm3129_vm3, %v9011_v6  ;;  %v2737_v4 = vmul.f32 %v8905_v55, %v2602_v26  ;;  %v1151_v13 = vmul.f32 %v8852_v11, %v8522_v36 }
 0x278   : > { %v3978_v19 = vld [vmem:[#allocation3 + $0x32] sm:$0xff]  ;;  %v3818_v40 = vpack.c.bf16 %v3787_v12, %v3786_v63  ;;  %v2851_v22 = vpop.permute.xlu1 %2850  ;;  %3451 = vst.msk [vmem:[#allocation4 + $0x58] sm:$0xff] %vm3129_vm3, %v9013_v43  ;;  %v2505_v7 = vadd.f32 %v2473_v2, %v2240_v23  ;;  %v1415_v63 = vmul.f32 %v8864_v27, %v8732_v39  ;;  %v1679_v36 = vmul.f32 %v8873_v29, %v8827_v61 }
 0x279   : > { %v4010_v30 = vpack.c.bf16 %v3979_v24, %v3978_v19  ;;  %3642 = vst.msk [vmem:[#allocation4 + $0x38] sm:$0xff] %vm3129_vm3, %v9015_v20  ;;  %v2998_v21 = vmul.f32 %v8912_v54, %v2851_v22  ;;  %2392 = vperm.xlu1 %7900, %v2286_v52   ;;  %v2289_v62 = vld [vmem:[#allocation2 + $0x128] sm:$0xff]  ;;  %v1183_v19 = vadd.f32 %v1151_v13, %v887_v16 }
 0x27a   : > { %3834 = vst.msk [vmem:[#allocation4 + $0x18] sm:$0xff] %vm3129_vm3, %v3818_v40  ;;  %v1819_v56 = vpop.permute.xlu0 %1818  ;;  %v2769_v48 = vadd.f32 %v2737_v4, %v2505_v7  ;;  %v1943_v39 = vmul.f32 %v8883_v31, %v9007_v60  ;;  %v11187_v22 = vld [vmem:[#allocation23_spill] sm:$0xff]  ;;  %v1418_v61 = vmul.f32 %v8864_v27, %v8717_v42  ;;  %v1682_v60 = vmul.f32 %v8873_v29, %v8809_v5 }
 0x27b   : > { %4026 = vst.msk [vmem:[#allocation4 + $0x20] sm:$0xff] %vm3129_vm3, %v4010_v30  ;;  %v3030_v49 = vadd.f32 %v2998_v21, %v2766_v14  ;;  %2142 = vperm.xlu0 %7899, %v2815_v35   ;;  %v1447_v40 = vadd.f32 %v1415_v63, %v1183_v19  ;;  %v890_v52 = vmul.f32 %v8859_v50, %v11187_v22  ;;  %v2814_v14 = vld [vmem:[#allocation2 + $0x10a] sm:$0xff]  ;;  %v3981_v42 = vld [vmem:[#allocation3 + $0x52] sm:$0xff] }
 0x27c   : > { %v2068_v53 = vpop.permute.xlu1 %2067  ;;  %v1946_v17 = vmul.f32 %v8883_v31, %v1819_v56 }
 0x27d   : > { %v3069_v33 = vadd.f32 %v8924_v1, %v3030_v49  ;;  %2656 = vperm.xlu1 %7900, %v2550_v10   ;;  %v1711_v2 = vadd.f32 %v1679_v36, %v1447_v40  ;;  %v2207_v21 = vmul.f32 %v8890_v59, %v2068_v53  ;;  %v1186_v23 = vadd.f32 %v1154_v57, %v890_v52  ;;  %v2553_v49 = vld [vmem:[#allocation2 + $0x129] sm:$0xff] }
 0x27e   : > { %v2866_v25 = vpop.permute.xlu0 %2865 }
 0x27f   : > { %v3101_v26 = vmax.f32 %v3069_v33, 0.0  ;;  %v3001_v35 = vmul.f32 %v8912_v54, %v2866_v25  ;;  %2407 = vperm.xlu0 %7899, %v2289_v62   ;;  %v1450_v7 = vadd.f32 %v1418_v61, %v1186_v23  ;;  %v2817_v23 = vld [vmem:[#allocation2 + $0x12a] sm:$0xff] }
 0x280   : > { %v2333_v12 = vpop.permute.xlu1 %2332 }
 0x281   : > { %3180 = vst.msk [vmem:[#allocation3 + $0x49] sm:$0xff] %vm3129_vm3, %v3101_v26  ;;  %v3033_v24 = vadd.f32 %v3001_v35, %v2769_v48  ;;  %1873 = vperm.xlu1 %7900, %v2550_v10   ;;  %v1975_v10 = vadd.f32 %v1943_v39, %v1711_v2  ;;  %v2472_v13 = vmul.f32 %v8899_v47, %v2333_v12  ;;  %v3408_v26 = vld [vmem:[#allocation3 + $0x52] sm:$0xff] }
 0x282   : > { %v2083_v32 = vpop.permute.xlu0 %2082  ;;  %v3853_v35 = vld [vmem:[#allocation3 + $0x51] sm:$0xff]  ;;  %v1714_v19 = vadd.f32 %v1682_v60, %v1450_v7  ;;  %v1153_v7 = vmul.f32 %v8852_v11, %v8560_v0 }
 0x283   : > { %v3072_v30 = vadd.f32 %v8924_v1, %v3033_v24  ;;  %1624 = vperm.xlu0 %7899, %v2289_v62   ;;  %v2239_v62 = vadd.f32 %v2207_v21, %v1975_v10  ;;  %v7905_v0 = vld [vmem:[%s11091_s3 + $0x48] sm:$0xff]  }
 0x284   : > { %v2597_v34 = vpop.permute.xlu1 %2596 }
 0x285   : > { %v3104_v3 = vmax.f32 %v3072_v30, 0.0  ;;  %2920 = vperm.xlu1 %7900, %v2814_v14   ;;  %v2736_v5 = vmul.f32 %v8905_v55, %v2597_v34  ;;  %v2504_v39 = vadd.f32 %v2472_v13, %v2239_v62  ;;  %v2210_v30 = vmul.f32 %v8890_v59, %v2083_v32  ;;  %v2288_v34 = vld [vmem:[#allocation2 + $0x120] sm:$0xff] }
 0x286   : > { %v2348_v4 = vpop.permute.xlu0 %2347  ;;  %v1417_v62 = vmul.f32 %v8864_v27, %v8738_v18  ;;  %v1681_v18 = vmul.f32 %v8873_v29, %v8831_v28 }
 0x287   : > { %3183 = vst.msk [vmem:[#allocation3 + $0x69] sm:$0xff] %vm3129_vm3, %v3104_v3  ;;  %2671 = vperm.xlu0 %7899, %v2553_v49   ;;  %v2768_v2 = vadd.f32 %v2736_v5, %v2504_v39  ;;  %v2475_v21 = vmul.f32 %v8899_v47, %v2348_v4  ;;  %v7903_v4 = vld [vmem:[%s11091_s3 + $0x40] sm:$0xff]  }
 0x288   : > { %v3980_v33 = vld [vmem:[#allocation3 + $0x4a] sm:$0xff]  ;;  %v9055_v53 = vpop.permute.xlu1 %1813  ;;  %7319 = vmatprep.subr.bf16.mxu0 %v7903_v4  ;;  %v1684_v4 = vmul.f32 %v8873_v29, %v8820_v8 }
 0x289   : > { %v3469_v16 = vld [vmem:[#allocation3 + $0x48] sm:$0xff]  ;;  %v3470_v25 = vld [vmem:[#allocation3 + $0x50] sm:$0xff]  ;;  %2137 = vperm.xlu1 %7900, %v2814_v14   ;;  %v4011_v12 = vpack.c.bf16 %v3981_v42, %v3980_v33  ;;  %v1978_v14 = vadd.f32 %v1946_v17, %v1714_v19 }
 0x28a   : > { %v9058_v63 = vpack.c.bf16 %v3470_v25, %v3469_v16  ;;  %v3407_v48 = vld [vmem:[#allocation3 + $0x4a] sm:$0xff]  ;;  %v2612_v36 = vpop.permute.xlu0 %2611  ;;  %v889_v16 = vmul.f32 %v8859_v50, %v8527_v41  ;;  %v3272_v19 = vld [vmem:[#allocation3 + $0x1] sm:$0xff]  ;;  %v7906_v41 = vld [vmem:[%s11091_s3 + $0x8] sm:$0xff]  }
 0x28b   : > { %v9060_v24 = vpack.c.bf16 %v3408_v26, %v3407_v48  ;;  %v3852_v57 = vld [vmem:[#allocation3 + $0x49] sm:$0xff]  ;;  %1888 = vperm.xlu0 %7899, %v2553_v49   ;;  %4027 = vst.msk [vmem:[#allocation4 + $0x48] sm:$0xff] %vm3129_vm3, %v4011_v12  ;;  %v2242_v60 = vadd.f32 %v2210_v30, %v1978_v14  ;;  %v2739_v49 = vmul.f32 %v8905_v55, %v2612_v36  ;;  %v7907_v14 = vld [vmem:[%s11091_s3 + $0x50] sm:$0xff]  }
 0x28c   : > { %v3788_v56 = vld [vmem:[#allocation3 + $0x48] sm:$0xff]  ;;  %v3789_v40 = vld [vmem:[#allocation3 + $0x50] sm:$0xff]  ;;  %3259 = vst.msk [vmem:[#allocation4 + $0x78] sm:$0xff] %vm3129_vm3, %v9058_v63  ;;  %v9065_v22 = vpack.c.bf16 %v3853_v35, %v3852_v57  ;;  %v2861_v61 = vpop.permute.xlu1 %2860  ;;  %v1185_v57 = vadd.f32 %v1153_v7, %v889_v16 }
 0x28d   : > { %v3819_v52 = vpack.c.bf16 %v3789_v40, %v3788_v56  ;;  %3452 = vst.msk [vmem:[#allocation4 + $0x80] sm:$0xff] %vm3129_vm3, %v9060_v24  ;;  %v3000_v32 = vmul.f32 %v8912_v54, %v2861_v61  ;;  %2402 = vperm.xlu1 %7900, %v2288_v34   ;;  %v7904_v42 = vld [vmem:[%s11091_s3] sm:$0xff]   ;;  %v2507_v33 = vadd.f32 %v2475_v21, %v2242_v60  ;;  %v9103_v30 = vld [vmem:[#allocation2 + $0x138] sm:$0xff] }
 0x28e   : > { %3643 = vst.msk [vmem:[#allocation4 + $0x60] sm:$0xff] %vm3129_vm3, %v9065_v22  ;;  %v9075_v3 = vpop.permute.xlu0 %1828  ;;  %7320 = vmatpush3.bf16.msra.mxu0 %v7904_v42  ;;  %v2552_v35 = vld [vmem:[#allocation2 + $0x121] sm:$0xff]  ;;  %v3273_v36 = vld [vmem:[#allocation3 + $0x9] sm:$0xff]  ;;  %v1156_v40 = vmul.f32 %v8852_v11, %v8551_v15  ;;  %v1945_v61 = vmul.f32 %v8883_v31, %v9055_v53  ;;  %v7908_v15 = vld [vmem:[%s11091_s3 + $0x10] sm:$0xff]  }
 0x28f   : > { %3835 = vst.msk [vmem:[#allocation4 + $0x40] sm:$0xff] %vm3129_vm3, %v3819_v52  ;;  %v3032_v10 = vadd.f32 %v3000_v32, %v2768_v2  ;;  %2935 = vperm.xlu0 %7899, %v2817_v23   ;;  %v2771_v5 = vadd.f32 %v2739_v49, %v2507_v33  ;;  %7321 = vmatprep.subr.bf16.mxu0 %v7905_v0  ;;  %v11188_v2 = vld [vmem:[#allocation11_spill] sm:$0xff]  ;;  %v3410_v16 = vld [vmem:[#allocation3 + $0x6a] sm:$0xff] }
 0x290   : > { %v2078_v13 = vpop.permute.xlu1 %2077  ;;  %v1449_v52 = vadd.f32 %v1417_v62, %v1185_v57  ;;  %v3304_v28 = vpack.c.bf16 %v3273_v36, %v3272_v19  ;;  %v892_v21 = vmul.f32 %v8859_v50, %v11188_v2  ;;  %v1420_v32 = vmul.f32 %v8864_v27, %v8723_v51  ;;  %v2816_v7 = vld [vmem:[#allocation2 + $0x122] sm:$0xff]  ;;  %v7909_v51 = vld [vmem:[%s11091_s3 + $0x58] sm:$0xff]   ;;  %v3466_v36 = vld [vmem:[#allocation3 + $0x20] sm:$0xff] }
 0x291   : > { %v3071_v17 = vadd.f32 %v8924_v1, %v3032_v10  ;;  %1619 = vperm.xlu1 %7900, %v2288_v34   ;;  %v2209_v60 = vmul.f32 %v8890_v59, %v2078_v13  ;;  %v3208_v13 = vld [vmem:[#allocation3] sm:$0xff]  ;;  %v1948_v8 = vmul.f32 %v8883_v31, %v9075_v3  ;;  %v3465_v19 = vld [vmem:[#allocation3 + $0x18] sm:$0xff]  ;;  %v3209_v57 = vld [vmem:[#allocation3 + $0x8] sm:$0xff] }
 0x292   : > { %v2876_v25 = vpop.permute.xlu0 %2875  ;;  %7322 = vmatpush3.bf16.msra.mxu0 %v7906_v41  ;;  %v1188_v10 = vadd.f32 %v1156_v40, %v892_v21  ;;  %v7910_v3 = vld [vmem:[%s11091_s3 + $0x18] sm:$0xff]   ;;  %v7911_v21 = vld [vmem:[%s11091_s3 + $0x60] sm:$0xff]  }
 0x293   : > { %v3103_v48 = vmax.f32 %v3071_v17, 0.0  ;;  %v3003_v26 = vmul.f32 %v8912_v54, %v2876_v25  ;;  %2152 = vperm.xlu0 %7899, %v2817_v23   ;;  %v1713_v23 = vadd.f32 %v1681_v18, %v1449_v52  ;;  %7323 = vmatprep.subr.bf16.mxu0 %v7907_v14  ;;  %v3240_v52 = vpack.c.bf16 %v3209_v57, %v3208_v13 }
 0x294   : > { %v2343_v12 = vpop.permute.xlu1 %2342  ;;  %v1452_v25 = vadd.f32 %v1420_v32, %v1188_v10 }
 0x295   : > { %3182 = vst.msk [vmem:[#allocation3 + $0x61] sm:$0xff] %vm3129_vm3, %v3103_v48  ;;  %v3035_v56 = vadd.f32 %v3003_v26, %v2771_v5  ;;  %2666 = vperm.xlu1 %7900, %v2552_v35   ;;  %v1977_v33 = vadd.f32 %v1945_v61, %v1713_v23  ;;  %v2474_v17 = vmul.f32 %v8899_v47, %v2343_v12  ;;  %v9132_v5 = vld [vmem:[#allocation2 + $0x140] sm:$0xff]  ;;  %3256 = vst.msk [vmem:[#allocation4] sm:$0xff] %vm3129_vm3, %v3240_v52 }
 0x296   : > { %v2093_v39 = vpop.permute.xlu0 %2092  ;;  %7324 = vmatpush3.bf16.msra.mxu0 %v7908_v15  ;;  %v3983_v23 = vld [vmem:[#allocation3 + $0x6a] sm:$0xff] }
 0x297   : > { %v3074_v34 = vadd.f32 %v8924_v1, %v3035_v56  ;;  %2412 = vperm.xlu0 %7899, %v9103_v30   ;;  %v2241_v0 = vadd.f32 %v2209_v60, %v1977_v33  ;;  %v1716_v56 = vadd.f32 %v1684_v4, %v1452_v25  ;;  %7325 = vmatprep.subr.bf16.mxu0 %v7909_v51 }
 0x298   : > { %v2607_v53 = vpop.permute.xlu1 %2606  ;;  %v2212_v2 = vmul.f32 %v8890_v59, %v2093_v39  ;;  %v7912_v39 = vld [vmem:[%s11091_s3 + $0x20] sm:$0xff]   ;;  %v3497_v25 = vpack.c.bf16 %v3466_v36, %v3465_v19  ;;  %v1155_v19 = vmul.f32 %v8852_v11, %v8572_v44 }
 0x299   : > { %v3106_v49 = vmax.f32 %v3074_v34, 0.0  ;;  %1883 = vperm.xlu1 %7900, %v2552_v35   ;;  %v3855_v35 = vld [vmem:[#allocation3 + $0x69] sm:$0xff]  ;;  %v2738_v12 = vmul.f32 %v8905_v55, %v2607_v53  ;;  %v2506_v15 = vadd.f32 %v2474_v17, %v2241_v0  ;;  %v1980_v60 = vadd.f32 %v1948_v8, %v1716_v56 }
 0x29a   : > { %v2358_v42 = vpop.permute.xlu0 %2357  ;;  %7326 = vmatpush3.bf16.msra.mxu0 %v7910_v3  ;;  %v3401_v0 = vld [vmem:[#allocation3 + $0x2] sm:$0xff] }
 0x29b   : > { %3185 = vst.msk [vmem:[#allocation3 + $0x81] sm:$0xff] %vm3129_vm3, %v3106_v49  ;;  %3336 = vrot.lane.b32.xlu0 %v3304_v28, %s8010_s20  ;;  %v2770_v33 = vadd.f32 %v2738_v12, %v2506_v15  ;;  %v2477_v17 = vmul.f32 %v8899_v47, %v2358_v42  ;;  %7327 = vmatprep.subr.bf16.mxu0 %v7911_v21  ;;  %v7913_v42 = vld [vmem:[%s11091_s3 + $0x68] sm:$0xff]   ;;  %v3402_v12 = vld [vmem:[#allocation3 + $0xa] sm:$0xff]  ;;  %v7915_v3 = vld [vmem:[%s11091_s3 + $0x70] sm:$0xff]  }
 0x29c   : > { %v9130_v62 = vpop.permute.xlu1 %1823  ;;  %v3471_v48 = vld [vmem:[#allocation3 + $0x60] sm:$0xff]  ;;  %v3472_v26 = vld [vmem:[#allocation3 + $0x68] sm:$0xff]  ;;  %v2244_v8 = vadd.f32 %v2212_v2, %v1980_v60  ;;  %v3433_v52 = vpack.c.bf16 %v3402_v12, %v3401_v0  ;;  %v2819_v60 = vld [vmem:[#allocation2 + $0x142] sm:$0xff] }
 0x29d   : > { %2930 = vperm.xlu1 %7900, %v2816_v7   ;;  %v9135_v41 = vpack.c.bf16 %v3472_v26, %v3471_v48  ;;  %v3409_v18 = vld [vmem:[#allocation3 + $0x62] sm:$0xff] }
 0x29e   : > { %v2622_v40 = vpop.permute.xlu0 %2621  ;;  %v9140_v61 = vpack.c.bf16 %v3410_v16, %v3409_v18  ;;  %v3854_v34 = vld [vmem:[#allocation3 + $0x61] sm:$0xff]  ;;  %v2555_v16 = vld [vmem:[#allocation2 + $0x141] sm:$0xff]  ;;  %7328 = vmatpush3.bf16.msra.mxu0 %v7912_v39  ;;  %v2509_v36 = vadd.f32 %v2477_v17, %v2244_v8  ;;  %3449 = vst.msk [vmem:[#allocation4 + $0x8] sm:$0xff] %vm3129_vm3, %v3433_v52  ;;  %v1947_v39 = vmul.f32 %v8883_v31, %v9130_v62 }
 0x29f   : > { %v3790_v28 = vld [vmem:[#allocation3 + $0x60] sm:$0xff]  ;;  %v3791_v14 = vld [vmem:[#allocation3 + $0x68] sm:$0xff]  ;;  %1634 = vperm.xlu0 %7899, %v9132_v5   ;;  %3260 = vst.msk [vmem:[#allocation4 + $0xa0] sm:$0xff] %vm3129_vm3, %v9135_v41  ;;  %v9149_v32 = vpack.c.bf16 %v3855_v35, %v3854_v34  ;;  %v2741_v48 = vmul.f32 %v8905_v55, %v2622_v40  ;;  %v7914_v35 = vld [vmem:[%s11091_s3 + $0x28] sm:$0xff]   ;;  %7329 = vmatprep.subr.bf16.mxu0 %v7913_v42 }
 0x2a0   : > { %v3982_v53 = vld [vmem:[#allocation3 + $0x62] sm:$0xff]  ;;  %v2871_v49 = vpop.permute.xlu1 %2870  ;;  %3453 = vst.msk [vmem:[#allocation4 + $0xa8] sm:$0xff] %vm3129_vm3, %v9140_v61  ;;  %v3820_v10 = vpack.c.bf16 %v3791_v14, %v3790_v28  ;;  %v11189_v18 = vld [vmem:[#allocation18_spill] sm:$0xff]  ;;  %v1419_v34 = vmul.f32 %v8864_v27, %v8744_v38 }
 0x2a1   : > { %v4012_v4 = vpack.c.bf16 %v3983_v23, %v3982_v53  ;;  %v3002_v51 = vmul.f32 %v8912_v54, %v2871_v49  ;;  %2147 = vperm.xlu1 %7900, %v2816_v7   ;;  %3644 = vst.msk [vmem:[#allocation4 + $0x88] sm:$0xff] %vm3129_vm3, %v9149_v32  ;;  %v891_v56 = vmul.f32 %v8859_v50, %v11189_v18  ;;  %v7916_v2 = vld [vmem:[%s11091_s3 + $0x30] sm:$0xff]   ;;  %v11190_v17 = vld [vmem:[#allocation74_spill] sm:$0xff] }
 0x2a2   : > { %v9161_v13 = vpop.permute.xlu0 %1838  ;;  %3836 = vst.msk [vmem:[#allocation4 + $0x68] sm:$0xff] %vm3129_vm3, %v3820_v10  ;;  %v2773_v28 = vadd.f32 %v2741_v48, %v2509_v36  ;;  %7330 = vmatpush3.bf16.msra.mxu0 %v7914_v35  ;;  %v1683_v53 = vmul.f32 %v8873_v29, %v8836_v9  ;;  %v7917_v9 = vld [vmem:[%s11091_s3 + $0x78] sm:$0xff]  }
 0x2a3   : > { %4028 = vst.msk [vmem:[#allocation4 + $0x70] sm:$0xff] %vm3129_vm3, %v4012_v4  ;;  %v3034_v26 = vadd.f32 %v3002_v51, %v2770_v33  ;;  %2681 = vperm.xlu0 %7899, %v2555_v16   ;;  %7331 = vmatprep.subr.bf16.mxu0 %v7915_v3  ;;  %v1187_v21 = vadd.f32 %v1155_v19, %v891_v56  ;;  %v7918_v4 = vld [vmem:[%s11091_s3 + $0x38] sm:$0xff]  }
 0x2a4   : > { %v2088_v7 = vpop.permute.xlu1 %2087  ;;  %v1686_v51 = vmul.f32 %v8873_v29, %v11190_v17  ;;  %v3857_v42 = vld [vmem:[#allocation3 + $0x81] sm:$0xff]  ;;  %v9220_v29 = vld [vmem:[%s11089_s1 + $0x4] ss:$0 sm:$0xff]  ;;  %v9275_v17 = vld [vmem:[%s11090_s2] ss:$0 sm:$0xff] }
 0x2a5   : > { %v3073_v57 = vadd.f32 %v8924_v1, %v3034_v26  ;;  %3529 = vrot.lane.b32.xlu1 %v3497_v25, %s8010_s20  ;;  %v1451_v49 = vadd.f32 %v1419_v34, %v1187_v21  ;;  %v3412_v25 = vld [vmem:[#allocation3 + $0x82] sm:$0xff] }
 0x2a6   : > { %v2886_v40 = vpop.permute.xlu0 %2885  ;;  %7332 = vmatpush3.bf16.msra.mxu0 %v7916_v2  ;;  %v3985_v34 = vld [vmem:[#allocation3 + $0x82] sm:$0xff] }
 0x2a7   : > { %v3105_v44 = vmax.f32 %v3073_v57, 0.0  ;;  %v3005_v14 = vmul.f32 %v8912_v54, %v2886_v40  ;;  %1898 = vperm.xlu0 %7899, %v2555_v16   ;;  %v1158_v54 = vmul.f32 %v8852_v11, %v8557_v37  ;;  %v1422_v37 = vmul.f32 %v8864_v27, %v8729_v46  ;;  %7333 = vmatprep.subr.bf16.mxu0 %v7917_v9  ;;  %v2554_v27 = vld [vmem:[#allocation2 + $0x139] sm:$0xff]  ;;  %v3274_v16 = vld [vmem:[#allocation3 + $0x19] sm:$0xff]  ;;  %v9261_v9 = vld [vmem:[%s11089_s1 + $0x7] ss:$0 sm:$0xff] }
 0x2a8   : > { %v2353_v15 = vpop.permute.xlu1 %2352  ;;  %v1715_v31 = vadd.f32 %v1683_v53, %v1451_v49 }
 0x2a9   : > { %3184 = vst.msk [vmem:[#allocation3 + $0x79] sm:$0xff] %vm3129_vm3, %v3105_v44  ;;  %v3037_v38 = vadd.f32 %v3005_v14, %v2773_v28  ;;  %2417 = vperm.xlu1 %7900, %v9132_v5   ;;  %v894_v5 = vmul.f32 %v8859_v50, %v8516_v58  ;;  %v2476_v46 = vmul.f32 %v8899_v47, %v2353_v15  ;;  %v3275_v44 = vld [vmem:[#allocation3 + $0x21] sm:$0xff] }
 0x2aa   : > { %v2103_v23 = vpop.permute.xlu0 %2102  ;;  %v1979_v50 = vadd.f32 %v1947_v39, %v1715_v31  ;;  %7334 = vmatpush3.bf16.msra.mxu0 %v7918_v4  ;;  %v1950_v47 = vmul.f32 %v9220_v29, %v9161_v13  ;;  %v3305_v21 = vpack.c.bf16 %v3275_v44, %v3274_v16  ;;  %v2818_v4 = vld [vmem:[#allocation2 + $0x13a] sm:$0xff] }
 0x2ab   : > { %v3076_v10 = vadd.f32 %v8924_v1, %v3037_v38  ;;  %2945 = vperm.xlu0 %7899, %v2819_v60   ;;  %v2211_v1 = vmul.f32 %v8890_v59, %v2088_v7  ;;  %v1190_v33 = vadd.f32 %v1158_v54, %v894_v5  ;;  %v9247_v54 = vld [vmem:[%s11089_s1 + $0x6] ss:$0 sm:$0xff]  ;;  %v9268_v31 = vld [vmem:[%s11089_s1 + $0x1] ss:$0 sm:$0xff]  ;;  %v1502_v16 = vld [vmem:[#allocation2 + $0x158] sm:$0xff] }
 0x2ac   : > { %v2617_v11 = vpop.permute.xlu1 %2616 }
 0x2ad   : > { %v3108_v62 = vmax.f32 %v3076_v10, 0.0  ;;  %1629 = vperm.xlu1 %7900, %v9103_v30   ;;  %v1454_v59 = vadd.f32 %v1422_v37, %v1190_v33  ;;  %v9215_v30 = vld [vmem:[#allocation2 + $0x150] sm:$0xff]  ;;  %v2243_v7 = vadd.f32 %v2211_v1, %v1979_v50  ;;  %v2740_v35 = vmul.f32 %v8905_v55, %v2617_v11  ;;  %v9234_v55 = vld [vmem:[%s11089_s1 + $0x5] ss:$0 sm:$0xff] }
 0x2ae   : > { %v2368_v58 = vpop.permute.xlu0 %2367  ;;  %v2214_v13 = vmul.f32 %v9234_v55, %v2103_v23  ;;  %v11191_v1 = vld [vmem:[#allocation39_spill] sm:$0xff]  ;;  %v11192_v50 = vld [vmem:[#allocation28_spill] sm:$0xff] }
 0x2af   : > { %3187 = vst.msk [vmem:[#allocation3 + $0x99] sm:$0xff] %vm3129_vm3, %v3108_v62  ;;  %2162 = vperm.xlu0 %7899, %v2819_v60   ;;  %v1718_v57 = vadd.f32 %v1686_v51, %v1454_v59  ;;  %v2508_v28 = vadd.f32 %v2476_v46, %v2243_v7  ;;  %v2479_v23 = vmul.f32 %v9247_v54, %v2368_v58  ;;  %v9253_v60 = vld [vmem:[%s11089_s1 + $0x8] ss:$0 sm:$0xff]  ;;  %v9281_v58 = vld [vmem:[%s11089_s1] ss:$0 sm:$0xff] }
 0x2b0   : > { %v9213_v8 = vpop.permute.xlu1 %1833  ;;  %v3473_v48 = vld [vmem:[#allocation3 + $0x78] sm:$0xff]  ;;  %v3474_v26 = vld [vmem:[#allocation3 + $0x80] sm:$0xff]  ;;  %v1157_v62 = vmul.f32 %v9268_v31, %v11191_v1  ;;  %v893_v46 = vmul.f32 %v9281_v58, %v11192_v50 }
 0x2b1   : > { %2676 = vperm.xlu1 %7900, %v2554_v27   ;;  %v9225_v0 = vpack.c.bf16 %v3474_v26, %v3473_v48  ;;  %v3411_v12 = vld [vmem:[#allocation3 + $0x7a] sm:$0xff]  ;;  %v1982_v53 = vadd.f32 %v1950_v47, %v1718_v57  ;;  %v2772_v38 = vadd.f32 %v2740_v35, %v2508_v28  ;;  %v11193_v59 = vld [vmem:[#allocation58_spill] sm:$0xff] }
 0x2b2   : > { %v3856_v19 = vld [vmem:[#allocation3 + $0x79] sm:$0xff]  ;;  %v2632_v3 = vpop.permute.xlu0 %2631  ;;  %v9227_v18 = vpack.c.bf16 %v3412_v25, %v3411_v12  ;;  %v9288_v25 = vld [vmem:[%s11089_s1 + $0x2] ss:$0 sm:$0xff]  ;;  %v1189_v35 = vadd.f32 %v1157_v62, %v893_v46  ;;  %v9296_v12 = vld [vmem:[%s11089_s1 + $0x3] ss:$0 sm:$0xff] }
 0x2b3   : > { %v3792_v36 = vld [vmem:[#allocation3 + $0x78] sm:$0xff]  ;;  %v9229_v56 = vpack.c.bf16 %v3857_v42, %v3856_v19  ;;  %v3793_v40 = vld [vmem:[#allocation3 + $0x80] sm:$0xff]  ;;  %2422 = vperm.xlu0 %7899, %v9215_v30   ;;  %3261 = vst.msk [vmem:[#allocation4 + $0xc8] sm:$0xff] %vm3129_vm3, %v9225_v0  ;;  %v2246_v10 = vadd.f32 %v2214_v13, %v1982_v53  ;;  %v2743_v5 = vmul.f32 %v9261_v9, %v2632_v3 }
 0x2b4   : > { %v3984_v52 = vld [vmem:[#allocation3 + $0x7a] sm:$0xff]  ;;  %v3821_v14 = vpack.c.bf16 %v3793_v40, %v3792_v36  ;;  %v2881_v2 = vpop.permute.xlu1 %2880  ;;  %3454 = vst.msk [vmem:[#allocation4 + $0xd0] sm:$0xff] %vm3129_vm3, %v9227_v18  ;;  %v1421_v48 = vmul.f32 %v9288_v25, %v11193_v59  ;;  %v11194_v19 = vld [vmem:[#allocation78_spill] sm:$0xff]  ;;  %v1949_v13 = vmul.f32 %v9220_v29, %v9213_v8 }
 0x2b5   : > { %v4013_v15 = vpack.c.bf16 %v3985_v34, %v3984_v52  ;;  %3645 = vst.msk [vmem:[#allocation4 + $0xb0] sm:$0xff] %vm3129_vm3, %v9229_v56  ;;  %v3004_v49 = vmul.f32 %v9253_v60, %v2881_v2  ;;  %1893 = vperm.xlu1 %7900, %v2554_v27   ;;  %v2511_v33 = vadd.f32 %v2479_v23, %v2246_v10  ;;  %v11195_v3 = vld [vmem:[#allocation35_spill] sm:$0xff]  ;;  %v2557_v34 = vld [vmem:[#allocation2 + $0x159] sm:$0xff] }
 0x2b6   : > { %3837 = vst.msk [vmem:[#allocation4 + $0x90] sm:$0xff] %vm3129_vm3, %v3821_v14  ;;  %v1849_v39 = vpop.permute.xlu0 %1848  ;;  %v1685_v36 = vmul.f32 %v9296_v12, %v11194_v19  ;;  %v1160_v40 = vmul.f32 %v9268_v31, %v11195_v3  ;;  %v1453_v28 = vadd.f32 %v1421_v48, %v1189_v35  ;;  %v11196_v14 = vld [vmem:[#allocation25_spill] sm:$0xff]  ;;  %v11197_v2 = vld [vmem:[#allocation55_spill] sm:$0xff] }
 0x2b7   : > { %4029 = vst.msk [vmem:[#allocation4 + $0x98] sm:$0xff] %vm3129_vm3, %v4013_v15  ;;  %v3036_v37 = vadd.f32 %v3004_v49, %v2772_v38  ;;  %3338 = vrot.lane.b32.xlu0 %v3305_v21, %s8010_s20  ;;  %v2775_v26 = vadd.f32 %v2743_v5, %v2511_v33  ;;  %v896_v15 = vmul.f32 %v9281_v58, %v11196_v14  ;;  %v11198_v8 = vld [vmem:[#allocation75_spill] sm:$0xff]  ;;  %v2821_v35 = vld [vmem:[#allocation2 + $0x15a] sm:$0xff] }
 0x2b8   : > { %v2098_v11 = vpop.permute.xlu1 %2097  ;;  %v1424_v21 = vmul.f32 %v9288_v25, %v11197_v2  ;;  %v1717_v38 = vadd.f32 %v1685_v36, %v1453_v28  ;;  %v3414_v62 = vld [vmem:[#allocation3 + $0x9a] sm:$0xff] }
 0x2b9   : > { %v3075_v51 = vadd.f32 %v9275_v17, %v3036_v37  ;;  %2940 = vperm.xlu1 %7900, %v2818_v4   ;;  %v2213_v23 = vmul.f32 %v9234_v55, %v2098_v11  ;;  %v1192_v10 = vadd.f32 %v1160_v40, %v896_v15  ;;  %v1688_v37 = vmul.f32 %v9296_v12, %v11198_v8  ;;  %v3859_v46 = vld [vmem:[#allocation3 + $0x99] sm:$0xff]  ;;  %v11200_v8 = vld [vmem:[#allocation30_spill] sm:$0xff] }
 0x2ba   : > { %v2896_v27 = vpop.permute.xlu0 %2895 }
 0x2bb   : > { %v3107_v42 = vmax.f32 %v3075_v51, 0.0  ;;  %v3007_v47 = vmul.f32 %v9253_v60, %v2896_v27  ;;  %1644 = vperm.xlu0 %7899, %v1502_v16   ;;  %v1456_v33 = vadd.f32 %v1424_v21, %v1192_v10 }
 0x2bc   : > { %v2363_v7 = vpop.permute.xlu1 %2362 }
 0x2bd   : > { %3186 = vst.msk [vmem:[#allocation3 + $0x91] sm:$0xff] %vm3129_vm3, %v3107_v42  ;;  %v3039_v57 = vadd.f32 %v3007_v47, %v2775_v26  ;;  %2157 = vperm.xlu1 %7900, %v2818_v4   ;;  %v1981_v4 = vadd.f32 %v1949_v13, %v1717_v38  ;;  %v2478_v1 = vmul.f32 %v9247_v54, %v2363_v7  ;;  %v2556_v38 = vld [vmem:[#allocation2 + $0x151] sm:$0xff] }
 0x2be   : > { %v2113_v52 = vpop.permute.xlu0 %2112  ;;  %v1720_v3 = vadd.f32 %v1688_v37, %v1456_v33 }
 0x2bf   : > { %v3078_v44 = vadd.f32 %v9275_v17, %v3039_v57  ;;  %2691 = vperm.xlu0 %7899, %v2557_v34   ;;  %v2245_v27 = vadd.f32 %v2213_v23, %v1981_v4  ;;  %v11199_v23 = vld [vmem:[#allocation41_spill] sm:$0xff]  ;;  %v9346_v4 = vld [vmem:[#allocation2 + $0x168] sm:$0xff] }
 0x2c0   : > { %v2627_v53 = vpop.permute.xlu1 %2626 }
 0x2c1   : > { %v3110_v49 = vmax.f32 %v3078_v44, 0.0  ;;  %3531 = vrot.lane.b32.xlu1 %v9011_v6, %s8010_s20  ;;  %v1952_v6 = vmul.f32 %v9220_v29, %v1849_v39  ;;  %v2742_v59 = vmul.f32 %v9261_v9, %v2627_v53  ;;  %v2510_v40 = vadd.f32 %v2478_v1, %v2245_v27  ;;  %v3276_v1 = vld [vmem:[#allocation3 + $0x31] sm:$0xff]  ;;  %v3277_v27 = vld [vmem:[#allocation3 + $0x39] sm:$0xff] }
 0x2c2   : > { %v2378_v5 = vpop.permute.xlu0 %2377  ;;  %v2216_v39 = vmul.f32 %v9234_v55, %v2113_v52 }
 0x2c3   : > { %3189 = vst.msk [vmem:[#allocation3 + $0xb1] sm:$0xff] %vm3129_vm3, %v3110_v49  ;;  %1908 = vperm.xlu0 %7899, %v2557_v34   ;;  %v1984_v28 = vadd.f32 %v1952_v6, %v1720_v3  ;;  %v2774_v13 = vadd.f32 %v2742_v59, %v2510_v40  ;;  %v2481_v44 = vmul.f32 %v9247_v54, %v2378_v5 }
 0x2c4   : > { %v9317_v51 = vpop.permute.xlu1 %1843  ;;  %v3475_v11 = vld [vmem:[#allocation3 + $0x90] sm:$0xff]  ;;  %v3476_v50 = vld [vmem:[#allocation3 + $0x98] sm:$0xff]  ;;  %v1159_v49 = vmul.f32 %v9268_v31, %v11199_v23 }
 0x2c5   : > { %2427 = vperm.xlu1 %7900, %v1502_v16   ;;  %v9321_v48 = vpack.c.bf16 %v3476_v50, %v3475_v11  ;;  %v3413_v26 = vld [vmem:[#allocation3 + $0x92] sm:$0xff]  ;;  %v2248_v15 = vadd.f32 %v2216_v39, %v1984_v28  ;;  %v1951_v39 = vmul.f32 %v9220_v29, %v9317_v51 }
 0x2c6   : > { %v3858_v42 = vld [vmem:[#allocation3 + $0x91] sm:$0xff]  ;;  %v2642_v7 = vpop.permute.xlu0 %2641  ;;  %v9323_v19 = vpack.c.bf16 %v3414_v62, %v3413_v26  ;;  %v11201_v62 = vld [vmem:[#allocation60_spill] sm:$0xff] }
 0x2c7   : > { %v3794_v47 = vld [vmem:[#allocation3 + $0x90] sm:$0xff]  ;;  %v9325_v36 = vpack.c.bf16 %v3859_v46, %v3858_v42  ;;  %v3795_v57 = vld [vmem:[#allocation3 + $0x98] sm:$0xff]  ;;  %2955 = vperm.xlu0 %7899, %v2821_v35   ;;  %3262 = vst.msk [vmem:[#allocation4 + $0xf0] sm:$0xff] %vm3129_vm3, %v9321_v48  ;;  %v2745_v2 = vmul.f32 %v9261_v9, %v2642_v7  ;;  %v2513_v10 = vadd.f32 %v2481_v44, %v2248_v15  ;;  %v11202_v26 = vld [vmem:[#allocation80_spill] sm:$0xff] }
 0x2c8   : > { %v3822_v16 = vpack.c.bf16 %v3795_v57, %v3794_v47  ;;  %v2891_v34 = vpop.permute.xlu1 %2890  ;;  %3455 = vst.msk [vmem:[#allocation4 + $0xf8] sm:$0xff] %vm3129_vm3, %v9323_v19  ;;  %4030 = vst.msk [vmem:[#allocation4 + $0xc0] sm:$0xff] %vm3129_vm3, %v9323_v19  ;;  %v1423_v33 = vmul.f32 %v9288_v25, %v11201_v62  ;;  %v1687_v42 = vmul.f32 %v9296_v12, %v11202_v26  ;;  %v2820_v15 = vld [vmem:[#allocation2 + $0x152] sm:$0xff] }
 0x2c9   : > { %3646 = vst.msk [vmem:[#allocation4 + $0xd8] sm:$0xff] %vm3129_vm3, %v9325_v36  ;;  %v3006_v52 = vmul.f32 %v9253_v60, %v2891_v34  ;;  %1639 = vperm.xlu1 %7900, %v9215_v30   ;;  %v895_v30 = vmul.f32 %v9281_v58, %v11200_v8  ;;  %v2777_v11 = vadd.f32 %v2745_v2, %v2513_v10  ;;  %v11204_v34 = vld [vmem:[#allocation32_spill] sm:$0xff] }
 0x2ca   : > { %3838 = vst.msk [vmem:[#allocation4 + $0xb8] sm:$0xff] %vm3129_vm3, %v3822_v16  ;;  %v1859_v14 = vpop.permute.xlu0 %1858  ;;  %v3306_v7 = vpack.c.bf16 %v3277_v27, %v3276_v1  ;;  %v898_v28 = vmul.f32 %v9281_v58, %v11204_v34  ;;  %v3989_v34 = vld [vmem:[#allocation3 + $0xb2] sm:$0xff] }
 0x2cb   : > { %v3038_v21 = vadd.f32 %v3006_v52, %v2774_v13  ;;  %2172 = vperm.xlu0 %7899, %v2821_v35   ;;  %v1191_v59 = vadd.f32 %v1159_v49, %v895_v30  ;;  %v11203_v35 = vld [vmem:[#allocation37_spill] sm:$0xff]  ;;  %v11205_v13 = vld [vmem:[#allocation56_spill] sm:$0xff] }
 0x2cc   : > { %v2108_v53 = vpop.permute.xlu1 %2107  ;;  %v1162_v57 = vmul.f32 %v9268_v31, %v11203_v35  ;;  %v1426_v44 = vmul.f32 %v9288_v25, %v11205_v13  ;;  %v11206_v49 = vld [vmem:[#allocation76_spill] sm:$0xff] }
 0x2cd   : > { %v3077_v5 = vadd.f32 %v9275_v17, %v3038_v21  ;;  %2686 = vperm.xlu1 %7900, %v2556_v38   ;;  %v1455_v40 = vadd.f32 %v1423_v33, %v1191_v59  ;;  %v2215_v21 = vmul.f32 %v9234_v55, %v2108_v53  ;;  %v1690_v51 = vmul.f32 %v9296_v12, %v11206_v49  ;;  %v2559_v33 = vld [vmem:[#allocation2 + $0x171] sm:$0xff] }
 0x2ce   : > { %v2906_v37 = vpop.permute.xlu0 %2905  ;;  %v1194_v23 = vadd.f32 %v1162_v57, %v898_v28 }
 0x2cf   : > { %v3109_v50 = vmax.f32 %v3077_v5, 0.0  ;;  %v3009_v46 = vmul.f32 %v9253_v60, %v2906_v37  ;;  %2432 = vperm.xlu0 %7899, %v9346_v4   ;;  %v1719_v2 = vadd.f32 %v1687_v42, %v1455_v40  ;;  %v1504_v5 = vld [vmem:[#allocation2 + $0x170] sm:$0xff]  ;;  %v3416_v37 = vld [vmem:[#allocation3 + $0xb2] sm:$0xff] }
 0x2d0   : > { %v2373_v6 = vpop.permute.xlu1 %2372  ;;  %v1458_v1 = vadd.f32 %v1426_v44, %v1194_v23 }
 0x2d1   : > { %3188 = vst.msk [vmem:[#allocation3 + $0xa9] sm:$0xff] %vm3129_vm3, %v3109_v50  ;;  %v3041_v47 = vadd.f32 %v3009_v46, %v2777_v11  ;;  %1903 = vperm.xlu1 %7900, %v2556_v38   ;;  %v1983_v8 = vadd.f32 %v1951_v39, %v1719_v2  ;;  %v2480_v30 = vmul.f32 %v9247_v54, %v2373_v6  ;;  %v3861_v50 = vld [vmem:[#allocation3 + $0xb1] sm:$0xff] }
 0x2d2   : > { %v2123_v3 = vpop.permute.xlu0 %2122  ;;  %v1954_v46 = vmul.f32 %v9220_v29, %v1859_v14 }
 0x2d3   : > { %v3080_v16 = vadd.f32 %v9275_v17, %v3041_v47  ;;  %3340 = vrot.lane.b32.xlu0 %v3306_v7, %s8010_s20  ;;  %v2247_v27 = vadd.f32 %v2215_v21, %v1983_v8  ;;  %v1722_v7 = vadd.f32 %v1690_v51, %v1458_v1  ;;  %v2218_v14 = vmul.f32 %v9234_v55, %v2123_v3 }
 0x2d4   : > { %v2637_v52 = vpop.permute.xlu1 %2636 }
 0x2d5   : > { %v3112_v38 = vmax.f32 %v3080_v16, 0.0  ;;  %2950 = vperm.xlu1 %7900, %v2820_v15   ;;  %v2744_v59 = vmul.f32 %v9261_v9, %v2637_v52  ;;  %v2512_v28 = vadd.f32 %v2480_v30, %v2247_v27  ;;  %v11207_v30 = vld [vmem:[#allocation43_spill] sm:$0xff] }
 0x2d6   : > { %v2388_v10 = vpop.permute.xlu0 %2387 }
 0x2d7   : > { %3191 = vst.msk [vmem:[#allocation3 + $0xc9] sm:$0xff] %vm3129_vm3, %v3112_v38  ;;  %1654 = vperm.xlu0 %7899, %v1504_v5   ;;  %v2776_v2 = vadd.f32 %v2744_v59, %v2512_v28  ;;  %v2483_v21 = vmul.f32 %v9247_v54, %v2388_v10 }
 0x2d8   : > { %v9370_v62 = vpop.permute.xlu1 %1853  ;;  %v3477_v53 = vld [vmem:[#allocation3 + $0xa8] sm:$0xff]  ;;  %v3478_v11 = vld [vmem:[#allocation3 + $0xb0] sm:$0xff] }
 0x2d9   : > { %2167 = vperm.xlu1 %7900, %v2820_v15   ;;  %v9374_v26 = vpack.c.bf16 %v3478_v11, %v3477_v53  ;;  %v3415_v42 = vld [vmem:[#allocation3 + $0xaa] sm:$0xff]  ;;  %v1986_v15 = vadd.f32 %v1954_v46, %v1722_v7  ;;  %v11208_v53 = vld [vmem:[#allocation36_spill] sm:$0xff] }
 0x2da   : > { %v3860_v47 = vld [vmem:[#allocation3 + $0xa9] sm:$0xff]  ;;  %v2652_v35 = vpop.permute.xlu0 %2651  ;;  %v9376_v57 = vpack.c.bf16 %v3416_v37, %v3415_v42  ;;  %v1161_v37 = vmul.f32 %v9268_v31, %v11207_v30  ;;  %v11209_v46 = vld [vmem:[#allocation62_spill] sm:$0xff] }
 0x2db   : > { %v3796_v6 = vld [vmem:[#allocation3 + $0xa8] sm:$0xff]  ;;  %v9378_v40 = vpack.c.bf16 %v3861_v50, %v3860_v47  ;;  %v3797_v39 = vld [vmem:[#allocation3 + $0xb0] sm:$0xff]  ;;  %2701 = vperm.xlu0 %7899, %v2559_v33   ;;  %3263 = vst.msk [vmem:[#allocation4 + $0x118] sm:$0xff] %vm3129_vm3, %v9374_v26  ;;  %v2250_v23 = vadd.f32 %v2218_v14, %v1986_v15  ;;  %v2747_v49 = vmul.f32 %v9261_v9, %v2652_v35 }
 0x2dc   : > { %v3988_v16 = vld [vmem:[#allocation3 + $0xaa] sm:$0xff]  ;;  %v3823_v13 = vpack.c.bf16 %v3797_v39, %v3796_v6  ;;  %v2901_v52 = vpop.permute.xlu1 %2900  ;;  %3456 = vst.msk [vmem:[#allocation4 + $0x120] sm:$0xff] %vm3129_vm3, %v9376_v57  ;;  %v2823_v50 = vld [vmem:[#allocation2 + $0x172] sm:$0xff]  ;;  %v1425_v27 = vmul.f32 %v9288_v25, %v11209_v46  ;;  %v1953_v14 = vmul.f32 %v9220_v29, %v9370_v62 }
 0x2dd   : > { %v4015_v44 = vpack.c.bf16 %v3989_v34, %v3988_v16  ;;  %3647 = vst.msk [vmem:[#allocation4 + $0x100] sm:$0xff] %vm3129_vm3, %v9378_v40  ;;  %v3008_v38 = vmul.f32 %v9253_v60, %v2901_v52  ;;  %3533 = vrot.lane.b32.xlu1 %v9058_v63, %s8010_s20  ;;  %v2515_v10 = vadd.f32 %v2483_v21, %v2250_v23  ;;  %v11210_v7 = vld [vmem:[#allocation81_spill] sm:$0xff]  ;;  %v11211_v39 = vld [vmem:[#allocation38_spill] sm:$0xff] }
 0x2de   : > { %3839 = vst.msk [vmem:[#allocation4 + $0xe0] sm:$0xff] %vm3129_vm3, %v3823_v13  ;;  %v1869_v3 = vpop.permute.xlu0 %1868  ;;  %v897_v63 = vmul.f32 %v9281_v58, %v11208_v53  ;;  %v1689_v35 = vmul.f32 %v9296_v12, %v11210_v7  ;;  %v1164_v16 = vmul.f32 %v9268_v31, %v11211_v39  ;;  %v11213_v15 = vld [vmem:[#allocation57_spill] sm:$0xff] }
 0x2df   : > { %4031 = vst.msk [vmem:[#allocation4 + $0xe8] sm:$0xff] %vm3129_vm3, %v4015_v44  ;;  %v3040_v51 = vadd.f32 %v3008_v38, %v2776_v2  ;;  %1918 = vperm.xlu0 %7899, %v2559_v33   ;;  %v2779_v59 = vadd.f32 %v2747_v49, %v2515_v10  ;;  %v11212_v44 = vld [vmem:[#allocation8_spill] sm:$0xff]  ;;  %v1428_v2 = vmul.f32 %v9288_v25, %v11213_v15  ;;  %v2558_v38 = vld [vmem:[#allocation2 + $0x169] sm:$0xff]  ;;  %v9416_v62 = vld [vmem:[#allocation2 + $0x180] sm:$0xff] }
 0x2e0   : > { %v2118_v8 = vpop.permute.xlu1 %2117  ;;  %v1193_v6 = vadd.f32 %v1161_v37, %v897_v63  ;;  %v900_v52 = vmul.f32 %v9281_v58, %v11212_v44  ;;  %v11214_v10 = vld [vmem:[#allocation77_spill] sm:$0xff] }
 0x2e1   : > { %v3079_v1 = vadd.f32 %v9275_v17, %v3040_v51  ;;  %2437 = vperm.xlu1 %7900, %v1504_v5   ;;  %v2217_v23 = vmul.f32 %v9234_v55, %v2118_v8  ;;  %v3278_v51 = vld [vmem:[#allocation3 + $0x49] sm:$0xff] }
 0x2e2   : > { %v2916_v11 = vpop.permute.xlu0 %2915  ;;  %v1457_v28 = vadd.f32 %v1425_v27, %v1193_v6  ;;  %v1196_v30 = vadd.f32 %v1164_v16, %v900_v52  ;;  %v1956_v6 = vmul.f32 %v9220_v29, %v1869_v3 }
 0x2e3   : > { %v3111_v42 = vmax.f32 %v3079_v1, 0.0  ;;  %v3011_v33 = vmul.f32 %v9253_v60, %v2916_v11  ;;  %2965 = vperm.xlu0 %7899, %v2823_v50   ;;  %v1692_v1 = vmul.f32 %v9296_v12, %v11214_v10  ;;  %v3279_v11 = vld [vmem:[#allocation3 + $0x51] sm:$0xff] }
 0x2e4   : > { %v2383_v47 = vpop.permute.xlu1 %2382  ;;  %v1460_v8 = vadd.f32 %v1428_v2, %v1196_v30  ;;  %v3307_v27 = vpack.c.bf16 %v3279_v11, %v3278_v51  ;;  %v1506_v30 = vld [vmem:[#allocation2 + $0x188] sm:$0xff]  ;;  %v11215_v11 = vld [vmem:[#allocation45_spill] sm:$0xff] }
 0x2e5   : > { %3190 = vst.msk [vmem:[#allocation3 + $0xc1] sm:$0xff] %vm3129_vm3, %v3111_v42  ;;  %v3043_v5 = vadd.f32 %v3011_v33, %v2779_v59  ;;  %1649 = vperm.xlu1 %7900, %v9346_v4   ;;  %v1721_v4 = vadd.f32 %v1689_v35, %v1457_v28  ;;  %v2482_v63 = vmul.f32 %v9247_v54, %v2383_v47  ;;  %v3863_v33 = vld [vmem:[#allocation3 + $0xc9] sm:$0xff] }
 0x2e6   : > { %v2133_v34 = vpop.permute.xlu0 %2132  ;;  %v1724_v52 = vadd.f32 %v1692_v1, %v1460_v8 }
 0x2e7   : > { %v3082_v13 = vadd.f32 %v9275_v17, %v3043_v5  ;;  %2182 = vperm.xlu0 %7899, %v2823_v50   ;;  %v1985_v53 = vadd.f32 %v1953_v14, %v1721_v4  ;;  %v3418_v50 = vld [vmem:[#allocation3 + $0xca] sm:$0xff]  ;;  %v2220_v2 = vmul.f32 %v9234_v55, %v2133_v34 }
 0x2e8   : > { %v2647_v21 = vpop.permute.xlu1 %2646  ;;  %v1988_v4 = vadd.f32 %v1956_v6, %v1724_v52  ;;  %v11217_v6 = vld [vmem:[#allocation64_spill] sm:$0xff] }
 0x2e9   : > { %v3114_v49 = vmax.f32 %v3082_v13, 0.0  ;;  %2696 = vperm.xlu1 %7900, %v2558_v38   ;;  %v2249_v7 = vadd.f32 %v2217_v23, %v1985_v53  ;;  %v2746_v35 = vmul.f32 %v9261_v9, %v2647_v21 }
 0x2ea   : > { %v2398_v37 = vpop.permute.xlu0 %2397  ;;  %v2252_v10 = vadd.f32 %v2220_v2, %v1988_v4 }
 0x2eb   : > { %3193 = vst.msk [vmem:[#allocation3 + $0xe1] sm:$0xff] %vm3129_vm3, %v3114_v49  ;;  %2442 = vperm.xlu0 %7899, %v9416_v62   ;;  %v2514_v15 = vadd.f32 %v2482_v63, %v2249_v7  ;;  %v2485_v34 = vmul.f32 %v9247_v54, %v2398_v37  ;;  %v1427_v7 = vmul.f32 %v9288_v25, %v11217_v6 }
 0x2ec   : > { %v1864_v46 = vpop.permute.xlu1 %1863  ;;  %v3479_v59 = vld [vmem:[#allocation3 + $0xc0] sm:$0xff]  ;;  %v3480_v42 = vld [vmem:[#allocation3 + $0xc8] sm:$0xff] }
 0x2ed   : > { %1913 = vperm.xlu1 %7900, %v2558_v38   ;;  %v9425_v5 = vpack.c.bf16 %v3480_v42, %v3479_v59  ;;  %v3417_v39 = vld [vmem:[#allocation3 + $0xc2] sm:$0xff]  ;;  %v2822_v38 = vld [vmem:[#allocation2 + $0x16a] sm:$0xff]  ;;  %v2778_v23 = vadd.f32 %v2746_v35, %v2514_v15  ;;  %v2517_v8 = vadd.f32 %v2485_v34, %v2252_v10 }
 0x2ee   : > { %v3862_v47 = vld [vmem:[#allocation3 + $0xc1] sm:$0xff]  ;;  %v2662_v28 = vpop.permute.xlu0 %2661  ;;  %v9427_v14 = vpack.c.bf16 %v3418_v50, %v3417_v39  ;;  %v1163_v50 = vmul.f32 %v9268_v31, %v11215_v11 }
 0x2ef   : > { %v3798_v16 = vld [vmem:[#allocation3 + $0xc0] sm:$0xff]  ;;  %v9429_v13 = vpack.c.bf16 %v3863_v33, %v3862_v47  ;;  %v3799_v44 = vld [vmem:[#allocation3 + $0xc8] sm:$0xff]  ;;  %3342 = vrot.lane.b32.xlu0 %v3307_v27, %s8010_s20  ;;  %3264 = vst.msk [vmem:[#allocation4 + $0x140] sm:$0xff] %vm3129_vm3, %v9425_v5  ;;  %v2749_v1 = vmul.f32 %v9261_v9, %v2662_v28 }
 0x2f0   : > { %v3824_v3 = vpack.c.bf16 %v3799_v44, %v3798_v16  ;;  %v2911_v21 = vpop.permute.xlu1 %2910  ;;  %3457 = vst.msk [vmem:[#allocation4 + $0x148] sm:$0xff] %vm3129_vm3, %v9427_v14  ;;  %4032 = vst.msk [vmem:[#allocation4 + $0x110] sm:$0xff] %vm3129_vm3, %v9427_v14  ;;  %v11216_v27 = vld [vmem:[#allocation7_spill] sm:$0xff]  ;;  %v11218_v44 = vld [vmem:[#allocation82_spill] sm:$0xff] }
 0x2f1   : > { %3648 = vst.msk [vmem:[#allocation4 + $0x128] sm:$0xff] %vm3129_vm3, %v9429_v13  ;;  %v3010_v49 = vmul.f32 %v9253_v60, %v2911_v21  ;;  %2960 = vperm.xlu1 %7900, %v2822_v38   ;;  %v899_v59 = vmul.f32 %v9281_v58, %v11216_v27  ;;  %v2561_v33 = vld [vmem:[#allocation2 + $0x189] sm:$0xff]  ;;  %v2781_v35 = vadd.f32 %v2749_v1, %v2517_v8  ;;  %v11219_v10 = vld [vmem:[#allocation40_spill] sm:$0xff]  ;;  %v11220_v8 = vld [vmem:[#allocation13_spill] sm:$0xff] }
 0x2f2   : > { %3840 = vst.msk [vmem:[#allocation4 + $0x108] sm:$0xff] %vm3129_vm3, %v3824_v3  ;;  %v9444_v51 = vpop.permute.xlu0 %1878  ;;  %v1691_v52 = vmul.f32 %v9296_v12, %v11218_v44  ;;  %v1955_v21 = vmul.f32 %v9220_v29, %v1864_v46  ;;  %v1166_v1 = vmul.f32 %v9268_v31, %v11219_v10  ;;  %v2825_v11 = vld [vmem:[#allocation2 + $0x18a] sm:$0xff]  ;;  %v3420_v46 = vld [vmem:[#allocation3 + $0xe2] sm:$0xff] }
 0x2f3   : > { %v3042_v53 = vadd.f32 %v3010_v49, %v2778_v23  ;;  %1664 = vperm.xlu0 %7899, %v1506_v30   ;;  %v1195_v28 = vadd.f32 %v1163_v50, %v899_v59 }
 0x2f4   : > { %v2128_v63 = vpop.permute.xlu1 %2127 }
 0x2f5   : > { %v3081_v37 = vadd.f32 %v9275_v17, %v3042_v53  ;;  %2177 = vperm.xlu1 %7900, %v2822_v38   ;;  %v1459_v3 = vadd.f32 %v1427_v7, %v1195_v28  ;;  %v2219_v34 = vmul.f32 %v9234_v55, %v2128_v63 }
 0x2f6   : > { %v2926_v42 = vpop.permute.xlu0 %2925 }
 0x2f7   : > { %v3113_v39 = vmax.f32 %v3081_v37, 0.0  ;;  %v3013_v47 = vmul.f32 %v9253_v60, %v2926_v42  ;;  %2711 = vperm.xlu0 %7899, %v2561_v33   ;;  %v1723_v23 = vadd.f32 %v1691_v52, %v1459_v3  ;;  %v902_v37 = vmul.f32 %v9281_v58, %v11220_v8  ;;  %v11221_v42 = vld [vmem:[#allocation59_spill] sm:$0xff] }
 0x2f8   : > { %v2393_v16 = vpop.permute.xlu1 %2392  ;;  %v1958_v8 = vmul.f32 %v9220_v29, %v9444_v51 }
 0x2f9   : > { %3192 = vst.msk [vmem:[#allocation3 + $0xd9] sm:$0xff] %vm3129_vm3, %v3113_v39  ;;  %v3045_v15 = vadd.f32 %v3013_v47, %v2781_v35  ;;  %3535 = vrot.lane.b32.xlu1 %v9135_v41, %s8010_s20  ;;  %v1987_v50 = vadd.f32 %v1955_v21, %v1723_v23  ;;  %v2484_v41 = vmul.f32 %v9247_v54, %v2393_v16  ;;  %v11222_v23 = vld [vmem:[#allocation79_spill] sm:$0xff] }
 0x2fa   : > { %v2143_v2 = vpop.permute.xlu0 %2142  ;;  %v1198_v28 = vadd.f32 %v1166_v1, %v902_v37  ;;  %v2560_v1 = vld [vmem:[#allocation2 + $0x181] sm:$0xff] }
 0x2fb   : > { %v3084_v38 = vadd.f32 %v9275_v17, %v3045_v15  ;;  %1928 = vperm.xlu0 %7899, %v2561_v33   ;;  %v1430_v33 = vmul.f32 %v9288_v25, %v11221_v42  ;;  %v2251_v6 = vadd.f32 %v2219_v34, %v1987_v50  ;;  %v2298_v50 = vld [vmem:[#allocation2 + $0x198] sm:$0xff] }
 0x2fc   : > { %v2657_v4 = vpop.permute.xlu1 %2656 }
 0x2fd   : > { %v3116_v49 = vmax.f32 %v3084_v38, 0.0  ;;  %2447 = vperm.xlu1 %7900, %v1506_v30   ;;  %v3865_v30 = vld [vmem:[#allocation3 + $0xe1] sm:$0xff]  ;;  %v2748_v7 = vmul.f32 %v9261_v9, %v2657_v4  ;;  %v1694_v4 = vmul.f32 %v9296_v12, %v11222_v23  ;;  %v2516_v34 = vadd.f32 %v2484_v41, %v2251_v6  ;;  %v2563_v23 = vld [vmem:[#allocation2 + $0x1a1] sm:$0xff] }
 0x2fe   : > { %v2408_v53 = vpop.permute.xlu0 %2407  ;;  %v3993_v38 = vld [vmem:[#allocation3 + $0xe2] sm:$0xff] }
 0x2ff   : > { %3195 = vst.msk [vmem:[#allocation3 + $0xf9] sm:$0xff] %vm3129_vm3, %v3116_v49  ;;  %2975 = vperm.xlu0 %7899, %v2825_v11   ;;  %v2780_v41 = vadd.f32 %v2748_v7, %v2516_v34  ;;  %v2487_v51 = vmul.f32 %v9247_v54, %v2408_v53 }
 0x300   : > { %v9469_v27 = vpop.permute.xlu1 %1873  ;;  %v3481_v63 = vld [vmem:[#allocation3 + $0xd8] sm:$0xff]  ;;  %v3482_v59 = vld [vmem:[#allocation3 + $0xe0] sm:$0xff] }
 0x301   : > { %1659 = vperm.xlu1 %7900, %v9416_v62   ;;  %v9475_v35 = vpack.c.bf16 %v3482_v59, %v3481_v63  ;;  %v3419_v39 = vld [vmem:[#allocation3 + $0xda] sm:$0xff] }
 0x302   : > { %v3864_v47 = vld [vmem:[#allocation3 + $0xd9] sm:$0xff]  ;;  %v9477_v44 = vpop.permute.xlu0 %1624  ;;  %v9479_v52 = vpack.c.bf16 %v3420_v46, %v3419_v39  ;;  %v1462_v46 = vadd.f32 %v1430_v33, %v1198_v28  ;;  %v3280_v63 = vld [vmem:[#allocation3 + $0x61] sm:$0xff]  ;;  %v3281_v33 = vld [vmem:[#allocation3 + $0x69] sm:$0xff] }
 0x303   : > { %v3800_v16 = vld [vmem:[#allocation3 + $0xd8] sm:$0xff]  ;;  %v9481_v15 = vpack.c.bf16 %v3865_v30, %v3864_v47  ;;  %v3801_v3 = vld [vmem:[#allocation3 + $0xe0] sm:$0xff]  ;;  %2192 = vperm.xlu0 %7899, %v2825_v11   ;;  %3265 = vst.msk [vmem:[#allocation4 + $0x168] sm:$0xff] %vm3129_vm3, %v9475_v35  ;;  %v2222_v30 = vmul.f32 %v9234_v55, %v2143_v2  ;;  %v3308_v47 = vpack.c.bf16 %v3281_v33, %v3280_v63 }
 0x304   : > { %v3992_v21 = vld [vmem:[#allocation3 + $0xda] sm:$0xff]  ;;  %v3825_v62 = vpack.c.bf16 %v3801_v3, %v3800_v16  ;;  %v2921_v10 = vpop.permute.xlu1 %2920  ;;  %3458 = vst.msk [vmem:[#allocation4 + $0x170] sm:$0xff] %vm3129_vm3, %v9479_v52  ;;  %v1726_v59 = vadd.f32 %v1694_v4, %v1462_v46 }
 0x305   : > { %v4017_v49 = vpack.c.bf16 %v3993_v38, %v3992_v21  ;;  %3649 = vst.msk [vmem:[#allocation4 + $0x150] sm:$0xff] %vm3129_vm3, %v9481_v15  ;;  %v3012_v11 = vmul.f32 %v9253_v60, %v2921_v10  ;;  %2706 = vperm.xlu1 %7900, %v2560_v1   ;;  %v2824_v38 = vld [vmem:[#allocation2 + $0x182] sm:$0xff] }
 0x306   : > { %3841 = vst.msk [vmem:[#allocation4 + $0x130] sm:$0xff] %vm3129_vm3, %v3825_v62  ;;  %v2672_v37 = vpop.permute.xlu0 %2671  ;;  %v1990_v39 = vadd.f32 %v1958_v8, %v1726_v59  ;;  %v11223_v4 = vld [vmem:[#allocation47_spill] sm:$0xff] }
 0x307   : > { %4033 = vst.msk [vmem:[#allocation4 + $0x138] sm:$0xff] %vm3129_vm3, %v4017_v49  ;;  %v3044_v42 = vadd.f32 %v3012_v11, %v2780_v41  ;;  %2452 = vperm.xlu0 %7899, %v2298_v50   ;;  %v2751_v21 = vmul.f32 %v9261_v9, %v2672_v37  ;;  %v1165_v34 = vmul.f32 %v9268_v31, %v11223_v4  ;;  %v11224_v49 = vld [vmem:[#allocation20_spill] sm:$0xff]  ;;  %v2827_v11 = vld [vmem:[#allocation2 + $0x1a2] sm:$0xff] }
 0x308   : > { %v2138_v6 = vpop.permute.xlu1 %2137  ;;  %v2254_v28 = vadd.f32 %v2222_v30, %v1990_v39  ;;  %v901_v10 = vmul.f32 %v9281_v58, %v11224_v49  ;;  %v11226_v63 = vld [vmem:[#allocation83_spill] sm:$0xff] }
 0x309   : > { %v3083_v7 = vadd.f32 %v9275_v17, %v3044_v42  ;;  %1923 = vperm.xlu1 %7900, %v2560_v1   ;;  %v11225_v1 = vld [vmem:[#allocation66_spill] sm:$0xff]  ;;  %v1693_v59 = vmul.f32 %v9296_v12, %v11226_v63  ;;  %v3282_v33 = vld [vmem:[#allocation3 + $0x79] sm:$0xff] }
 0x30a   : > { %v9499_v16 = vpop.permute.xlu0 %1888  ;;  %v2519_v62 = vadd.f32 %v2487_v51, %v2254_v28  ;;  %v1429_v50 = vmul.f32 %v9288_v25, %v11225_v1  ;;  %v1197_v37 = vadd.f32 %v1165_v34, %v901_v10  ;;  %v1957_v51 = vmul.f32 %v9220_v29, %v9469_v27  ;;  %v3422_v28 = vld [vmem:[#allocation3 + $0xfa] sm:$0xff] }
 0x30b   : > { %v3115_v3 = vmax.f32 %v3083_v7, 0.0  ;;  %3344 = vrot.lane.b32.xlu0 %v3308_v47, %s8010_s20  ;;  %v3283_v47 = vld [vmem:[#allocation3 + $0x81] sm:$0xff] }
 0x30c   : > { %v2403_v2 = vpop.permute.xlu1 %2402  ;;  %v2783_v46 = vadd.f32 %v2751_v21, %v2519_v62  ;;  %v1461_v39 = vadd.f32 %v1429_v50, %v1197_v37  ;;  %v2299_v21 = vld [vmem:[#allocation2 + $0x1a0] sm:$0xff]  ;;  %v3612_v62 = vld [vmem:[#allocation3 + $0xf9] sm:$0xff]  ;;  %v3309_v10 = vpack.c.bf16 %v3283_v47, %v3282_v33 }
 0x30d   : > { %3194 = vst.msk [vmem:[#allocation3 + $0xf1] sm:$0xff] %vm3129_vm3, %v3115_v3  ;;  %2970 = vperm.xlu1 %7900, %v2824_v38   ;;  %v3285_v47 = vld [vmem:[#allocation3 + $0x99] sm:$0xff] }
 0x30e   : > { %v2936_v53 = vpop.permute.xlu0 %2935 }
 0x30f   : > { %v3015_v8 = vmul.f32 %v9253_v60, %v2936_v53  ;;  %2721 = vperm.xlu0 %7899, %v2563_v23   ;;  %v3284_v23 = vld [vmem:[#allocation3 + $0x91] sm:$0xff]  ;;  %v1725_v53 = vadd.f32 %v1693_v59, %v1461_v39  ;;  %v3995_v59 = vld [vmem:[#allocation3 + $0xfa] sm:$0xff] }
 0x310   : > { %v9511_v41 = vpop.permute.xlu1 %1619 }
 0x311   : > { %v3047_v30 = vadd.f32 %v3015_v8, %v2783_v46  ;;  %2187 = vperm.xlu1 %7900, %v2824_v38   ;;  %v2221_v38 = vmul.f32 %v9234_v55, %v2138_v6  ;;  %v1989_v39 = vadd.f32 %v1957_v51, %v1725_v53  ;;  %v2486_v6 = vmul.f32 %v9247_v54, %v2403_v2 }
 0x312   : > { %v9515_v42 = vpop.permute.xlu0 %2152 }
 0x313   : > { %v3086_v7 = vadd.f32 %v9275_v17, %v3047_v30  ;;  %2985 = vperm.xlu0 %7899, %v2827_v11   ;;  %v2253_v51 = vadd.f32 %v2221_v38, %v1989_v39 }
 0x314   : > { %v2667_v3 = vpop.permute.xlu1 %2666  ;;  %v3483_v4 = vld [vmem:[#allocation3 + $0xf0] sm:$0xff]  ;;  %v3484_v34 = vld [vmem:[#allocation3 + $0xf8] sm:$0xff] }
 0x315   : > { %v3118_v49 = vmax.f32 %v3086_v7, 0.0  ;;  %3537 = vrot.lane.b32.xlu1 %v9225_v0, %s8010_s20  ;;  %v3421_v27 = vld [vmem:[#allocation3 + $0xf2] sm:$0xff]  ;;  %v9525_v8 = vpack.c.bf16 %v3484_v34, %v3483_v4  ;;  %v2750_v2 = vmul.f32 %v9261_v9, %v2667_v3  ;;  %v2562_v34 = vld [vmem:[#allocation2 + $0x199] sm:$0xff]  ;;  %v2518_v53 = vadd.f32 %v2486_v6, %v2253_v51 }
 0x316   : > { %v3611_v1 = vld [vmem:[#allocation3 + $0xf1] sm:$0xff]  ;;  %v9523_v46 = vpop.permute.xlu0 %2412  ;;  %v9527_v11 = vpack.c.bf16 %v3422_v28, %v3421_v27  ;;  %v3310_v28 = vpack.c.bf16 %v3285_v47, %v3284_v23  ;;  %v1696_v51 = vmul.f32 %v9296_v12, %v9477_v44 }
 0x317   : > { %v3802_v50 = vld [vmem:[#allocation3 + $0xf0] sm:$0xff]  ;;  %v3634_v37 = vpack.c.bf16 %v3612_v62, %v3611_v1  ;;  %v3803_v63 = vld [vmem:[#allocation3 + $0xf8] sm:$0xff]  ;;  %3197 = vst.msk [vmem:[#allocation3 + $0x111] sm:$0xff] %vm3129_vm3, %v3118_v49  ;;  %3346 = vrot.lane.b32.xlu0 %v3309_v10, %s8010_s20  ;;  %3266 = vst.msk [vmem:[#allocation4 + $0x190] sm:$0xff] %vm3129_vm3, %v9525_v8  ;;  %v2782_v3 = vadd.f32 %v2750_v2, %v2518_v53  ;;  %v1960_v53 = vmul.f32 %v9220_v29, %v9499_v16 }
 0x318   : > { %v3994_v30 = vld [vmem:[#allocation3 + $0xf2] sm:$0xff]  ;;  %v3826_v0 = vpack.c.bf16 %v3803_v63, %v3802_v50  ;;  %v9532_v7 = vpop.permute.xlu1 %1883  ;;  %3459 = vst.msk [vmem:[#allocation4 + $0x198] sm:$0xff] %vm3129_vm3, %v9527_v11  ;;  %v3286_v62 = vld [vmem:[#allocation3 + $0xa9] sm:$0xff] }
 0x319   : > { %v4018_v33 = vpack.c.bf16 %v3995_v59, %v3994_v30  ;;  %3650 = vst.msk [vmem:[#allocation4 + $0x178] sm:$0xff] %vm3129_vm3, %v3634_v37  ;;  %2457 = vperm.xlu1 %7900, %v2299_v21   ;;  %v3287_v10 = vld [vmem:[#allocation3 + $0xb1] sm:$0xff]  ;;  %v3288_v37 = vld [vmem:[#allocation3 + $0xc1] sm:$0xff]  ;;  %v11228_v63 = vld [vmem:[#allocation15_spill] sm:$0xff] }
 0x31a   : > { %3842 = vst.msk [vmem:[#allocation4 + $0x158] sm:$0xff] %vm3129_vm3, %v3826_v0  ;;  %v3337_v4 = vpop.permute.xlu0 %3336  ;;  %v11227_v27 = vld [vmem:[#allocation42_spill] sm:$0xff]  ;;  %v3311_v23 = vpack.c.bf16 %v3287_v10, %v3286_v62  ;;  %v904_v30 = vmul.f32 %v9281_v58, %v11228_v63  ;;  %v11229_v59 = vld [vmem:[#allocation61_spill] sm:$0xff] }
 0x31b   : > { %4034 = vst.msk [vmem:[#allocation4 + $0x160] sm:$0xff] %vm3129_vm3, %v4018_v33  ;;  %3348 = vrot.lane.b32.xlu0 %v3310_v28, %s8010_s20  ;;  %v1168_v38 = vmul.f32 %v9268_v31, %v11227_v27  ;;  %v2826_v50 = vld [vmem:[#allocation2 + $0x19a] sm:$0xff]  ;;  %v1432_v39 = vmul.f32 %v9288_v25, %v11229_v59  ;;  %v3291_v27 = vld [vmem:[#allocation3 + $0xe1] sm:$0xff]  ;;  %v3293_v59 = vld [vmem:[#allocation3 + $0xf9] sm:$0xff] }
 0x31c   : > { %3385 = vst.msk [vmem:[#allocation4] sm:$0xff] %vm3384_vm6, %v3337_v4  ;;  %v2931_v49 = vpop.permute.xlu1 %2930  ;;  %v3289_v33 = vld [vmem:[#allocation3 + $0xc9] sm:$0xff] }
 0x31d   : > { %v3014_v21 = vmul.f32 %v9253_v60, %v2931_v49  ;;  %2716 = vperm.xlu1 %7900, %v2562_v34   ;;  %v1200_v47 = vadd.f32 %v1168_v38, %v904_v30  ;;  %v3312_v28 = vpack.c.bf16 %v3289_v33, %v3288_v37  ;;  %v3290_v34 = vld [vmem:[#allocation3 + $0xd9] sm:$0xff]  ;;  %v2224_v38 = vmul.f32 %v9234_v55, %v9515_v42  ;;  %v11231_v37 = vld [vmem:[#allocation22_spill] sm:$0xff]  ;;  %v11232_v42 = vld [vmem:[#allocation68_spill] sm:$0xff] }
 0x31e   : > { %v9547_v1 = vpop.permute.xlu0 %1634  ;;  %v3313_v44 = vpack.c.bf16 %v3291_v27, %v3290_v34  ;;  %v903_v55 = vmul.f32 %v9281_v58, %v11231_v37  ;;  %v1431_v63 = vmul.f32 %v9288_v25, %v11232_v42 }
 0x31f   : > { %v3046_v6 = vadd.f32 %v3014_v21, %v2782_v3  ;;  %3350 = vrot.lane.b32.xlu0 %v3311_v23, %s8010_s20  ;;  %v1464_v62 = vadd.f32 %v1432_v39, %v1200_v47  ;;  %v11230_v21 = vld [vmem:[#allocation49_spill] sm:$0xff]  ;;  %v3292_v23 = vld [vmem:[#allocation3 + $0xf1] sm:$0xff] }
 0x320   : > { %v9554_v0 = vpop.permute.xlu1 %2147  ;;  %v1167_v29 = vmul.f32 %v9268_v31, %v11230_v21  ;;  %v9580_v31 = vpack.c.bf16 %v3293_v59, %v3292_v23  ;;  %v3295_v47 = vld [vmem:[#allocation3 + $0x111] sm:$0xff] }
 0x321   : > { %v3085_v2 = vadd.f32 %v9275_v17, %v3046_v6  ;;  %2980 = vperm.xlu1 %7900, %v2826_v50   ;;  %v1728_v3 = vadd.f32 %v1696_v51, %v1464_v62  ;;  %v1695_v51 = vmul.f32 %v9296_v12, %v9511_v41 }
 0x322   : > { %v2682_v4 = vpop.permute.xlu0 %2681  ;;  %v1199_v6 = vadd.f32 %v1167_v29, %v903_v55 }
 0x323   : > { %v3117_v49 = vmax.f32 %v3085_v2, 0.0  ;;  %3352 = vrot.lane.b32.xlu0 %v3312_v28, %s8010_s20  ;;  %v1992_v50 = vadd.f32 %v1960_v53, %v1728_v3  ;;  %v2753_v58 = vmul.f32 %v9261_v9, %v2682_v4  ;;  %v4042_v25 = vld [vmem:[#allocation4] sm:$0xff] }
 0x324   : > { %v3530_v10 = vpop.permute.xlu1 %3529  ;;  %v3424_v28 = vld [vmem:[#allocation3 + $0x112] sm:$0xff]  ;;  %v1463_v34 = vadd.f32 %v1431_v63, %v1199_v6 }
 0x325   : > { %3196 = vst.msk [vmem:[#allocation3 + $0x109] sm:$0xff] %vm3129_vm3, %v3117_v49  ;;  %3539 = vrot.lane.b32.xlu1 %v9321_v48, %s8010_s20  ;;  %v2256_v39 = vadd.f32 %v2224_v38, %v1992_v50 }
 0x326   : > { %3577 = vst.msk [vmem:[#allocation4 + $0x8] sm:$0xff] %vm3384_vm6, %v3530_v10  ;;  %v9570_v16 = vpop.permute.xlu0 %1898 }
 0x327   : > { %3354 = vrot.lane.b32.xlu0 %v3313_v44, %s8010_s20 }
 0x328   : > { %v2418_v30 = vpop.permute.xlu1 %2417 }
 0x329   : > { %v2489_v48 = vmul.f32 %v9247_v54, %v2418_v30  ;;  %3541 = vrot.lane.b32.xlu1 %v9374_v26, %s8010_s20  ;;  %v3869_v54 = vld [vmem:[#allocation3 + $0x111] sm:$0xff] }
 0x32a   : > { %v2946_v33 = vpop.permute.xlu0 %2945  ;;  %v9590_v26 = vld [vmem:[%s11089_s1 + $0x4] ss:$0 sm:$0xff] }
 0x32b   : > { %v2521_v2 = vadd.f32 %v2489_v48, %v2256_v39  ;;  %3356 = vrot.lane.b32.xlu0 %v9580_v31, %s8010_s20  ;;  %v1959_v62 = vmul.f32 %v9590_v26, %v9532_v7  ;;  %v3017_v49 = vmul.f32 %v9253_v60, %v2946_v33  ;;  %v1727_v60 = vadd.f32 %v1695_v51, %v1463_v34  ;;  %v3997_v30 = vld [vmem:[#allocation3 + $0x112] sm:$0xff]  ;;  %v9650_v34 = vld [vmem:[%s11089_s1 + $0x1] ss:$0 sm:$0xff] }
 0x32c   : > { %v9594_v53 = vpop.permute.xlu1 %1629  ;;  %v3294_v9 = vld [vmem:[#allocation3 + $0x109] sm:$0xff] }
 0x32d   : > { %v4043_v12 = vld [vmem:[#allocation4 + $0x8] sm:$0xff]  ;;  %v3485_v41 = vld [vmem:[#allocation3 + $0x108] sm:$0xff]  ;;  %v2785_v4 = vadd.f32 %v2753_v58, %v2521_v2  ;;  %3543 = vrot.lane.b32.xlu1 %v9425_v5, %s8010_s20  ;;  %v3315_v10 = vpack.c.bf16 %v3295_v47, %v3294_v9  ;;  %v3486_v27 = vld [vmem:[#allocation3 + $0x110] sm:$0xff]  ;;  %v1991_v48 = vadd.f32 %v1959_v62, %v1727_v60 }
 0x32e   : > { %4497 = vmatprep.mubr.bf16.mxu0 %v4043_v12  ;;  %v3423_v3 = vld [vmem:[#allocation3 + $0x10a] sm:$0xff]  ;;  %v9599_v44 = vpop.permute.xlu0 %2162  ;;  %v3507_v7 = vpack.c.bf16 %v3486_v27, %v3485_v41  ;;  %v9608_v5 = vld [vmem:[%s11089_s1 + $0x5] ss:$0 sm:$0xff]  ;;  %v9630_v58 = vld [vmem:[%s11089_s1 + $0x6] ss:$0 sm:$0xff] }
 0x32f   : > { %v3868_v38 = vld [vmem:[#allocation3 + $0x109] sm:$0xff]  ;;  %4498 = vmatmul.mubr.bf16.vlgmr.msra.gmra.mrb[0].mxu0 %v4042_v25  ;;  %v9601_v21 = vpack.c.bf16 %v3424_v28, %v3423_v3  ;;  %v2223_v55 = vmul.f32 %v9608_v5, %v9554_v0  ;;  %v3049_v42 = vadd.f32 %v3017_v49, %v2785_v4  ;;  %3358 = vrot.lane.b32.xlu0 %v3315_v10, %s8010_s20  ;;  %v11233_v62 = vld [vmem:[#allocation44_spill] sm:$0xff]  ;;  %v11234_v10 = vld [vmem:[#allocation26_spill] sm:$0xff] }
 0x330   : > { %v9603_v29 = vpack.c.bf16 %v3869_v54, %v3868_v38  ;;  %v3804_v23 = vld [vmem:[#allocation3 + $0x108] sm:$0xff]  ;;  %v3805_v50 = vld [vmem:[#allocation3 + $0x110] sm:$0xff]  ;;  %v2677_v59 = vpop.permute.xlu1 %2676  ;;  %3267 = vst.msk [vmem:[#allocation4 + $0x1b8] sm:$0xff] %vm3129_vm3, %v3507_v7  ;;  %v1170_v12 = vmul.f32 %v9650_v34, %v11233_v62  ;;  %v11235_v38 = vld [vmem:[#allocation63_spill] sm:$0xff] }
 0x331   : > { %v3996_v37 = vld [vmem:[#allocation3 + $0x10a] sm:$0xff]  ;;  %v3827_v63 = vpack.c.bf16 %v3805_v50, %v3804_v23  ;;  %3460 = vst.msk [vmem:[#allocation4 + $0x1c0] sm:$0xff] %vm3129_vm3, %v9601_v21  ;;  %v3088_v6 = vadd.f32 %v9275_v17, %v3049_v42  ;;  %3545 = vrot.lane.b32.xlu1 %v9475_v35, %s8010_s20  ;;  %v2255_v33 = vadd.f32 %v2223_v55, %v1991_v48  ;;  %v9638_v35 = vld [vmem:[%s11089_s1 + $0x7] ss:$0 sm:$0xff]  ;;  %v9673_v3 = vld [vmem:[%s11089_s1 + $0x2] ss:$0 sm:$0xff] }
 0x332   : > { %3651 = vst.msk [vmem:[#allocation4 + $0x1a0] sm:$0xff] %vm3129_vm3, %v9603_v29  ;;  %v4019_v39 = vpack.c.bf16 %v3997_v30, %v3996_v37  ;;  %v9622_v0 = vpop.permute.xlu0 %2422  ;;  %v2488_v17 = vmul.f32 %v9630_v58, %v9523_v46  ;;  %v2752_v2 = vmul.f32 %v9638_v35, %v2677_v59  ;;  %v7919_v28 = vld [vmem:[%s11091_s3 + $0x100] sm:$0xff]   ;;  %v1434_v23 = vmul.f32 %v9673_v3, %v11235_v38 }
 0x333   : > { %3843 = vst.msk [vmem:[#allocation4 + $0x180] sm:$0xff] %vm3129_vm3, %v3827_v63  ;;  %v3120_v47 = vmax.f32 %v3088_v6, 0.0  ;;  %7807 = vmatprep.subr.bf16.mxu0 %v7919_v28  ;;  %v9666_v49 = vld [vmem:[%s11089_s1] ss:$0 sm:$0xff]  ;;  %v9680_v60 = vld [vmem:[%s11089_s1 + $0x3] ss:$0 sm:$0xff] }
 0x334   : > { %4035 = vst.msk [vmem:[#allocation4 + $0x188] sm:$0xff] %vm3129_vm3, %v4019_v39  ;;  %v9625_v51 = vpop.permute.xlu1 %1893  ;;  %v2520_v54 = vadd.f32 %v2488_v17, %v2255_v33  ;;  %7808 = vmatpush3.bf16.msra.mxu0 %v7919_v28  ;;  %v906_v27 = vmul.f32 %v9666_v49, %v11234_v10  ;;  %v1698_v55 = vmul.f32 %v9680_v60, %v9547_v1  ;;  %v9687_v42 = vld [vmem:[%s11090_s2] ss:$0 sm:$0xff]  ;;  %v11236_v1 = vld [vmem:[#allocation51_spill] sm:$0xff] }
 0x335   : > { %3199 = vst.msk [vmem:[#allocation3 + $0x129] sm:$0xff] %vm3129_vm3, %v3120_v47  ;;  %3547 = vrot.lane.b32.xlu1 %v9525_v8, %s8010_s20  ;;  %v9657_v8 = vld [vmem:[%s11089_s1 + $0x8] ss:$0 sm:$0xff]  ;;  %v1962_v39 = vmul.f32 %v9590_v26, %v9570_v16  ;;  %v2226_v47 = vmul.f32 %v9608_v5, %v9599_v44  ;;  %v1169_v17 = vmul.f32 %v9650_v34, %v11236_v1  ;;  %v11237_v28 = vld [vmem:[#allocation31_spill] sm:$0xff] }
 0x336   : > { %v3339_v25 = vpop.permute.xlu0 %3338  ;;  %v2784_v9 = vadd.f32 %v2752_v2, %v2520_v54  ;;  %v1202_v37 = vadd.f32 %v1170_v12, %v906_v27  ;;  %v905_v54 = vmul.f32 %v9666_v49, %v11237_v28  ;;  %v11238_v16 = vld [vmem:[#allocation70_spill] sm:$0xff]  ;;  %v1697_v10 = vmul.f32 %v9680_v60, %v9594_v53 }
 0x337   : > { %3386 = vst.msk [vmem:[#allocation4 + $0x28] sm:$0xff] %vm3384_vm6, %v3339_v25 }
 0x338   : > { %v2941_v46 = vpop.permute.xlu1 %2940  ;;  %v1466_v59 = vadd.f32 %v1434_v23, %v1202_v37 }
 0x339   : > { %v3016_v41 = vmul.f32 %v9657_v8, %v2941_v46  ;;  %3549 = vrot.lane.b32.xlu1 %v3507_v7, %s8010_s20  ;;  %v1433_v46 = vmul.f32 %v9673_v3, %v11238_v16 }
 0x33a   : > { %v9661_v4 = vpop.permute.xlu0 %1644  ;;  %v1730_v33 = vadd.f32 %v1698_v55, %v1466_v59 }
 0x33b   : > { %v3048_v7 = vadd.f32 %v3016_v41, %v2784_v9  ;;  %v1201_v9 = vadd.f32 %v1169_v17, %v905_v54 }
 0x33c   : > { %v2158_v50 = vpop.permute.xlu1 %2157  ;;  %v1994_v25 = vadd.f32 %v1962_v39, %v1730_v33  ;;  %v3680_v37 = vld [vmem:[#allocation3 + $0x12a] sm:$0xff]  ;;  %v1961_v33 = vmul.f32 %v9590_v26, %v9625_v51 }
 0x33d   : > { %v3087_v63 = vadd.f32 %v9687_v42, %v3048_v7  ;;  %v3297_v7 = vld [vmem:[#allocation3 + $0x129] sm:$0xff]  ;;  %v2225_v51 = vmul.f32 %v9608_v5, %v2158_v50 }
 0x33e   : > { %v2692_v30 = vpop.permute.xlu0 %2691  ;;  %v2258_v12 = vadd.f32 %v2226_v47, %v1994_v25  ;;  %v4047_v23 = vld [vmem:[#allocation4 + $0x28] sm:$0xff]  ;;  %v3616_v55 = vld [vmem:[#allocation3 + $0x129] sm:$0xff] }
 0x33f   : > { %v3119_v48 = vmax.f32 %v3087_v63, 0.0  ;;  %v2755_v27 = vmul.f32 %v9638_v35, %v2692_v30  ;;  %v1465_v63 = vadd.f32 %v1433_v46, %v1201_v9 }
 0x340   : > { %v3532_v6 = vpop.permute.xlu1 %3531 }
 0x341   : > { %3198 = vst.msk [vmem:[#allocation3 + $0x121] sm:$0xff] %vm3129_vm3, %v3119_v48 }
 0x342   : > { %3578 = vst.msk [vmem:[#allocation4 + $0x30] sm:$0xff] %vm3384_vm6, %v3532_v6  ;;  %v9698_v2 = vpop.permute.xlu0 %1908 }
 0x344   : > { %v2428_v62 = vpop.permute.xlu1 %2427 }
 0x345   : > { %v2491_v44 = vmul.f32 %v9630_v58, %v2428_v62 }
 0x346   : > { %v2956_v41 = vpop.permute.xlu0 %2955 }
 0x347   : > { %v2523_v38 = vadd.f32 %v2491_v44, %v2258_v12  ;;  %v3019_v1 = vmul.f32 %v9657_v8, %v2956_v41  ;;  %v1729_v44 = vadd.f32 %v1697_v10, %v1465_v63 }
 0x348   : > { %v9708_v59 = vpop.permute.xlu1 %1639  ;;  %v3487_v48 = vld [vmem:[#allocation3 + $0x120] sm:$0xff]  ;;  %v3488_v6 = vld [vmem:[#allocation3 + $0x128] sm:$0xff] }
 0x349   : > { %v4048_v39 = vld [vmem:[#allocation4 + $0x30] sm:$0xff]  ;;  %v2787_v47 = vadd.f32 %v2755_v27, %v2523_v38  ;;  %v3508_v53 = vpack.c.bf16 %v3488_v6, %v3487_v48  ;;  %v3807_v12 = vld [vmem:[#allocation3 + $0x128] sm:$0xff]  ;;  %v1993_v10 = vadd.f32 %v1961_v33, %v1729_v44  ;;  %v11240_v33 = vld [vmem:[#allocation46_spill] sm:$0xff] }
 0x34a   : > { %4505 = vmatprep.mubr.bf16.mxu0 %v4048_v39  ;;  %v3296_v30 = vld [vmem:[#allocation3 + $0x121] sm:$0xff]  ;;  %v2173_v28 = vpop.permute.xlu0 %2172 }
 0x34b   : > { %v3679_v17 = vld [vmem:[#allocation3 + $0x122] sm:$0xff]  ;;  %4506 = vmatmul.mubr.bf16.gmra.mrb[4].mxu0 %v4047_v23  ;;  %v9713_v54 = vpack.c.bf16 %v3297_v7, %v3296_v30  ;;  %v3051_v9 = vadd.f32 %v3019_v1, %v2787_v47  ;;  %3551 = vrot.lane.b32.xlu1 %v3508_v53, %s8010_s20  ;;  %3268 = vst.msk [vmem:[#allocation4 + $0x1e0] sm:$0xff] %vm3129_vm3, %v3508_v53 }
 0x34c   : > { %v3615_v25 = vld [vmem:[#allocation3 + $0x121] sm:$0xff]  ;;  %v9715_v16 = vpack.c.bf16 %v3680_v37, %v3679_v17  ;;  %v2687_v27 = vpop.permute.xlu1 %2686  ;;  %v2257_v23 = vadd.f32 %v2225_v51, %v1993_v10  ;;  %v1172_v47 = vmul.f32 %v9650_v34, %v11240_v33  ;;  %v11241_v17 = vld [vmem:[#allocation17_spill] sm:$0xff] }
 0x34d   : > { %11239 = vst [vmem:[#allocation9_spill] sm:$0xff] %v9713_v54  ;;  %v3636_v46 = vpack.c.bf16 %v3616_v55, %v3615_v25  ;;  %v3806_v62 = vld [vmem:[#allocation3 + $0x120] sm:$0xff]  ;;  %3360 = vrot.lane.b32.xlu0 %v9713_v54, %s8010_s20  ;;  %v3090_v50 = vadd.f32 %v9687_v42, %v3051_v9  ;;  %v2490_v55 = vmul.f32 %v9630_v58, %v9622_v0  ;;  %v7920_v0 = vld [vmem:[%s11091_s3 + $0x108] sm:$0xff]  }
 0x34e   : > { %v3828_v41 = vpack.c.bf16 %v3807_v12, %v3806_v62  ;;  %3461 = vst.msk [vmem:[#allocation4 + $0x1e8] sm:$0xff] %vm3129_vm3, %v9715_v16  ;;  %4036 = vst.msk [vmem:[#allocation4 + $0x1b0] sm:$0xff] %vm3129_vm3, %v9715_v16  ;;  %v9729_v38 = vpop.permute.xlu0 %2432  ;;  %v2754_v63 = vmul.f32 %v9638_v35, %v2687_v27  ;;  %v908_v25 = vmul.f32 %v9666_v49, %v11241_v17  ;;  %7809 = vmatprep.subr.bf16.mxu0 %v7920_v0  ;;  %v11244_v33 = vld [vmem:[#allocation24_spill] sm:$0xff] }
 0x34f   : > { %3652 = vst.msk [vmem:[#allocation4 + $0x1c8] sm:$0xff] %vm3129_vm3, %v3636_v46  ;;  %v3122_v7 = vmax.f32 %v3090_v50, 0.0  ;;  %v2522_v48 = vadd.f32 %v2490_v55, %v2257_v23  ;;  %v11242_v46 = vld [vmem:[#allocation65_spill] sm:$0xff]  ;;  %v1700_v9 = vmul.f32 %v9680_v60, %v9661_v4  ;;  %7810 = vmatpush3.bf16.msra.mxu0 %v7920_v0  ;;  %v1964_v50 = vmul.f32 %v9590_v26, %v9698_v2 }
 0x350   : > { %3844 = vst.msk [vmem:[#allocation4 + $0x1a8] sm:$0xff] %vm3129_vm3, %v3828_v41  ;;  %v1904_v37 = vpop.permute.xlu1 %1903  ;;  %v1436_v62 = vmul.f32 %v9673_v3, %v11242_v46  ;;  %v1204_v51 = vadd.f32 %v1172_v47, %v908_v25  ;;  %v907_v47 = vmul.f32 %v9666_v49, %v11244_v33  ;;  %v1699_v46 = vmul.f32 %v9680_v60, %v9708_v59 }
 0x351   : > { %3201 = vst.msk [vmem:[#allocation3 + $0x141] sm:$0xff] %vm3129_vm3, %v3122_v7  ;;  %v2786_v1 = vadd.f32 %v2754_v63, %v2522_v48  ;;  %v2228_v63 = vmul.f32 %v9608_v5, %v2173_v28 }
 0x352   : > { %v3341_v39 = vpop.permute.xlu0 %3340  ;;  %v1468_v10 = vadd.f32 %v1436_v62, %v1204_v51 }
 0x353   : > { %3387 = vst.msk [vmem:[#allocation4 + $0x50] sm:$0xff] %vm3384_vm6, %v3341_v39  ;;  %v11243_v39 = vld [vmem:[#allocation52_spill] sm:$0xff] }
 0x354   : > { %v2951_v6 = vpop.permute.xlu1 %2950  ;;  %v1732_v55 = vadd.f32 %v1700_v9, %v1468_v10  ;;  %v1171_v4 = vmul.f32 %v9650_v34, %v11243_v39  ;;  %v1963_v39 = vmul.f32 %v9590_v26, %v1904_v37 }
 0x355   : > { %v3018_v53 = vmul.f32 %v9657_v8, %v2951_v6 }
 0x356   : > { %v9739_v30 = vpop.permute.xlu0 %1654  ;;  %v1996_v6 = vadd.f32 %v1964_v50, %v1732_v55  ;;  %v1203_v17 = vadd.f32 %v1171_v4, %v907_v47 }
 0x357   : > { %v3050_v12 = vadd.f32 %v3018_v53, %v2786_v1  ;;  %v11245_v1 = vld [vmem:[#allocation71_spill] sm:$0xff] }
 0x358   : > { %v2168_v44 = vpop.permute.xlu1 %2167  ;;  %v1435_v2 = vmul.f32 %v9673_v3, %v11245_v1  ;;  %v2260_v0 = vadd.f32 %v2228_v63, %v1996_v6  ;;  %v3299_v9 = vld [vmem:[#allocation3 + $0x141] sm:$0xff] }
 0x359   : > { %v3089_v41 = vadd.f32 %v9687_v42, %v3050_v12  ;;  %v3618_v10 = vld [vmem:[#allocation3 + $0x141] sm:$0xff]  ;;  %v2227_v37 = vmul.f32 %v9608_v5, %v2168_v44 }
 0x35a   : > { %v2702_v27 = vpop.permute.xlu0 %2701  ;;  %v4052_v51 = vld [vmem:[#allocation4 + $0x50] sm:$0xff]  ;;  %v1467_v50 = vadd.f32 %v1435_v2, %v1203_v17 }
 0x35b   : > { %v3121_v23 = vmax.f32 %v3089_v41, 0.0  ;;  %v2757_v62 = vmul.f32 %v9638_v35, %v2702_v27  ;;  %v3682_v41 = vld [vmem:[#allocation3 + $0x142] sm:$0xff] }
 0x35c   : > { %v3534_v7 = vpop.permute.xlu1 %3533  ;;  %v1731_v54 = vadd.f32 %v1699_v46, %v1467_v50  ;;  %v2492_v50 = vmul.f32 %v9630_v58, %v9729_v38 }
 0x35d   : > { %3200 = vst.msk [vmem:[#allocation3 + $0x139] sm:$0xff] %vm3129_vm3, %v3121_v23 }
 0x35e   : > { %3579 = vst.msk [vmem:[#allocation4 + $0x58] sm:$0xff] %vm3384_vm6, %v3534_v7  ;;  %v9758_v48 = vpop.permute.xlu0 %1918  ;;  %v1995_v46 = vadd.f32 %v1963_v39, %v1731_v54  ;;  %v11247_v39 = vld [vmem:[#allocation48_spill] sm:$0xff] }
 0x360   : > { %v2438_v53 = vpop.permute.xlu1 %2437 }
 0x361   : > { %v2493_v28 = vmul.f32 %v9630_v58, %v2438_v53 }
 0x362   : > { %v2966_v25 = vpop.permute.xlu0 %2965 }
 0x363   : > { %v2525_v12 = vadd.f32 %v2493_v28, %v2260_v0  ;;  %v3021_v6 = vmul.f32 %v9657_v8, %v2966_v25 }
 0x364   : > { %v9768_v23 = vpop.permute.xlu1 %1649  ;;  %v3489_v55 = vld [vmem:[#allocation3 + $0x138] sm:$0xff]  ;;  %v3490_v63 = vld [vmem:[#allocation3 + $0x140] sm:$0xff] }
 0x365   : > { %v4053_v7 = vld [vmem:[#allocation4 + $0x58] sm:$0xff]  ;;  %v2789_v4 = vadd.f32 %v2757_v62, %v2525_v12  ;;  %v3509_v59 = vpack.c.bf16 %v3490_v63, %v3489_v55  ;;  %v3298_v33 = vld [vmem:[#allocation3 + $0x139] sm:$0xff] }
 0x366   : > { %4513 = vmatprep.mubr.bf16.mxu0 %v4053_v7  ;;  %v3681_v27 = vld [vmem:[#allocation3 + $0x13a] sm:$0xff]  ;;  %v2183_v1 = vpop.permute.xlu0 %2182  ;;  %v9772_v53 = vpack.c.bf16 %v3299_v9, %v3298_v33  ;;  %v2259_v9 = vadd.f32 %v2227_v37, %v1995_v46 }
 0x367   : > { %v3617_v47 = vld [vmem:[#allocation3 + $0x139] sm:$0xff]  ;;  %4514 = vmatmul.mubr.bf16.gmra.mrb[8].mxu0 %v4052_v51  ;;  %v9774_v2 = vpack.c.bf16 %v3682_v41, %v3681_v27  ;;  %v3053_v62 = vadd.f32 %v3021_v6, %v2789_v4  ;;  %3553 = vrot.lane.b32.xlu1 %v3509_v59, %s8010_s20  ;;  %3269 = vst.msk [vmem:[#allocation4 + $0x208] sm:$0xff] %vm3129_vm3, %v3509_v59 }
 0x368   : > { %11246 = vst [vmem:[#allocation6_spill] sm:$0xff] %v9772_v53  ;;  %v3637_v0 = vpack.c.bf16 %v3618_v10, %v3617_v47  ;;  %v3808_v28 = vld [vmem:[#allocation3 + $0x138] sm:$0xff]  ;;  %v3809_v17 = vld [vmem:[#allocation3 + $0x140] sm:$0xff]  ;;  %3362 = vrot.lane.b32.xlu0 %v9772_v53, %s8010_s20  ;;  %v2697_v12 = vpop.permute.xlu1 %2696  ;;  %v2524_v63 = vadd.f32 %v2492_v50, %v2259_v9  ;;  %v1174_v4 = vmul.f32 %v9650_v34, %v11247_v39  ;;  %v11251_v39 = vld [vmem:[#allocation33_spill] sm:$0xff] }
 0x369   : > { %v3829_v25 = vpack.c.bf16 %v3809_v17, %v3808_v28  ;;  %3462 = vst.msk [vmem:[#allocation4 + $0x210] sm:$0xff] %vm3129_vm3, %v9774_v2  ;;  %4037 = vst.msk [vmem:[#allocation4 + $0x1d8] sm:$0xff] %vm3129_vm3, %v9774_v2  ;;  %v3092_v44 = vadd.f32 %v9687_v42, %v3053_v62  ;;  %v2756_v7 = vmul.f32 %v9638_v35, %v2697_v12  ;;  %v11248_v27 = vld [vmem:[#allocation27_spill] sm:$0xff] }
 0x36a   : > { %3653 = vst.msk [vmem:[#allocation4 + $0x1f0] sm:$0xff] %vm3129_vm3, %v3637_v0  ;;  %v9788_v51 = vpop.permute.xlu0 %2442  ;;  %v910_v38 = vmul.f32 %v9666_v49, %v11248_v27  ;;  %v11249_v47 = vld [vmem:[#allocation67_spill] sm:$0xff]  ;;  %v1702_v62 = vmul.f32 %v9680_v60, %v9739_v30  ;;  %v11250_v30 = vld [vmem:[#allocation53_spill] sm:$0xff] }
 0x36b   : > { %3845 = vst.msk [vmem:[#allocation4 + $0x1d0] sm:$0xff] %vm3129_vm3, %v3829_v25  ;;  %v3124_v41 = vmax.f32 %v3092_v44, 0.0  ;;  %v2788_v6 = vadd.f32 %v2756_v7, %v2524_v63  ;;  %v1438_v0 = vmul.f32 %v9673_v3, %v11249_v47  ;;  %v1966_v44 = vmul.f32 %v9590_v26, %v9758_v48 }
 0x36c   : > { %v1914_v10 = vpop.permute.xlu1 %1913  ;;  %v1206_v37 = vadd.f32 %v1174_v4, %v910_v38  ;;  %v1173_v63 = vmul.f32 %v9650_v34, %v11250_v30  ;;  %v909_v4 = vmul.f32 %v9666_v49, %v11251_v39 }
 0x36d   : > { %3203 = vst.msk [vmem:[#allocation3 + $0x159] sm:$0xff] %vm3129_vm3, %v3124_v41  ;;  %v7921_v41 = vld [vmem:[%s11091_s3 + $0x110] sm:$0xff]  }
 0x36e   : > { %v3343_v55 = vpop.permute.xlu0 %3342  ;;  %v1470_v46 = vadd.f32 %v1438_v0, %v1206_v37  ;;  %7811 = vmatprep.subr.bf16.mxu0 %v7921_v41  ;;  %v1205_v47 = vadd.f32 %v1173_v63, %v909_v4 }
 0x36f   : > { %3388 = vst.msk [vmem:[#allocation4 + $0x78] sm:$0xff] %vm3384_vm6, %v3343_v55  ;;  %v2230_v55 = vmul.f32 %v9608_v5, %v2183_v1  ;;  %7812 = vmatpush3.bf16.msra.mxu0 %v7921_v41 }
 0x370   : > { %v2961_v54 = vpop.permute.xlu1 %2960  ;;  %v1734_v7 = vadd.f32 %v1702_v62, %v1470_v46 }
 0x371   : > { %v3020_v59 = vmul.f32 %v9657_v8, %v2961_v54 }
 0x372   : > { %v9798_v33 = vpop.permute.xlu0 %1664  ;;  %v1998_v48 = vadd.f32 %v1966_v44, %v1734_v7 }
 0x373   : > { %v3052_v28 = vadd.f32 %v3020_v59, %v2788_v6  ;;  %v11252_v6 = vld [vmem:[#allocation72_spill] sm:$0xff] }
 0x374   : > { %v2178_v17 = vpop.permute.xlu1 %2177  ;;  %v1437_v59 = vmul.f32 %v9673_v3, %v11252_v6  ;;  %v2262_v1 = vadd.f32 %v2230_v55, %v1998_v48  ;;  %v3684_v46 = vld [vmem:[#allocation3 + $0x15a] sm:$0xff]  ;;  %v1965_v55 = vmul.f32 %v9590_v26, %v1914_v10 }
 0x375   : > { %v3091_v25 = vadd.f32 %v9687_v42, %v3052_v28  ;;  %v1701_v28 = vmul.f32 %v9680_v60, %v9768_v23  ;;  %v3620_v30 = vld [vmem:[#allocation3 + $0x159] sm:$0xff]  ;;  %v2229_v10 = vmul.f32 %v9608_v5, %v2178_v17 }
 0x376   : > { %v2712_v12 = vpop.permute.xlu0 %2711  ;;  %v1469_v44 = vadd.f32 %v1437_v59, %v1205_v47  ;;  %v4057_v39 = vld [vmem:[#allocation4 + $0x78] sm:$0xff] }
 0x377   : > { %v3123_v9 = vmax.f32 %v3091_v25, 0.0  ;;  %v2759_v37 = vmul.f32 %v9638_v35, %v2712_v12  ;;  %v3301_v25 = vld [vmem:[#allocation3 + $0x159] sm:$0xff] }
 0x378   : > { %v3536_v50 = vpop.permute.xlu1 %3535  ;;  %v1733_v53 = vadd.f32 %v1701_v28, %v1469_v44 }
 0x379   : > { %3202 = vst.msk [vmem:[#allocation3 + $0x151] sm:$0xff] %vm3129_vm3, %v3123_v9 }
 0x37a   : > { %3580 = vst.msk [vmem:[#allocation4 + $0x80] sm:$0xff] %vm3384_vm6, %v3536_v50  ;;  %v9817_v54 = vpop.permute.xlu0 %1928  ;;  %v1997_v28 = vadd.f32 %v1965_v55, %v1733_v53 }
 0x37c   : > { %v2448_v27 = vpop.permute.xlu1 %2447  ;;  %v2261_v44 = vadd.f32 %v2229_v10, %v1997_v28  ;;  %v11256_v10 = vld [vmem:[#allocation69_spill] sm:$0xff] }
 0x37d   : > { %v2495_v38 = vmul.f32 %v9630_v58, %v2448_v27 }
 0x37e   : > { %v2976_v0 = vpop.permute.xlu0 %2975 }
 0x37f   : > { %v2527_v62 = vadd.f32 %v2495_v38, %v2262_v1  ;;  %v3023_v63 = vmul.f32 %v9657_v8, %v2976_v0 }
 0x380   : > { %v9827_v9 = vpop.permute.xlu1 %1659  ;;  %v3491_v50 = vld [vmem:[#allocation3 + $0x150] sm:$0xff]  ;;  %v3492_v7 = vld [vmem:[#allocation3 + $0x158] sm:$0xff] }
 0x381   : > { %v4058_v41 = vld [vmem:[#allocation4 + $0x80] sm:$0xff]  ;;  %v2791_v48 = vadd.f32 %v2759_v37, %v2527_v62  ;;  %v3510_v23 = vpack.c.bf16 %v3492_v7, %v3491_v50  ;;  %v3811_v47 = vld [vmem:[#allocation3 + $0x158] sm:$0xff]  ;;  %v2494_v7 = vmul.f32 %v9630_v58, %v9788_v51 }
 0x382   : > { %4521 = vmatprep.mubr.bf16.mxu0 %v4058_v41  ;;  %v3300_v4 = vld [vmem:[#allocation3 + $0x151] sm:$0xff]  ;;  %v2193_v6 = vpop.permute.xlu0 %2192  ;;  %v11255_v51 = vld [vmem:[#allocation29_spill] sm:$0xff] }
 0x383   : > { %v3683_v12 = vld [vmem:[#allocation3 + $0x152] sm:$0xff]  ;;  %4522 = vmatmul.mubr.bf16.gmra.mrb[12].mxu0 %v4057_v39  ;;  %v9831_v27 = vpack.c.bf16 %v3301_v25, %v3300_v4  ;;  %v3055_v37 = vadd.f32 %v3023_v63, %v2791_v48  ;;  %3555 = vrot.lane.b32.xlu1 %v3510_v23, %s8010_s20  ;;  %3270 = vst.msk [vmem:[#allocation4 + $0x230] sm:$0xff] %vm3129_vm3, %v3510_v23 }
 0x384   : > { %v9833_v59 = vpack.c.bf16 %v3684_v46, %v3683_v12  ;;  %v3619_v1 = vld [vmem:[#allocation3 + $0x151] sm:$0xff]  ;;  %v2707_v62 = vpop.permute.xlu1 %2706  ;;  %v2526_v53 = vadd.f32 %v2494_v7, %v2261_v44  ;;  %v11258_v44 = vld [vmem:[#allocation73_spill] sm:$0xff]  ;;  %v1704_v7 = vmul.f32 %v9680_v60, %v9798_v33 }
 0x385   : > { %v3810_v38 = vld [vmem:[#allocation3 + $0x150] sm:$0xff]  ;;  %v3638_v0 = vpack.c.bf16 %v3620_v30, %v3619_v1  ;;  %3364 = vrot.lane.b32.xlu0 %v9831_v27, %s8010_s20  ;;  %v3094_v17 = vadd.f32 %v9687_v42, %v3055_v37  ;;  %v2758_v30 = vmul.f32 %v9638_v35, %v2707_v62  ;;  %v1440_v37 = vmul.f32 %v9673_v3, %v11256_v10 }
 0x386   : > { %3463 = vst.msk [vmem:[#allocation4 + $0x238] sm:$0xff] %vm3129_vm3, %v9833_v59  ;;  %v3830_v25 = vpack.c.bf16 %v3811_v47, %v3810_v38  ;;  %4038 = vst.msk [vmem:[#allocation4 + $0x200] sm:$0xff] %vm3129_vm3, %v9833_v59  ;;  %v9846_v46 = vpop.permute.xlu0 %2452  ;;  %v11253_v63 = vld [vmem:[#allocation50_spill] sm:$0xff]  ;;  %v912_v47 = vmul.f32 %v9666_v49, %v11255_v51 }
 0x387   : > { %3654 = vst.msk [vmem:[#allocation4 + $0x218] sm:$0xff] %vm3129_vm3, %v3638_v0  ;;  %v3126_v41 = vmax.f32 %v3094_v17, 0.0  ;;  %v1176_v39 = vmul.f32 %v9650_v34, %v11253_v63  ;;  %v2790_v23 = vadd.f32 %v2758_v30, %v2526_v53  ;;  %v11254_v12 = vld [vmem:[#allocation54_spill] sm:$0xff]  ;;  %v1703_v63 = vmul.f32 %v9680_v60, %v9827_v9 }
 0x388   : > { %3846 = vst.msk [vmem:[#allocation4 + $0x1f8] sm:$0xff] %vm3129_vm3, %v3830_v25  ;;  %v1924_v50 = vpop.permute.xlu1 %1923  ;;  %v1175_v1 = vmul.f32 %v9650_v34, %v11254_v12  ;;  %v11257_v62 = vld [vmem:[#allocation34_spill] sm:$0xff]  ;;  %v2232_v12 = vmul.f32 %v9608_v5, %v2193_v6 }
 0x389   : > { %3205 = vst.msk [vmem:[#allocation3 + $0x171] sm:$0xff] %vm3129_vm3, %v3126_v41  ;;  %v911_v25 = vmul.f32 %v9666_v49, %v11257_v62  ;;  %v1208_v17 = vadd.f32 %v1176_v39, %v912_v47  ;;  %v1439_v41 = vmul.f32 %v9673_v3, %v11258_v44  ;;  %v7922_v39 = vld [vmem:[%s11091_s3 + $0xc0] sm:$0xff]   ;;  %v7924_v47 = vld [vmem:[%s11091_s3 + $0x118] sm:$0xff]   ;;  %v7926_v6 = vld [vmem:[%s11091_s3 + $0x88] sm:$0xff]  }
 0x38a   : > { %v3345_v48 = vpop.permute.xlu0 %3344  ;;  %v7923_v3 = vld [vmem:[%s11091_s3 + $0x80] sm:$0xff]   ;;  %7431 = vmatprep.subr.bf16.mxu1 %v7922_v39  ;;  %7813 = vmatprep.subr.bf16.mxu0 %v7924_v47 }
 0x38b   : > { %3389 = vst.msk [vmem:[#allocation4 + $0xa0] sm:$0xff] %vm3384_vm6, %v3345_v48  ;;  %v1207_v30 = vadd.f32 %v1175_v1, %v911_v25  ;;  %v1472_v53 = vadd.f32 %v1440_v37, %v1208_v17  ;;  %v1967_v1 = vmul.f32 %v9590_v26, %v1924_v50  ;;  %7432 = vmatpush3.bf16.msra.mxu1 %v7923_v3 }
 0x38c   : > { %v2971_v55 = vpop.permute.xlu1 %2970  ;;  %7814 = vmatpush3.bf16.msra.mxu0 %v7924_v47 }
 0x38d   : > { %v3022_v4 = vmul.f32 %v9657_v8, %v2971_v55  ;;  %v1968_v55 = vmul.f32 %v9590_v26, %v9817_v54  ;;  %v7925_v26 = vld [vmem:[%s11091_s3 + $0xc8] sm:$0xff]  }
 0x38e   : > { %v2722_v38 = vpop.permute.xlu0 %2721  ;;  %7433 = vmatprep.subr.bf16.mxu1 %v7925_v26 }
 0x38f   : > { %v3054_v0 = vadd.f32 %v3022_v4, %v2790_v23  ;;  %v1471_v23 = vadd.f32 %v1439_v41, %v1207_v30  ;;  %v1736_v4 = vadd.f32 %v1704_v7, %v1472_v53  ;;  %7434 = vmatpush3.bf16.msra.mxu1 %v7926_v6  ;;  %v2761_v62 = vmul.f32 %v9638_v35, %v2722_v38  ;;  %v7927_v7 = vld [vmem:[%s11091_s3 + $0xd0] sm:$0xff]   ;;  %v7929_v6 = vld [vmem:[%s11091_s3 + $0xd8] sm:$0xff]  }
 0x390   : > { %v2188_v28 = vpop.permute.xlu1 %2187  ;;  %v3303_v44 = vld [vmem:[#allocation3 + $0x171] sm:$0xff]  ;;  %v2496_v53 = vmul.f32 %v9630_v58, %v9846_v46  ;;  %7435 = vmatprep.subr.bf16.mxu1 %v7927_v7 }
 0x391   : > { %v3093_v34 = vadd.f32 %v9687_v42, %v3054_v0  ;;  %v2000_v54 = vadd.f32 %v1968_v55, %v1736_v4  ;;  %v1735_v9 = vadd.f32 %v1703_v63, %v1471_v23  ;;  %v2231_v51 = vmul.f32 %v9608_v5, %v2188_v28  ;;  %v3686_v41 = vld [vmem:[#allocation3 + $0x172] sm:$0xff] }
 0x392   : > { %v2986_v48 = vpop.permute.xlu0 %2985  ;;  %v4062_v17 = vld [vmem:[#allocation4 + $0xa0] sm:$0xff] }
 0x393   : > { %v3125_v49 = vmax.f32 %v3093_v34, 0.0  ;;  %v2264_v10 = vadd.f32 %v2232_v12, %v2000_v54  ;;  %v1999_v37 = vadd.f32 %v1967_v1, %v1735_v9  ;;  %v7928_v34 = vld [vmem:[%s11091_s3 + $0x90] sm:$0xff]   ;;  %v3622_v30 = vld [vmem:[#allocation3 + $0x171] sm:$0xff]  ;;  %v3025_v38 = vmul.f32 %v9657_v8, %v2986_v48 }
 0x394   : > { %v3538_v33 = vpop.permute.xlu1 %3537  ;;  %7436 = vmatpush3.bf16.msra.mxu1 %v7928_v34  ;;  %v7933_v34 = vld [vmem:[%s11091_s3 + $0xe8] sm:$0xff]  }
 0x395   : > { %3204 = vst.msk [vmem:[#allocation3 + $0x169] sm:$0xff] %vm3129_vm3, %v3125_v49  ;;  %v2263_v25 = vadd.f32 %v2231_v51, %v1999_v37  ;;  %7437 = vmatprep.subr.bf16.mxu1 %v7929_v6 }
 0x396   : > { %3581 = vst.msk [vmem:[#allocation4 + $0xa8] sm:$0xff] %vm3384_vm6, %v3538_v33  ;;  %v3347_v60 = vpop.permute.xlu0 %3346 }
 0x397   : > { %3390 = vst.msk [vmem:[#allocation4 + $0xc8] sm:$0xff] %vm3384_vm6, %v3347_v60  ;;  %v2528_v47 = vadd.f32 %v2496_v53, %v2263_v25  ;;  %v7935_v53 = vld [vmem:[%s11091_s3 + $0xf0] sm:$0xff]  }
 0x398   : > { %v2458_v50 = vpop.permute.xlu1 %2457 }
 0x399   : > { %v2497_v0 = vmul.f32 %v9630_v58, %v2458_v50 }
 0x39a   : > { %v3349_v5 = vpop.permute.xlu0 %3348 }
 0x39b   : > { %v2529_v28 = vadd.f32 %v2497_v0, %v2264_v10  ;;  %3391 = vst.msk [vmem:[#allocation4 + $0xf0] sm:$0xff] %vm3384_vm6, %v3349_v5  ;;  %v7930_v0 = vld [vmem:[%s11091_s3 + $0x98] sm:$0xff]  }
 0x39c   : > { %v2717_v55 = vpop.permute.xlu1 %2716  ;;  %v3493_v49 = vld [vmem:[#allocation3 + $0x168] sm:$0xff]  ;;  %v3494_v39 = vld [vmem:[#allocation3 + $0x170] sm:$0xff]  ;;  %7438 = vmatpush3.bf16.msra.mxu1 %v7930_v0 }
 0x39d   : > { %v4063_v63 = vld [vmem:[#allocation4 + $0xa8] sm:$0xff]  ;;  %v2793_v3 = vadd.f32 %v2761_v62, %v2529_v28  ;;  %v2760_v33 = vmul.f32 %v9638_v35, %v2717_v55  ;;  %v3511_v23 = vpack.c.bf16 %v3494_v39, %v3493_v49  ;;  %v3302_v4 = vld [vmem:[#allocation3 + $0x169] sm:$0xff] }
 0x39e   : > { %4529 = vmatprep.mubr.bf16.mxu0 %v4063_v63  ;;  %v3685_v12 = vld [vmem:[#allocation3 + $0x16a] sm:$0xff]  ;;  %v3351_v60 = vpop.permute.xlu0 %3350  ;;  %v9908_v54 = vpack.c.bf16 %v3303_v44, %v3302_v4  ;;  %v4067_v63 = vld [vmem:[#allocation4 + $0xc8] sm:$0xff] }
 0x39f   : > { %v3621_v1 = vld [vmem:[#allocation3 + $0x169] sm:$0xff]  ;;  %4530 = vmatmul.mubr.bf16.gmra.mrb[16].mxu0 %v4062_v17  ;;  %v9910_v58 = vpack.c.bf16 %v3686_v41, %v3685_v12  ;;  %v3057_v51 = vadd.f32 %v3025_v38, %v2793_v3  ;;  %3392 = vst.msk [vmem:[#allocation4 + $0x118] sm:$0xff] %vm3384_vm6, %v3351_v60  ;;  %3557 = vrot.lane.b32.xlu1 %v3511_v23, %s8010_s20  ;;  %v7936_v38 = vld [vmem:[%s11091_s3 + $0xb0] sm:$0xff]  }
 0x3a0   : > { %v3639_v46 = vpack.c.bf16 %v3622_v30, %v3621_v1  ;;  %v3812_v48 = vld [vmem:[#allocation3 + $0x168] sm:$0xff]  ;;  %v3813_v9 = vld [vmem:[#allocation3 + $0x170] sm:$0xff]  ;;  %3271 = vst.msk [vmem:[#allocation4 + $0x258] sm:$0xff] %vm3129_vm3, %v3511_v23  ;;  %3366 = vrot.lane.b32.xlu0 %v9908_v54, %s8010_s20  ;;  %v2981_v26 = vpop.permute.xlu1 %2980  ;;  %v2792_v10 = vadd.f32 %v2760_v33, %v2528_v47 }
 0x3a1   : > { %v3831_v35 = vpack.c.bf16 %v3813_v9, %v3812_v48  ;;  %3464 = vst.msk [vmem:[#allocation4 + $0x260] sm:$0xff] %vm3129_vm3, %v9910_v58  ;;  %4039 = vst.msk [vmem:[#allocation4 + $0x228] sm:$0xff] %vm3129_vm3, %v9910_v58  ;;  %v3096_v50 = vadd.f32 %v9687_v42, %v3057_v51  ;;  %v3024_v37 = vmul.f32 %v9657_v8, %v2981_v26  ;;  %v7931_v28 = vld [vmem:[%s11091_s3 + $0xe0] sm:$0xff]   ;;  %v7937_v33 = vld [vmem:[%s11091_s3 + $0xf8] sm:$0xff]  }
 0x3a2   : > { %3655 = vst.msk [vmem:[#allocation4 + $0x240] sm:$0xff] %vm3129_vm3, %v3639_v46  ;;  %v3353_v5 = vpop.permute.xlu0 %3352  ;;  %v7932_v8 = vld [vmem:[%s11091_s3 + $0xa0] sm:$0xff]   ;;  %7439 = vmatprep.subr.bf16.mxu1 %v7931_v28  ;;  %v7938_v48 = vld [vmem:[%s11091_s3 + $0xb8] sm:$0xff]   ;;  %v4072_v6 = vld [vmem:[#allocation4 + $0xf0] sm:$0xff] }
 0x3a3   : > { %3847 = vst.msk [vmem:[#allocation4 + $0x220] sm:$0xff] %vm3129_vm3, %v3831_v35  ;;  %v3128_v62 = vmax.f32 %v3096_v50, 0.0  ;;  %v3056_v25 = vadd.f32 %v3024_v37, %v2792_v10  ;;  %7440 = vmatpush3.bf16.msra.mxu1 %v7932_v8 }
 0x3a4   : > { %3393 = vst.msk [vmem:[#allocation4 + $0x140] sm:$0xff] %vm3384_vm6, %v3353_v5  ;;  %3721 = vrot.lane.b32.xlu0 %v8973_v45, %s8010_s20  ;;  %v3540_v17 = vpop.permute.xlu1 %3539  ;;  %v7934_v45 = vld [vmem:[%s11091_s3 + $0xa8] sm:$0xff]   ;;  %7441 = vmatprep.subr.bf16.mxu1 %v7933_v34 }
 0x3a5   : > { %3207 = vst.msk [vmem:[#allocation3 + $0x189] sm:$0xff] %vm3129_vm3, %v3128_v62  ;;  %v3095_v44 = vadd.f32 %v9687_v42, %v3056_v25 }
 0x3a6   : > { %3582 = vst.msk [vmem:[#allocation4 + $0xd0] sm:$0xff] %vm3384_vm6, %v3540_v17  ;;  %v3355_v41 = vpop.permute.xlu0 %3354  ;;  %v4077_v37 = vld [vmem:[#allocation4 + $0x118] sm:$0xff] }
 0x3a7   : > { %v3127_v7 = vmax.f32 %v3095_v44, 0.0  ;;  %3394 = vst.msk [vmem:[#allocation4 + $0x168] sm:$0xff] %vm3384_vm6, %v3355_v41  ;;  %7442 = vmatpush3.bf16.msra.mxu1 %v7934_v45 }
 0x3a8   : > { %3723 = vrot.lane.b32.xlu0 %v9013_v43, %s8010_s20  ;;  %v3542_v42 = vpop.permute.xlu1 %3541  ;;  %7443 = vmatprep.subr.bf16.mxu1 %v7935_v53 }
 0x3a9   : > { %3206 = vst.msk [vmem:[#allocation3 + $0x181] sm:$0xff] %vm3129_vm3, %v3127_v7 }
 0x3aa   : > { %3583 = vst.msk [vmem:[#allocation4 + $0xf8] sm:$0xff] %vm3384_vm6, %v3542_v42  ;;  %v3357_v30 = vpop.permute.xlu0 %3356  ;;  %v4008_v42 = vld [vmem:[#allocation3 + $0x19a] sm:$0xff] }
 0x3ab   : > { %3395 = vst.msk [vmem:[#allocation4 + $0x190] sm:$0xff] %vm3384_vm6, %v3357_v30  ;;  %7444 = vmatpush3.bf16.msra.mxu1 %v7936_v38  ;;  %v4009_v30 = vld [vmem:[#allocation3 + $0x1a2] sm:$0xff] }
 0x3ac   : > { %3725 = vrot.lane.b32.xlu0 %v9060_v24, %s8010_s20  ;;  %v3544_v43 = vpop.permute.xlu1 %3543  ;;  %v3688_v39 = vld [vmem:[#allocation3 + $0x18a] sm:$0xff]  ;;  %7445 = vmatprep.subr.bf16.mxu1 %v7937_v33  ;;  %v4025_v38 = vpack.c.bf16 %v4009_v30, %v4008_v42 }
 0x3ad   : > { %v4068_v55 = vld [vmem:[#allocation4 + $0xd0] sm:$0xff]  ;;  %3584 = vst.msk [vmem:[#allocation4 + $0x120] sm:$0xff] %vm3384_vm6, %v3544_v43  ;;  %v3879_v3 = vld [vmem:[#allocation3 + $0x189] sm:$0xff] }
 0x3ae   : > { %4537 = vmatprep.mubr.bf16.mxu0 %v4068_v55  ;;  %v3359_v49 = vpop.permute.xlu0 %3358  ;;  %4041 = vst.msk [vmem:[#allocation4 + $0x278] sm:$0xff] %vm3129_vm3, %v4025_v38  ;;  %v4086_v42 = vld [vmem:[#allocation4 + $0x160] sm:$0xff] }
 0x3af   : > { %4538 = vmatmul.mubr.bf16.gmra.mrb[20].mxu0 %v4067_v63  ;;  %3396 = vst.msk [vmem:[#allocation4 + $0x1b8] sm:$0xff] %vm3384_vm6, %v3359_v49  ;;  %7446 = vmatpush3.bf16.msra.mxu1 %v7938_v48 }
 0x3b0   : > { %3727 = vrot.lane.b32.xlu0 %v9140_v61, %s8010_s20  ;;  %v3546_v24 = vpop.permute.xlu1 %3545  ;;  %v3495_v4 = vld [vmem:[#allocation3 + $0x180] sm:$0xff]  ;;  %v3496_v12 = vld [vmem:[#allocation3 + $0x188] sm:$0xff] }
 0x3b1   : > { %v4073_v23 = vld [vmem:[#allocation4 + $0xf8] sm:$0xff]  ;;  %3585 = vst.msk [vmem:[#allocation4 + $0x148] sm:$0xff] %vm3384_vm6, %v3546_v24  ;;  %v3512_v1 = vpack.c.bf16 %v3496_v12, %v3495_v4  ;;  %v3814_v61 = vld [vmem:[#allocation3 + $0x180] sm:$0xff] }
 0x3b2   : > { %4545 = vmatprep.mubr.bf16.mxu0 %v4073_v23  ;;  %v3687_v60 = vld [vmem:[#allocation3 + $0x182] sm:$0xff] }
 0x3b3   : > { %v3878_v46 = vld [vmem:[#allocation3 + $0x181] sm:$0xff]  ;;  %v9974_v9 = vpack.c.bf16 %v3688_v39, %v3687_v60  ;;  %3559 = vrot.lane.b32.xlu1 %v3512_v1, %s8010_s20  ;;  %v3816_v39 = vld [vmem:[#allocation3 + $0x198] sm:$0xff] }
 0x3b4   : > { %v9976_v51 = vpack.c.bf16 %v3879_v3, %v3878_v46  ;;  %v3815_v47 = vld [vmem:[#allocation3 + $0x188] sm:$0xff]  ;;  %3729 = vrot.lane.b32.xlu0 %v9227_v18, %s8010_s20  ;;  %v3548_v26 = vpop.permute.xlu1 %3547  ;;  %v4078_v50 = vld [vmem:[#allocation4 + $0x120] sm:$0xff]  ;;  %v3817_v3 = vld [vmem:[#allocation3 + $0x1a0] sm:$0xff] }
 0x3b5   : > { %v3832_v35 = vpack.c.bf16 %v3815_v47, %v3814_v61  ;;  %4040 = vst.msk [vmem:[#allocation4 + $0x250] sm:$0xff] %vm3129_vm3, %v9974_v9  ;;  %v3833_v24 = vpack.c.bf16 %v3817_v3, %v3816_v39  ;;  %v10064_v60 = vld [vmem:[#allocation4 + $0x278] sm:$0xff]  ;;  %v4091_v3 = vld [vmem:[#allocation4 + $0x188] sm:$0xff] }
 0x3b6   : > { %3656 = vst.msk [vmem:[#allocation4 + $0x268] sm:$0xff] %vm3129_vm3, %v9976_v51  ;;  %5843 = vst.msk [vmem:[#allocation4 + $0x278] sm:$0xff] %vm3129_vm3, %v4025_v38 }
 0x3b7   : > { %3586 = vst.msk [vmem:[#allocation4 + $0x170] sm:$0xff] %vm3384_vm6, %v3548_v26  ;;  %4546 = vmatmul.mubr.bf16.gmra.mrb[24].mxu0 %v4072_v6  ;;  %3914 = vrot.lane.b32.xlu1 %v9015_v20, %s8010_s20 }
 0x3b8   : > { %3848 = vst.msk [vmem:[#allocation4 + $0x248] sm:$0xff] %vm3129_vm3, %v3832_v35  ;;  %4553 = vmatprep.mubr.bf16.mxu0 %v4078_v50  ;;  %3731 = vrot.lane.b32.xlu0 %v9323_v19, %s8010_s20  ;;  %v3550_v18 = vpop.permute.xlu1 %3549  ;;  %v4083_v20 = vld [vmem:[#allocation4 + $0x148] sm:$0xff]  ;;  %3849 = vst.msk [vmem:[#allocation4 + $0x270] sm:$0xff] %vm3129_vm3, %v3833_v24  ;;  %v4046_v35 = vld [vmem:[#allocation4 + $0x20] sm:$0xff] }
 0x3b9   : > { %3587 = vst.msk [vmem:[#allocation4 + $0x198] sm:$0xff] %vm3384_vm6, %v3550_v18 }
 0x3bb   : > { %3916 = vrot.lane.b32.xlu1 %v9065_v22, %s8010_s20  ;;  %v4082_v22 = vld [vmem:[#allocation4 + $0x140] sm:$0xff] }
 0x3bc   : > { %3733 = vrot.lane.b32.xlu0 %v9376_v57, %s8010_s20 }
 0x3bd   : > { %v3552_v10 = vpop.permute.xlu1 %3551 }
 0x3be   : > { %3588 = vst.msk [vmem:[#allocation4 + $0x1c0] sm:$0xff] %vm3384_vm6, %v3552_v10  ;;  %v4088_v19 = vld [vmem:[#allocation4 + $0x170] sm:$0xff] }
 0x3bf   : > { %v3361_v0 = vpop.permute.xlu0 %3360  ;;  %4554 = vmatmul.mubr.bf16.gmra.mrb[28].mxu0 %v4077_v37  ;;  %3918 = vrot.lane.b32.xlu1 %v9149_v32, %s8010_s20  ;;  %v4087_v32 = vld [vmem:[#allocation4 + $0x168] sm:$0xff] }
 0x3c0   : > { %3397 = vst.msk [vmem:[#allocation4 + $0x1e0] sm:$0xff] %vm3384_vm6, %v3361_v0  ;;  %4561 = vmatprep.mubr.bf16.mxu0 %v4083_v20  ;;  %3735 = vrot.lane.b32.xlu0 %v9427_v14, %s8010_s20  ;;  %v4051_v20 = vld [vmem:[#allocation4 + $0x48] sm:$0xff] }
 0x3c3   : > { %3920 = vrot.lane.b32.xlu1 %v9229_v56, %s8010_s20  ;;  %v4093_v56 = vld [vmem:[#allocation4 + $0x198] sm:$0xff] }
 0x3c4   : > { %3737 = vrot.lane.b32.xlu0 %v9479_v52, %s8010_s20  ;;  %v11259_v52 = vld [vmem:[#allocation9_spill] sm:$0xff] }
 0x3c5   : > { %v4098_v57 = vld [vmem:[#allocation4 + $0x1c0] sm:$0xff] }
 0x3c7   : > { %4562 = vmatmul.mubr.bf16.gmra.mrb[32].mxu0 %v4082_v22  ;;  %3922 = vrot.lane.b32.xlu1 %v9325_v36, %s8010_s20  ;;  %v4092_v36 = vld [vmem:[#allocation4 + $0x190] sm:$0xff] }
 0x3c8   : > { %4569 = vmatprep.mubr.bf16.mxu0 %v4088_v19  ;;  %3739 = vrot.lane.b32.xlu0 %v9527_v11, %s8010_s20  ;;  %v11260_v11 = vld [vmem:[#allocation6_spill] sm:$0xff]  ;;  %v4056_v22 = vld [vmem:[#allocation4 + $0x70] sm:$0xff] }
 0x3cb   : > { %3924 = vrot.lane.b32.xlu1 %v9378_v40, %s8010_s20 }
 0x3cc   : > { %3741 = vrot.lane.b32.xlu0 %v9601_v21, %s8010_s20  ;;  %v3880_v21 = vld [vmem:[#allocation3 + $0x199] sm:$0xff] }
 0x3cf   : > { %4570 = vmatmul.mubr.bf16.gmra.mrb[36].mxu0 %v4087_v32  ;;  %3926 = vrot.lane.b32.xlu1 %v9429_v13, %s8010_s20  ;;  %v4097_v13 = vld [vmem:[#allocation4 + $0x1b8] sm:$0xff] }
 0x3d0   : > { %4577 = vmatprep.mubr.bf16.mxu0 %v4093_v56  ;;  %3743 = vrot.lane.b32.xlu0 %v9715_v16, %s8010_s20 }
 0x3d3   : > { %3928 = vrot.lane.b32.xlu1 %v9481_v15, %s8010_s20 }
 0x3d4   : > { %3745 = vrot.lane.b32.xlu0 %v9774_v2, %s8010_s20 }
 0x3d7   : > { %4578 = vmatmul.mubr.bf16.gmra.mrb[40].mxu0 %v4092_v36  ;;  %3930 = vrot.lane.b32.xlu1 %v9580_v31, %s8010_s20  ;;  %v4102_v31 = vld [vmem:[#allocation4 + $0x1e0] sm:$0xff] }
 0x3d8   : > { %4585 = vmatprep.mubr.bf16.mxu0 %v4098_v57  ;;  %3747 = vrot.lane.b32.xlu0 %v9833_v59, %s8010_s20 }
 0x3d9   : > { %v3554_v40 = vpop.permute.xlu1 %3553 }
 0x3da   : > { %3589 = vst.msk [vmem:[#allocation4 + $0x1e8] sm:$0xff] %vm3384_vm6, %v3554_v40  ;;  %v3363_v14 = vpop.permute.xlu0 %3362 }
 0x3db   : > { %3398 = vst.msk [vmem:[#allocation4 + $0x208] sm:$0xff] %vm3384_vm6, %v3363_v14  ;;  %3932 = vrot.lane.b32.xlu1 %v9603_v29, %s8010_s20  ;;  %v3881_v29 = vld [vmem:[#allocation3 + $0x1a1] sm:$0xff] }
 0x3dc   : > { %3749 = vrot.lane.b32.xlu0 %v9910_v58, %s8010_s20  ;;  %v3897_v16 = vpack.c.bf16 %v3881_v29, %v3880_v21  ;;  %v4061_v21 = vld [vmem:[#allocation4 + $0x98] sm:$0xff]  ;;  %v4066_v29 = vld [vmem:[#allocation4 + $0xc0] sm:$0xff] }
 0x3df   : > { %4586 = vmatmul.mubr.bf16.gmra.mrb[44].mxu0 %v4097_v13  ;;  %3934 = vrot.lane.b32.xlu1 %v11259_v52, %s8010_s20 }
 0x3e0   : > { %3751 = vrot.lane.b32.xlu0 %v9974_v9, %s8010_s20 }
 0x3e1   : > { %v4103_v15 = vld [vmem:[#allocation4 + $0x1e8] sm:$0xff] }
 0x3e2   : > { %4593 = vmatprep.mubr.bf16.mxu0 %v4103_v15 }
 0x3e3   : > { %3936 = vrot.lane.b32.xlu1 %v11260_v11, %s8010_s20 }
 0x3e7   : > { %4594 = vmatmul.mubr.bf16.gmra.mrb[48].mxu0 %v4102_v31  ;;  %3938 = vrot.lane.b32.xlu1 %v9831_v27, %s8010_s20  ;;  %v4107_v27 = vld [vmem:[#allocation4 + $0x208] sm:$0xff] }
 0x3eb   : > { %3940 = vrot.lane.b32.xlu1 %v9908_v54, %s8010_s20 }
 0x3ef   : > { %3942 = vrot.lane.b32.xlu1 %v9976_v51, %s8010_s20 }
 0x3f3   : > { %3944 = vrot.lane.b32.xlu1 %v3897_v16, %s8010_s20 }
 0x3f5   : > { %v3556_v2 = vpop.permute.xlu1 %3555 }
 0x3f6   : > { %3590 = vst.msk [vmem:[#allocation4 + $0x210] sm:$0xff] %vm3384_vm6, %v3556_v2 }
 0x3f7   : > { %v3365_v59 = vpop.permute.xlu0 %3364 }
 0x3f8   : > { %3399 = vst.msk [vmem:[#allocation4 + $0x230] sm:$0xff] %vm3384_vm6, %v3365_v59 }
 0x3fd   : > { %v4108_v58 = vld [vmem:[#allocation4 + $0x210] sm:$0xff] }
 0x3fe   : > { %4601 = vmatprep.mubr.bf16.mxu0 %v4108_v58 }
 0x3ff   : > { %4602 = vmatmul.mubr.bf16.gmra.mrb[52].mxu0 %v4107_v27  ;;  %v4112_v45 = vld [vmem:[#allocation4 + $0x230] sm:$0xff] }
 0x402   : > { %v7335_v5 = vpop.f32.mrb[0].mxu0 }
 0x403   : > { %v7336_v54 = vpop.f32.mrb[1].mxu0 }
 0x404   : > { %v10047_v62 = vadd.f32 %v7336_v54, %v7335_v5  ;;  %v7338_v25 = vpop.f32.mrb[2].mxu0  ;;  %v4071_v54 = vld [vmem:[#allocation4 + $0xe8] sm:$0xff] }
 0x405   : > { %v7339_v28 = vpop.f32.mrb[3].mxu0 }
 0x406   : > { %v10049_v8 = vadd.f32 %v7339_v28, %v7338_v25  ;;  %v4076_v25 = vld [vmem:[#allocation4 + $0x110] sm:$0xff] }
 0x411   : > { %v3558_v17 = vpop.permute.xlu1 %3557 }
 0x412   : > { %3591 = vst.msk [vmem:[#allocation4 + $0x238] sm:$0xff] %vm3384_vm6, %v3558_v17  ;;  %v3367_v44 = vpop.permute.xlu0 %3366 }
 0x413   : > { %3400 = vst.msk [vmem:[#allocation4 + $0x258] sm:$0xff] %vm3384_vm6, %v3367_v44 }
 0x416   : > { %v3722_v41 = vpop.permute.xlu0 %3721 }
 0x417   : > { %3769 = vst.msk [vmem:[#allocation4 + $0x10] sm:$0xff] %vm3384_vm6, %v3722_v41 }
 0x419   : > { %v4113_v7 = vld [vmem:[#allocation4 + $0x238] sm:$0xff] }
 0x41a   : > { %v3724_v34 = vpop.permute.xlu0 %3723  ;;  %4609 = vmatprep.mubr.bf16.mxu0 %v4113_v7  ;;  %v4117_v47 = vld [vmem:[#allocation4 + $0x258] sm:$0xff] }
 0x41b   : > { %3770 = vst.msk [vmem:[#allocation4 + $0x38] sm:$0xff] %vm3384_vm6, %v3724_v34  ;;  %4610 = vmatmul.mubr.bf16.gmra.mrb[56].mxu0 %v4112_v45  ;;  %v4081_v45 = vld [vmem:[#allocation4 + $0x138] sm:$0xff] }
 0x41e   : > { %v7341_v53 = vpop.f32.mrb[4].mxu0  ;;  %v3726_v43 = vpop.permute.xlu0 %3725  ;;  %v4044_v18 = vld [vmem:[#allocation4 + $0x10] sm:$0xff] }
 0x41f   : > { %v7342_v55 = vpop.f32.mrb[5].mxu0  ;;  %3771 = vst.msk [vmem:[#allocation4 + $0x60] sm:$0xff] %vm3384_vm6, %v3726_v43 }
 0x420   : > { %v10056_v63 = vadd.f32 %v7342_v55, %v7341_v53  ;;  %v7344_v49 = vpop.f32.mrb[6].mxu0 }
 0x421   : > { %v7345_v33 = vpop.f32.mrb[7].mxu0 }
 0x422   : > { %v10059_v23 = vadd.f32 %v7345_v33, %v7344_v49  ;;  %v3728_v4 = vpop.permute.xlu0 %3727  ;;  %v4049_v57 = vld [vmem:[#allocation4 + $0x38] sm:$0xff] }
 0x423   : > { %3772 = vst.msk [vmem:[#allocation4 + $0x88] sm:$0xff] %vm3384_vm6, %v3728_v4  ;;  %v4096_v4 = vld [vmem:[#allocation4 + $0x1b0] sm:$0xff] }
 0x425   : > { %v3560_v12 = vpop.permute.xlu1 %3559 }
 0x426   : > { %3592 = vst.msk [vmem:[#allocation4 + $0x260] sm:$0xff] %vm3384_vm6, %v3560_v12  ;;  %v3730_v1 = vpop.permute.xlu0 %3729  ;;  %v4054_v59 = vld [vmem:[#allocation4 + $0x60] sm:$0xff] }
 0x427   : > { %3773 = vst.msk [vmem:[#allocation4 + $0xb0] sm:$0xff] %vm3384_vm6, %v3730_v1 }
 0x429   : > { %v3915_v46 = vpop.permute.xlu1 %3914 }
 0x42a   : > { %3962 = vst.msk [vmem:[#allocation4 + $0x18] sm:$0xff] %vm3384_vm6, %v3915_v46  ;;  %v3732_v48 = vpop.permute.xlu0 %3731  ;;  %v4059_v44 = vld [vmem:[#allocation4 + $0x88] sm:$0xff] }
 0x42b   : > { %3774 = vst.msk [vmem:[#allocation4 + $0xd8] sm:$0xff] %vm3384_vm6, %v3732_v48 }
 0x42d   : > { %v3917_v9 = vpop.permute.xlu1 %3916  ;;  %v4118_v51 = vld [vmem:[#allocation4 + $0x260] sm:$0xff] }
 0x42e   : > { %3963 = vst.msk [vmem:[#allocation4 + $0x40] sm:$0xff] %vm3384_vm6, %v3917_v9  ;;  %v3734_v61 = vpop.permute.xlu0 %3733  ;;  %4617 = vmatprep.mubr.bf16.mxu0 %v4118_v51  ;;  %v4064_v38 = vld [vmem:[#allocation4 + $0xb0] sm:$0xff] }
 0x42f   : > { %3775 = vst.msk [vmem:[#allocation4 + $0x100] sm:$0xff] %vm3384_vm6, %v3734_v61  ;;  %4618 = vmatmul.mubr.bf16.gmra.mrb[60].mxu0 %v4117_v47  ;;  %v4101_v61 = vld [vmem:[#allocation4 + $0x1d8] sm:$0xff]  ;;  %v4106_v47 = vld [vmem:[#allocation4 + $0x200] sm:$0xff] }
 0x430   : > { %7815 = vmatprep.mubr.msk.bf16.mxu0 %vm3129_vm3, %v4046_v35 }
 0x431   : > { %v3919_v26 = vpop.permute.xlu1 %3918  ;;  %v4045_v6 = vld [vmem:[#allocation4 + $0x18] sm:$0xff] }
 0x432   : > { %3964 = vst.msk [vmem:[#allocation4 + $0x68] sm:$0xff] %vm3384_vm6, %v3919_v26  ;;  %v3736_v50 = vpop.permute.xlu0 %3735  ;;  %4658 = vmatprep.mubr.bf16.mxu1 %v4045_v6  ;;  %v4069_v48 = vld [vmem:[#allocation4 + $0xd8] sm:$0xff] }
 0x433   : > { %3776 = vst.msk [vmem:[#allocation4 + $0x128] sm:$0xff] %vm3384_vm6, %v3736_v50  ;;  %4659 = vmatmul.mubr.bf16.vlgmr.msra.gmra.mrb[0].mxu1 %v4044_v18  ;;  %v4111_v18 = vld [vmem:[#allocation4 + $0x228] sm:$0xff] }
 0x435   : > { %v3921_v10 = vpop.permute.xlu1 %3920  ;;  %v4050_v37 = vld [vmem:[#allocation4 + $0x40] sm:$0xff] }
 0x436   : > { %3965 = vst.msk [vmem:[#allocation4 + $0x90] sm:$0xff] %vm3384_vm6, %v3921_v10  ;;  %v3738_v0 = vpop.permute.xlu0 %3737  ;;  %4666 = vmatprep.mubr.bf16.mxu1 %v4050_v37  ;;  %v4074_v26 = vld [vmem:[#allocation4 + $0x100] sm:$0xff]  ;;  %v4116_v10 = vld [vmem:[#allocation4 + $0x250] sm:$0xff] }
 0x437   : > { %3777 = vst.msk [vmem:[#allocation4 + $0x150] sm:$0xff] %vm3384_vm6, %v3738_v0  ;;  %7816 = vmatmul.mubr.msk.bf16.vlgmr.msra.gmra.mrb[64].mxu0 %vm3129_vm3, %v4051_v20 }
 0x438   : > { %7819 = vmatprep.mubr.msk.bf16.mxu0 %vm3129_vm3, %v4056_v22 }
 0x439   : > { %v3923_v32 = vpop.permute.xlu1 %3922  ;;  %v4055_v13 = vld [vmem:[#allocation4 + $0x68] sm:$0xff] }
 0x43a   : > { %v7347_v19 = vpop.f32.mrb[8].mxu0  ;;  %3966 = vst.msk [vmem:[#allocation4 + $0xb8] sm:$0xff] %vm3384_vm6, %v3923_v32  ;;  %v3740_v56 = vpop.permute.xlu0 %3739  ;;  %v4079_v37 = vld [vmem:[#allocation4 + $0x128] sm:$0xff] }
 0x43b   : > { %v7348_v36 = vpop.f32.mrb[9].mxu0  ;;  %3778 = vst.msk [vmem:[#allocation4 + $0x178] sm:$0xff] %vm3384_vm6, %v3740_v56  ;;  %4667 = vmatmul.mubr.bf16.gmra.mrb[4].mxu1 %v4049_v57 }
 0x43c   : > { %v10081_v40 = vadd.f32 %v7348_v36, %v7347_v19  ;;  %v7350_v14 = vpop.f32.mrb[10].mxu0  ;;  %4674 = vmatprep.mubr.bf16.mxu1 %v4055_v13 }
 0x43d   : > { %v7351_v52 = vpop.f32.mrb[11].mxu0  ;;  %v3925_v11 = vpop.permute.xlu1 %3924  ;;  %v4060_v58 = vld [vmem:[#allocation4 + $0x90] sm:$0xff] }
 0x43e   : > { %v10083_v15 = vadd.f32 %v7351_v52, %v7350_v14  ;;  %3967 = vst.msk [vmem:[#allocation4 + $0xe0] sm:$0xff] %vm3384_vm6, %v3925_v11  ;;  %v3742_v31 = vpop.permute.xlu0 %3741  ;;  %v4084_v19 = vld [vmem:[#allocation4 + $0x150] sm:$0xff] }
 0x43f   : > { %3779 = vst.msk [vmem:[#allocation4 + $0x1a0] sm:$0xff] %vm3384_vm6, %v3742_v31  ;;  %7820 = vmatmul.mubr.msk.bf16.gmra.mrb[68].mxu0 %vm3129_vm3, %v4061_v21 }
 0x440   : > { %7823 = vmatprep.mubr.msk.bf16.mxu0 %vm3129_vm3, %v4066_v29 }
 0x441   : > { %v3927_v16 = vpop.permute.xlu1 %3926  ;;  %v4065_v41 = vld [vmem:[#allocation4 + $0xb8] sm:$0xff] }
 0x442   : > { %3968 = vst.msk [vmem:[#allocation4 + $0x108] sm:$0xff] %vm3384_vm6, %v3927_v16  ;;  %v3744_v2 = vpop.permute.xlu0 %3743  ;;  %v4089_v13 = vld [vmem:[#allocation4 + $0x178] sm:$0xff] }
 0x443   : > { %3780 = vst.msk [vmem:[#allocation4 + $0x1c8] sm:$0xff] %vm3384_vm6, %v3744_v2  ;;  %4675 = vmatmul.mubr.bf16.gmra.mrb[8].mxu1 %v4054_v59 }
 0x444   : > { %4682 = vmatprep.mubr.bf16.mxu1 %v4060_v58 }
 0x445   : > { %v3929_v27 = vpop.permute.xlu1 %3928  ;;  %v4070_v43 = vld [vmem:[#allocation4 + $0xe0] sm:$0xff] }
 0x446   : > { %3969 = vst.msk [vmem:[#allocation4 + $0x130] sm:$0xff] %vm3384_vm6, %v3929_v27  ;;  %v3746_v5 = vpop.permute.xlu0 %3745  ;;  %v4094_v21 = vld [vmem:[#allocation4 + $0x1a0] sm:$0xff] }
 0x447   : > { %3781 = vst.msk [vmem:[#allocation4 + $0x1f0] sm:$0xff] %vm3384_vm6, %v3746_v5  ;;  %7824 = vmatmul.mubr.msk.bf16.gmra.mrb[72].mxu0 %vm3129_vm3, %v4071_v54 }
 0x448   : > { %7827 = vmatprep.mubr.msk.bf16.mxu0 %vm3129_vm3, %v4076_v25 }
 0x449   : > { %v3931_v28 = vpop.permute.xlu1 %3930  ;;  %v4075_v9 = vld [vmem:[#allocation4 + $0x108] sm:$0xff] }
 0x44a   : > { %3970 = vst.msk [vmem:[#allocation4 + $0x158] sm:$0xff] %vm3384_vm6, %v3931_v28  ;;  %v3748_v17 = vpop.permute.xlu0 %3747  ;;  %v4099_v5 = vld [vmem:[#allocation4 + $0x1c8] sm:$0xff] }
 0x44b   : > { %3782 = vst.msk [vmem:[#allocation4 + $0x218] sm:$0xff] %vm3384_vm6, %v3748_v17  ;;  %4683 = vmatmul.mubr.bf16.gmra.mrb[12].mxu1 %v4059_v44 }
 0x44c   : > { %4690 = vmatprep.mubr.bf16.mxu1 %v4065_v41 }
 0x44d   : > { %v3933_v7 = vpop.permute.xlu1 %3932  ;;  %v4080_v6 = vld [vmem:[#allocation4 + $0x130] sm:$0xff] }
 0x44e   : > { %3971 = vst.msk [vmem:[#allocation4 + $0x180] sm:$0xff] %vm3384_vm6, %v3933_v7  ;;  %v3750_v34 = vpop.permute.xlu0 %3749 }
 0x44f   : > { %3783 = vst.msk [vmem:[#allocation4 + $0x240] sm:$0xff] %vm3384_vm6, %v3750_v34  ;;  %7828 = vmatmul.mubr.msk.bf16.gmra.mrb[76].mxu0 %vm3129_vm3, %v4081_v45  ;;  %v4104_v34 = vld [vmem:[#allocation4 + $0x1f0] sm:$0xff] }
 0x450   : > { %7831 = vmatprep.mubr.msk.bf16.mxu0 %vm3129_vm3, %v4086_v42 }
 0x451   : > { %v3935_v30 = vpop.permute.xlu1 %3934  ;;  %v4085_v0 = vld [vmem:[#allocation4 + $0x158] sm:$0xff] }
 0x452   : > { %3972 = vst.msk [vmem:[#allocation4 + $0x1a8] sm:$0xff] %vm3384_vm6, %v3935_v30  ;;  %v3752_v53 = vpop.permute.xlu0 %3751 }
 0x453   : > { %3784 = vst.msk [vmem:[#allocation4 + $0x268] sm:$0xff] %vm3384_vm6, %v3752_v53  ;;  %4691 = vmatmul.mubr.bf16.gmra.mrb[16].mxu1 %v4064_v38 }
 0x454   : > { %4698 = vmatprep.mubr.bf16.mxu1 %v4070_v43  ;;  %v5076_v43 = vld [vmem:[#allocation3 + $0x1] sm:$0xff] }
 0x455   : > { %v3937_v49 = vpop.permute.xlu1 %3936  ;;  %v4090_v36 = vld [vmem:[#allocation4 + $0x180] sm:$0xff] }
 0x456   : > { %v7353_v55 = vpop.f32.mrb[12].mxu0  ;;  %3973 = vst.msk [vmem:[#allocation4 + $0x1d0] sm:$0xff] %vm3384_vm6, %v3937_v49 }
 0x457   : > { %v7354_v39 = vpop.f32.mrb[13].mxu0  ;;  %7832 = vmatmul.mubr.msk.bf16.gmra.mrb[80].mxu0 %vm3129_vm3, %v4091_v3 }
 0x458   : > { %v10104_v33 = vadd.f32 %v7354_v39, %v7353_v55  ;;  %v7356_v24 = vpop.f32.mrb[14].mxu0  ;;  %7835 = vmatprep.mubr.msk.bf16.mxu0 %vm3129_vm3, %v4096_v4  ;;  %v5077_v55 = vld [vmem:[#allocation3 + $0x9] sm:$0xff] }
 0x459   : > { %v7357_v12 = vpop.f32.mrb[15].mxu0  ;;  %v3939_v46 = vpop.permute.xlu1 %3938  ;;  %v4095_v52 = vld [vmem:[#allocation4 + $0x1a8] sm:$0xff]  ;;  %v5108_v39 = vpack.c.bf16 %v5077_v55, %v5076_v43 }
 0x45a   : > { %v10108_v1 = vadd.f32 %v7357_v12, %v7356_v24  ;;  %3974 = vst.msk [vmem:[#allocation4 + $0x1f8] sm:$0xff] %vm3384_vm6, %v3939_v46  ;;  %v4109_v24 = vld [vmem:[#allocation4 + $0x218] sm:$0xff] }
 0x45b   : > { %4699 = vmatmul.mubr.bf16.gmra.mrb[20].mxu1 %v4069_v48  ;;  %5140 = vrot.lane.b32.xlu0 %v5108_v39, %s8010_s20 }
 0x45c   : > { %4706 = vmatprep.mubr.bf16.mxu1 %v4075_v9 }
 0x45d   : > { %v3941_v51 = vpop.permute.xlu1 %3940  ;;  %v4100_v16 = vld [vmem:[#allocation4 + $0x1d0] sm:$0xff] }
 0x45e   : > { %3975 = vst.msk [vmem:[#allocation4 + $0x220] sm:$0xff] %vm3384_vm6, %v3941_v51  ;;  %v7939_v51 = vld [vmem:[%s11093_s5 + $0x40] sm:$0xff]  }
 0x45f   : > { %7836 = vmatmul.mubr.msk.bf16.gmra.mrb[84].mxu0 %vm3129_vm3, %v4101_v61  ;;  %v7940_v61 = vld [vmem:[%s11093_s5] sm:$0xff]   ;;  %7563 = vmatprep.subr.bf16.mxu1 %v7939_v51 }
 0x460   : > { %7839 = vmatprep.mubr.msk.bf16.mxu0 %vm3129_vm3, %v4106_v47  ;;  %7564 = vmatpush3.bf16.msra.mxu1 %v7940_v61  ;;  %v7949_v61 = vld [vmem:[%s11093_s5 + $0x68] sm:$0xff]  }
 0x461   : > { %v3943_v35 = vpop.permute.xlu1 %3942  ;;  %v4105_v28 = vld [vmem:[#allocation4 + $0x1f8] sm:$0xff] }
 0x462   : > { %3976 = vst.msk [vmem:[#allocation4 + $0x248] sm:$0xff] %vm3384_vm6, %v3943_v35 }
 0x463   : > { %4707 = vmatmul.mubr.bf16.gmra.mrb[24].mxu1 %v4074_v26 }
 0x464   : > { %4714 = vmatprep.mubr.bf16.mxu1 %v4080_v6  ;;  %v4114_v6 = vld [vmem:[#allocation4 + $0x240] sm:$0xff] }
 0x465   : > { %v3945_v50 = vpop.permute.xlu1 %3944  ;;  %v4110_v30 = vld [vmem:[#allocation4 + $0x220] sm:$0xff] }
 0x466   : > { %3977 = vst.msk [vmem:[#allocation4 + $0x270] sm:$0xff] %vm3384_vm6, %v3945_v50 }
 0x467   : > { %7840 = vmatmul.mubr.msk.bf16.gmra.mrb[88].mxu0 %vm3129_vm3, %v4111_v18 }
 0x468   : > { %7843 = vmatprep.mubr.msk.bf16.mxu0 %vm3129_vm3, %v4116_v10 }
 0x469   : > { %v4115_v46 = vld [vmem:[#allocation4 + $0x248] sm:$0xff] }
 0x46b   : > { %4715 = vmatmul.mubr.bf16.gmra.mrb[28].mxu1 %v4079_v37 }
 0x46c   : > { %4722 = vmatprep.mubr.bf16.mxu1 %v4085_v0 }
 0x46d   : > { %v4120_v35 = vld [vmem:[#allocation4 + $0x270] sm:$0xff] }
 0x46f   : > { %7844 = vmatmul.mubr.msk.bf16.gmra.mrb[92].mxu0 %vm3129_vm3, %v10064_v60 }
 0x472   : > { %v7359_v20 = vpop.f32.mrb[16].mxu0 }
 0x473   : > { %v7360_v22 = vpop.f32.mrb[17].mxu0  ;;  %4723 = vmatmul.mubr.bf16.gmra.mrb[32].mxu1 %v4084_v19 }
 0x474   : > { %v10120_v32 = vadd.f32 %v7360_v22, %v7359_v20  ;;  %v7362_v56 = vpop.f32.mrb[18].mxu0  ;;  %4730 = vmatprep.mubr.bf16.mxu1 %v4090_v36  ;;  %v4119_v22 = vld [vmem:[#allocation4 + $0x268] sm:$0xff] }
 0x475   : > { %v7363_v57 = vpop.f32.mrb[19].mxu0 }
 0x476   : > { %v10122_v14 = vadd.f32 %v7363_v57, %v7362_v56 }
 0x47b   : > { %4731 = vmatmul.mubr.bf16.gmra.mrb[36].mxu1 %v4089_v13  ;;  %v7941_v13 = vld [vmem:[%s11093_s5 + $0x48] sm:$0xff]  }
 0x47c   : > { %4738 = vmatprep.mubr.bf16.mxu1 %v4095_v52  ;;  %v7942_v52 = vld [vmem:[%s11093_s5 + $0x8] sm:$0xff]   ;;  %7565 = vmatprep.subr.bf16.mxu1 %v7941_v13 }
 0x47d   : > { %7566 = vmatpush3.bf16.msra.mxu1 %v7942_v52 }
 0x482   : > { %v7365_v11 = vpop.f32.mrb[20].mxu0 }
 0x483   : > { %v7366_v31 = vpop.f32.mrb[21].mxu0  ;;  %4739 = vmatmul.mubr.bf16.gmra.mrb[40].mxu1 %v4094_v21 }
 0x484   : > { %v10124_v60 = vadd.f32 %v7366_v31, %v7365_v11  ;;  %v7368_v29 = vpop.f32.mrb[22].mxu0  ;;  %4746 = vmatprep.mubr.bf16.mxu1 %v4100_v16 }
 0x485   : > { %v7369_v2 = vpop.f32.mrb[23].mxu0 }
 0x486   : > { %v10126_v59 = vadd.f32 %v7369_v2, %v7368_v29 }
 0x48a   : > { %v7371_v58 = vpop.f32.mrb[24].mxu0 }
 0x48b   : > { %v7372_v27 = vpop.f32.mrb[25].mxu0  ;;  %4747 = vmatmul.mubr.bf16.gmra.mrb[44].mxu1 %v4099_v5 }
 0x48c   : > { %v10128_v54 = vadd.f32 %v7372_v27, %v7371_v58  ;;  %v7374_v25 = vpop.f32.mrb[26].mxu0  ;;  %4754 = vmatprep.mubr.bf16.mxu1 %v4105_v28 }
 0x48d   : > { %v7375_v17 = vpop.f32.mrb[27].mxu0 }
 0x48e   : > { %v10130_v44 = vadd.f32 %v7375_v17, %v7374_v25 }
 0x492   : > { %v7377_v41 = vpop.f32.mrb[28].mxu0 }
 0x493   : > { %v7378_v7 = vpop.f32.mrb[29].mxu0  ;;  %4755 = vmatmul.mubr.bf16.gmra.mrb[48].mxu1 %v4104_v34  ;;  %v7945_v34 = vld [vmem:[%s11093_s5 + $0x58] sm:$0xff]  }
 0x494   : > { %v10132_v45 = vadd.f32 %v7378_v7, %v7377_v41  ;;  %v7380_v42 = vpop.f32.mrb[30].mxu0  ;;  %4762 = vmatprep.mubr.bf16.mxu1 %v4110_v30  ;;  %v7943_v41 = vld [vmem:[%s11093_s5 + $0x50] sm:$0xff]  }
 0x495   : > { %v7381_v53 = vpop.f32.mrb[31].mxu0  ;;  %v7944_v7 = vld [vmem:[%s11093_s5 + $0x10] sm:$0xff]   ;;  %7567 = vmatprep.subr.bf16.mxu1 %v7943_v41 }
 0x496   : > { %v10134_v38 = vadd.f32 %v7381_v53, %v7380_v42  ;;  %7568 = vmatpush3.bf16.msra.mxu1 %v7944_v7  ;;  %v7946_v42 = vld [vmem:[%s11093_s5 + $0x18] sm:$0xff]  }
 0x497   : > { %7569 = vmatprep.subr.bf16.mxu1 %v7945_v34  ;;  %v7953_v7 = vld [vmem:[%s11093_s5 + $0x78] sm:$0xff]  }
 0x498   : > { %v7954_v34 = vld [vmem:[%s11093_s5 + $0x38] sm:$0xff]  }
 0x49a   : > { %v7383_v49 = vpop.f32.mrb[32].mxu0  ;;  %7570 = vmatpush3.bf16.msra.mxu1 %v7946_v42  ;;  %v5012_v42 = vld [vmem:[#allocation3] sm:$0xff] }
 0x49b   : > { %v7384_v3 = vpop.f32.mrb[33].mxu0  ;;  %4763 = vmatmul.mubr.bf16.gmra.mrb[52].mxu1 %v4109_v24  ;;  %v7948_v24 = vld [vmem:[%s11093_s5 + $0x20] sm:$0xff]  }
 0x49c   : > { %v10136_v4 = vadd.f32 %v7384_v3, %v7383_v49  ;;  %v7386_v12 = vpop.f32.mrb[34].mxu0  ;;  %4770 = vmatprep.mubr.bf16.mxu1 %v4115_v46  ;;  %v7947_v3 = vld [vmem:[%s11093_s5 + $0x60] sm:$0xff]  }
 0x49d   : > { %v7387_v48 = vpop.f32.mrb[35].mxu0  ;;  %7571 = vmatprep.subr.bf16.mxu1 %v7947_v3 }
 0x49e   : > { %v10139_v9 = vadd.f32 %v7387_v48, %v7386_v12  ;;  %7572 = vmatpush3.bf16.msra.mxu1 %v7948_v24  ;;  %v5205_v24 = vld [vmem:[#allocation3 + $0xa] sm:$0xff] }
 0x49f   : > { %7573 = vmatprep.subr.bf16.mxu1 %v7949_v61 }
 0x4a2   : > { %v7389_v47 = vpop.f32.mrb[36].mxu0 }
 0x4a3   : > { %v7390_v26 = vpop.f32.mrb[37].mxu0  ;;  %4771 = vmatmul.mubr.bf16.gmra.mrb[56].mxu1 %v4114_v6  ;;  %v7951_v6 = vld [vmem:[%s11093_s5 + $0x70] sm:$0xff]  }
 0x4a4   : > { %v10147_v50 = vadd.f32 %v7390_v26, %v7389_v47  ;;  %v7392_v18 = vpop.f32.mrb[38].mxu0  ;;  %4778 = vmatprep.mubr.bf16.mxu1 %v4120_v35  ;;  %v7950_v47 = vld [vmem:[%s11093_s5 + $0x28] sm:$0xff]  }
 0x4a5   : > { %v7393_v10 = vpop.f32.mrb[39].mxu0  ;;  %7574 = vmatpush3.bf16.msra.mxu1 %v7950_v47 }
 0x4a6   : > { %v10149_v37 = vadd.f32 %v7393_v10, %v7392_v18  ;;  %7575 = vmatprep.subr.bf16.mxu1 %v7951_v6  ;;  %v7952_v18 = vld [vmem:[%s11093_s5 + $0x30] sm:$0xff]  }
 0x4a9   : > { %7576 = vmatpush3.bf16.msra.mxu1 %v7952_v18 }
 0x4aa   : > { %v7395_v0 = vpop.f32.mrb[40].mxu0  ;;  %7577 = vmatprep.subr.bf16.mxu1 %v7953_v7 }
 0x4ab   : > { %v7396_v20 = vpop.f32.mrb[41].mxu0  ;;  %4779 = vmatmul.mubr.bf16.gmra.mrb[60].mxu1 %v4119_v22 }
 0x4ac   : > { %v10151_v19 = vadd.f32 %v7396_v20, %v7395_v0  ;;  %v7398_v56 = vpop.f32.mrb[42].mxu0 }
 0x4ad   : > { %v7399_v36 = vpop.f32.mrb[43].mxu0  ;;  %7578 = vmatpush3.bf16.msra.mxu1 %v7954_v34 }
 0x4ae   : > { %v10153_v57 = vadd.f32 %v7399_v36, %v7398_v56  ;;  %v10212_v56 = vld [vmem:[%s11092_s4] ss:$0 sm:$0xff] }
 0x4af   : > { %v4508_v18 = vadd.f32 %v10056_v63, %v10212_v56 }
 0x4b2   : > { %v7401_v11 = vpop.f32.mrb[44].mxu0 }
 0x4b3   : > { %v7402_v31 = vpop.f32.mrb[45].mxu0 }
 0x4b4   : > { %v10161_v21 = vadd.f32 %v7402_v31, %v7401_v11  ;;  %v7404_v29 = vpop.f32.mrb[46].mxu0  ;;  %v4500_v31 = vadd.f32 %v10047_v62, %v10212_v56  ;;  %v5013_v62 = vld [vmem:[#allocation3 + $0x8] sm:$0xff] }
 0x4b5   : > { %v7405_v16 = vpop.f32.mrb[47].mxu0  ;;  %v5044_v3 = vpack.c.bf16 %v5013_v62, %v5012_v42  ;;  %v4516_v62 = vadd.f32 %v10081_v40, %v10212_v56 }
 0x4b6   : > { %v10163_v2 = vadd.f32 %v7405_v16, %v7404_v29 }
 0x4b7   : > { %5060 = vst.msk [vmem:[#allocation4] sm:$0xff] %vm3129_vm3, %v5044_v3 }
 0x4ba   : > { %v7407_v58 = vpop.f32.mrb[48].mxu0 }
 0x4bb   : > { %v7408_v27 = vpop.f32.mrb[49].mxu0 }
 0x4bc   : > { %v10165_v5 = vadd.f32 %v7408_v27, %v7407_v58  ;;  %v7410_v25 = vpop.f32.mrb[50].mxu0  ;;  %v4503_v27 = vadd.f32 %v10049_v8, %v10212_v56  ;;  %v5204_v8 = vld [vmem:[#allocation3 + $0x2] sm:$0xff] }
 0x4bd   : > { %v7411_v28 = vpop.f32.mrb[51].mxu0 }
 0x4be   : > { %v10167_v17 = vadd.f32 %v7411_v28, %v7410_v25 }
 0x4d2   : > { %v7413_v30 = vpop.f32.mrb[52].mxu0 }
 0x4d3   : > { %v7414_v53 = vpop.f32.mrb[53].mxu0 }
 0x4d4   : > { %v10181_v43 = vadd.f32 %v7414_v53, %v7413_v30  ;;  %v7416_v55 = vpop.f32.mrb[54].mxu0 }
 0x4d5   : > { %v7417_v49 = vpop.f32.mrb[55].mxu0 }
 0x4d6   : > { %v10183_v39 = vadd.f32 %v7417_v49, %v7416_v55 }
 0x4ee   : > { %v7419_v12 = vpop.f32.mrb[56].mxu0 }
 0x4ef   : > { %v7420_v46 = vpop.f32.mrb[57].mxu0 }
 0x4f0   : > { %v10191_v48 = vadd.f32 %v7420_v46, %v7419_v12  ;;  %v7422_v51 = vpop.f32.mrb[58].mxu0  ;;  %v5236_v46 = vpack.c.bf16 %v5205_v24, %v5204_v8  ;;  %v7957_v8 = vld [vmem:[%s11093_s5 + $0x80] sm:$0xff]   ;;  %v4519_v24 = vadd.f32 %v10083_v15, %v10212_v56 }
 0x4f1   : > { %v7423_v35 = vpop.f32.mrb[59].mxu0 }
 0x4f2   : > { %v10199_v26 = vadd.f32 %v7423_v35, %v7422_v51  ;;  %v5141_v35 = vpop.permute.xlu0 %5140  ;;  %5252 = vst.msk [vmem:[#allocation4 + $0x8] sm:$0xff] %vm3129_vm3, %v5236_v46 }
 0x4f3   : > { %5188 = vst.msk [vmem:[#allocation4] sm:$0xff] %vm3384_vm6, %v5141_v35 }
 0x502   : > { %v7425_v10 = vpop.f32.mrb[60].mxu0 }
 0x503   : > { %v7426_v0 = vpop.f32.mrb[61].mxu0 }
 0x504   : > { %v10207_v20 = vadd.f32 %v7426_v0, %v7425_v10  ;;  %v7428_v22 = vpop.f32.mrb[62].mxu0 }
 0x505   : > { %v7429_v36 = vpop.f32.mrb[63].mxu0 }
 0x506   : > { %11261 = vst [vmem:[#allocation19_spill] sm:$0xff] %v10207_v20  ;;  %v10214_v13 = vadd.f32 %v7429_v36, %v7428_v22  ;;  %v7447_v52 = vpop.f32.mrb[0].mxu1 }
 0x507   : > { %v7448_v11 = vpop.f32.mrb[1].mxu1 }
 0x508   : > { %11262 = vst [vmem:[#allocation12_spill] sm:$0xff] %v10214_v13  ;;  %v7449_v29 = vadd.f32 %v7448_v11, %v7447_v52  ;;  %v7450_v16 = vpop.f32.mrb[2].mxu1  ;;  %v4511_v52 = vadd.f32 %v10059_v23, %v10212_v56  ;;  %v7955_v23 = vld [vmem:[%s11093_s5 + $0xc0] sm:$0xff]  }
 0x509   : > { %v7451_v58 = vpop.f32.mrb[3].mxu1  ;;  %7675 = vmatprep.subr.bf16.mxu0 %v7955_v23  ;;  %v7958_v23 = vld [vmem:[%s11093_s5 + $0xc8] sm:$0xff]  }
 0x50a   : > { %v7452_v25 = vadd.f32 %v7451_v58, %v7450_v16  ;;  %v7817_v28 = vpop.f32.mrb[64].mxu0  ;;  %v4661_v41 = vadd.f32 %v7449_v29, %v4500_v31  ;;  %7676 = vmatpush3.bf16.msra.mxu0 %v7957_v8  ;;  %v4527_v8 = vadd.f32 %v10108_v1, %v10212_v56 }
 0x50b   : > { %v4821_v30 = vpop.f32.mrb[65].mxu0  ;;  %7677 = vmatprep.subr.bf16.mxu0 %v7958_v23 }
 0x50c   : > { %v4822_v53 = vadd.f32 %v4821_v30, %v4661_v41  ;;  %v7818_v55 = vpop.f32.mrb[66].mxu0  ;;  %v4664_v49 = vadd.f32 %v7452_v25, %v4503_v27 }
 0x50d   : > { %v4824_v12 = vpop.f32.mrb[67].mxu0 }
 0x50e   : > { %v4948_v51 = vmax.f32 %v4822_v53, 0.0  ;;  %v4825_v61 = vadd.f32 %v4824_v12, %v4664_v49  ;;  %v7453_v47 = vpop.f32.mrb[4].mxu1 }
 0x50f   : > { %v7454_v6 = vpop.f32.mrb[5].mxu1 }
 0x510   : > { %4980 = vst.msk [vmem:[#allocation3 + $0x19] sm:$0xff] %vm3129_vm3, %v4948_v51  ;;  %v4949_v10 = vmax.f32 %v4825_v61, 0.0  ;;  %v7455_v0 = vadd.f32 %v7454_v6, %v7453_v47  ;;  %v7456_v22 = vpop.f32.mrb[6].mxu1 }
 0x511   : > { %v7457_v36 = vpop.f32.mrb[7].mxu1 }
 0x512   : > { %4981 = vst.msk [vmem:[#allocation3 + $0x21] sm:$0xff] %vm3129_vm3, %v4949_v10  ;;  %v4669_v11 = vadd.f32 %v7455_v0, %v4508_v18  ;;  %v7458_v31 = vadd.f32 %v7457_v36, %v7456_v22  ;;  %v10235_v29 = vpop.f32.mrb[68].mxu0 }
 0x513   : > { %v4837_v16 = vpop.f32.mrb[69].mxu0 }
 0x514   : > { %v4830_v58 = vadd.f32 %v7817_v28, %v4669_v11  ;;  %v4672_v27 = vadd.f32 %v7458_v31, %v4511_v52  ;;  %v10237_v25 = vpop.f32.mrb[70].mxu0 }
 0x515   : > { %v4840_v63 = vpop.f32.mrb[71].mxu0 }
 0x516   : > { %v4950_v41 = vmax.f32 %v4830_v58, 0.0  ;;  %v4833_v7 = vadd.f32 %v7818_v55, %v4672_v27  ;;  %v7459_v34 = vpop.f32.mrb[8].mxu1  ;;  %v7956_v55 = vld [vmem:[%s11093_s5 + $0x100] sm:$0xff]  }
 0x517   : > { %v7460_v42 = vpop.f32.mrb[9].mxu1  ;;  %v5268_v30 = vld [vmem:[#allocation3 + $0x18] sm:$0xff]  ;;  %7847 = vmatprep.subr.bf16.mxu1 %v7956_v55 }
 0x518   : > { %4982 = vst.msk [vmem:[#allocation3 + $0x31] sm:$0xff] %vm3129_vm3, %v4950_v41  ;;  %v4951_v53 = vmax.f32 %v4833_v7, 0.0  ;;  %v7461_v28 = vadd.f32 %v7460_v42, %v7459_v34  ;;  %v7462_v49 = vpop.f32.mrb[10].mxu1  ;;  %v5078_v3 = vld [vmem:[#allocation3 + $0x19] sm:$0xff] }
 0x519   : > { %v7463_v12 = vpop.f32.mrb[11].mxu1  ;;  %v5269_v46 = vld [vmem:[#allocation3 + $0x20] sm:$0xff] }
 0x51a   : > { %v5079_v40 = vld [vmem:[#allocation3 + $0x21] sm:$0xff]  ;;  %4983 = vst.msk [vmem:[#allocation3 + $0x39] sm:$0xff] %vm3129_vm3, %v4951_v53  ;;  %v4677_v61 = vadd.f32 %v7461_v28, %v4516_v62  ;;  %v7464_v47 = vadd.f32 %v7463_v12, %v7462_v49  ;;  %v10254_v35 = vpop.f32.mrb[72].mxu0  ;;  %v5300_v6 = vpack.c.bf16 %v5269_v46, %v5268_v30  ;;  %v5396_v0 = vld [vmem:[#allocation3 + $0x19] sm:$0xff]  ;;  %v4524_v62 = vadd.f32 %v10104_v33, %v10212_v56 }
 0x51b   : > { %v5460_v51 = vld [vmem:[#allocation3 + $0x1a] sm:$0xff]  ;;  %v5109_v18 = vpack.c.bf16 %v5079_v40, %v5078_v3  ;;  %v5461_v10 = vld [vmem:[#allocation3 + $0x22] sm:$0xff]  ;;  %v10256_v36 = vpop.f32.mrb[73].mxu0 }
 0x51c   : > { %v5397_v22 = vld [vmem:[#allocation3 + $0x21] sm:$0xff]  ;;  %v10258_v15 = vpack.c.bf16 %v5461_v10, %v5460_v51  ;;  %v4838_v11 = vadd.f32 %v4837_v16, %v4677_v61  ;;  %v4680_v31 = vadd.f32 %v7464_v47, %v4519_v24  ;;  %v10260_v58 = vpop.f32.mrb[74].mxu0  ;;  %5332 = vrot.lane.b32.xlu1 %v5300_v6, %s8010_s20  ;;  %5061 = vst.msk [vmem:[#allocation4 + $0x28] sm:$0xff] %vm3129_vm3, %v5300_v6 }
 0x51d   : > { %v5428_v52 = vpack.c.bf16 %v5397_v22, %v5396_v0  ;;  %5142 = vrot.lane.b32.xlu0 %v5109_v18, %s8010_s20  ;;  %v10265_v27 = vpop.f32.mrb[75].mxu0 }
 0x51e   : > { %5253 = vst.msk [vmem:[#allocation4 + $0x30] sm:$0xff] %vm3129_vm3, %v10258_v15  ;;  %v4952_v41 = vmax.f32 %v4838_v11, 0.0  ;;  %v4841_v7 = vadd.f32 %v4840_v63, %v4680_v31  ;;  %v7465_v34 = vpop.f32.mrb[12].mxu1  ;;  %v7959_v63 = vld [vmem:[%s11093_s5 + $0x88] sm:$0xff]  }
 0x51f   : > { %5444 = vst.msk [vmem:[#allocation4 + $0x10] sm:$0xff] %vm3129_vm3, %v5428_v52  ;;  %v7466_v16 = vpop.f32.mrb[13].mxu1  ;;  %v5270_v42 = vld [vmem:[#allocation3 + $0x30] sm:$0xff]  ;;  %7678 = vmatpush3.bf16.msra.mxu0 %v7959_v63  ;;  %v7960_v63 = vld [vmem:[%s11093_s5 + $0xd0] sm:$0xff]  }
 0x520   : > { %v5080_v30 = vld [vmem:[#allocation3 + $0x31] sm:$0xff]  ;;  %4984 = vst.msk [vmem:[#allocation3 + $0x49] sm:$0xff] %vm3129_vm3, %v4952_v41  ;;  %v4953_v53 = vmax.f32 %v4841_v7, 0.0  ;;  %v7467_v28 = vadd.f32 %v7466_v16, %v7465_v34  ;;  %v7468_v49 = vpop.f32.mrb[14].mxu1  ;;  %7679 = vmatprep.subr.bf16.mxu0 %v7960_v63 }
 0x521   : > { %v5588_v3 = vld [vmem:[#allocation3 + $0x30] sm:$0xff]  ;;  %v7469_v24 = vpop.f32.mrb[15].mxu1  ;;  %v5271_v12 = vld [vmem:[#allocation3 + $0x38] sm:$0xff] }
 0x522   : > { %v5398_v55 = vld [vmem:[#allocation3 + $0x31] sm:$0xff]  ;;  %v5081_v46 = vld [vmem:[#allocation3 + $0x39] sm:$0xff]  ;;  %4985 = vst.msk [vmem:[#allocation3 + $0x51] sm:$0xff] %vm3129_vm3, %v4953_v53  ;;  %v4685_v33 = vadd.f32 %v7467_v28, %v4524_v62  ;;  %v7470_v51 = vadd.f32 %v7469_v24, %v7468_v49  ;;  %v10282_v61 = vpop.f32.mrb[76].mxu0  ;;  %v5301_v47 = vpack.c.bf16 %v5271_v12, %v5270_v42 }
 0x523   : > { %v5462_v40 = vld [vmem:[#allocation3 + $0x32] sm:$0xff]  ;;  %v10284_v6 = vpack.c.bf16 %v5081_v46, %v5080_v30  ;;  %v5463_v18 = vld [vmem:[#allocation3 + $0x3a] sm:$0xff]  ;;  %v10286_v22 = vpop.f32.mrb[77].mxu0 }
 0x524   : > { %v5589_v10 = vld [vmem:[#allocation3 + $0x38] sm:$0xff]  ;;  %v10288_v1 = vpack.c.bf16 %v5463_v18, %v5462_v40  ;;  %v4846_v7 = vadd.f32 %v10235_v29, %v4685_v33  ;;  %v4688_v34 = vadd.f32 %v7470_v51, %v4527_v8  ;;  %v10291_v16 = vpop.f32.mrb[78].mxu0  ;;  %5334 = vrot.lane.b32.xlu1 %v5301_v47, %s8010_s20  ;;  %5062 = vst.msk [vmem:[#allocation4 + $0x50] sm:$0xff] %vm3129_vm3, %v5301_v47 }
 0x525   : > { %v5399_v0 = vld [vmem:[#allocation3 + $0x39] sm:$0xff]  ;;  %v5620_v52 = vpack.c.bf16 %v5589_v10, %v5588_v3  ;;  %5144 = vrot.lane.b32.xlu0 %v10284_v6, %s8010_s20  ;;  %v10297_v30 = vpop.f32.mrb[79].mxu0  ;;  %v4532_v3 = vadd.f32 %v10120_v32, %v10212_v56  ;;  %v4535_v40 = vadd.f32 %v10122_v14, %v10212_v56 }
 0x526   : > { %v5429_v11 = vpack.c.bf16 %v5399_v0, %v5398_v55  ;;  %v5780_v31 = vld [vmem:[#allocation3 + $0x32] sm:$0xff]  ;;  %v5781_v41 = vld [vmem:[#allocation3 + $0x3a] sm:$0xff]  ;;  %5254 = vst.msk [vmem:[#allocation4 + $0x58] sm:$0xff] %vm3129_vm3, %v10288_v1  ;;  %v4954_v29 = vmax.f32 %v4846_v7, 0.0  ;;  %v4849_v23 = vadd.f32 %v10237_v25, %v4688_v34  ;;  %v7471_v62 = vpop.f32.mrb[16].mxu1 }
 0x527   : > { %v5812_v42 = vpack.c.bf16 %v5781_v41, %v5780_v31  ;;  %5636 = vst.msk [vmem:[#allocation4 + $0x18] sm:$0xff] %vm3129_vm3, %v5620_v52  ;;  %v7472_v53 = vpop.f32.mrb[17].mxu1  ;;  %v5272_v28 = vld [vmem:[#allocation3 + $0x48] sm:$0xff]  ;;  %v7961_v25 = vld [vmem:[%s11093_s5 + $0x90] sm:$0xff]  }
 0x528   : > { %5445 = vst.msk [vmem:[#allocation4 + $0x38] sm:$0xff] %vm3129_vm3, %v5429_v11  ;;  %v5082_v49 = vld [vmem:[#allocation3 + $0x49] sm:$0xff]  ;;  %4986 = vst.msk [vmem:[#allocation3 + $0x61] sm:$0xff] %vm3129_vm3, %v4954_v29  ;;  %v4955_v55 = vmax.f32 %v4849_v23, 0.0  ;;  %v7473_v8 = vadd.f32 %v7472_v53, %v7471_v62  ;;  %v7474_v24 = vpop.f32.mrb[18].mxu1  ;;  %7680 = vmatpush3.bf16.msra.mxu0 %v7961_v25 }
 0x529   : > { %5828 = vst.msk [vmem:[#allocation4 + $0x20] sm:$0xff] %vm3129_vm3, %v5812_v42  ;;  %v5590_v12 = vld [vmem:[#allocation3 + $0x48] sm:$0xff]  ;;  %v7475_v33 = vpop.f32.mrb[19].mxu1  ;;  %v5273_v51 = vld [vmem:[#allocation3 + $0x50] sm:$0xff] }
 0x52a   : > { %v5400_v46 = vld [vmem:[#allocation3 + $0x49] sm:$0xff]  ;;  %v5083_v47 = vld [vmem:[#allocation3 + $0x51] sm:$0xff]  ;;  %4987 = vst.msk [vmem:[#allocation3 + $0x69] sm:$0xff] %vm3129_vm3, %v4955_v55  ;;  %v4693_v32 = vadd.f32 %v7473_v8, %v4532_v3  ;;  %v7476_v10 = vadd.f32 %v7475_v33, %v7474_v24  ;;  %v10317_v0 = vpop.f32.mrb[80].mxu0  ;;  %v5302_v52 = vpack.c.bf16 %v5273_v51, %v5272_v28 }
 0x52b   : > { %v5464_v18 = vld [vmem:[#allocation3 + $0x4a] sm:$0xff]  ;;  %v10319_v11 = vpack.c.bf16 %v5083_v47, %v5082_v49  ;;  %v5465_v31 = vld [vmem:[#allocation3 + $0x52] sm:$0xff]  ;;  %v10321_v34 = vpop.f32.mrb[81].mxu0 }
 0x52c   : > { %v5591_v41 = vld [vmem:[#allocation3 + $0x50] sm:$0xff]  ;;  %v10323_v14 = vpack.c.bf16 %v5465_v31, %v5464_v18  ;;  %v4854_v53 = vadd.f32 %v10256_v36, %v4693_v32  ;;  %v4696_v63 = vadd.f32 %v7476_v10, %v4535_v40  ;;  %v10326_v3 = vpop.f32.mrb[82].mxu0  ;;  %5336 = vrot.lane.b32.xlu1 %v5302_v52, %s8010_s20  ;;  %5063 = vst.msk [vmem:[#allocation4 + $0x78] sm:$0xff] %vm3129_vm3, %v5302_v52 }
 0x52d   : > { %v5401_v7 = vld [vmem:[#allocation3 + $0x51] sm:$0xff]  ;;  %v5621_v42 = vpack.c.bf16 %v5591_v41, %v5590_v12  ;;  %5146 = vrot.lane.b32.xlu0 %v10319_v11, %s8010_s20  ;;  %v10332_v49 = vpop.f32.mrb[83].mxu0  ;;  %v4540_v40 = vadd.f32 %v10124_v60, %v10212_v56  ;;  %v4543_v10 = vadd.f32 %v10126_v59, %v10212_v56 }
 0x52e   : > { %v5430_v29 = vpack.c.bf16 %v5401_v7, %v5400_v46  ;;  %v5782_v23 = vld [vmem:[#allocation3 + $0x4a] sm:$0xff]  ;;  %v5783_v62 = vld [vmem:[#allocation3 + $0x52] sm:$0xff]  ;;  %5255 = vst.msk [vmem:[#allocation4 + $0x80] sm:$0xff] %vm3129_vm3, %v10323_v14  ;;  %v4956_v36 = vmax.f32 %v4854_v53, 0.0  ;;  %v4857_v55 = vadd.f32 %v10265_v27, %v4696_v63  ;;  %v7477_v8 = vpop.f32.mrb[20].mxu1 }
 0x52f   : > { %v5813_v28 = vpack.c.bf16 %v5783_v62, %v5782_v23  ;;  %5637 = vst.msk [vmem:[#allocation4 + $0x40] sm:$0xff] %vm3129_vm3, %v5621_v42  ;;  %v7478_v24 = vpop.f32.mrb[21].mxu1  ;;  %v5274_v25 = vld [vmem:[#allocation3 + $0x60] sm:$0xff]  ;;  %v7962_v46 = vld [vmem:[%s11093_s5 + $0xd8] sm:$0xff]  }
 0x530   : > { %5446 = vst.msk [vmem:[#allocation4 + $0x60] sm:$0xff] %vm3129_vm3, %v5430_v29  ;;  %v5084_v12 = vld [vmem:[#allocation3 + $0x61] sm:$0xff]  ;;  %4988 = vst.msk [vmem:[#allocation3 + $0x79] sm:$0xff] %vm3129_vm3, %v4956_v36  ;;  %v4957_v33 = vmax.f32 %v4857_v55, 0.0  ;;  %v7479_v51 = vadd.f32 %v7478_v24, %v7477_v8  ;;  %v7480_v47 = vpop.f32.mrb[22].mxu1  ;;  %7681 = vmatprep.subr.bf16.mxu0 %v7962_v46 }
 0x531   : > { %5829 = vst.msk [vmem:[#allocation4 + $0x48] sm:$0xff] %vm3129_vm3, %v5813_v28  ;;  %v7963_v27 = vld [vmem:[%s11093_s5 + $0x98] sm:$0xff]   ;;  %v5592_v18 = vld [vmem:[#allocation3 + $0x60] sm:$0xff]  ;;  %v7481_v52 = vpop.f32.mrb[23].mxu1 }
 0x532   : > { %v5402_v32 = vld [vmem:[#allocation3 + $0x61] sm:$0xff]  ;;  %v5085_v41 = vld [vmem:[#allocation3 + $0x69] sm:$0xff]  ;;  %4989 = vst.msk [vmem:[#allocation3 + $0x81] sm:$0xff] %vm3129_vm3, %v4957_v33  ;;  %v4701_v60 = vadd.f32 %v7479_v51, %v4540_v40  ;;  %v7482_v42 = vadd.f32 %v7481_v52, %v7480_v47  ;;  %v10352_v29 = vpop.f32.mrb[84].mxu0  ;;  %7682 = vmatpush3.bf16.msra.mxu0 %v7963_v27 }
 0x533   : > { %v5275_v31 = vld [vmem:[#allocation3 + $0x68] sm:$0xff]  ;;  %v10354_v62 = vpack.c.bf16 %v5085_v41, %v5084_v12  ;;  %v10356_v36 = vpop.f32.mrb[85].mxu0 }
 0x534   : > { %v5466_v7 = vld [vmem:[#allocation3 + $0x62] sm:$0xff]  ;;  %v5303_v23 = vpack.c.bf16 %v5275_v31, %v5274_v25  ;;  %v5467_v53 = vld [vmem:[#allocation3 + $0x6a] sm:$0xff]  ;;  %v4862_v40 = vadd.f32 %v10254_v35, %v4701_v60  ;;  %v4704_v33 = vadd.f32 %v7482_v42, %v4543_v10  ;;  %v10361_v51 = vpop.f32.mrb[86].mxu0  ;;  %v4548_v10 = vadd.f32 %v10128_v54, %v10212_v56 }
 0x535   : > { %v5593_v63 = vld [vmem:[#allocation3 + $0x68] sm:$0xff]  ;;  %v10358_v59 = vpack.c.bf16 %v5467_v53, %v5466_v7  ;;  %5148 = vrot.lane.b32.xlu0 %v10354_v62, %s8010_s20  ;;  %v10367_v12 = vpop.f32.mrb[87].mxu0 }
 0x536   : > { %v5403_v28 = vld [vmem:[#allocation3 + $0x69] sm:$0xff]  ;;  %v5622_v55 = vpack.c.bf16 %v5593_v63, %v5592_v18  ;;  %5338 = vrot.lane.b32.xlu1 %v5303_v23, %s8010_s20  ;;  %5064 = vst.msk [vmem:[#allocation4 + $0xa0] sm:$0xff] %vm3129_vm3, %v5303_v23  ;;  %v4958_v35 = vmax.f32 %v4862_v40, 0.0  ;;  %v4865_v47 = vadd.f32 %v10260_v58, %v4704_v33  ;;  %v7483_v27 = vpop.f32.mrb[24].mxu1  ;;  %v4551_v58 = vadd.f32 %v10130_v44, %v10212_v56 }
 0x537   : > { %v5431_v8 = vpack.c.bf16 %v5403_v28, %v5402_v32  ;;  %v5784_v24 = vld [vmem:[#allocation3 + $0x62] sm:$0xff]  ;;  %v5785_v46 = vld [vmem:[#allocation3 + $0x6a] sm:$0xff]  ;;  %5256 = vst.msk [vmem:[#allocation4 + $0xa8] sm:$0xff] %vm3129_vm3, %v10358_v59  ;;  %v7484_v18 = vpop.f32.mrb[25].mxu1  ;;  %v5276_v7 = vld [vmem:[#allocation3 + $0x78] sm:$0xff] }
 0x538   : > { %v5814_v25 = vpack.c.bf16 %v5785_v46, %v5784_v24  ;;  %5638 = vst.msk [vmem:[#allocation4 + $0x68] sm:$0xff] %vm3129_vm3, %v5622_v55  ;;  %v7964_v32 = vld [vmem:[%s11093_s5 + $0xe0] sm:$0xff]   ;;  %4990 = vst.msk [vmem:[#allocation3 + $0x91] sm:$0xff] %vm3129_vm3, %v4958_v35  ;;  %v4959_v52 = vmax.f32 %v4865_v47, 0.0  ;;  %v7485_v31 = vadd.f32 %v7484_v18, %v7483_v27  ;;  %v7486_v41 = vpop.f32.mrb[26].mxu1  ;;  %v5086_v60 = vld [vmem:[#allocation3 + $0x79] sm:$0xff] }
 0x539   : > { %5447 = vst.msk [vmem:[#allocation4 + $0x88] sm:$0xff] %vm3129_vm3, %v5431_v8  ;;  %v5594_v42 = vld [vmem:[#allocation3 + $0x78] sm:$0xff]  ;;  %v7487_v23 = vpop.f32.mrb[27].mxu1  ;;  %v5277_v53 = vld [vmem:[#allocation3 + $0x80] sm:$0xff]  ;;  %7683 = vmatprep.subr.bf16.mxu0 %v7964_v32  ;;  %v7966_v44 = vld [vmem:[%s11093_s5 + $0xa0] sm:$0xff]  }
 0x53a   : > { %5830 = vst.msk [vmem:[#allocation4 + $0x70] sm:$0xff] %vm3129_vm3, %v5814_v25  ;;  %v5087_v63 = vld [vmem:[#allocation3 + $0x81] sm:$0xff]  ;;  %v5404_v55 = vld [vmem:[#allocation3 + $0x79] sm:$0xff]  ;;  %4991 = vst.msk [vmem:[#allocation3 + $0x99] sm:$0xff] %vm3129_vm3, %v4959_v52  ;;  %v4709_v54 = vadd.f32 %v7485_v31, %v4548_v10  ;;  %v7488_v8 = vadd.f32 %v7487_v23, %v7486_v41  ;;  %v10384_v24 = vpop.f32.mrb[88].mxu0  ;;  %v5304_v46 = vpack.c.bf16 %v5277_v53, %v5276_v7  ;;  %7684 = vmatpush3.bf16.msra.mxu0 %v7966_v44 }
 0x53b   : > { %v5468_v28 = vld [vmem:[#allocation3 + $0x7a] sm:$0xff]  ;;  %v10386_v40 = vpack.c.bf16 %v5087_v63, %v5086_v60  ;;  %v5469_v33 = vld [vmem:[#allocation3 + $0x82] sm:$0xff]  ;;  %v10391_v35 = vpop.f32.mrb[89].mxu0  ;;  %v4559_v44 = vadd.f32 %v10134_v38, %v10212_v56 }
 0x53c   : > { %v5595_v25 = vld [vmem:[#allocation3 + $0x80] sm:$0xff]  ;;  %v10393_v47 = vpack.c.bf16 %v5469_v33, %v5468_v28  ;;  %v4870_v52 = vadd.f32 %v10286_v22, %v4709_v54  ;;  %v4712_v31 = vadd.f32 %v7488_v8, %v4551_v58  ;;  %v10396_v41 = vpop.f32.mrb[90].mxu0  ;;  %5340 = vrot.lane.b32.xlu1 %v5304_v46, %s8010_s20  ;;  %5065 = vst.msk [vmem:[#allocation4 + $0xc8] sm:$0xff] %vm3129_vm3, %v5304_v46  ;;  %v7967_v63 = vld [vmem:[%s11093_s5 + $0xe8] sm:$0xff]  }
 0x53d   : > { %v5623_v27 = vpack.c.bf16 %v5595_v25, %v5594_v42  ;;  %v5405_v18 = vld [vmem:[#allocation3 + $0x81] sm:$0xff]  ;;  %5150 = vrot.lane.b32.xlu0 %v10386_v40, %s8010_s20  ;;  %v10402_v60 = vpop.f32.mrb[91].mxu0  ;;  %v4556_v28 = vadd.f32 %v10132_v45, %v10212_v56  ;;  %7685 = vmatprep.subr.bf16.mxu0 %v7967_v63  ;;  %v7968_v38 = vld [vmem:[%s11093_s5 + $0xa8] sm:$0xff]  }
 0x53e   : > { %v5786_v32 = vld [vmem:[#allocation3 + $0x7a] sm:$0xff]  ;;  %v5787_v10 = vld [vmem:[#allocation3 + $0x82] sm:$0xff]  ;;  %v5432_v7 = vpack.c.bf16 %v5405_v18, %v5404_v55  ;;  %5257 = vst.msk [vmem:[#allocation4 + $0xd0] sm:$0xff] %vm3129_vm3, %v10393_v47  ;;  %v4960_v42 = vmax.f32 %v4870_v52, 0.0  ;;  %v4873_v58 = vadd.f32 %v10297_v30, %v4712_v31  ;;  %v7489_v23 = vpop.f32.mrb[28].mxu1  ;;  %7686 = vmatpush3.bf16.msra.mxu0 %v7968_v38  ;;  %v4567_v38 = vadd.f32 %v10139_v9, %v10212_v56 }
 0x53f   : > { %5639 = vst.msk [vmem:[#allocation4 + $0x90] sm:$0xff] %vm3129_vm3, %v5623_v27  ;;  %v5815_v22 = vpack.c.bf16 %v5787_v10, %v5786_v32  ;;  %v7490_v53 = vpop.f32.mrb[29].mxu1  ;;  %v5278_v46 = vld [vmem:[#allocation3 + $0x90] sm:$0xff] }
 0x540   : > { %5448 = vst.msk [vmem:[#allocation4 + $0xb0] sm:$0xff] %vm3129_vm3, %v5432_v7  ;;  %4992 = vst.msk [vmem:[#allocation3 + $0xa9] sm:$0xff] %vm3129_vm3, %v4960_v42  ;;  %v4961_v55 = vmax.f32 %v4873_v58, 0.0  ;;  %v7491_v54 = vadd.f32 %v7490_v53, %v7489_v23  ;;  %v7492_v8 = vpop.f32.mrb[30].mxu1  ;;  %v5088_v30 = vld [vmem:[#allocation3 + $0x91] sm:$0xff] }
 0x541   : > { %5831 = vst.msk [vmem:[#allocation4 + $0x98] sm:$0xff] %vm3129_vm3, %v5815_v22  ;;  %v5596_v33 = vld [vmem:[#allocation3 + $0x90] sm:$0xff]  ;;  %v7493_v25 = vpop.f32.mrb[31].mxu1  ;;  %v5279_v27 = vld [vmem:[#allocation3 + $0x98] sm:$0xff] }
 0x542   : > { %v5089_v18 = vld [vmem:[#allocation3 + $0x99] sm:$0xff]  ;;  %v5406_v10 = vld [vmem:[#allocation3 + $0x91] sm:$0xff]  ;;  %4993 = vst.msk [vmem:[#allocation3 + $0xb1] sm:$0xff] %vm3129_vm3, %v4961_v55  ;;  %v4717_v45 = vadd.f32 %v7491_v54, %v4556_v28  ;;  %v7494_v52 = vadd.f32 %v7493_v25, %v7492_v8  ;;  %v5305_v31 = vpack.c.bf16 %v5279_v27, %v5278_v46  ;;  %v10421_v22 = vpop.f32.mrb[92].mxu0 }
 0x543   : > { %v5470_v32 = vld [vmem:[#allocation3 + $0x92] sm:$0xff]  ;;  %v10419_v7 = vpack.c.bf16 %v5089_v18, %v5088_v30  ;;  %11263 = vst [vmem:[#allocation10_spill] sm:$0xff] %v10421_v22  ;;  %v5471_v42 = vld [vmem:[#allocation3 + $0x9a] sm:$0xff]  ;;  %v10426_v23 = vpop.f32.mrb[93].mxu0 }
 0x544   : > { %v5597_v58 = vld [vmem:[#allocation3 + $0x98] sm:$0xff]  ;;  %v10428_v53 = vpack.c.bf16 %v5471_v42, %v5470_v32  ;;  %v4878_v54 = vadd.f32 %v10282_v61, %v4717_v45  ;;  %v4720_v8 = vadd.f32 %v7494_v52, %v4559_v44  ;;  %5342 = vrot.lane.b32.xlu1 %v5305_v31, %s8010_s20  ;;  %v10434_v46 = vpop.f32.mrb[94].mxu0  ;;  %5066 = vst.msk [vmem:[#allocation4 + $0xf0] sm:$0xff] %vm3129_vm3, %v5305_v31 }
 0x545   : > { %v5624_v63 = vpack.c.bf16 %v5597_v58, %v5596_v33  ;;  %v5407_v13 = vld [vmem:[#allocation3 + $0x99] sm:$0xff]  ;;  %5152 = vrot.lane.b32.xlu0 %v10419_v7, %s8010_s20  ;;  %11264 = vst [vmem:[#allocation21_spill] sm:$0xff] %v10434_v46  ;;  %v10437_v25 = vpop.f32.mrb[95].mxu0  ;;  %v4564_v32 = vadd.f32 %v10136_v4, %v10212_v56 }
 0x546   : > { %v5788_v55 = vld [vmem:[#allocation3 + $0x92] sm:$0xff]  ;;  %v5789_v28 = vld [vmem:[#allocation3 + $0x9a] sm:$0xff]  ;;  %v5433_v30 = vpack.c.bf16 %v5407_v13, %v5406_v10  ;;  %5258 = vst.msk [vmem:[#allocation4 + $0xf8] sm:$0xff] %vm3129_vm3, %v10428_v53  ;;  %v4962_v33 = vmax.f32 %v4878_v54, 0.0  ;;  %v4881_v44 = vadd.f32 %v10291_v16, %v4720_v8  ;;  %v7495_v27 = vpop.f32.mrb[32].mxu1 }
 0x547   : > { %5640 = vst.msk [vmem:[#allocation4 + $0xb8] sm:$0xff] %vm3129_vm3, %v5624_v63  ;;  %v5816_v61 = vpack.c.bf16 %v5789_v28, %v5788_v55  ;;  %v7496_v18 = vpop.f32.mrb[33].mxu1  ;;  %v7969_v13 = vld [vmem:[%s11093_s5 + $0xf0] sm:$0xff]   ;;  %v5280_v31 = vld [vmem:[#allocation3 + $0xa8] sm:$0xff] }
 0x548   : > { %5449 = vst.msk [vmem:[#allocation4 + $0xd8] sm:$0xff] %vm3129_vm3, %v5433_v30  ;;  %4994 = vst.msk [vmem:[#allocation3 + $0xc1] sm:$0xff] %vm3129_vm3, %v4962_v33  ;;  %v4963_v10 = vmax.f32 %v4881_v44, 0.0  ;;  %v7497_v45 = vadd.f32 %v7496_v18, %v7495_v27  ;;  %v7498_v52 = vpop.f32.mrb[34].mxu1  ;;  %v5090_v16 = vld [vmem:[#allocation3 + $0xa9] sm:$0xff]  ;;  %7687 = vmatprep.subr.bf16.mxu0 %v7969_v13  ;;  %v7970_v44 = vld [vmem:[%s11093_s5 + $0xb0] sm:$0xff]  }
 0x549   : > { %5832 = vst.msk [vmem:[#allocation4 + $0xc0] sm:$0xff] %vm3129_vm3, %v5816_v61  ;;  %v5598_v42 = vld [vmem:[#allocation3 + $0xa8] sm:$0xff]  ;;  %v7499_v58 = vpop.f32.mrb[35].mxu1  ;;  %v5281_v63 = vld [vmem:[#allocation3 + $0xb0] sm:$0xff]  ;;  %7688 = vmatpush3.bf16.msra.mxu0 %v7970_v44 }
 0x54a   : > { %v5091_v55 = vld [vmem:[#allocation3 + $0xb1] sm:$0xff]  ;;  %v5408_v54 = vld [vmem:[#allocation3 + $0xa9] sm:$0xff]  ;;  %4995 = vst.msk [vmem:[#allocation3 + $0xc9] sm:$0xff] %vm3129_vm3, %v4963_v10  ;;  %v4725_v4 = vadd.f32 %v7497_v45, %v4564_v32  ;;  %v7500_v8 = vadd.f32 %v7499_v58, %v7498_v52  ;;  %v5306_v30 = vpack.c.bf16 %v5281_v63, %v5280_v31 }
 0x54b   : > { %v5472_v28 = vld [vmem:[#allocation3 + $0xaa] sm:$0xff]  ;;  %v10454_v61 = vpack.c.bf16 %v5091_v55, %v5090_v16  ;;  %v5473_v33 = vld [vmem:[#allocation3 + $0xb2] sm:$0xff]  ;;  %v4575_v55 = vadd.f32 %v10149_v37, %v10212_v56 }
 0x54c   : > { %v5599_v27 = vld [vmem:[#allocation3 + $0xb0] sm:$0xff]  ;;  %v10459_v9 = vpack.c.bf16 %v5473_v33, %v5472_v28  ;;  %v4886_v20 = vadd.f32 %v10321_v34, %v4725_v4  ;;  %v4728_v10 = vadd.f32 %v7500_v8, %v4567_v38  ;;  %5344 = vrot.lane.b32.xlu1 %v5306_v30, %s8010_s20  ;;  %5067 = vst.msk [vmem:[#allocation4 + $0x118] sm:$0xff] %vm3129_vm3, %v5306_v30  ;;  %v7972_v63 = vld [vmem:[%s11093_s5 + $0xb8] sm:$0xff]  }
 0x54d   : > { %v5625_v18 = vpack.c.bf16 %v5599_v27, %v5598_v42  ;;  %v5409_v46 = vld [vmem:[#allocation3 + $0xb1] sm:$0xff]  ;;  %5154 = vrot.lane.b32.xlu0 %v10454_v61, %s8010_s20  ;;  %v7971_v42 = vld [vmem:[%s11093_s5 + $0xf8] sm:$0xff]  }
 0x54e   : > { %v5790_v22 = vld [vmem:[#allocation3 + $0xaa] sm:$0xff]  ;;  %v5791_v13 = vld [vmem:[#allocation3 + $0xb2] sm:$0xff]  ;;  %v5434_v32 = vpack.c.bf16 %v5409_v46, %v5408_v54  ;;  %5259 = vst.msk [vmem:[#allocation4 + $0x120] sm:$0xff] %vm3129_vm3, %v10459_v9  ;;  %v4964_v52 = vmax.f32 %v4886_v20, 0.0  ;;  %v4889_v31 = vadd.f32 %v10332_v49, %v4728_v10  ;;  %v7501_v34 = vpop.f32.mrb[36].mxu1  ;;  %v4572_v46 = vadd.f32 %v10147_v50, %v10212_v56  ;;  %7689 = vmatprep.subr.bf16.mxu0 %v7971_v42 }
 0x54f   : > { %5641 = vst.msk [vmem:[#allocation4 + $0xe0] sm:$0xff] %vm3129_vm3, %v5625_v18  ;;  %v5817_v45 = vpack.c.bf16 %v5791_v13, %v5790_v22  ;;  %v7502_v16 = vpop.f32.mrb[37].mxu1  ;;  %v5282_v49 = vld [vmem:[#allocation3 + $0xc0] sm:$0xff]  ;;  %7690 = vmatpush3.bf16.msra.mxu0 %v7972_v63 }
 0x550   : > { %5450 = vst.msk [vmem:[#allocation4 + $0x100] sm:$0xff] %vm3129_vm3, %v5434_v32  ;;  %4996 = vst.msk [vmem:[#allocation3 + $0xd9] sm:$0xff] %vm3129_vm3, %v4964_v52  ;;  %v4965_v38 = vmax.f32 %v4889_v31, 0.0  ;;  %v7503_v22 = vadd.f32 %v7502_v16, %v7501_v34  ;;  %v7504_v20 = vpop.f32.mrb[38].mxu1  ;;  %v5092_v58 = vld [vmem:[#allocation3 + $0xc1] sm:$0xff] }
 0x551   : > { %5833 = vst.msk [vmem:[#allocation4 + $0xe8] sm:$0xff] %vm3129_vm3, %v5817_v45  ;;  %5524 = vrot.lane.b32.xlu0 %v10258_v15, %s8010_s20  ;;  %v7505_v28 = vpop.f32.mrb[39].mxu1  ;;  %v5283_v54 = vld [vmem:[#allocation3 + $0xc8] sm:$0xff]  ;;  %v5600_v27 = vld [vmem:[#allocation3 + $0xc0] sm:$0xff] }
 0x552   : > { %v5093_v50 = vld [vmem:[#allocation3 + $0xc9] sm:$0xff]  ;;  %4997 = vst.msk [vmem:[#allocation3 + $0xe1] sm:$0xff] %vm3129_vm3, %v4965_v38  ;;  %v4733_v8 = vadd.f32 %v7503_v22, %v4572_v46  ;;  %v7506_v30 = vadd.f32 %v7505_v28, %v7504_v20  ;;  %v5307_v15 = vpack.c.bf16 %v5283_v54, %v5282_v49  ;;  %v5410_v37 = vld [vmem:[#allocation3 + $0xc1] sm:$0xff]  ;;  %v4580_v49 = vadd.f32 %v10151_v19, %v10212_v56 }
 0x553   : > { %v5474_v4 = vld [vmem:[#allocation3 + $0xc2] sm:$0xff]  ;;  %v10486_v33 = vpack.c.bf16 %v5093_v50, %v5092_v58  ;;  %v5475_v44 = vld [vmem:[#allocation3 + $0xca] sm:$0xff]  ;;  %v4583_v50 = vadd.f32 %v10153_v57, %v10212_v56 }
 0x554   : > { %v5601_v18 = vld [vmem:[#allocation3 + $0xc8] sm:$0xff]  ;;  %v10488_v13 = vpack.c.bf16 %v5475_v44, %v5474_v4  ;;  %v4894_v52 = vadd.f32 %v10317_v0, %v4733_v8  ;;  %v4736_v31 = vadd.f32 %v7506_v30, %v4575_v55  ;;  %5346 = vrot.lane.b32.xlu1 %v5307_v15, %s8010_s20  ;;  %5068 = vst.msk [vmem:[#allocation4 + $0x140] sm:$0xff] %vm3129_vm3, %v5307_v15 }
 0x555   : > { %v5626_v10 = vpack.c.bf16 %v5601_v18, %v5600_v27  ;;  %v5411_v32 = vld [vmem:[#allocation3 + $0xc9] sm:$0xff]  ;;  %5156 = vrot.lane.b32.xlu0 %v10486_v33, %s8010_s20 }
 0x556   : > { %v5792_v45 = vld [vmem:[#allocation3 + $0xc2] sm:$0xff]  ;;  %v5435_v34 = vpack.c.bf16 %v5411_v32, %v5410_v37  ;;  %v5793_v16 = vld [vmem:[#allocation3 + $0xca] sm:$0xff]  ;;  %5260 = vst.msk [vmem:[#allocation4 + $0x148] sm:$0xff] %vm3129_vm3, %v10488_v13  ;;  %v4966_v46 = vmax.f32 %v4894_v52, 0.0  ;;  %v4897_v38 = vadd.f32 %v10326_v3, %v4736_v31  ;;  %v7507_v0 = vpop.f32.mrb[40].mxu1 }
 0x557   : > { %5642 = vst.msk [vmem:[#allocation4 + $0x108] sm:$0xff] %vm3129_vm3, %v5626_v10  ;;  %v5818_v42 = vpack.c.bf16 %v5793_v16, %v5792_v45  ;;  %v7508_v22 = vpop.f32.mrb[41].mxu1  ;;  %v5284_v20 = vld [vmem:[#allocation3 + $0xd8] sm:$0xff] }
 0x558   : > { %5451 = vst.msk [vmem:[#allocation4 + $0x128] sm:$0xff] %vm3129_vm3, %v5435_v34  ;;  %4998 = vst.msk [vmem:[#allocation3 + $0xf1] sm:$0xff] %vm3129_vm3, %v4966_v46  ;;  %v4967_v58 = vmax.f32 %v4897_v38, 0.0  ;;  %v7509_v63 = vadd.f32 %v7508_v22, %v7507_v0  ;;  %5716 = vrot.lane.b32.xlu1 %v10284_v6, %s8010_s20  ;;  %v7510_v3 = vpop.f32.mrb[42].mxu1  ;;  %v5094_v55 = vld [vmem:[#allocation3 + $0xd9] sm:$0xff]  ;;  %v4588_v22 = vadd.f32 %v10161_v21, %v10212_v56 }
 0x559   : > { %5834 = vst.msk [vmem:[#allocation4 + $0x110] sm:$0xff] %vm3129_vm3, %v5818_v42  ;;  %5526 = vrot.lane.b32.xlu0 %v10288_v1, %s8010_s20  ;;  %v5602_v28 = vld [vmem:[#allocation3 + $0xd8] sm:$0xff]  ;;  %v7511_v4 = vpop.f32.mrb[43].mxu1  ;;  %v5285_v8 = vld [vmem:[#allocation3 + $0xe0] sm:$0xff] }
 0x55a   : > { %v5412_v54 = vld [vmem:[#allocation3 + $0xd9] sm:$0xff]  ;;  %v5095_v19 = vld [vmem:[#allocation3 + $0xe1] sm:$0xff]  ;;  %4999 = vst.msk [vmem:[#allocation3 + $0xf9] sm:$0xff] %vm3129_vm3, %v4967_v58  ;;  %v4741_v15 = vadd.f32 %v7509_v63, %v4580_v49  ;;  %v7512_v44 = vadd.f32 %v7511_v4, %v7510_v3  ;;  %v5308_v27 = vpack.c.bf16 %v5285_v8, %v5284_v20 }
 0x55b   : > { %v5476_v30 = vld [vmem:[#allocation3 + $0xda] sm:$0xff]  ;;  %v10511_v6 = vpack.c.bf16 %v5095_v19, %v5094_v55  ;;  %v5477_v18 = vld [vmem:[#allocation3 + $0xe2] sm:$0xff]  ;;  %v4591_v55 = vadd.f32 %v10163_v2, %v10212_v56 }
 0x55c   : > { %v5603_v1 = vld [vmem:[#allocation3 + $0xe0] sm:$0xff]  ;;  %v10513_v37 = vpack.c.bf16 %v5477_v18, %v5476_v30  ;;  %v4902_v31 = vadd.f32 %v10356_v36, %v4741_v15  ;;  %v4744_v34 = vadd.f32 %v7512_v44, %v4583_v50  ;;  %5348 = vrot.lane.b32.xlu1 %v5308_v27, %s8010_s20  ;;  %5069 = vst.msk [vmem:[#allocation4 + $0x168] sm:$0xff] %vm3129_vm3, %v5308_v27 }
 0x55d   : > { %v5413_v10 = vld [vmem:[#allocation3 + $0xe1] sm:$0xff]  ;;  %v5627_v32 = vpack.c.bf16 %v5603_v1, %v5602_v28  ;;  %5158 = vrot.lane.b32.xlu0 %v10511_v6, %s8010_s20 }
 0x55e   : > { %v5436_v45 = vpack.c.bf16 %v5413_v10, %v5412_v54  ;;  %v5794_v52 = vld [vmem:[#allocation3 + $0xda] sm:$0xff]  ;;  %v5795_v57 = vld [vmem:[#allocation3 + $0xe2] sm:$0xff]  ;;  %5261 = vst.msk [vmem:[#allocation4 + $0x170] sm:$0xff] %vm3129_vm3, %v10513_v37  ;;  %v4968_v42 = vmax.f32 %v4902_v31, 0.0  ;;  %v4905_v46 = vadd.f32 %v10367_v12, %v4744_v34  ;;  %v7513_v36 = vpop.f32.mrb[44].mxu1 }
 0x55f   : > { %v5819_v16 = vpack.c.bf16 %v5795_v57, %v5794_v52  ;;  %5643 = vst.msk [vmem:[#allocation4 + $0x130] sm:$0xff] %vm3129_vm3, %v5627_v32  ;;  %v7514_v38 = vpop.f32.mrb[45].mxu1  ;;  %v5286_v0 = vld [vmem:[#allocation3 + $0xf0] sm:$0xff] }
 0x560   : > { %5452 = vst.msk [vmem:[#allocation4 + $0x150] sm:$0xff] %vm3129_vm3, %v5436_v45  ;;  %5000 = vst.msk [vmem:[#allocation3 + $0x109] sm:$0xff] %vm3129_vm3, %v4968_v42  ;;  %v4969_v20 = vmax.f32 %v4905_v46, 0.0  ;;  %v7515_v49 = vadd.f32 %v7514_v38, %v7513_v36  ;;  %5718 = vrot.lane.b32.xlu1 %v10319_v11, %s8010_s20  ;;  %v7516_v58 = vpop.f32.mrb[46].mxu1  ;;  %v5096_v12 = vld [vmem:[#allocation3 + $0xf1] sm:$0xff] }
 0x561   : > { %5835 = vst.msk [vmem:[#allocation4 + $0x138] sm:$0xff] %vm3129_vm3, %v5819_v16  ;;  %5528 = vrot.lane.b32.xlu0 %v10323_v14, %s8010_s20  ;;  %v5414_v63 = vld [vmem:[#allocation3 + $0xf1] sm:$0xff]  ;;  %v7517_v28 = vpop.f32.mrb[47].mxu1  ;;  %v5097_v21 = vld [vmem:[#allocation3 + $0xf9] sm:$0xff]  ;;  %v10554_v34 = vld [vmem:[%s11092_s4] ss:$0 sm:$0xff] }
 0x562   : > { %v5604_v3 = vld [vmem:[#allocation3 + $0xf0] sm:$0xff]  ;;  %v5287_v54 = vld [vmem:[#allocation3 + $0xf8] sm:$0xff]  ;;  %5001 = vst.msk [vmem:[#allocation3 + $0x111] sm:$0xff] %vm3129_vm3, %v4969_v20  ;;  %v4749_v4 = vadd.f32 %v7515_v49, %v4588_v22  ;;  %v7518_v8 = vadd.f32 %v7517_v28, %v7516_v58  ;;  %v10536_v11 = vpack.c.bf16 %v5097_v21, %v5096_v12  ;;  %v4596_v16 = vadd.f32 %v10554_v34, %v10165_v5 }
 0x563   : > { %v5478_v50 = vld [vmem:[#allocation3 + $0xf2] sm:$0xff]  ;;  %v5309_v19 = vpack.c.bf16 %v5287_v54, %v5286_v0  ;;  %v5479_v30 = vld [vmem:[#allocation3 + $0xfa] sm:$0xff]  ;;  %v4599_v22 = vadd.f32 %v10554_v34, %v10167_v17 }
 0x564   : > { %v5415_v14 = vld [vmem:[#allocation3 + $0xf9] sm:$0xff]  ;;  %v10538_v44 = vpack.c.bf16 %v5479_v30, %v5478_v50  ;;  %v4910_v56 = vadd.f32 %v10352_v29, %v4749_v4  ;;  %v4752_v10 = vadd.f32 %v7518_v8, %v4591_v55 }
 0x565   : > { %v5605_v15 = vld [vmem:[#allocation3 + $0xf8] sm:$0xff]  ;;  %v5437_v27 = vpack.c.bf16 %v5415_v14, %v5414_v63  ;;  %5350 = vrot.lane.b32.xlu1 %v5309_v19, %s8010_s20  ;;  %5160 = vrot.lane.b32.xlu0 %v10536_v11, %s8010_s20  ;;  %5070 = vst.msk [vmem:[#allocation4 + $0x190] sm:$0xff] %vm3129_vm3, %v5309_v19 }
 0x566   : > { %v5628_v18 = vpack.c.bf16 %v5605_v15, %v5604_v3  ;;  %v5796_v1 = vld [vmem:[#allocation3 + $0xf2] sm:$0xff]  ;;  %v5797_v2 = vld [vmem:[#allocation3 + $0xfa] sm:$0xff]  ;;  %5262 = vst.msk [vmem:[#allocation4 + $0x198] sm:$0xff] %vm3129_vm3, %v10538_v44  ;;  %v4970_v45 = vmax.f32 %v4910_v56, 0.0  ;;  %v4913_v52 = vadd.f32 %v10361_v51, %v4752_v10  ;;  %v7519_v29 = vpop.f32.mrb[48].mxu1 }
 0x567   : > { %v5820_v32 = vpack.c.bf16 %v5797_v2, %v5796_v1  ;;  %5453 = vst.msk [vmem:[#allocation4 + $0x178] sm:$0xff] %vm3129_vm3, %v5437_v27  ;;  %v7520_v57 = vpop.f32.mrb[49].mxu1  ;;  %v5288_v31 = vld [vmem:[#allocation3 + $0x108] sm:$0xff]  ;;  %v4604_v1 = vadd.f32 %v10554_v34, %v10181_v43 }
 0x568   : > { %5644 = vst.msk [vmem:[#allocation4 + $0x158] sm:$0xff] %vm3129_vm3, %v5628_v18  ;;  %5002 = vst.msk [vmem:[#allocation3 + $0x121] sm:$0xff] %vm3129_vm3, %v4970_v45  ;;  %v4971_v42 = vmax.f32 %v4913_v52, 0.0  ;;  %v7521_v46 = vadd.f32 %v7520_v57, %v7519_v29  ;;  %v7522_v51 = vpop.f32.mrb[50].mxu1  ;;  %v5098_v36 = vld [vmem:[#allocation3 + $0x109] sm:$0xff]  ;;  %v4607_v52 = vadd.f32 %v10554_v34, %v10183_v39 }
 0x569   : > { %5836 = vst.msk [vmem:[#allocation4 + $0x160] sm:$0xff] %vm3129_vm3, %v5820_v32  ;;  %5720 = vrot.lane.b32.xlu1 %v10354_v62, %s8010_s20  ;;  %5530 = vrot.lane.b32.xlu0 %v10358_v59, %s8010_s20  ;;  %v5416_v38 = vld [vmem:[#allocation3 + $0x109] sm:$0xff]  ;;  %v7523_v20 = vpop.f32.mrb[51].mxu1  ;;  %v5099_v5 = vld [vmem:[#allocation3 + $0x111] sm:$0xff] }
 0x56a   : > { %v5606_v0 = vld [vmem:[#allocation3 + $0x108] sm:$0xff]  ;;  %v5289_v49 = vld [vmem:[#allocation3 + $0x110] sm:$0xff]  ;;  %5003 = vst.msk [vmem:[#allocation3 + $0x129] sm:$0xff] %vm3129_vm3, %v4971_v42  ;;  %v4757_v12 = vadd.f32 %v7521_v46, %v4596_v16  ;;  %v7524_v63 = vadd.f32 %v7523_v20, %v7522_v51  ;;  %v10566_v62 = vpack.c.bf16 %v5099_v5, %v5098_v36 }
 0x56b   : > { %v5480_v58 = vld [vmem:[#allocation3 + $0x10a] sm:$0xff]  ;;  %v5310_v3 = vpack.c.bf16 %v5289_v49, %v5288_v31  ;;  %v5481_v55 = vld [vmem:[#allocation3 + $0x112] sm:$0xff] }
 0x56c   : > { %v5417_v59 = vld [vmem:[#allocation3 + $0x111] sm:$0xff]  ;;  %v10568_v54 = vpack.c.bf16 %v5481_v55, %v5480_v58  ;;  %v4918_v8 = vadd.f32 %v10391_v35, %v4757_v12  ;;  %v4760_v19 = vadd.f32 %v7524_v63, %v4599_v22 }
 0x56d   : > { %v5607_v28 = vld [vmem:[#allocation3 + $0x110] sm:$0xff]  ;;  %v5438_v21 = vpack.c.bf16 %v5417_v59, %v5416_v38  ;;  %5352 = vrot.lane.b32.xlu1 %v5310_v3, %s8010_s20  ;;  %5162 = vrot.lane.b32.xlu0 %v10566_v62, %s8010_s20  ;;  %5071 = vst.msk [vmem:[#allocation4 + $0x1b8] sm:$0xff] %vm3129_vm3, %v5310_v3  ;;  %v4612_v59 = vadd.f32 %v10554_v34, %v10191_v48 }
 0x56e   : > { %v5629_v50 = vpack.c.bf16 %v5607_v28, %v5606_v0  ;;  %v5798_v4 = vld [vmem:[#allocation3 + $0x10a] sm:$0xff]  ;;  %v5799_v17 = vld [vmem:[#allocation3 + $0x112] sm:$0xff]  ;;  %5263 = vst.msk [vmem:[#allocation4 + $0x1c0] sm:$0xff] %vm3129_vm3, %v10568_v54  ;;  %v4972_v14 = vmax.f32 %v4918_v8, 0.0  ;;  %v4921_v15 = vadd.f32 %v10402_v60, %v4760_v19  ;;  %v7525_v35 = vpop.f32.mrb[52].mxu1  ;;  %v4615_v8 = vadd.f32 %v10554_v34, %v10199_v26 }
 0x56f   : > { %v5821_v30 = vpack.c.bf16 %v5799_v17, %v5798_v4  ;;  %5454 = vst.msk [vmem:[#allocation4 + $0x1a0] sm:$0xff] %vm3129_vm3, %v5438_v21  ;;  %v7526_v27 = vpop.f32.mrb[53].mxu1  ;;  %v5290_v18 = vld [vmem:[#allocation3 + $0x120] sm:$0xff] }
 0x570   : > { %5645 = vst.msk [vmem:[#allocation4 + $0x180] sm:$0xff] %vm3129_vm3, %v5629_v50  ;;  %5004 = vst.msk [vmem:[#allocation3 + $0x139] sm:$0xff] %vm3129_vm3, %v4972_v14  ;;  %v4973_v2 = vmax.f32 %v4921_v15, 0.0  ;;  %v7527_v56 = vadd.f32 %v7526_v27, %v7525_v35  ;;  %v7528_v10 = vpop.f32.mrb[54].mxu1  ;;  %v5100_v60 = vld [vmem:[#allocation3 + $0x121] sm:$0xff] }
 0x571   : > { %5837 = vst.msk [vmem:[#allocation4 + $0x188] sm:$0xff] %vm3129_vm3, %v5821_v30  ;;  %5722 = vrot.lane.b32.xlu1 %v10386_v40, %s8010_s20  ;;  %5532 = vrot.lane.b32.xlu0 %v10393_v47, %s8010_s20  ;;  %v5418_v32 = vld [vmem:[#allocation3 + $0x121] sm:$0xff]  ;;  %v7529_v29 = vpop.f32.mrb[55].mxu1  ;;  %v5101_v43 = vld [vmem:[#allocation3 + $0x129] sm:$0xff] }
 0x572   : > { %v5608_v45 = vld [vmem:[#allocation3 + $0x120] sm:$0xff]  ;;  %v5291_v57 = vld [vmem:[#allocation3 + $0x128] sm:$0xff]  ;;  %5005 = vst.msk [vmem:[#allocation3 + $0x141] sm:$0xff] %vm3129_vm3, %v4973_v2  ;;  %v4765_v16 = vadd.f32 %v7527_v56, %v4604_v1  ;;  %v7530_v42 = vadd.f32 %v7529_v29, %v7528_v10  ;;  %v10591_v40 = vpack.c.bf16 %v5101_v43, %v5100_v60 }
 0x573   : > { %v5482_v31 = vld [vmem:[#allocation3 + $0x122] sm:$0xff]  ;;  %v5311_v46 = vpack.c.bf16 %v5291_v57, %v5290_v18  ;;  %v5483_v51 = vld [vmem:[#allocation3 + $0x12a] sm:$0xff] }
 0x574   : > { %v5419_v47 = vld [vmem:[#allocation3 + $0x129] sm:$0xff]  ;;  %v10593_v38 = vpack.c.bf16 %v5483_v51, %v5482_v31  ;;  %v4926_v49 = vadd.f32 %v10384_v24, %v4765_v16  ;;  %v4768_v5 = vadd.f32 %v7530_v42, %v4607_v52  ;;  %v11265_v16 = vld [vmem:[#allocation19_spill] sm:$0xff] }
 0x575   : > { %v5609_v36 = vld [vmem:[#allocation3 + $0x128] sm:$0xff]  ;;  %v5439_v0 = vpack.c.bf16 %v5419_v47, %v5418_v32  ;;  %5354 = vrot.lane.b32.xlu1 %v5311_v46, %s8010_s20  ;;  %5164 = vrot.lane.b32.xlu0 %v10591_v40, %s8010_s20  ;;  %5072 = vst.msk [vmem:[#allocation4 + $0x1e0] sm:$0xff] %vm3129_vm3, %v5311_v46  ;;  %v4620_v42 = vadd.f32 %v10554_v34, %v11265_v16 }
 0x576   : > { %v5630_v22 = vpack.c.bf16 %v5609_v36, %v5608_v45  ;;  %v5800_v20 = vld [vmem:[#allocation3 + $0x122] sm:$0xff]  ;;  %v5801_v39 = vld [vmem:[#allocation3 + $0x12a] sm:$0xff]  ;;  %5264 = vst.msk [vmem:[#allocation4 + $0x1e8] sm:$0xff] %vm3129_vm3, %v10593_v38  ;;  %v4974_v12 = vmax.f32 %v4926_v49, 0.0  ;;  %v4929_v63 = vadd.f32 %v10396_v41, %v4768_v5  ;;  %v7531_v24 = vpop.f32.mrb[56].mxu1 }
 0x577   : > { %v5822_v58 = vpack.c.bf16 %v5801_v39, %v5800_v20  ;;  %5455 = vst.msk [vmem:[#allocation4 + $0x1c8] sm:$0xff] %vm3129_vm3, %v5439_v0  ;;  %v7532_v3 = vpop.f32.mrb[57].mxu1  ;;  %v5292_v55 = vld [vmem:[#allocation3 + $0x138] sm:$0xff] }
 0x578   : > { %5646 = vst.msk [vmem:[#allocation4 + $0x1a8] sm:$0xff] %vm3129_vm3, %v5630_v22  ;;  %5006 = vst.msk [vmem:[#allocation3 + $0x151] sm:$0xff] %vm3129_vm3, %v4974_v12  ;;  %v4975_v28 = vmax.f32 %v4929_v63, 0.0  ;;  %v7533_v21 = vadd.f32 %v7532_v3, %v7531_v24  ;;  %v7534_v50 = vpop.f32.mrb[58].mxu1  ;;  %v5102_v41 = vld [vmem:[#allocation3 + $0x139] sm:$0xff]  ;;  %v11266_v22 = vld [vmem:[#allocation12_spill] sm:$0xff] }
 0x579   : > { %5838 = vst.msk [vmem:[#allocation4 + $0x1b0] sm:$0xff] %vm3129_vm3, %v5822_v58  ;;  %5724 = vrot.lane.b32.xlu1 %v10419_v7, %s8010_s20  ;;  %5534 = vrot.lane.b32.xlu0 %v10428_v53, %s8010_s20  ;;  %v5420_v4 = vld [vmem:[#allocation3 + $0x139] sm:$0xff]  ;;  %v7535_v19 = vpop.f32.mrb[59].mxu1  ;;  %v5103_v48 = vld [vmem:[#allocation3 + $0x141] sm:$0xff]  ;;  %v4623_v20 = vadd.f32 %v10554_v34, %v11266_v22 }
 0x57a   : > { %v5610_v17 = vld [vmem:[#allocation3 + $0x138] sm:$0xff]  ;;  %v5293_v30 = vld [vmem:[#allocation3 + $0x140] sm:$0xff]  ;;  %5007 = vst.msk [vmem:[#allocation3 + $0x159] sm:$0xff] %vm3129_vm3, %v4975_v28  ;;  %v4773_v15 = vadd.f32 %v7533_v21, %v4612_v59  ;;  %v7536_v35 = vadd.f32 %v7535_v19, %v7534_v50  ;;  %v10616_v7 = vpack.c.bf16 %v5103_v48, %v5102_v41 }
 0x57b   : > { %v5484_v14 = vld [vmem:[#allocation3 + $0x13a] sm:$0xff]  ;;  %v5312_v27 = vpack.c.bf16 %v5293_v30, %v5292_v55  ;;  %v5485_v18 = vld [vmem:[#allocation3 + $0x142] sm:$0xff]  ;;  %v11267_v41 = vld [vmem:[#allocation10_spill] sm:$0xff] }
 0x57c   : > { %v5421_v53 = vld [vmem:[#allocation3 + $0x141] sm:$0xff]  ;;  %v10618_v2 = vpack.c.bf16 %v5485_v18, %v5484_v14  ;;  %v4934_v32 = vadd.f32 %v10426_v23, %v4773_v15  ;;  %v4776_v45 = vadd.f32 %v7536_v35, %v4615_v8  ;;  %v11268_v30 = vld [vmem:[#allocation21_spill] sm:$0xff] }
 0x57d   : > { %v5611_v1 = vld [vmem:[#allocation3 + $0x140] sm:$0xff]  ;;  %v5440_v56 = vpack.c.bf16 %v5421_v53, %v5420_v4  ;;  %5356 = vrot.lane.b32.xlu1 %v5312_v27, %s8010_s20  ;;  %5166 = vrot.lane.b32.xlu0 %v10616_v7, %s8010_s20  ;;  %5073 = vst.msk [vmem:[#allocation4 + $0x208] sm:$0xff] %vm3129_vm3, %v5312_v27 }
 0x57e   : > { %v5631_v10 = vpack.c.bf16 %v5611_v1, %v5610_v17  ;;  %v5802_v60 = vld [vmem:[#allocation3 + $0x13a] sm:$0xff]  ;;  %v5803_v26 = vld [vmem:[#allocation3 + $0x142] sm:$0xff]  ;;  %5265 = vst.msk [vmem:[#allocation4 + $0x210] sm:$0xff] %vm3129_vm3, %v10618_v2  ;;  %v4976_v29 = vmax.f32 %v4934_v32, 0.0  ;;  %v4937_v57 = vadd.f32 %v10437_v25, %v4776_v45  ;;  %v7537_v23 = vpop.f32.mrb[60].mxu1 }
 0x57f   : > { %v5823_v52 = vpack.c.bf16 %v5803_v26, %v5802_v60  ;;  %5456 = vst.msk [vmem:[#allocation4 + $0x1f0] sm:$0xff] %vm3129_vm3, %v5440_v56  ;;  %v7538_v43 = vpop.f32.mrb[61].mxu1  ;;  %v5294_v31 = vld [vmem:[#allocation3 + $0x150] sm:$0xff] }
 0x580   : > { %5647 = vst.msk [vmem:[#allocation4 + $0x1d0] sm:$0xff] %vm3129_vm3, %v5631_v10  ;;  %5008 = vst.msk [vmem:[#allocation3 + $0x169] sm:$0xff] %vm3129_vm3, %v4976_v29  ;;  %v4977_v46 = vmax.f32 %v4937_v57, 0.0  ;;  %v7539_v51 = vadd.f32 %v7538_v43, %v7537_v23  ;;  %v7540_v47 = vpop.f32.mrb[62].mxu1  ;;  %v5104_v25 = vld [vmem:[#allocation3 + $0x151] sm:$0xff] }
 0x581   : > { %5839 = vst.msk [vmem:[#allocation4 + $0x1d8] sm:$0xff] %vm3129_vm3, %v5823_v52  ;;  %5726 = vrot.lane.b32.xlu1 %v10454_v61, %s8010_s20  ;;  %5536 = vrot.lane.b32.xlu0 %v10459_v9, %s8010_s20  ;;  %v5422_v36 = vld [vmem:[#allocation3 + $0x151] sm:$0xff]  ;;  %v7541_v39 = vpop.f32.mrb[63].mxu1  ;;  %v5105_v5 = vld [vmem:[#allocation3 + $0x159] sm:$0xff] }
 0x582   : > { %v5612_v0 = vld [vmem:[#allocation3 + $0x150] sm:$0xff]  ;;  %v5295_v49 = vld [vmem:[#allocation3 + $0x158] sm:$0xff]  ;;  %5009 = vst.msk [vmem:[#allocation3 + $0x171] sm:$0xff] %vm3129_vm3, %v4977_v46  ;;  %v4781_v12 = vadd.f32 %v7539_v51, %v4620_v42  ;;  %v7542_v63 = vadd.f32 %v7541_v39, %v7540_v47  ;;  %v10641_v61 = vpack.c.bf16 %v5105_v5, %v5104_v25 }
 0x583   : > { %v5486_v58 = vld [vmem:[#allocation3 + $0x152] sm:$0xff]  ;;  %v5313_v24 = vpack.c.bf16 %v5295_v49, %v5294_v31  ;;  %v5487_v3 = vld [vmem:[#allocation3 + $0x15a] sm:$0xff] }
 0x584   : > { %v5423_v9 = vld [vmem:[#allocation3 + $0x159] sm:$0xff]  ;;  %v10643_v59 = vpack.c.bf16 %v5487_v3, %v5486_v58  ;;  %v4942_v4 = vadd.f32 %v11267_v41, %v4781_v12  ;;  %v4784_v17 = vadd.f32 %v7542_v63, %v4623_v20  ;;  %v5844_v58 = vld [vmem:[#allocation4] sm:$0xff]  ;;  %v7974_v3 = vld [vmem:[%s11093_s5 + $0x118] sm:$0xff]  }
 0x585   : > { %v5613_v55 = vld [vmem:[#allocation3 + $0x158] sm:$0xff]  ;;  %v5441_v28 = vpack.c.bf16 %v5423_v9, %v5422_v36  ;;  %5358 = vrot.lane.b32.xlu1 %v5313_v24, %s8010_s20  ;;  %5168 = vrot.lane.b32.xlu0 %v10641_v61, %s8010_s20  ;;  %5074 = vst.msk [vmem:[#allocation4 + $0x230] sm:$0xff] %vm3129_vm3, %v5313_v24  ;;  %v7996_v12 = vld [vmem:[%s11093_s5 + $0x100] sm:$0xff]   ;;  %v7973_v63 = vld [vmem:[%s11093_s5 + $0x110] sm:$0xff]  }
 0x586   : > { %v5632_v21 = vpack.c.bf16 %v5613_v55, %v5612_v0  ;;  %v5804_v50 = vld [vmem:[#allocation3 + $0x152] sm:$0xff]  ;;  %v5805_v34 = vld [vmem:[#allocation3 + $0x15a] sm:$0xff]  ;;  %5266 = vst.msk [vmem:[#allocation4 + $0x238] sm:$0xff] %vm3129_vm3, %v10643_v59  ;;  %v4978_v19 = vmax.f32 %v4942_v4, 0.0  ;;  %v4945_v48 = vadd.f32 %v11268_v30, %v4784_v17 }
 0x587   : > { %v5824_v8 = vpack.c.bf16 %v5805_v34, %v5804_v50  ;;  %5457 = vst.msk [vmem:[#allocation4 + $0x218] sm:$0xff] %vm3129_vm3, %v5441_v28  ;;  %v5296_v14 = vld [vmem:[#allocation3 + $0x168] sm:$0xff]  ;;  %v5682_v28 = vld [vmem:[#allocation3 + $0x199] sm:$0xff] }
 0x588   : > { %5648 = vst.msk [vmem:[#allocation4 + $0x1f8] sm:$0xff] %vm3129_vm3, %v5632_v21  ;;  %5010 = vst.msk [vmem:[#allocation3 + $0x181] sm:$0xff] %vm3129_vm3, %v4978_v19  ;;  %v4979_v15 = vmax.f32 %v4945_v48, 0.0  ;;  %v5106_v35 = vld [vmem:[#allocation3 + $0x169] sm:$0xff]  ;;  %v5683_v21 = vld [vmem:[#allocation3 + $0x1a1] sm:$0xff] }
 0x589   : > { %5840 = vst.msk [vmem:[#allocation4 + $0x200] sm:$0xff] %vm3129_vm3, %v5824_v8  ;;  %5728 = vrot.lane.b32.xlu1 %v10486_v33, %s8010_s20  ;;  %5538 = vrot.lane.b32.xlu0 %v10488_v13, %s8010_s20  ;;  %v5424_v27 = vld [vmem:[#allocation3 + $0x169] sm:$0xff]  ;;  %v5107_v1 = vld [vmem:[#allocation3 + $0x171] sm:$0xff]  ;;  %v5699_v4 = vpack.c.bf16 %v5683_v21, %v5682_v28 }
 0x58a   : > { %v5614_v18 = vld [vmem:[#allocation3 + $0x168] sm:$0xff]  ;;  %v5297_v53 = vld [vmem:[#allocation3 + $0x170] sm:$0xff]  ;;  %5011 = vst.msk [vmem:[#allocation3 + $0x189] sm:$0xff] %vm3129_vm3, %v4979_v15  ;;  %v10662_v60 = vpack.c.bf16 %v5107_v1, %v5106_v35 }
 0x58b   : > { %v5488_v56 = vld [vmem:[#allocation3 + $0x16a] sm:$0xff]  ;;  %v5314_v10 = vpack.c.bf16 %v5297_v53, %v5296_v14  ;;  %v5489_v26 = vld [vmem:[#allocation3 + $0x172] sm:$0xff]  ;;  %v5619_v53 = vld [vmem:[#allocation3 + $0x1a0] sm:$0xff] }
 0x58c   : > { %v5425_v32 = vld [vmem:[#allocation3 + $0x171] sm:$0xff]  ;;  %v10664_v52 = vpack.c.bf16 %v5489_v26, %v5488_v56 }
 0x58d   : > { %v5615_v45 = vld [vmem:[#allocation3 + $0x170] sm:$0xff]  ;;  %v5442_v33 = vpack.c.bf16 %v5425_v32, %v5424_v27  ;;  %5360 = vrot.lane.b32.xlu1 %v5314_v10, %s8010_s20  ;;  %5170 = vrot.lane.b32.xlu0 %v10662_v60, %s8010_s20  ;;  %5075 = vst.msk [vmem:[#allocation4 + $0x258] sm:$0xff] %vm3129_vm3, %v5314_v10 }
 0x58e   : > { %v5633_v29 = vpack.c.bf16 %v5615_v45, %v5614_v18  ;;  %v5806_v57 = vld [vmem:[#allocation3 + $0x16a] sm:$0xff]  ;;  %v5807_v13 = vld [vmem:[#allocation3 + $0x172] sm:$0xff]  ;;  %5267 = vst.msk [vmem:[#allocation4 + $0x260] sm:$0xff] %vm3129_vm3, %v10664_v52  ;;  %v5333_v43 = vpop.permute.xlu1 %5332 }
 0x58f   : > { %v5825_v23 = vpack.c.bf16 %v5807_v13, %v5806_v57  ;;  %5458 = vst.msk [vmem:[#allocation4 + $0x240] sm:$0xff] %vm3129_vm3, %v5442_v33  ;;  %v5143_v31 = vpop.permute.xlu0 %5142  ;;  %v5298_v16 = vld [vmem:[#allocation3 + $0x180] sm:$0xff]  ;;  %v5618_v18 = vld [vmem:[#allocation3 + $0x198] sm:$0xff] }
 0x590   : > { %5649 = vst.msk [vmem:[#allocation4 + $0x220] sm:$0xff] %vm3129_vm3, %v5633_v29  ;;  %v5680_v46 = vld [vmem:[#allocation3 + $0x181] sm:$0xff]  ;;  %v5635_v1 = vpack.c.bf16 %v5619_v53, %v5618_v18 }
 0x591   : > { %5841 = vst.msk [vmem:[#allocation4 + $0x228] sm:$0xff] %vm3129_vm3, %v5825_v23  ;;  %5730 = vrot.lane.b32.xlu1 %v10511_v6, %s8010_s20  ;;  %5540 = vrot.lane.b32.xlu0 %v10513_v37, %s8010_s20  ;;  %v5299_v42 = vld [vmem:[#allocation3 + $0x188] sm:$0xff]  ;;  %v5616_v51 = vld [vmem:[#allocation3 + $0x180] sm:$0xff] }
 0x592   : > { %5380 = vst.msk [vmem:[#allocation4 + $0x8] sm:$0xff] %vm3384_vm6, %v5333_v43  ;;  %5189 = vst.msk [vmem:[#allocation4 + $0x28] sm:$0xff] %vm3384_vm6, %v5143_v31  ;;  %v5315_v47 = vpack.c.bf16 %v5299_v42, %v5298_v16  ;;  %v5681_v25 = vld [vmem:[#allocation3 + $0x189] sm:$0xff] }
 0x593   : > { %v5617_v36 = vld [vmem:[#allocation3 + $0x188] sm:$0xff]  ;;  %v10681_v22 = vpack.c.bf16 %v5681_v25, %v5680_v46  ;;  %5651 = vst.msk [vmem:[#allocation4 + $0x270] sm:$0xff] %vm3129_vm3, %v5635_v1 }
 0x594   : > { %v5808_v0 = vld [vmem:[#allocation3 + $0x182] sm:$0xff]  ;;  %v5634_v20 = vpack.c.bf16 %v5617_v36, %v5616_v51  ;;  %v5809_v39 = vld [vmem:[#allocation3 + $0x18a] sm:$0xff] }
 0x595   : > { %5542 = vrot.lane.b32.xlu0 %v10538_v44, %s8010_s20  ;;  %5362 = vrot.lane.b32.xlu1 %v5315_v47, %s8010_s20  ;;  %v5826_v6 = vpack.c.bf16 %v5809_v39, %v5808_v0  ;;  %5459 = vst.msk [vmem:[#allocation4 + $0x268] sm:$0xff] %vm3129_vm3, %v10681_v22  ;;  %v7965_v44 = vld [vmem:[%s11093_s5 + $0x108] sm:$0xff]  }
 0x596   : > { %5650 = vst.msk [vmem:[#allocation4 + $0x248] sm:$0xff] %vm3129_vm3, %v5634_v20  ;;  %v5335_v37 = vpop.permute.xlu1 %5334 }
 0x597   : > { %v5145_v49 = vpop.permute.xlu0 %5144  ;;  %5842 = vst.msk [vmem:[#allocation4 + $0x250] sm:$0xff] %vm3129_vm3, %v5826_v6 }
 0x598   : > { %5381 = vst.msk [vmem:[#allocation4 + $0x30] sm:$0xff] %vm3384_vm6, %v5335_v37  ;;  %5190 = vst.msk [vmem:[#allocation4 + $0x50] sm:$0xff] %vm3384_vm6, %v5145_v49 }
 0x599   : > { %v5845_v5 = vld [vmem:[#allocation4 + $0x8] sm:$0xff]  ;;  %5544 = vrot.lane.b32.xlu0 %v10568_v54, %s8010_s20  ;;  %5732 = vrot.lane.b32.xlu1 %v10536_v11, %s8010_s20 }
 0x59a   : > { %6299 = vmatprep.mubr.bf16.mxu1 %v5845_v5 }
 0x59b   : > { %6300 = vmatmul.mubr.bf16.vlgmr.msra.gmra.mrb[64].mxu1 %v5844_v58 }
 0x59c   : > { %7848 = vmatpush3.bf16.msra.mxu1 %v7996_v12 }
 0x59d   : > { %7849 = vmatprep.subr.bf16.mxu1 %v7965_v44  ;;  %5546 = vrot.lane.b32.xlu0 %v10593_v38, %s8010_s20 }
 0x59e   : > { %5734 = vrot.lane.b32.xlu1 %v10566_v62, %s8010_s20  ;;  %v5337_v54 = vpop.permute.xlu1 %5336  ;;  %v5849_v62 = vld [vmem:[#allocation4 + $0x28] sm:$0xff] }
 0x59f   : > { %v5147_v24 = vpop.permute.xlu0 %5146  ;;  %v5850_v11 = vld [vmem:[#allocation4 + $0x30] sm:$0xff]  ;;  %5382 = vst.msk [vmem:[#allocation4 + $0x58] sm:$0xff] %vm3384_vm6, %v5337_v54 }
 0x5a0   : > { %7850 = vmatpush3.bf16.msra.mxu1 %v7965_v44  ;;  %5191 = vst.msk [vmem:[#allocation4 + $0x78] sm:$0xff] %vm3384_vm6, %v5147_v24  ;;  %6307 = vmatprep.mubr.bf16.mxu1 %v5850_v11 }
 0x5a1   : > { %7851 = vmatprep.subr.bf16.mxu1 %v7973_v63  ;;  %5548 = vrot.lane.b32.xlu0 %v10618_v2, %s8010_s20  ;;  %v5491_v2 = vld [vmem:[#allocation3 + $0x18a] sm:$0xff] }
 0x5a2   : > { %5736 = vrot.lane.b32.xlu1 %v10591_v40, %s8010_s20  ;;  %v5490_v40 = vld [vmem:[#allocation3 + $0x182] sm:$0xff] }
 0x5a3   : > { %6308 = vmatmul.mubr.bf16.gmra.mrb[68].mxu1 %v5849_v62 }
 0x5a4   : > { %7852 = vmatpush3.bf16.msra.mxu1 %v7973_v63 }
 0x5a5   : > { %7853 = vmatprep.subr.bf16.mxu1 %v7974_v3  ;;  %5550 = vrot.lane.b32.xlu0 %v10643_v59, %s8010_s20  ;;  %v5854_v59 = vld [vmem:[#allocation4 + $0x50] sm:$0xff] }
 0x5a6   : > { %5738 = vrot.lane.b32.xlu1 %v10616_v7, %s8010_s20  ;;  %v5855_v55 = vld [vmem:[#allocation4 + $0x58] sm:$0xff]  ;;  %v5507_v7 = vpack.c.bf16 %v5491_v2, %v5490_v40 }
 0x5a7   : > { %v5149_v9 = vpop.permute.xlu0 %5148  ;;  %6315 = vmatprep.mubr.bf16.mxu1 %v5855_v55 }
 0x5a8   : > { %v5339_v38 = vpop.permute.xlu1 %5338  ;;  %7854 = vmatpush3.bf16.msra.mxu1 %v7974_v3  ;;  %5192 = vst.msk [vmem:[#allocation4 + $0xa0] sm:$0xff] %vm3384_vm6, %v5149_v9 }
 0x5a9   : > { %5383 = vst.msk [vmem:[#allocation4 + $0x80] sm:$0xff] %vm3384_vm6, %v5339_v38  ;;  %5552 = vrot.lane.b32.xlu0 %v10664_v52, %s8010_s20 }
 0x5aa   : > { %5740 = vrot.lane.b32.xlu1 %v10641_v61, %s8010_s20  ;;  %v5859_v61 = vld [vmem:[#allocation4 + $0x78] sm:$0xff] }
 0x5ab   : > { %6316 = vmatmul.mubr.bf16.gmra.mrb[72].mxu1 %v5854_v59 }
 0x5ad   : > { %5554 = vrot.lane.b32.xlu0 %v5507_v7, %s8010_s20 }
 0x5ae   : > { %5742 = vrot.lane.b32.xlu1 %v10662_v60, %s8010_s20  ;;  %v5341_v50 = vpop.permute.xlu1 %5340 }
 0x5af   : > { %v5151_v34 = vpop.permute.xlu0 %5150  ;;  %5384 = vst.msk [vmem:[#allocation4 + $0xa8] sm:$0xff] %vm3384_vm6, %v5341_v50  ;;  %v5864_v30 = vld [vmem:[#allocation4 + $0xa0] sm:$0xff] }
 0x5b0   : > { %v5860_v41 = vld [vmem:[#allocation4 + $0x80] sm:$0xff]  ;;  %5193 = vst.msk [vmem:[#allocation4 + $0xc8] sm:$0xff] %vm3384_vm6, %v5151_v34 }
 0x5b1   : > { %6323 = vmatprep.mubr.bf16.mxu1 %v5860_v41 }
 0x5b2   : > { %5744 = vrot.lane.b32.xlu1 %v10681_v22, %s8010_s20 }
 0x5b3   : > { %6324 = vmatmul.mubr.bf16.gmra.mrb[76].mxu1 %v5859_v61 }
 0x5b6   : > { %5746 = vrot.lane.b32.xlu1 %v5699_v4, %s8010_s20  ;;  %v5343_v17 = vpop.permute.xlu1 %5342  ;;  %v5865_v19 = vld [vmem:[#allocation4 + $0xa8] sm:$0xff] }
 0x5b7   : > { %v5153_v8 = vpop.permute.xlu0 %5152  ;;  %5385 = vst.msk [vmem:[#allocation4 + $0xd0] sm:$0xff] %vm3384_vm6, %v5343_v17  ;;  %6331 = vmatprep.mubr.bf16.mxu1 %v5865_v19  ;;  %v5869_v35 = vld [vmem:[#allocation4 + $0xc8] sm:$0xff] }
 0x5b8   : > { %5194 = vst.msk [vmem:[#allocation4 + $0xf0] sm:$0xff] %vm3384_vm6, %v5153_v8 }
 0x5bb   : > { %6332 = vmatmul.mubr.bf16.gmra.mrb[80].mxu1 %v5864_v30 }
 0x5be   : > { %v5345_v48 = vpop.permute.xlu1 %5344  ;;  %v5870_v15 = vld [vmem:[#allocation4 + $0xd0] sm:$0xff] }
 0x5bf   : > { %v5155_v14 = vpop.permute.xlu0 %5154  ;;  %5386 = vst.msk [vmem:[#allocation4 + $0xf8] sm:$0xff] %vm3384_vm6, %v5345_v48  ;;  %6339 = vmatprep.mubr.bf16.mxu1 %v5870_v15  ;;  %v5874_v26 = vld [vmem:[#allocation4 + $0xf0] sm:$0xff] }
 0x5c0   : > { %5195 = vst.msk [vmem:[#allocation4 + $0x118] sm:$0xff] %vm3384_vm6, %v5155_v14 }
 0x5c3   : > { %6340 = vmatmul.mubr.bf16.gmra.mrb[84].mxu1 %v5869_v35  ;;  %v5525_v27 = vpop.permute.xlu0 %5524 }
 0x5c4   : > { %5572 = vst.msk [vmem:[#allocation4 + $0x10] sm:$0xff] %vm3384_vm6, %v5525_v27 }
 0x5c6   : > { %v5347_v56 = vpop.permute.xlu1 %5346  ;;  %v5875_v60 = vld [vmem:[#allocation4 + $0xf8] sm:$0xff] }
 0x5c7   : > { %v5157_v10 = vpop.permute.xlu0 %5156  ;;  %5387 = vst.msk [vmem:[#allocation4 + $0x120] sm:$0xff] %vm3384_vm6, %v5347_v56  ;;  %6347 = vmatprep.mubr.bf16.mxu1 %v5875_v60  ;;  %v5879_v57 = vld [vmem:[#allocation4 + $0x118] sm:$0xff] }
 0x5c8   : > { %5196 = vst.msk [vmem:[#allocation4 + $0x140] sm:$0xff] %vm3384_vm6, %v5157_v10 }
 0x5ca   : > { %v5717_v32 = vpop.permute.xlu1 %5716 }
 0x5cb   : > { %6348 = vmatmul.mubr.bf16.gmra.mrb[88].mxu1 %v5874_v26  ;;  %v5527_v45 = vpop.permute.xlu0 %5526  ;;  %5764 = vst.msk [vmem:[#allocation4 + $0x18] sm:$0xff] %vm3384_vm6, %v5717_v32  ;;  %v5846_v31 = vld [vmem:[#allocation4 + $0x10] sm:$0xff] }
 0x5cc   : > { %5573 = vst.msk [vmem:[#allocation4 + $0x38] sm:$0xff] %vm3384_vm6, %v5527_v45 }
 0x5ce   : > { %v5349_v52 = vpop.permute.xlu1 %5348  ;;  %v5880_v29 = vld [vmem:[#allocation4 + $0x120] sm:$0xff] }
 0x5cf   : > { %v5159_v33 = vpop.permute.xlu0 %5158  ;;  %5388 = vst.msk [vmem:[#allocation4 + $0x148] sm:$0xff] %vm3384_vm6, %v5349_v52  ;;  %6355 = vmatprep.mubr.bf16.mxu1 %v5880_v29  ;;  %v5884_v51 = vld [vmem:[#allocation4 + $0x140] sm:$0xff] }
 0x5d0   : > { %5197 = vst.msk [vmem:[#allocation4 + $0x168] sm:$0xff] %vm3384_vm6, %v5159_v33 }
 0x5d2   : > { %v5719_v13 = vpop.permute.xlu1 %5718  ;;  %v5847_v43 = vld [vmem:[#allocation4 + $0x18] sm:$0xff] }
 0x5d3   : > { %6356 = vmatmul.mubr.bf16.gmra.mrb[92].mxu1 %v5879_v57  ;;  %v5529_v23 = vpop.permute.xlu0 %5528  ;;  %5765 = vst.msk [vmem:[#allocation4 + $0x40] sm:$0xff] %vm3384_vm6, %v5719_v13  ;;  %6460 = vmatprep.mubr.bf16.mxu0 %v5847_v43  ;;  %v5851_v0 = vld [vmem:[#allocation4 + $0x38] sm:$0xff]  ;;  %v5848_v13 = vld [vmem:[#allocation4 + $0x20] sm:$0xff] }
 0x5d4   : > { %5574 = vst.msk [vmem:[#allocation4 + $0x60] sm:$0xff] %vm3384_vm6, %v5529_v23  ;;  %6461 = vmatmul.mubr.bf16.vlgmr.msra.gmra.mrb[96].mxu0 %v5846_v31 }
 0x5d6   : > { %v5885_v46 = vld [vmem:[#allocation4 + $0x148] sm:$0xff] }
 0x5d7   : > { %v5351_v16 = vpop.permute.xlu1 %5350  ;;  %v5161_v42 = vpop.permute.xlu0 %5160  ;;  %6363 = vmatprep.mubr.bf16.mxu1 %v5885_v46  ;;  %v5889_v6 = vld [vmem:[#allocation4 + $0x168] sm:$0xff] }
 0x5d8   : > { %5389 = vst.msk [vmem:[#allocation4 + $0x170] sm:$0xff] %vm3384_vm6, %v5351_v16  ;;  %5198 = vst.msk [vmem:[#allocation4 + $0x190] sm:$0xff] %vm3384_vm6, %v5161_v42 }
 0x5da   : > { %v5852_v36 = vld [vmem:[#allocation4 + $0x40] sm:$0xff] }
 0x5db   : > { %6364 = vmatmul.mubr.bf16.gmra.mrb[96].mxu1 %v5884_v51  ;;  %v5721_v47 = vpop.permute.xlu1 %5720  ;;  %v5531_v25 = vpop.permute.xlu0 %5530  ;;  %6468 = vmatprep.mubr.bf16.mxu0 %v5852_v36  ;;  %v5856_v58 = vld [vmem:[#allocation4 + $0x60] sm:$0xff] }
 0x5dc   : > { %5766 = vst.msk [vmem:[#allocation4 + $0x68] sm:$0xff] %vm3384_vm6, %v5721_v47  ;;  %5575 = vst.msk [vmem:[#allocation4 + $0x88] sm:$0xff] %vm3384_vm6, %v5531_v25  ;;  %6469 = vmatmul.mubr.bf16.gmra.mrb[100].mxu0 %v5851_v0  ;;  %v5853_v47 = vld [vmem:[#allocation4 + $0x48] sm:$0xff]  ;;  %v5858_v25 = vld [vmem:[#allocation4 + $0x70] sm:$0xff] }
 0x5df   : > { %v5353_v22 = vpop.permute.xlu1 %5352  ;;  %v5163_v20 = vpop.permute.xlu0 %5162  ;;  %v5890_v39 = vld [vmem:[#allocation4 + $0x170] sm:$0xff] }
 0x5e0   : > { %5390 = vst.msk [vmem:[#allocation4 + $0x198] sm:$0xff] %vm3384_vm6, %v5353_v22  ;;  %5199 = vst.msk [vmem:[#allocation4 + $0x1b8] sm:$0xff] %vm3384_vm6, %v5163_v20  ;;  %6371 = vmatprep.mubr.bf16.mxu1 %v5890_v39  ;;  %v5894_v54 = vld [vmem:[#allocation4 + $0x190] sm:$0xff] }
 0x5e3   : > { %6372 = vmatmul.mubr.bf16.gmra.mrb[100].mxu1 %v5889_v6  ;;  %v5723_v37 = vpop.permute.xlu1 %5722  ;;  %v5533_v49 = vpop.permute.xlu0 %5532  ;;  %v5857_v5 = vld [vmem:[#allocation4 + $0x68] sm:$0xff] }
 0x5e4   : > { %5767 = vst.msk [vmem:[#allocation4 + $0x90] sm:$0xff] %vm3384_vm6, %v5723_v37  ;;  %5576 = vst.msk [vmem:[#allocation4 + $0xb0] sm:$0xff] %vm3384_vm6, %v5533_v49  ;;  %6476 = vmatprep.mubr.bf16.mxu0 %v5857_v5  ;;  %v5861_v62 = vld [vmem:[#allocation4 + $0x88] sm:$0xff]  ;;  %v5863_v37 = vld [vmem:[#allocation4 + $0x98] sm:$0xff] }
 0x5e5   : > { %6477 = vmatmul.mubr.bf16.gmra.mrb[104].mxu0 %v5856_v58  ;;  %v5868_v49 = vld [vmem:[#allocation4 + $0xc0] sm:$0xff] }
 0x5e7   : > { %v5355_v44 = vpop.permute.xlu1 %5354  ;;  %v5165_v12 = vpop.permute.xlu0 %5164  ;;  %v5895_v63 = vld [vmem:[#allocation4 + $0x198] sm:$0xff] }
 0x5e8   : > { %5391 = vst.msk [vmem:[#allocation4 + $0x1c0] sm:$0xff] %vm3384_vm6, %v5355_v44  ;;  %5200 = vst.msk [vmem:[#allocation4 + $0x1e0] sm:$0xff] %vm3384_vm6, %v5165_v12  ;;  %6379 = vmatprep.mubr.bf16.mxu1 %v5895_v63  ;;  %v5899_v40 = vld [vmem:[#allocation4 + $0x1b8] sm:$0xff]  ;;  %v5873_v63 = vld [vmem:[#allocation4 + $0xe8] sm:$0xff] }
 0x5eb   : > { %6380 = vmatmul.mubr.bf16.gmra.mrb[104].mxu1 %v5894_v54  ;;  %v5725_v24 = vpop.permute.xlu1 %5724  ;;  %v5535_v11 = vpop.permute.xlu0 %5534  ;;  %v5862_v3 = vld [vmem:[#allocation4 + $0x90] sm:$0xff] }
 0x5ec   : > { %5768 = vst.msk [vmem:[#allocation4 + $0xb8] sm:$0xff] %vm3384_vm6, %v5725_v24  ;;  %5577 = vst.msk [vmem:[#allocation4 + $0xd8] sm:$0xff] %vm3384_vm6, %v5535_v11  ;;  %6484 = vmatprep.mubr.bf16.mxu0 %v5862_v3  ;;  %v5866_v28 = vld [vmem:[#allocation4 + $0xb0] sm:$0xff]  ;;  %v5883_v3 = vld [vmem:[#allocation4 + $0x138] sm:$0xff] }
 0x5ed   : > { %6485 = vmatmul.mubr.bf16.gmra.mrb[108].mxu0 %v5861_v62  ;;  %v5878_v54 = vld [vmem:[#allocation4 + $0x110] sm:$0xff]  ;;  %v5888_v62 = vld [vmem:[#allocation4 + $0x160] sm:$0xff] }
 0x5ef   : > { %v5357_v38 = vpop.permute.xlu1 %5356  ;;  %v5167_v9 = vpop.permute.xlu0 %5166  ;;  %v5900_v55 = vld [vmem:[#allocation4 + $0x1c0] sm:$0xff] }
 0x5f0   : > { %5392 = vst.msk [vmem:[#allocation4 + $0x1e8] sm:$0xff] %vm3384_vm6, %v5357_v38  ;;  %5201 = vst.msk [vmem:[#allocation4 + $0x208] sm:$0xff] %vm3384_vm6, %v5167_v9  ;;  %6387 = vmatprep.mubr.bf16.mxu1 %v5900_v55  ;;  %v5904_v41 = vld [vmem:[#allocation4 + $0x1e0] sm:$0xff]  ;;  %v5893_v55 = vld [vmem:[#allocation4 + $0x188] sm:$0xff] }
 0x5f3   : > { %6388 = vmatmul.mubr.bf16.gmra.mrb[108].mxu1 %v5899_v40  ;;  %v5727_v2 = vpop.permute.xlu1 %5726  ;;  %v5537_v59 = vpop.permute.xlu0 %5536  ;;  %v5867_v7 = vld [vmem:[#allocation4 + $0xb8] sm:$0xff]  ;;  %v5898_v40 = vld [vmem:[#allocation4 + $0x1b0] sm:$0xff] }
 0x5f4   : > { %5769 = vst.msk [vmem:[#allocation4 + $0xe0] sm:$0xff] %vm3384_vm6, %v5727_v2  ;;  %5578 = vst.msk [vmem:[#allocation4 + $0x100] sm:$0xff] %vm3384_vm6, %v5537_v59  ;;  %6492 = vmatprep.mubr.bf16.mxu0 %v5867_v7  ;;  %v5871_v8 = vld [vmem:[#allocation4 + $0xd8] sm:$0xff] }
 0x5f5   : > { %6493 = vmatmul.mubr.bf16.gmra.mrb[112].mxu0 %v5866_v28  ;;  %v5903_v7 = vld [vmem:[#allocation4 + $0x1d8] sm:$0xff]  ;;  %v5908_v28 = vld [vmem:[#allocation4 + $0x200] sm:$0xff] }
 0x5f7   : > { %v5359_v21 = vpop.permute.xlu1 %5358  ;;  %v5169_v50 = vpop.permute.xlu0 %5168  ;;  %v5905_v34 = vld [vmem:[#allocation4 + $0x1e8] sm:$0xff] }
 0x5f8   : > { %5393 = vst.msk [vmem:[#allocation4 + $0x210] sm:$0xff] %vm3384_vm6, %v5359_v21  ;;  %5202 = vst.msk [vmem:[#allocation4 + $0x230] sm:$0xff] %vm3384_vm6, %v5169_v50  ;;  %6395 = vmatprep.mubr.bf16.mxu1 %v5905_v34  ;;  %v5909_v14 = vld [vmem:[#allocation4 + $0x208] sm:$0xff] }
 0x5f9   : > { %v5913_v34 = vld [vmem:[#allocation4 + $0x228] sm:$0xff] }
 0x5fb   : > { %6396 = vmatmul.mubr.bf16.gmra.mrb[112].mxu1 %v5904_v41  ;;  %v5729_v61 = vpop.permute.xlu1 %5728  ;;  %v5539_v4 = vpop.permute.xlu0 %5538  ;;  %v5872_v17 = vld [vmem:[#allocation4 + $0xe0] sm:$0xff]  ;;  %v5918_v41 = vld [vmem:[#allocation4 + $0x250] sm:$0xff] }
 0x5fc   : > { %5770 = vst.msk [vmem:[#allocation4 + $0x108] sm:$0xff] %vm3384_vm6, %v5729_v61  ;;  %5579 = vst.msk [vmem:[#allocation4 + $0x128] sm:$0xff] %vm3384_vm6, %v5539_v4  ;;  %6500 = vmatprep.mubr.bf16.mxu0 %v5872_v17  ;;  %v5876_v18 = vld [vmem:[#allocation4 + $0x100] sm:$0xff]  ;;  %v5923_v4 = vld [vmem:[#allocation4 + $0x278] sm:$0xff] }
 0x5fd   : > { %6501 = vmatmul.mubr.bf16.gmra.mrb[116].mxu0 %v5871_v8 }
 0x5ff   : > { %v5361_v19 = vpop.permute.xlu1 %5360  ;;  %v5171_v30 = vpop.permute.xlu0 %5170  ;;  %v5910_v48 = vld [vmem:[#allocation4 + $0x210] sm:$0xff] }
 0x600   : > { %5394 = vst.msk [vmem:[#allocation4 + $0x238] sm:$0xff] %vm3384_vm6, %v5361_v19  ;;  %5203 = vst.msk [vmem:[#allocation4 + $0x258] sm:$0xff] %vm3384_vm6, %v5171_v30  ;;  %6403 = vmatprep.mubr.bf16.mxu1 %v5910_v48  ;;  %v5914_v10 = vld [vmem:[#allocation4 + $0x230] sm:$0xff] }
 0x603   : > { %6404 = vmatmul.mubr.bf16.gmra.mrb[116].mxu1 %v5909_v14  ;;  %v5731_v15 = vpop.permute.xlu1 %5730  ;;  %v5541_v35 = vpop.permute.xlu0 %5540  ;;  %v5877_v27 = vld [vmem:[#allocation4 + $0x108] sm:$0xff] }
 0x604   : > { %5771 = vst.msk [vmem:[#allocation4 + $0x130] sm:$0xff] %vm3384_vm6, %v5731_v15  ;;  %5580 = vst.msk [vmem:[#allocation4 + $0x150] sm:$0xff] %vm3384_vm6, %v5541_v35  ;;  %6508 = vmatprep.mubr.bf16.mxu0 %v5877_v27  ;;  %v5881_v45 = vld [vmem:[#allocation4 + $0x128] sm:$0xff] }
 0x605   : > { %6509 = vmatmul.mubr.bf16.gmra.mrb[120].mxu0 %v5876_v18 }
 0x607   : > { %v5363_v53 = vpop.permute.xlu1 %5362  ;;  %v5543_v1 = vpop.permute.xlu0 %5542  ;;  %v5915_v56 = vld [vmem:[#allocation4 + $0x238] sm:$0xff] }
 0x608   : > { %5395 = vst.msk [vmem:[#allocation4 + $0x260] sm:$0xff] %vm3384_vm6, %v5363_v53  ;;  %5581 = vst.msk [vmem:[#allocation4 + $0x178] sm:$0xff] %vm3384_vm6, %v5543_v1  ;;  %6411 = vmatprep.mubr.bf16.mxu1 %v5915_v56  ;;  %v5919_v57 = vld [vmem:[#allocation4 + $0x258] sm:$0xff] }
 0x60b   : > { %6412 = vmatmul.mubr.bf16.gmra.mrb[120].mxu1 %v5914_v10  ;;  %v5733_v60 = vpop.permute.xlu1 %5732  ;;  %v5545_v26 = vpop.permute.xlu0 %5544  ;;  %v5882_v32 = vld [vmem:[#allocation4 + $0x130] sm:$0xff] }
 0x60c   : > { %5772 = vst.msk [vmem:[#allocation4 + $0x158] sm:$0xff] %vm3384_vm6, %v5733_v60  ;;  %5582 = vst.msk [vmem:[#allocation4 + $0x1a0] sm:$0xff] %vm3384_vm6, %v5545_v26  ;;  %6516 = vmatprep.mubr.bf16.mxu0 %v5882_v32  ;;  %v5886_v16 = vld [vmem:[#allocation4 + $0x150] sm:$0xff] }
 0x60d   : > { %6517 = vmatmul.mubr.bf16.gmra.mrb[124].mxu0 %v5881_v45 }
 0x60f   : > { %v5547_v33 = vpop.permute.xlu0 %5546  ;;  %v5920_v29 = vld [vmem:[#allocation4 + $0x260] sm:$0xff]  ;;  %v5891_v22 = vld [vmem:[#allocation4 + $0x178] sm:$0xff] }
 0x610   : > { %v5735_v52 = vpop.permute.xlu1 %5734  ;;  %5583 = vst.msk [vmem:[#allocation4 + $0x1c8] sm:$0xff] %vm3384_vm6, %v5547_v33  ;;  %6419 = vmatprep.mubr.bf16.mxu1 %v5920_v29 }
 0x611   : > { %5773 = vst.msk [vmem:[#allocation4 + $0x180] sm:$0xff] %vm3384_vm6, %v5735_v52 }
 0x613   : > { %6420 = vmatmul.mubr.bf16.gmra.mrb[124].mxu1 %v5919_v57  ;;  %v5549_v43 = vpop.permute.xlu0 %5548  ;;  %v5887_v31 = vld [vmem:[#allocation4 + $0x158] sm:$0xff]  ;;  %v5896_v58 = vld [vmem:[#allocation4 + $0x1a0] sm:$0xff] }
 0x614   : > { %7855 = vmatprep.mubr.msk.bf16.mxu1 %vm3129_vm3, %v5848_v13  ;;  %v5737_v23 = vpop.permute.xlu1 %5736  ;;  %5584 = vst.msk [vmem:[#allocation4 + $0x1f0] sm:$0xff] %vm3384_vm6, %v5549_v43  ;;  %6524 = vmatprep.mubr.bf16.mxu0 %v5887_v31 }
 0x615   : > { %5774 = vst.msk [vmem:[#allocation4 + $0x1a8] sm:$0xff] %vm3384_vm6, %v5737_v23  ;;  %6525 = vmatmul.mubr.bf16.gmra.mrb[128].mxu0 %v5886_v16 }
 0x617   : > { %v5551_v46 = vpop.permute.xlu0 %5550  ;;  %v5901_v24 = vld [vmem:[#allocation4 + $0x1c8] sm:$0xff] }
 0x618   : > { %v5739_v42 = vpop.permute.xlu1 %5738  ;;  %v5892_v51 = vld [vmem:[#allocation4 + $0x180] sm:$0xff]  ;;  %5585 = vst.msk [vmem:[#allocation4 + $0x218] sm:$0xff] %vm3384_vm6, %v5551_v46 }
 0x619   : > { %5775 = vst.msk [vmem:[#allocation4 + $0x1d0] sm:$0xff] %vm3384_vm6, %v5739_v42  ;;  %6532 = vmatprep.mubr.bf16.mxu0 %v5892_v51 }
 0x61b   : > { %7856 = vmatmul.mubr.msk.bf16.vlgmr.msra.gmra.mrb[128].mxu1 %vm3129_vm3, %v5853_v47  ;;  %v5553_v0 = vpop.permute.xlu0 %5552  ;;  %v5906_v38 = vld [vmem:[#allocation4 + $0x1f0] sm:$0xff] }
 0x61c   : > { %7859 = vmatprep.mubr.msk.bf16.mxu1 %vm3129_vm3, %v5858_v25  ;;  %v5741_v36 = vpop.permute.xlu1 %5740  ;;  %5586 = vst.msk [vmem:[#allocation4 + $0x240] sm:$0xff] %vm3384_vm6, %v5553_v0  ;;  %v5897_v20 = vld [vmem:[#allocation4 + $0x1a8] sm:$0xff] }
 0x61d   : > { %5776 = vst.msk [vmem:[#allocation4 + $0x1f8] sm:$0xff] %vm3384_vm6, %v5741_v36  ;;  %6533 = vmatmul.mubr.bf16.gmra.mrb[132].mxu0 %v5891_v22 }
 0x61e   : > { %6540 = vmatprep.mubr.bf16.mxu0 %v5897_v20 }
 0x61f   : > { %v5555_v6 = vpop.permute.xlu0 %5554  ;;  %v5911_v2 = vld [vmem:[#allocation4 + $0x218] sm:$0xff] }
 0x620   : > { %v5743_v39 = vpop.permute.xlu1 %5742  ;;  %5587 = vst.msk [vmem:[#allocation4 + $0x268] sm:$0xff] %vm3384_vm6, %v5555_v6  ;;  %v5902_v44 = vld [vmem:[#allocation4 + $0x1d0] sm:$0xff] }
 0x621   : > { %5777 = vst.msk [vmem:[#allocation4 + $0x220] sm:$0xff] %vm3384_vm6, %v5743_v39 }
 0x623   : > { %7860 = vmatmul.mubr.msk.bf16.gmra.mrb[132].mxu1 %vm3129_vm3, %v5863_v37  ;;  %v5916_v50 = vld [vmem:[#allocation4 + $0x240] sm:$0xff] }
 0x624   : > { %7863 = vmatprep.mubr.msk.bf16.mxu1 %vm3129_vm3, %v5868_v49  ;;  %v5745_v5 = vpop.permute.xlu1 %5744  ;;  %v5907_v11 = vld [vmem:[#allocation4 + $0x1f8] sm:$0xff] }
 0x625   : > { %5778 = vst.msk [vmem:[#allocation4 + $0x248] sm:$0xff] %vm3384_vm6, %v5745_v5  ;;  %6541 = vmatmul.mubr.bf16.gmra.mrb[136].mxu0 %v5896_v58 }
 0x626   : > { %6548 = vmatprep.mubr.bf16.mxu0 %v5902_v44 }
 0x627   : > { %v5921_v61 = vld [vmem:[#allocation4 + $0x268] sm:$0xff] }
 0x628   : > { %v5747_v12 = vpop.permute.xlu1 %5746  ;;  %v5912_v9 = vld [vmem:[#allocation4 + $0x220] sm:$0xff] }
 0x629   : > { %5779 = vst.msk [vmem:[#allocation4 + $0x270] sm:$0xff] %vm3384_vm6, %v5747_v12 }
 0x62b   : > { %7864 = vmatmul.mubr.msk.bf16.gmra.mrb[136].mxu1 %vm3129_vm3, %v5873_v63  ;;  %v10826_v63 = vld [vmem:[#allocation5] ss:$0 sm:$0xff] }
 0x62c   : > { %7867 = vmatprep.mubr.msk.bf16.mxu1 %vm3129_vm3, %v5878_v54  ;;  %v5917_v59 = vld [vmem:[#allocation4 + $0x248] sm:$0xff] }
 0x62d   : > { %6549 = vmatmul.mubr.bf16.gmra.mrb[140].mxu0 %v5901_v24 }
 0x62e   : > { %6556 = vmatprep.mubr.bf16.mxu0 %v5907_v11 }
 0x630   : > { %v5922_v21 = vld [vmem:[#allocation4 + $0x270] sm:$0xff] }
 0x633   : > { %7868 = vmatmul.mubr.msk.bf16.gmra.mrb[140].mxu1 %vm3129_vm3, %v5883_v3 }
 0x634   : > { %7871 = vmatprep.mubr.msk.bf16.mxu1 %vm3129_vm3, %v5888_v62 }
 0x635   : > { %6557 = vmatmul.mubr.bf16.gmra.mrb[144].mxu0 %v5906_v38 }
 0x636   : > { %6564 = vmatprep.mubr.bf16.mxu0 %v5912_v9 }
 0x63b   : > { %7872 = vmatmul.mubr.msk.bf16.gmra.mrb[144].mxu1 %vm3129_vm3, %v5893_v55 }
 0x63c   : > { %7875 = vmatprep.mubr.msk.bf16.mxu1 %vm3129_vm3, %v5898_v40 }
 0x63d   : > { %6565 = vmatmul.mubr.bf16.gmra.mrb[148].mxu0 %v5911_v2 }
 0x63e   : > { %6572 = vmatprep.mubr.bf16.mxu0 %v5917_v59 }
 0x643   : > { %7876 = vmatmul.mubr.msk.bf16.gmra.mrb[148].mxu1 %vm3129_vm3, %v5903_v7 }
 0x644   : > { %7879 = vmatprep.mubr.msk.bf16.mxu1 %vm3129_vm3, %v5908_v28 }
 0x645   : > { %6573 = vmatmul.mubr.bf16.gmra.mrb[152].mxu0 %v5916_v50 }
 0x646   : > { %6580 = vmatprep.mubr.bf16.mxu0 %v5922_v21 }
 0x64b   : > { %7880 = vmatmul.mubr.msk.bf16.gmra.mrb[152].mxu1 %vm3129_vm3, %v5913_v34 }
 0x64c   : > { %7883 = vmatprep.mubr.msk.bf16.mxu1 %vm3129_vm3, %v5918_v41 }
 0x64d   : > { %6581 = vmatmul.mubr.bf16.gmra.mrb[156].mxu0 %v5921_v61 }
 0x653   : > { %7884 = vmatmul.mubr.msk.bf16.gmra.mrb[156].mxu1 %vm3129_vm3, %v5923_v4 }
 0x66e   : > { %v7579_v17 = vpop.f32.mrb[64].mxu1 }
 0x66f   : > { %v7580_v8 = vpop.f32.mrb[65].mxu1 }
 0x670   : > { %v7581_v19 = vadd.f32 %v7580_v8, %v7579_v17  ;;  %v7582_v30 = vpop.f32.mrb[66].mxu1 }
 0x671   : > { %v7583_v48 = vpop.f32.mrb[67].mxu1 }
 0x672   : > { %v7584_v14 = vadd.f32 %v7583_v48, %v7582_v30  ;;  %v6302_v9 = vadd.f32 %v7581_v19, %v10826_v63 }
 0x674   : > { %v6305_v59 = vadd.f32 %v7584_v14, %v10826_v63 }
 0x676   : > { %v7585_v15 = vpop.f32.mrb[68].mxu1 }
 0x677   : > { %v7586_v35 = vpop.f32.mrb[69].mxu1 }
 0x678   : > { %v7587_v27 = vadd.f32 %v7586_v35, %v7585_v15  ;;  %v7588_v18 = vpop.f32.mrb[70].mxu1 }
 0x679   : > { %v7589_v53 = vpop.f32.mrb[71].mxu1 }
 0x67a   : > { %v7590_v1 = vadd.f32 %v7589_v53, %v7588_v18  ;;  %v6310_v30 = vadd.f32 %v7587_v27, %v10826_v63 }
 0x67c   : > { %v6313_v35 = vadd.f32 %v7590_v1, %v10826_v63 }
 0x67e   : > { %v7591_v56 = vpop.f32.mrb[72].mxu1 }
 0x67f   : > { %v7592_v10 = vpop.f32.mrb[73].mxu1 }
 0x680   : > { %v10806_v60 = vadd.f32 %v7592_v10, %v7591_v56  ;;  %v7594_v26 = vpop.f32.mrb[74].mxu1 }
 0x681   : > { %v7595_v32 = vpop.f32.mrb[75].mxu1 }
 0x682   : > { %v10808_v45 = vadd.f32 %v7595_v32, %v7594_v26 }
 0x686   : > { %v7597_v52 = vpop.f32.mrb[76].mxu1 }
 0x687   : > { %v7598_v33 = vpop.f32.mrb[77].mxu1 }
 0x688   : > { %v10810_v29 = vadd.f32 %v7598_v33, %v7597_v52  ;;  %v7600_v57 = vpop.f32.mrb[78].mxu1 }
 0x689   : > { %v7601_v13 = vpop.f32.mrb[79].mxu1 }
 0x68a   : > { %v10812_v23 = vadd.f32 %v7601_v13, %v7600_v57 }
 0x68e   : > { %v7603_v43 = vpop.f32.mrb[80].mxu1 }
 0x68f   : > { %v7604_v31 = vpop.f32.mrb[81].mxu1 }
 0x690   : > { %v10814_v16 = vadd.f32 %v7604_v31, %v7603_v43  ;;  %v7606_v42 = vpop.f32.mrb[82].mxu1  ;;  %v6318_v43 = vadd.f32 %v10806_v60, %v10826_v63 }
 0x691   : > { %v7607_v46 = vpop.f32.mrb[83].mxu1 }
 0x692   : > { %v10816_v51 = vadd.f32 %v7607_v46, %v7606_v42  ;;  %v6321_v46 = vadd.f32 %v10808_v45, %v10826_v63 }
 0x696   : > { %v7609_v47 = vpop.f32.mrb[84].mxu1 }
 0x697   : > { %v7610_v25 = vpop.f32.mrb[85].mxu1 }
 0x698   : > { %v10818_v36 = vadd.f32 %v7610_v25, %v7609_v47  ;;  %v7612_v0 = vpop.f32.mrb[86].mxu1 }
 0x699   : > { %v7613_v22 = vpop.f32.mrb[87].mxu1 }
 0x69a   : > { %v10820_v20 = vadd.f32 %v7613_v22, %v7612_v0 }
 0x69e   : > { %v7615_v39 = vpop.f32.mrb[88].mxu1 }
 0x69f   : > { %v7616_v6 = vpop.f32.mrb[89].mxu1 }
 0x6a0   : > { %v10822_v37 = vadd.f32 %v7616_v6, %v7615_v39  ;;  %v7618_v49 = vpop.f32.mrb[90].mxu1 }
 0x6a1   : > { %v7619_v5 = vpop.f32.mrb[91].mxu1 }
 0x6a2   : > { %v10824_v58 = vadd.f32 %v7619_v5, %v7618_v49 }
 0x6a6   : > { %v7621_v44 = vpop.f32.mrb[92].mxu1 }
 0x6a7   : > { %v7622_v12 = vpop.f32.mrb[93].mxu1  ;;  %v7691_v3 = vpop.f32.mrb[96].mxu0 }
 0x6a8   : > { %v10828_v54 = vadd.f32 %v7622_v12, %v7621_v44  ;;  %v7624_v24 = vpop.f32.mrb[94].mxu1  ;;  %v7692_v38 = vpop.f32.mrb[97].mxu0 }
 0x6a9   : > { %v7625_v11 = vpop.f32.mrb[95].mxu1  ;;  %v7693_v55 = vadd.f32 %v7692_v38, %v7691_v3  ;;  %v7694_v40 = vpop.f32.mrb[98].mxu0  ;;  %v6329_v38 = vadd.f32 %v10812_v23, %v10826_v63 }
 0x6aa   : > { %v10830_v62 = vadd.f32 %v7625_v11, %v7624_v24  ;;  %v7695_v2 = vpop.f32.mrb[99].mxu0  ;;  %v6326_v24 = vadd.f32 %v10810_v29, %v10826_v63 }
 0x6ab   : > { %v7696_v7 = vadd.f32 %v7695_v2, %v7694_v40  ;;  %v10834_v28 = vadd.f32 %v7693_v55, %v6302_v9 }
 0x6ad   : > { %v10836_v34 = vadd.f32 %v7696_v7, %v6305_v59 }
 0x6ae   : > { %v7627_v21 = vpop.f32.mrb[96].mxu1 }
 0x6af   : > { %v7628_v50 = vpop.f32.mrb[97].mxu1  ;;  %v7697_v17 = vpop.f32.mrb[100].mxu0 }
 0x6b0   : > { %v10838_v41 = vadd.f32 %v7628_v50, %v7627_v21  ;;  %v7630_v61 = vpop.f32.mrb[98].mxu1  ;;  %v7698_v19 = vpop.f32.mrb[101].mxu0 }
 0x6b1   : > { %v7631_v4 = vpop.f32.mrb[99].mxu1  ;;  %v7699_v48 = vadd.f32 %v7698_v19, %v7697_v17  ;;  %v7700_v15 = vpop.f32.mrb[102].mxu0  ;;  %v6334_v17 = vadd.f32 %v10814_v16, %v10826_v63 }
 0x6b2   : > { %v10840_v8 = vadd.f32 %v7631_v4, %v7630_v61  ;;  %v7701_v14 = vpop.f32.mrb[103].mxu0 }
 0x6b3   : > { %v7702_v18 = vadd.f32 %v7701_v14, %v7700_v15  ;;  %v10844_v53 = vadd.f32 %v7699_v48, %v6310_v30  ;;  %v6337_v48 = vadd.f32 %v10816_v51, %v10826_v63 }
 0x6b5   : > { %v10846_v26 = vadd.f32 %v7702_v18, %v6313_v35 }
 0x6b6   : > { %v7633_v56 = vpop.f32.mrb[100].mxu1 }
 0x6b7   : > { %v7634_v10 = vpop.f32.mrb[101].mxu1 }
 0x6b8   : > { %v10848_v32 = vadd.f32 %v7634_v10, %v7633_v56  ;;  %v7636_v52 = vpop.f32.mrb[102].mxu1  ;;  %v7703_v57 = vpop.f32.mrb[104].mxu0 }
 0x6b9   : > { %v7637_v33 = vpop.f32.mrb[103].mxu1  ;;  %v7704_v27 = vpop.f32.mrb[105].mxu0 }
 0x6ba   : > { %v10850_v13 = vadd.f32 %v7637_v33, %v7636_v52  ;;  %v7705_v31 = vadd.f32 %v7704_v27, %v7703_v57  ;;  %v7706_v1 = vpop.f32.mrb[106].mxu0 }
 0x6bb   : > { %v7707_v42 = vpop.f32.mrb[107].mxu0 }
 0x6bc   : > { %v7708_v47 = vadd.f32 %v7707_v42, %v7706_v1  ;;  %v10856_v25 = vadd.f32 %v7705_v31, %v6318_v43  ;;  %v6342_v43 = vadd.f32 %v10818_v36, %v10826_v63  ;;  %v6345_v42 = vadd.f32 %v10820_v20, %v10826_v63 }
 0x6be   : > { %v7639_v0 = vpop.f32.mrb[104].mxu1  ;;  %v10858_v39 = vadd.f32 %v7708_v47, %v6321_v46 }
 0x6bf   : > { %v7640_v22 = vpop.f32.mrb[105].mxu1 }
 0x6c0   : > { %v10860_v6 = vadd.f32 %v7640_v22, %v7639_v0  ;;  %v7642_v49 = vpop.f32.mrb[106].mxu1  ;;  %v7709_v44 = vpop.f32.mrb[108].mxu0 }
 0x6c1   : > { %v7643_v5 = vpop.f32.mrb[107].mxu1  ;;  %v7710_v60 = vpop.f32.mrb[109].mxu0 }
 0x6c2   : > { %v10862_v12 = vadd.f32 %v7643_v5, %v7642_v49  ;;  %v7711_v11 = vadd.f32 %v7710_v60, %v7709_v44  ;;  %v7712_v45 = vpop.f32.mrb[110].mxu0 }
 0x6c3   : > { %v7713_v3 = vpop.f32.mrb[111].mxu0 }
 0x6c4   : > { %v7714_v9 = vadd.f32 %v7713_v3, %v7712_v45  ;;  %v10868_v55 = vadd.f32 %v7711_v11, %v6326_v24  ;;  %v6350_v45 = vadd.f32 %v10822_v37, %v10826_v63 }
 0x6c6   : > { %v7645_v40 = vpop.f32.mrb[108].mxu1  ;;  %v10870_v59 = vadd.f32 %v7714_v9, %v6329_v38  ;;  %v6353_v9 = vadd.f32 %v10824_v58, %v10826_v63 }
 0x6c7   : > { %v7646_v2 = vpop.f32.mrb[109].mxu1 }
 0x6c8   : > { %v10872_v7 = vadd.f32 %v7646_v2, %v7645_v40  ;;  %v7648_v21 = vpop.f32.mrb[110].mxu1  ;;  %v7715_v61 = vpop.f32.mrb[112].mxu0 }
 0x6c9   : > { %v7649_v50 = vpop.f32.mrb[111].mxu1  ;;  %v7716_v29 = vpop.f32.mrb[113].mxu0 }
 0x6ca   : > { %v10874_v4 = vadd.f32 %v7649_v50, %v7648_v21  ;;  %v7717_v19 = vadd.f32 %v7716_v29, %v7715_v61  ;;  %v7718_v23 = vpop.f32.mrb[114].mxu0 }
 0x6cb   : > { %v7719_v30 = vpop.f32.mrb[115].mxu0 }
 0x6cc   : > { %v7720_v15 = vadd.f32 %v7719_v30, %v7718_v23  ;;  %v10880_v14 = vadd.f32 %v7717_v19, %v6334_v17 }
 0x6ce   : > { %v7651_v35 = vpop.f32.mrb[112].mxu1  ;;  %v10882_v56 = vadd.f32 %v7720_v15, %v6337_v48  ;;  %v6358_v48 = vadd.f32 %v10828_v54, %v10826_v63 }
 0x6cf   : > { %v7652_v18 = vpop.f32.mrb[113].mxu1 }
 0x6d0   : > { %v10884_v10 = vadd.f32 %v7652_v18, %v7651_v35  ;;  %v7654_v52 = vpop.f32.mrb[114].mxu1  ;;  %v7721_v57 = vpop.f32.mrb[116].mxu0  ;;  %v6361_v18 = vadd.f32 %v10830_v62, %v10826_v63 }
 0x6d1   : > { %v7655_v33 = vpop.f32.mrb[115].mxu1  ;;  %v7722_v16 = vpop.f32.mrb[117].mxu0 }
 0x6d2   : > { %v10886_v27 = vadd.f32 %v7655_v33, %v7654_v52  ;;  %v7723_v31 = vadd.f32 %v7722_v16, %v7721_v57  ;;  %v7724_v51 = vpop.f32.mrb[118].mxu0 }
 0x6d3   : > { %v7725_v1 = vpop.f32.mrb[119].mxu0 }
 0x6d4   : > { %v7726_v46 = vadd.f32 %v7725_v1, %v7724_v51  ;;  %v10892_v47 = vadd.f32 %v7723_v31, %v6342_v43 }
 0x6d6   : > { %v7657_v0 = vpop.f32.mrb[116].mxu1  ;;  %v10894_v49 = vadd.f32 %v7726_v46, %v6345_v42 }
 0x6d7   : > { %v7658_v22 = vpop.f32.mrb[117].mxu1 }
 0x6d8   : > { %v10896_v5 = vadd.f32 %v7658_v22, %v7657_v0  ;;  %v7660_v44 = vpop.f32.mrb[118].mxu1  ;;  %v7727_v24 = vpop.f32.mrb[120].mxu0  ;;  %v6366_v0 = vadd.f32 %v10838_v41, %v10826_v63 }
 0x6d9   : > { %v7661_v60 = vpop.f32.mrb[119].mxu1  ;;  %v7728_v36 = vpop.f32.mrb[121].mxu0 }
 0x6da   : > { %v10898_v11 = vadd.f32 %v7661_v60, %v7660_v44  ;;  %v7729_v3 = vadd.f32 %v7728_v36, %v7727_v24  ;;  %v7730_v20 = vpop.f32.mrb[122].mxu0  ;;  %v6369_v60 = vadd.f32 %v10840_v8, %v10826_v63 }
 0x6db   : > { %v7731_v38 = vpop.f32.mrb[123].mxu0 }
 0x6dc   : > { %v7732_v40 = vadd.f32 %v7731_v38, %v7730_v20  ;;  %v10904_v2 = vadd.f32 %v7729_v3, %v6350_v45 }
 0x6de   : > { %v7663_v21 = vpop.f32.mrb[120].mxu1  ;;  %v10906_v61 = vadd.f32 %v7732_v40, %v6353_v9 }
 0x6df   : > { %v7664_v50 = vpop.f32.mrb[121].mxu1 }
 0x6e0   : > { %v10908_v29 = vadd.f32 %v7664_v50, %v7663_v21  ;;  %v7666_v17 = vpop.f32.mrb[122].mxu1  ;;  %v7733_v23 = vpop.f32.mrb[124].mxu0 }
 0x6e1   : > { %v7667_v19 = vpop.f32.mrb[123].mxu1  ;;  %v7734_v37 = vpop.f32.mrb[125].mxu0 }
 0x6e2   : > { %v10910_v30 = vadd.f32 %v7667_v19, %v7666_v17  ;;  %v7735_v15 = vadd.f32 %v7734_v37, %v7733_v23  ;;  %v7736_v58 = vpop.f32.mrb[126].mxu0  ;;  %v6374_v19 = vadd.f32 %v10848_v32, %v10826_v63 }
 0x6e3   : > { %v7737_v35 = vpop.f32.mrb[127].mxu0 }
 0x6e4   : > { %v7738_v52 = vadd.f32 %v7737_v35, %v7736_v58  ;;  %v10916_v33 = vadd.f32 %v7735_v15, %v6358_v48  ;;  %v6377_v48 = vadd.f32 %v10850_v13, %v10826_v63 }
 0x6e6   : > { %v7669_v57 = vpop.f32.mrb[124].mxu1  ;;  %v10918_v43 = vadd.f32 %v7738_v52, %v6361_v18 }
 0x6e7   : > { %v7670_v16 = vpop.f32.mrb[125].mxu1 }
 0x6e8   : > { %v10920_v31 = vadd.f32 %v7670_v16, %v7669_v57  ;;  %v7672_v51 = vpop.f32.mrb[126].mxu1  ;;  %v7739_v42 = vpop.f32.mrb[128].mxu0 }
 0x6e9   : > { %v7673_v1 = vpop.f32.mrb[127].mxu1  ;;  %v7740_v54 = vpop.f32.mrb[129].mxu0 }
 0x6ea   : > { %v10922_v46 = vadd.f32 %v7673_v1, %v7672_v51  ;;  %v7741_v22 = vadd.f32 %v7740_v54, %v7739_v42  ;;  %v7742_v62 = vpop.f32.mrb[130].mxu0  ;;  %v6382_v1 = vadd.f32 %v10860_v6, %v10826_v63 }
 0x6eb   : > { %v7743_v44 = vpop.f32.mrb[131].mxu0 }
 0x6ec   : > { %v7744_v24 = vadd.f32 %v7743_v44, %v7742_v62  ;;  %v10928_v36 = vadd.f32 %v7741_v22, %v6366_v0  ;;  %v6385_v0 = vadd.f32 %v10862_v12, %v10826_v63 }
 0x6ee   : > { %v7857_v45 = vpop.f32.mrb[128].mxu1  ;;  %v10931_v38 = vadd.f32 %v7744_v24, %v6369_v60 }
 0x6ef   : > { %v6632_v3 = vadd.f32 %v7857_v45, %v10844_v53  ;;  %v6623_v20 = vpop.f32.mrb[129].mxu1 }
 0x6f0   : > { %v6624_v9 = vadd.f32 %v6623_v20, %v10834_v28  ;;  %v7858_v40 = vpop.f32.mrb[130].mxu1  ;;  %v7745_v50 = vpop.f32.mrb[132].mxu0 }
 0x6f1   : > { %v6635_v41 = vadd.f32 %v7858_v40, %v10846_v26  ;;  %6762 = vperm.xlu1 %7900, %v6632_v3   ;;  %v6626_v21 = vpop.f32.mrb[131].mxu1  ;;  %v7746_v8 = vpop.f32.mrb[133].mxu0 }
 0x6f2   : > { %v6627_v17 = vadd.f32 %v6626_v21, %v10836_v34  ;;  %v7747_v23 = vadd.f32 %v7746_v8, %v7745_v50  ;;  %v7748_v53 = vpop.f32.mrb[134].mxu0  ;;  %v6393_v21 = vadd.f32 %v10874_v4, %v10826_v63 }
 0x6f3   : > { %6767 = vperm.xlu0 %7899, %v6635_v41   ;;  %v7749_v37 = vpop.f32.mrb[135].mxu0 }
 0x6f4   : > { %v7750_v28 = vadd.f32 %v7749_v37, %v7748_v53  ;;  %v10940_v15 = vadd.f32 %v7747_v23, %v6374_v19 }
 0x6f5   : > { %6752 = vperm.xlu1 %7900, %v6624_v9   ;;  %v6390_v9 = vadd.f32 %v10872_v7, %v10826_v63 }
 0x6f6   : > { %v7861_v26 = vpop.f32.mrb[132].mxu1  ;;  %v10943_v34 = vadd.f32 %v7750_v28, %v6377_v48  ;;  %v6398_v28 = vadd.f32 %v10884_v10, %v10826_v63 }
 0x6f7   : > { %v6648_v58 = vadd.f32 %v7861_v26, %v10868_v55  ;;  %v6639_v35 = vpop.f32.mrb[133].mxu1  ;;  %6757 = vperm.xlu0 %7899, %v6627_v17  }
 0x6f8   : > { %v6640_v32 = vadd.f32 %v6639_v35, %v10856_v25  ;;  %v7862_v18 = vpop.f32.mrb[134].mxu1  ;;  %v7751_v16 = vpop.f32.mrb[136].mxu0  ;;  %v6401_v35 = vadd.f32 %v10886_v27, %v10826_v63 }
 0x6f9   : > { %v6651_v52 = vadd.f32 %v7862_v18, %v10870_v59  ;;  %v6642_v57 = vpop.f32.mrb[135].mxu1  ;;  %6782 = vperm.xlu1 %7900, %v6648_v58   ;;  %v7752_v51 = vpop.f32.mrb[137].mxu0 }
 0x6fa   : > { %v6643_v13 = vadd.f32 %v6642_v57, %v10858_v39  ;;  %v7753_v55 = vadd.f32 %v7752_v51, %v7751_v16  ;;  %v7754_v42 = vpop.f32.mrb[138].mxu0 }
 0x6fb   : > { %6787 = vperm.xlu0 %7899, %v6651_v52   ;;  %v7755_v54 = vpop.f32.mrb[139].mxu0 }
 0x6fc   : > { %v7756_v25 = vadd.f32 %v7755_v54, %v7754_v42  ;;  %v10952_v22 = vadd.f32 %v7753_v55, %v6382_v1  ;;  %v6406_v55 = vadd.f32 %v10896_v5, %v10826_v63 }
 0x6fd   : > { %6772 = vperm.xlu1 %7900, %v6640_v32  }
 0x6fe   : > { %v7865_v59 = vpop.f32.mrb[136].mxu1  ;;  %v10955_v39 = vadd.f32 %v7756_v25, %v6385_v0  ;;  %v6409_v0 = vadd.f32 %v10898_v11, %v10826_v63  ;;  %v6414_v11 = vadd.f32 %v10908_v29, %v10826_v63 }
 0x6ff   : > { %v6664_v62 = vadd.f32 %v7865_v59, %v10892_v47  ;;  %v6655_v44 = vpop.f32.mrb[137].mxu1  ;;  %6777 = vperm.xlu0 %7899, %v6643_v13  }
 0x700   : > { %v6656_v6 = vadd.f32 %v6655_v44, %v10880_v14  ;;  %v7866_v60 = vpop.f32.mrb[138].mxu1  ;;  %v7757_v3 = vpop.f32.mrb[140].mxu0 }
 0x701   : > { %v6667_v24 = vadd.f32 %v7866_v60, %v10894_v49  ;;  %v6658_v45 = vpop.f32.mrb[139].mxu1  ;;  %6802 = vperm.xlu1 %7900, %v6664_v62   ;;  %v7758_v20 = vpop.f32.mrb[141].mxu0 }
 0x702   : > { %v6659_v12 = vadd.f32 %v6658_v45, %v10882_v56  ;;  %v7759_v47 = vadd.f32 %v7758_v20, %v7757_v3  ;;  %v7760_v40 = vpop.f32.mrb[142].mxu0 }
 0x703   : > { %6807 = vperm.xlu0 %7899, %v6667_v24   ;;  %v7761_v41 = vpop.f32.mrb[143].mxu0 }
 0x704   : > { %v7762_v14 = vadd.f32 %v7761_v41, %v7760_v40  ;;  %v6551_v50 = vadd.f32 %v7759_v47, %v6390_v9  ;;  %v6417_v47 = vadd.f32 %v10910_v30, %v10826_v63 }
 0x705   : > { %6792 = vperm.xlu1 %7900, %v6656_v6  }
 0x706   : > { %v7869_v49 = vpop.f32.mrb[140].mxu1  ;;  %v6554_v56 = vadd.f32 %v7762_v14, %v6393_v21 }
 0x707   : > { %v6680_v17 = vadd.f32 %v7869_v49, %v10916_v33  ;;  %v6671_v8 = vpop.f32.mrb[141].mxu1  ;;  %6797 = vperm.xlu0 %7899, %v6659_v12  }
 0x708   : > { %v6672_v19 = vadd.f32 %v6671_v8, %v10904_v2  ;;  %v7870_v23 = vpop.f32.mrb[142].mxu1  ;;  %v7763_v37 = vpop.f32.mrb[144].mxu0 }
 0x709   : > { %v6683_v7 = vadd.f32 %v7870_v23, %v10918_v43  ;;  %v6674_v53 = vpop.f32.mrb[143].mxu1  ;;  %6822 = vperm.xlu1 %7900, %v6680_v17   ;;  %v7764_v4 = vpop.f32.mrb[145].mxu0  ;;  %v6422_v23 = vadd.f32 %v10920_v31, %v10826_v63 }
 0x70a   : > { %v6675_v48 = vadd.f32 %v6674_v53, %v10906_v61  ;;  %v7765_v26 = vadd.f32 %v7764_v4, %v7763_v37  ;;  %v7766_v33 = vpop.f32.mrb[146].mxu0  ;;  %v6425_v37 = vadd.f32 %v10922_v46, %v10826_v63 }
 0x70b   : > { %6827 = vperm.xlu0 %7899, %v6683_v7   ;;  %v7767_v58 = vpop.f32.mrb[147].mxu0 }
 0x70c   : > { %v7768_v2 = vadd.f32 %v7767_v58, %v7766_v33  ;;  %v6559_v32 = vadd.f32 %v7765_v26, %v6398_v28 }
 0x70d   : > { %6812 = vperm.xlu1 %7900, %v6672_v19  }
 0x70e   : > { %v7873_v43 = vpop.f32.mrb[144].mxu1  ;;  %v6562_v61 = vadd.f32 %v7768_v2, %v6401_v35 }
 0x70f   : > { %v6696_v18 = vadd.f32 %v7873_v43, %v10940_v15  ;;  %v6687_v52 = vpop.f32.mrb[145].mxu1  ;;  %6817 = vperm.xlu0 %7899, %v6675_v48  }
 0x710   : > { %v6688_v57 = vadd.f32 %v6687_v52, %v10928_v36  ;;  %v7874_v16 = vpop.f32.mrb[146].mxu1  ;;  %v7769_v51 = vpop.f32.mrb[148].mxu0 }
 0x711   : > { %v6699_v10 = vadd.f32 %v7874_v16, %v10943_v34  ;;  %v6690_v13 = vpop.f32.mrb[147].mxu1  ;;  %6842 = vperm.xlu1 %7900, %v6696_v18   ;;  %v7770_v27 = vpop.f32.mrb[149].mxu0  ;;  %v10991_v18 = vld [vmem:[%s8142_s30] sm:$0xff] }
 0x712   : > { %v6691_v1 = vadd.f32 %v6690_v13, %v10931_v38  ;;  %v7771_v42 = vadd.f32 %v7770_v27, %v7769_v51  ;;  %v7772_v15 = vpop.f32.mrb[150].mxu0 }
 0x713   : > { %6847 = vperm.xlu0 %7899, %v6699_v10   ;;  %v7773_v54 = vpop.f32.mrb[151].mxu0 }
 0x714   : > { %v7774_v36 = vadd.f32 %v7773_v54, %v7772_v15  ;;  %v6567_v25 = vadd.f32 %v7771_v42, %v6406_v55 }
 0x715   : > { %6832 = vperm.xlu1 %7900, %v6688_v57  }
 0x716   : > { %v7877_v34 = vpop.f32.mrb[148].mxu1  ;;  %v6570_v44 = vadd.f32 %v7774_v36, %v6409_v0 }
 0x717   : > { %v6712_v59 = vadd.f32 %v7877_v34, %v6551_v50  ;;  %v6703_v62 = vpop.f32.mrb[149].mxu1  ;;  %6837 = vperm.xlu0 %7899, %v6691_v1  }
 0x718   : > { %v6704_v38 = vadd.f32 %v6703_v62, %v10952_v22  ;;  %v7878_v6 = vpop.f32.mrb[150].mxu1  ;;  %v7775_v24 = vpop.f32.mrb[152].mxu0 }
 0x719   : > { %v6715_v60 = vadd.f32 %v7878_v6, %v6554_v56  ;;  %v6706_v5 = vpop.f32.mrb[151].mxu1  ;;  %6862 = vperm.xlu1 %7900, %v6712_v59   ;;  %v7776_v3 = vpop.f32.mrb[153].mxu0 }
 0x71a   : > { %v6707_v45 = vadd.f32 %v6706_v5, %v10955_v39  ;;  %v7777_v12 = vadd.f32 %v7776_v3, %v7775_v24  ;;  %v7778_v20 = vpop.f32.mrb[154].mxu0 }
 0x71b   : > { %6867 = vperm.xlu0 %7899, %v6715_v60   ;;  %v7779_v9 = vpop.f32.mrb[155].mxu0 }
 0x71c   : > { %v7780_v22 = vadd.f32 %v7779_v9, %v7778_v20  ;;  %v6575_v40 = vadd.f32 %v7777_v12, %v6414_v11 }
 0x71d   : > { %6852 = vperm.xlu1 %7900, %v6704_v38  }
 0x71e   : > { %v7881_v41 = vpop.f32.mrb[152].mxu1  ;;  %v6578_v50 = vadd.f32 %v7780_v22, %v6417_v47 }
 0x71f   : > { %v6728_v21 = vadd.f32 %v7881_v41, %v6567_v25  ;;  %v6719_v14 = vpop.f32.mrb[153].mxu1  ;;  %6857 = vperm.xlu0 %7899, %v6707_v45  }
 0x720   : > { %v6720_v39 = vadd.f32 %v6719_v14, %v6559_v32  ;;  %v7882_v49 = vpop.f32.mrb[154].mxu1  ;;  %v7781_v29 = vpop.f32.mrb[156].mxu0 }
 0x721   : > { %v6731_v17 = vadd.f32 %v7882_v49, %v6570_v44  ;;  %v6722_v8 = vpop.f32.mrb[155].mxu1  ;;  %6882 = vperm.xlu1 %7900, %v6728_v21   ;;  %v7782_v19 = vpop.f32.mrb[157].mxu0 }
 0x722   : > { %v6723_v56 = vadd.f32 %v6722_v8, %v6562_v61  ;;  %v7783_v30 = vadd.f32 %v7782_v19, %v7781_v29  ;;  %v7784_v7 = vpop.f32.mrb[158].mxu0  ;;  %v10995_v61 = vld [vmem:[%s8142_s30 + $0x8] sm:$0xff] }
 0x723   : > { %6887 = vperm.xlu0 %7899, %v6731_v17   ;;  %v7785_v53 = vpop.f32.mrb[159].mxu0 }
 0x724   : > { %v7786_v48 = vadd.f32 %v7785_v53, %v7784_v7  ;;  %v6583_v4 = vadd.f32 %v7783_v30, %v6422_v23 }
 0x725   : > { %6872 = vperm.xlu1 %7900, %v6720_v39  }
 0x726   : > { %v7885_v28 = vpop.f32.mrb[156].mxu1  ;;  %v6586_v58 = vadd.f32 %v7786_v48, %v6425_v37 }
 0x727   : > { %v6744_v26 = vadd.f32 %v7885_v28, %v6583_v4  ;;  %v6735_v33 = vpop.f32.mrb[157].mxu1  ;;  %6877 = vperm.xlu0 %7899, %v6723_v56  }
 0x728   : > { %v6736_v35 = vadd.f32 %v6735_v33, %v6575_v40  ;;  %v7886_v2 = vpop.f32.mrb[158].mxu1 }
 0x729   : > { %v6747_v31 = vadd.f32 %v7886_v2, %v6586_v58  ;;  %v6738_v32 = vpop.f32.mrb[159].mxu1 }
 0x72a   : > { %v6739_v43 = vadd.f32 %v6738_v32, %v6578_v50  ;;  %6892 = vperm.xlu1 %7900, %v6736_v35  }
 0x72c   : > { %6897 = vperm.xlu0 %7899, %v6739_v43  }
 0x72e   : > { %6902 = vperm.xlu1 %7900, %v6744_v26  }
 0x730   : > { %6907 = vperm.xlu0 %7899, %v6747_v31  }
 0x770   : > { %v6763_v63 = vpop.permute.xlu1 %6762 }
 0x771   : > { %v6912_v52 = vmul.f32 %v10991_v18, %v6763_v63 }
 0x772   : > { %v6768_v46 = vpop.permute.xlu0 %6767 }
 0x773   : > { %v6913_v57 = vmul.f32 %v10995_v61, %v6768_v46  ;;  %v6951_v1 = vsel %vm496_vm1, %v6912_v52, 0.0 }
 0x774   : > { %v6753_v16 = vpop.permute.xlu1 %6752 }
 0x775   : > { %v6952_v10 = vsel %vm496_vm1, %v6913_v57, 0.0  ;;  %v6910_v13 = vmul.f32 %v10991_v18, %v6753_v16 }
 0x776   : > { %v6758_v51 = vpop.permute.xlu0 %6757  ;;  %v6953_v55 = vadd.f32 %v6952_v10, %v6951_v1 }
 0x777   : > { %v6911_v27 = vmul.f32 %v10995_v61, %v6758_v51  ;;  %v6942_v15 = vsel %vm496_vm1, %v6910_v13, 0.0 }
 0x778   : > { %v6783_v42 = vpop.permute.xlu1 %6782  ;;  %v6954_v59 = vrot.slane %v6953_v55, 4 }
 0x779   : > { %v6943_v54 = vsel %vm496_vm1, %v6911_v27, 0.0  ;;  %v6916_v36 = vmul.f32 %v10991_v18, %v6783_v42 }
 0x77a   : > { %v6944_v0 = vadd.f32 %v6943_v54, %v6942_v15  ;;  %v6788_v25 = vpop.permute.xlu0 %6787  ;;  %v6955_v11 = vadd.f32 %v6954_v59, %v6953_v55 }
 0x77b   : > { %v6917_v34 = vmul.f32 %v10995_v61, %v6788_v25  ;;  %v6969_v60 = vsel %vm496_vm1, %v6916_v36, 0.0 }
 0x77c   : > { %v6945_v62 = vrot.slane %v6944_v0, 4  ;;  %v6773_v44 = vpop.permute.xlu1 %6772  ;;  %v6956_v50 = vrot.slane %v6955_v11, 2 }
 0x77d   : > { %v6970_v38 = vsel %vm496_vm1, %v6917_v34, 0.0  ;;  %v6914_v6 = vmul.f32 %v10991_v18, %v6773_v44 }
 0x77e   : > { %v6778_v5 = vpop.permute.xlu0 %6777  ;;  %v6946_v24 = vadd.f32 %v6945_v62, %v6944_v0  ;;  %v6971_v45 = vadd.f32 %v6970_v38, %v6969_v60  ;;  %v6957_v37 = vadd.f32 %v6956_v50, %v6955_v11 }
 0x77f   : > { %v6915_v3 = vmul.f32 %v10995_v61, %v6778_v5  ;;  %v6960_v20 = vsel %vm496_vm1, %v6914_v6, 0.0 }
 0x780   : > { %v6803_v12 = vpop.permute.xlu1 %6802  ;;  %v6947_v41 = vrot.slane %v6946_v24, 2  ;;  %v6972_v21 = vrot.slane %v6971_v45, 4  ;;  %v6958_v46 = vrot.slane %v6957_v37, 1 }
 0x781   : > { %v6961_v9 = vsel %vm496_vm1, %v6915_v3, 0.0  ;;  %v6920_v47 = vmul.f32 %v10991_v18, %v6803_v12 }
 0x782   : > { %v6962_v22 = vadd.f32 %v6961_v9, %v6960_v20  ;;  %v6808_v40 = vpop.permute.xlu0 %6807  ;;  %v6948_v30 = vadd.f32 %v6947_v41, %v6946_v24  ;;  %v6973_v7 = vadd.f32 %v6972_v21, %v6971_v45  ;;  %v6959_v62 = vadd.f32 %v6958_v46, %v6957_v37 }
 0x783   : > { %v6921_v14 = vmul.f32 %v10995_v61, %v6808_v40  ;;  %v6987_v17 = vsel %vm496_vm1, %v6920_v47, 0.0 }
 0x784   : > { %v6963_v39 = vrot.slane %v6962_v22, 4  ;;  %v6793_v49 = vpop.permute.xlu1 %6792  ;;  %v6949_v32 = vrot.slane %v6948_v30, 1  ;;  %v6974_v43 = vrot.slane %v6973_v7, 2 }
 0x785   : > { %v6988_v8 = vsel %vm496_vm1, %v6921_v14, 0.0  ;;  %v6918_v29 = vmul.f32 %v10991_v18, %v6793_v49 }
 0x786   : > { %v6964_v56 = vadd.f32 %v6963_v39, %v6962_v22  ;;  %v6989_v19 = vadd.f32 %v6988_v8, %v6987_v17  ;;  %v6798_v23 = vpop.permute.xlu0 %6797  ;;  %v6950_v15 = vadd.f32 %v6949_v32, %v6948_v30  ;;  %v6975_v54 = vadd.f32 %v6974_v43, %v6973_v7 }
 0x787   : > { %v6919_v53 = vmul.f32 %v10995_v61, %v6798_v23  ;;  %v6978_v26 = vsel %vm496_vm1, %v6918_v29, 0.0 }
 0x788   : > { %v6965_v48 = vrot.slane %v6964_v56, 2  ;;  %v6990_v4 = vrot.slane %v6989_v19, 4  ;;  %v6823_v28 = vpop.permute.xlu1 %6822  ;;  %v7103_v3 = vsel %vm7102_vm7, %v6959_v62, %v6950_v15  ;;  %v6976_v11 = vrot.slane %v6975_v54, 1 }
 0x789   : > { %v6979_v33 = vsel %vm496_vm1, %v6919_v53, 0.0  ;;  %v6924_v58 = vmul.f32 %v10991_v18, %v6823_v28 }
 0x78a   : > { %v6966_v35 = vadd.f32 %v6965_v48, %v6964_v56  ;;  %v6980_v2 = vadd.f32 %v6979_v33, %v6978_v26  ;;  %v6828_v31 = vpop.permute.xlu0 %6827  ;;  %v6991_v52 = vadd.f32 %v6990_v4, %v6989_v19  ;;  %v6977_v17 = vadd.f32 %v6976_v11, %v6975_v54 }
 0x78b   : > { %v6925_v63 = vmul.f32 %v10995_v61, %v6828_v31  ;;  %v7005_v13 = vsel %vm496_vm1, %v6924_v58, 0.0 }
 0x78c   : > { %v6981_v57 = vrot.slane %v6980_v2, 4  ;;  %v6813_v16 = vpop.permute.xlu1 %6812  ;;  %v6967_v10 = vrot.slane %v6966_v35, 1  ;;  %v6992_v36 = vrot.slane %v6991_v52, 2 }
 0x78d   : > { %v7006_v51 = vsel %vm496_vm1, %v6925_v63, 0.0  ;;  %v6922_v1 = vmul.f32 %v10991_v18, %v6813_v16 }
 0x78e   : > { %v6982_v27 = vadd.f32 %v6981_v57, %v6980_v2  ;;  %v7007_v55 = vadd.f32 %v7006_v51, %v7005_v13  ;;  %v6818_v42 = vpop.permute.xlu0 %6817  ;;  %v6968_v44 = vadd.f32 %v6967_v10, %v6966_v35  ;;  %v6993_v12 = vadd.f32 %v6992_v36, %v6991_v52 }
 0x78f   : > { %v6923_v0 = vmul.f32 %v10995_v61, %v6818_v42  ;;  %v6996_v38 = vsel %vm496_vm1, %v6922_v1, 0.0 }
 0x790   : > { %v6983_v25 = vrot.slane %v6982_v27, 2  ;;  %v7008_v34 = vrot.slane %v7007_v55, 4  ;;  %v6843_v59 = vpop.permute.xlu1 %6842  ;;  %v7105_v40 = vsel %vm7104_vm8, %v6968_v44, %v7103_v3  ;;  %v6994_v56 = vrot.slane %v6993_v12, 1 }
 0x791   : > { %v6997_v6 = vsel %vm496_vm1, %v6923_v0, 0.0  ;;  %v6928_v50 = vmul.f32 %v10991_v18, %v6843_v59  ;;  %v7107_v30 = vsel %vm7106_vm9, %v6977_v17, %v7105_v40 }
 0x792   : > { %v6984_v60 = vadd.f32 %v6983_v25, %v6982_v27  ;;  %v7009_v5 = vadd.f32 %v7008_v34, %v7007_v55  ;;  %v6998_v24 = vadd.f32 %v6997_v6, %v6996_v38  ;;  %v6848_v45 = vpop.permute.xlu0 %6847  ;;  %v6995_v31 = vadd.f32 %v6994_v56, %v6993_v12 }
 0x793   : > { %v6929_v41 = vmul.f32 %v10995_v61, %v6848_v45  ;;  %v7023_v4 = vsel %vm496_vm1, %v6928_v50, 0.0 }
 0x794   : > { %v6985_v20 = vrot.slane %v6984_v60, 1  ;;  %v7010_v9 = vrot.slane %v7009_v5, 2  ;;  %v6999_v47 = vrot.slane %v6998_v24, 4  ;;  %v6833_v22 = vpop.permute.xlu1 %6832 }
 0x795   : > { %v6926_v39 = vmul.f32 %v10991_v18, %v6833_v22  ;;  %v7024_v7 = vsel %vm496_vm1, %v6929_v41, 0.0 }
 0x796   : > { %v6986_v21 = vadd.f32 %v6985_v20, %v6984_v60  ;;  %v7000_v14 = vadd.f32 %v6999_v47, %v6998_v24  ;;  %v6838_v49 = vpop.permute.xlu0 %6837  ;;  %v7011_v8 = vadd.f32 %v7010_v9, %v7009_v5  ;;  %v7025_v43 = vadd.f32 %v7024_v7, %v7023_v4 }
 0x797   : > { %v6927_v29 = vmul.f32 %v10995_v61, %v6838_v49  ;;  %v7014_v28 = vsel %vm496_vm1, %v6926_v39, 0.0 }
 0x798   : > { %v7001_v19 = vrot.slane %v7000_v14, 2  ;;  %v6863_v23 = vpop.permute.xlu1 %6862  ;;  %v7109_v37 = vsel %vm7108_vm10, %v6986_v21, %v7107_v30  ;;  %v7012_v33 = vrot.slane %v7011_v8, 1  ;;  %v7026_v42 = vrot.slane %v7025_v43, 4 }
 0x799   : > { %v7015_v53 = vsel %vm496_vm1, %v6927_v29, 0.0  ;;  %v6932_v35 = vmul.f32 %v10991_v18, %v6863_v23  ;;  %v7111_v57 = vsel %vm7110_vm11, %v6995_v31, %v7109_v37 }
 0x79a   : > { %v7002_v48 = vadd.f32 %v7001_v19, %v7000_v14  ;;  %v6868_v26 = vpop.permute.xlu0 %6867  ;;  %v7016_v58 = vadd.f32 %v7015_v53, %v7014_v28  ;;  %v7013_v13 = vadd.f32 %v7012_v33, %v7011_v8  ;;  %v7027_v6 = vadd.f32 %v7026_v42, %v7025_v43 }
 0x79b   : > { %v6933_v2 = vmul.f32 %v10995_v61, %v6868_v26  ;;  %v7041_v1 = vsel %vm496_vm1, %v6932_v35, 0.0 }
 0x79c   : > { %v7003_v32 = vrot.slane %v7002_v48, 1  ;;  %v6853_v63 = vpop.permute.xlu1 %6852  ;;  %v7017_v51 = vrot.slane %v7016_v58, 4  ;;  %v7028_v40 = vrot.slane %v7027_v6, 2 }
 0x79d   : > { %v7042_v46 = vsel %vm496_vm1, %v6933_v2, 0.0  ;;  %v6930_v52 = vmul.f32 %v10991_v18, %v6853_v63 }
 0x79e   : > { %v7004_v16 = vadd.f32 %v7003_v32, %v7002_v48  ;;  %v6858_v10 = vpop.permute.xlu0 %6857  ;;  %v7043_v15 = vadd.f32 %v7042_v46, %v7041_v1  ;;  %v7018_v44 = vadd.f32 %v7017_v51, %v7016_v58  ;;  %v7029_v19 = vadd.f32 %v7028_v40, %v7027_v6 }
 0x79f   : > { %v6931_v27 = vmul.f32 %v10995_v61, %v6858_v10  ;;  %v7032_v36 = vsel %vm496_vm1, %v6930_v52, 0.0 }
 0x7a0   : > { %v7113_v55 = vsel %vm7112_vm12, %v7004_v16, %v7111_v57  ;;  %v6883_v54 = vpop.permute.xlu1 %6882  ;;  %v7044_v24 = vrot.slane %v7043_v15, 4  ;;  %v7019_v47 = vrot.slane %v7018_v44, 2  ;;  %v7030_v31 = vrot.slane %v7029_v19, 1 }
 0x7a1   : > { %v7115_v0 = vsel %vm7114_vm13, %v7013_v13, %v7113_v55  ;;  %v7033_v25 = vsel %vm496_vm1, %v6931_v27, 0.0  ;;  %v6936_v34 = vmul.f32 %v10991_v18, %v6883_v54 }
 0x7a2   : > { %7125 = vst.msk [vmem:[%s11050_s8] sm:$0xff] %vm496_vm1, %v7115_v0  ;;  %v7034_v59 = vadd.f32 %v7033_v25, %v7032_v36  ;;  %v6888_v62 = vpop.permute.xlu0 %6887  ;;  %v7045_v21 = vadd.f32 %v7044_v24, %v7043_v15  ;;  %v7020_v8 = vadd.f32 %v7019_v47, %v7018_v44  ;;  %v7031_v55 = vadd.f32 %v7030_v31, %v7029_v19 }
 0x7a3   : > { %v6937_v38 = vmul.f32 %v10995_v61, %v6888_v62  ;;  %v7059_v45 = vsel %vm496_vm1, %v6936_v34, 0.0 }
 0x7a4   : > { %v7035_v60 = vrot.slane %v7034_v59, 4  ;;  %v6873_v5 = vpop.permute.xlu1 %6872  ;;  %v7046_v53 = vrot.slane %v7045_v21, 2  ;;  %v7021_v33 = vrot.slane %v7020_v8, 1 }
 0x7a5   : > { %v7060_v3 = vsel %vm496_vm1, %v6937_v38, 0.0  ;;  %v6934_v11 = vmul.f32 %v10991_v18, %v6873_v5 }
 0x7a6   : > { %v7036_v12 = vadd.f32 %v7035_v60, %v7034_v59  ;;  %v7061_v20 = vadd.f32 %v7060_v3, %v7059_v45  ;;  %v6878_v9 = vpop.permute.xlu0 %6877  ;;  %v7047_v46 = vadd.f32 %v7046_v53, %v7045_v21  ;;  %v7022_v51 = vadd.f32 %v7021_v33, %v7020_v8 }
 0x7a7   : > { %v6935_v22 = vmul.f32 %v10995_v61, %v6878_v9  ;;  %v7050_v50 = vsel %vm496_vm1, %v6934_v11, 0.0 }
 0x7a8   : > { %v7037_v41 = vrot.slane %v7036_v12, 2  ;;  %v7062_v14 = vrot.slane %v7061_v20, 4  ;;  %v7048_v15 = vrot.slane %v7047_v46, 1 }
 0x7a9   : > { %v7051_v39 = vsel %vm496_vm1, %v6935_v22, 0.0  ;;  %v6893_v49 = vpop.permute.xlu1 %6892 }
 0x7aa   : > { %v7052_v17 = vadd.f32 %v7051_v39, %v7050_v50  ;;  %v6938_v29 = vmul.f32 %v10991_v18, %v6893_v49  ;;  %v7038_v23 = vadd.f32 %v7037_v41, %v7036_v12  ;;  %v7063_v37 = vadd.f32 %v7062_v14, %v7061_v20 }
 0x7ab   : > { %v6898_v56 = vpop.permute.xlu0 %6897  ;;  %v7049_v44 = vadd.f32 %v7048_v15, %v7047_v46 }
 0x7ac   : > { %v7053_v30 = vrot.slane %v7052_v17, 4  ;;  %v6939_v7 = vmul.f32 %v10995_v61, %v6898_v56  ;;  %v7068_v28 = vsel %vm496_vm1, %v6938_v29, 0.0  ;;  %v7039_v32 = vrot.slane %v7038_v23, 1 }
 0x7ad   : > { %v6903_v48 = vpop.permute.xlu1 %6902  ;;  %v7064_v52 = vrot.slane %v7063_v37, 2 }
 0x7ae   : > { %v7054_v4 = vadd.f32 %v7053_v30, %v7052_v17  ;;  %v7069_v26 = vsel %vm496_vm1, %v6939_v7, 0.0  ;;  %v6940_v35 = vmul.f32 %v10991_v18, %v6903_v48  ;;  %v7040_v42 = vadd.f32 %v7039_v32, %v7038_v23 }
 0x7af   : > { %v7070_v58 = vadd.f32 %v7069_v26, %v7068_v28  ;;  %v6908_v2 = vpop.permute.xlu0 %6907  ;;  %v7065_v54 = vadd.f32 %v7064_v52, %v7063_v37 }
 0x7b0   : > { %v7055_v43 = vrot.slane %v7054_v4, 2  ;;  %v6941_v63 = vmul.f32 %v10995_v61, %v6908_v2  ;;  %v7077_v10 = vsel %vm496_vm1, %v6940_v35, 0.0  ;;  %v7116_v61 = vsel %vm7102_vm7, %v7031_v55, %v7022_v51 }
 0x7b1   : > { %v7071_v57 = vrot.slane %v7070_v58, 4  ;;  %v7117_v59 = vsel %vm7104_vm8, %v7040_v42, %v7116_v61  ;;  %v7066_v38 = vrot.slane %v7065_v54, 1 }
 0x7b2   : > { %v7056_v16 = vadd.f32 %v7055_v43, %v7054_v4  ;;  %v7078_v13 = vsel %vm496_vm1, %v6941_v63, 0.0  ;;  %v7118_v5 = vsel %vm7106_vm9, %v7049_v44, %v7117_v59 }
 0x7b3   : > { %v7072_v1 = vadd.f32 %v7071_v57, %v7070_v58  ;;  %v7079_v27 = vadd.f32 %v7078_v13, %v7077_v10  ;;  %v7067_v11 = vadd.f32 %v7066_v38, %v7065_v54 }
 0x7b4   : > { %v7057_v18 = vrot.slane %v7056_v16, 1 }
 0x7b5   : > { %v7073_v0 = vrot.slane %v7072_v1, 2  ;;  %v7080_v36 = vrot.slane %v7079_v27, 4 }
 0x7b6   : > { %v7058_v62 = vadd.f32 %v7057_v18, %v7056_v16 }
 0x7b7   : > { %v7074_v25 = vadd.f32 %v7073_v0, %v7072_v1  ;;  %v7081_v34 = vadd.f32 %v7080_v36, %v7079_v27 }
 0x7b8   : > { %v7119_v45 = vsel %vm7108_vm10, %v7058_v62, %v7118_v5 }
 0x7b9   : > { %v7075_v6 = vrot.slane %v7074_v25, 1  ;;  %v7082_v60 = vrot.slane %v7081_v34, 2  ;;  %v7120_v20 = vsel %vm7110_vm11, %v7067_v11, %v7119_v45 }
 0x7bb   : > { %v7083_v24 = vadd.f32 %v7082_v60, %v7081_v34  ;;  %v7076_v3 = vadd.f32 %v7075_v6, %v7074_v25 }
 0x7bd   : > { %v7084_v12 = vrot.slane %v7083_v24, 1  ;;  %v7121_v47 = vsel %vm7112_vm12, %v7076_v3, %v7120_v20 }
 0x7bf   : > { %v7085_v9 = vadd.f32 %v7084_v12, %v7083_v24 }
 0x7c1   : > { %v7122_v22 = vsel %vm7114_vm13, %v7085_v9, %v7121_v47 }
 0x7c2   : > { %7126 = vst.msk [vmem:[%s11050_s8 + $0x8] sm:$0xff] %vm496_vm1, %v7122_v22 }
 0x7c3 PF: > { %s19_s26 = sadd.s32 1, %s8005_s26  }
 0x7c4   : > { %p16_p4 = scmp.ge.s32.totalorder %s19_s26, 4  }
 0x7c6   :  { %18 = sbr.rel (!%p16_p4) target bundleno = 3 (0x3), region = 91 }

</bundles_post_ra>
